<compile_context>
chip_gen: v6e
topology: v6e:2x2x1
jax: 0.10.0
libtpu: 0.0.40
codegen_flags: <defaults>
</compile_context>

<pallas_src>
import math

import jax
import jax.numpy as jnp
from jax.experimental import pallas as pl
from jax.experimental.pallas import tpu as pltpu


# ------------------------- model configuration -------------------------
HID_DIM = 32
N_HEADS = 4
HEAD_DIM = HID_DIM // N_HEADS
PF_DIM = 64
ENC_LAYERS = 2
CROSS_LAYERS = 2
OUTPUT_DIM = 1
BATCH = 2

CHANNELS1, IMG_SIZE1, PATCH1 = 4, 16, 8
CHANNELS2, IMG_SIZE2, PATCH2 = 2, 16, 8
NP1 = (IMG_SIZE1 // PATCH1) ** 2          # 4 patches
NP2 = (IMG_SIZE2 // PATCH2) ** 2          # 4 patches
PATCH_DIM1 = CHANNELS1 * PATCH1 * PATCH1  # 256
PATCH_DIM2 = CHANNELS2 * PATCH2 * PATCH2  # 128
SEQ = NP1 + 1                             # 5 (same for both branches)

LN_EPS = 1e-5
BN_EPS = 1e-5
VEC_W = 128
NEG_INF = -1e30

# attention blocks: enc branch1 x2, enc branch2 x2, cross1 x2, cross2 x2
ATTN_BLOCKS = ("e1_0", "e1_1", "e2_0", "e2_1", "x1_0", "x1_1", "x2_0", "x2_1")


# ----------------------------- slab layouts -----------------------------
def _make_layout(entries):
    layout, off = {}, 0
    for name, rows in entries:
        layout[name] = (off, rows)
        off += rows
    return layout, off


_w32_entries = [("emb1_w1", PATCH_DIM1), ("emb2_w1", PATCH_DIM2),
                ("emb1_w2", HID_DIM), ("emb2_w2", HID_DIM)]
for _k in ATTN_BLOCKS:
    _w32_entries += [(f"{_k}_wo", HID_DIM), (f"{_k}_fw2", PF_DIM)]
_w32_entries += [("head_w1", 2 * HID_DIM), ("head_w2", HID_DIM)]
W32_LAYOUT, W32_ROWS = _make_layout(_w32_entries)

W96_LAYOUT, W96_ROWS = _make_layout([(f"{_k}_wqkv", HID_DIM) for _k in ATTN_BLOCKS])
W64_LAYOUT, W64_ROWS = _make_layout([(f"{_k}_fw1", HID_DIM) for _k in ATTN_BLOCKS])

_vec_entries = []
for _b in ("emb1", "emb2"):
    _vec_entries += [(f"{_b}_b1", 1), (f"{_b}_ln1g", 1), (f"{_b}_ln1b", 1),
                     (f"{_b}_b2", 1), (f"{_b}_ln2g", 1), (f"{_b}_ln2b", 1),
                     (f"{_b}_clspe", SEQ)]
for _k in ATTN_BLOCKS:
    _vec_entries += [(f"{_k}_bqkv", 1), (f"{_k}_bo", 1),
                     (f"{_k}_ln1g", 1), (f"{_k}_ln1b", 1),
                     (f"{_k}_fb1", 1), (f"{_k}_fb2", 1),
                     (f"{_k}_ln2g", 1), (f"{_k}_ln2b", 1)]
_vec_entries += [("head_bn0s", 1), ("head_bn0b", 1), ("head_b1", 1),
                 ("head_bn1s", 1), ("head_bn1b", 1), ("head_b2", 1),
                 ("head_bn2s", 1), ("head_bn2b", 1), ("head_w3t", 1), ("head_b3", 1)]
VEC_LAYOUT, VEC_ROWS = _make_layout(_vec_entries)


# ----------------------------- kernel helpers -----------------------------
def _ln(z, g, b):
    mu = jnp.mean(z, axis=-1, keepdims=True)
    d = z - mu
    var = jnp.mean(d * d, axis=-1, keepdims=True)
    return d * jax.lax.rsqrt(var + LN_EPS) * g + b


def _mm(a, b):
    return jnp.dot(a, b, preferred_element_type=jnp.float32)


def _mm_nt(a, b):  # a @ b.T  (both 2-D)
    return jax.lax.dot_general(a, b, (((1,), (1,)), ((), ())),
                               preferred_element_type=jnp.float32)


# ----------------------------- fused kernel -----------------------------
def model_kernel(p1_ref, p2_ref, w32_ref, w96_ref, w64_ref, vec_ref, out_ref):
    bsz = p1_ref.shape[0] // NP1
    bs = bsz * SEQ

    def w32(name):
        off, n = W32_LAYOUT[name]
        return w32_ref[off:off + n, :]

    def w96(name):
        off, n = W96_LAYOUT[name]
        return w96_ref[off:off + n, :]

    def w64(name):
        off, n = W64_LAYOUT[name]
        return w64_ref[off:off + n, :]

    def vec(name, width=HID_DIM):
        off, n = VEC_LAYOUT[name]
        return vec_ref[off:off + n, 0:width]

    # Block-diagonal additive bias: batch is folded along sublanes, off-batch
    # score entries get -1e30 so their exp() is exactly 0 -> per-sample softmax.
    ri = jax.lax.broadcasted_iota(jnp.int32, (bs, bs), 0).astype(jnp.float32)
    ci = jax.lax.broadcasted_iota(jnp.int32, (bs, bs), 1).astype(jnp.float32)
    rb = jnp.floor(ri * (1.0 / SEQ) + 1e-3)
    cb = jnp.floor(ci * (1.0 / SEQ) + 1e-3)
    batch_bias = jnp.where(rb == cb, 0.0, NEG_INF)

    inv_scale = 1.0 / math.sqrt(HEAD_DIM)

    def attention(q2d, k2d, v2d):
        """q2d/k2d/v2d: (B*S, H) with heads packed along lanes -> (B*S, H)."""
        ctx = []
        for h in range(N_HEADS):
            sl = slice(h * HEAD_DIM, (h + 1) * HEAD_DIM)
            s = _mm_nt(q2d[:, sl], k2d[:, sl]) * inv_scale + batch_bias
            m = jnp.max(s, axis=-1, keepdims=True)
            e = jnp.exp(s - m)
            alpha = e / jnp.sum(e, axis=-1, keepdims=True)   # exact softmax
            ctx.append(_mm(alpha, v2d[:, sl]))
        return jnp.concatenate(ctx, axis=-1)                 # (B*S, H)

    def attn_ffn(x_res, ctx, k):
        attn = _mm(ctx, w32(f"{k}_wo")) + vec(f"{k}_bo")
        y = _ln(x_res + attn, vec(f"{k}_ln1g"), vec(f"{k}_ln1b"))
        h = jnp.maximum(_mm(y, w64(f"{k}_fw1")) + vec(f"{k}_fb1", PF_DIM), 0.0)
        ff = _mm(h, w32(f"{k}_fw2")) + vec(f"{k}_fb2")
        return _ln(y + ff, vec(f"{k}_ln2g"), vec(f"{k}_ln2b"))

    def self_attn_layer(x, k):
        qkv = _mm(x, w96(f"{k}_wqkv")) + vec(f"{k}_bqkv", 3 * HID_DIM)
        ctx = attention(qkv[:, 0:HID_DIM],
                        qkv[:, HID_DIM:2 * HID_DIM],
                        qkv[:, 2 * HID_DIM:])
        return attn_ffn(x, ctx, k)

    def cross_attn_layer(xq, xkv, k):
        wqkv = w96(f"{k}_wqkv")
        bqkv = vec(f"{k}_bqkv", 3 * HID_DIM)
        q = _mm(xq, wqkv[:, 0:HID_DIM]) + bqkv[:, 0:HID_DIM]
        kv = _mm(xkv, wqkv[:, HID_DIM:]) + bqkv[:, HID_DIM:]
        ctx = attention(q, kv[:, 0:HID_DIM], kv[:, HID_DIM:])
        return attn_ffn(xq, ctx, k)

    def image_branch(patches, tag, enc_keys, n_patches):
        # patch-embedding MLP (LayerNorm0 affine folded into w1/b1 host-side)
        mu = jnp.mean(patches, axis=-1, keepdims=True)
        d = patches - mu
        var = jnp.mean(d * d, axis=-1, keepdims=True)
        z = d * jax.lax.rsqrt(var + LN_EPS)
        z = _mm(z, w32(f"{tag}_w1")) + vec(f"{tag}_b1")
        z = _ln(z, vec(f"{tag}_ln1g"), vec(f"{tag}_ln1b"))
        z = jnp.maximum(z, 0.0)
        z = _mm(z, w32(f"{tag}_w2")) + vec(f"{tag}_b2")
        z = _ln(z, vec(f"{tag}_ln2g"), vec(f"{tag}_ln2b"))          # (B*P, H)
        # cls token + positional encodings: precomputed rows, sublane concat
        cls_pe = vec(f"{tag}_clspe")                                # (S, H), row0 = cls+pe0
        pieces = []
        for b in range(bsz):
            pieces.append(cls_pe[0:1, :])
            pieces.append(z[b * n_patches:(b + 1) * n_patches, :] + cls_pe[1:, :])
        x = jnp.concatenate(pieces, axis=0)                         # (B*S, H)
        for k in enc_keys:
            x = self_attn_layer(x, k)
        return x

    x1 = image_branch(p1_ref[...], "emb1", ("e1_0", "e1_1"), NP1)
    x2 = image_branch(p2_ref[...], "emb2", ("e2_0", "e2_1"), NP2)

    for l in range(CROSS_LAYERS):
        x1 = cross_attn_layer(x1, x2, f"x1_{l}")
        x2 = cross_attn_layer(x2, x1, f"x2_{l}")   # attends to *updated* x1 (torch order)

    # mean-pool per sample, concat branches, DNN head (eval BatchNorm -> affine)
    pooled = []
    for b in range(bsz):
        m1 = jnp.mean(x1[b * SEQ:(b + 1) * SEQ, :], axis=0, keepdims=True)
        m2 = jnp.mean(x2[b * SEQ:(b + 1) * SEQ, :], axis=0, keepdims=True)
        pooled.append(jnp.concatenate([m1, m2], axis=-1))
    z = jnp.concatenate(pooled, axis=0)                             # (B, 2H)
    z = z * vec("head_bn0s", 2 * HID_DIM) + vec("head_bn0b", 2 * HID_DIM)
    z = _mm(z, w32("head_w1")) + vec("head_b1")
    z = jnp.maximum(z * vec("head_bn1s") + vec("head_bn1b"), 0.0)
    z = _mm(z, w32("head_w2")) + vec("head_b2")
    z = jnp.maximum(z * vec("head_bn2s") + vec("head_bn2b"), 0.0)
    w3t = vec("head_w3t")                                           # (1, H) == w3^T
    b3 = vec("head_b3", OUTPUT_DIM)                                 # (1, 1)
    out_ref[...] = jnp.sum(z * w3t, axis=-1, keepdims=True) + b3


# ----------------------------- wrapper / glue -----------------------------
def _to_patches(x, channels, image_size, patch_size):
    """Mirrors ImageRepresentations.to_patch (view / permute / reshape)."""
    b = x.shape[0]
    n = image_size // patch_size
    x = x.reshape(b, channels, n, patch_size, n, patch_size)
    x = x.transpose(0, 2, 4, 1, 3, 5)
    return x.reshape(b, n * n, channels * patch_size * patch_size)


def _full_spec(arr):
    return pl.BlockSpec(arr.shape, lambda i: (0,) * arr.ndim)


def model_forward(image1, image2, label, slabs):
    """ModelSatelliteScene.forward (eval): returns {'loss', 'predicted_y', 'l1'}."""
    b = image1.shape[0]
    p1 = _to_patches(image1, CHANNELS1, IMG_SIZE1, PATCH1).reshape(b * NP1, PATCH_DIM1)
    p2 = _to_patches(image2, CHANNELS2, IMG_SIZE2, PATCH2).reshape(b * NP2, PATCH_DIM2)

    args = (p1, p2, slabs["w32"], slabs["w96"], slabs["w64"], slabs["vec"])
    pred = pl.pallas_call(
        model_kernel,
        out_shape=jax.ShapeDtypeStruct((b, OUTPUT_DIM), jnp.float32),
        grid=(1,),                                   # whole batch in one step
        in_specs=[_full_spec(a) for a in args],
        out_specs=pl.BlockSpec((b, OUTPUT_DIM), lambda i: (0, 0)),
        compiler_params=pltpu.CompilerParams(dimension_semantics=("arbitrary",)),
    )(*args)

    diff = pred.reshape(-1) - label.reshape(-1).astype(jnp.float32)
    loss = jnp.mean(diff * diff)          # nn.MSELoss
    l1 = jnp.mean(jnp.abs(diff))          # nn.L1Loss
    return {"loss": loss, "predicted_y": pred, "l1": l1}


# ----------------------------- parameter init -----------------------------
def _linear(key, fan_in, fan_out, scale=0.05):
    kw, kb = jax.random.split(key)
    return (scale * jax.random.normal(kw, (fan_in, fan_out), jnp.float32),
            scale * jax.random.normal(kb, (fan_out,), jnp.float32))


def _init_attn_block(key):
    ks = jax.random.split(key, 6)
    wq, bq = _linear(ks[0], HID_DIM, HID_DIM)
    wk, bk = _linear(ks[1], HID_DIM, HID_DIM)
    wv, bv = _linear(ks[2], HID_DIM, HID_DIM)
    wo, bo = _linear(ks[3], HID_DIM, HID_DIM)
    fw1, fb1 = _linear(ks[4], HID_DIM, PF_DIM)
    fw2, fb2 = _linear(ks[5], PF_DIM, HID_DIM)
    ones = jnp.ones((HID_DIM,), jnp.float32)
    zeros = jnp.zeros((HID_DIM,), jnp.float32)
    return dict(wq=wq, bq=bq, wk=wk, bk=bk, wv=wv, bv=bv, wo=wo, bo=bo,
                ln1_g=ones, ln1_b=zeros, fw1=fw1, fb1=fb1, fw2=fw2, fb2=fb2,
                ln2_g=ones, ln2_b=zeros)


def _init_branch(key, patch_dim):
    ks = jax.random.split(key, 3 + ENC_LAYERS)
    w1, b1 = _linear(ks[0], patch_dim, HID_DIM)
    w2, b2 = _linear(ks[1], HID_DIM, HID_DIM)
    cls = jax.random.normal(ks[2], (HID_DIM,), jnp.float32)
    return dict(
        ln0_g=jnp.ones((patch_dim,), jnp.float32),
        ln0_b=jnp.zeros((patch_dim,), jnp.float32),
        w1=w1, b1=b1,
        ln1_g=jnp.ones((HID_DIM,), jnp.float32), ln1_b=jnp.zeros((HID_DIM,), jnp.float32),
        w2=w2, b2=b2,
        ln2_g=jnp.ones((HID_DIM,), jnp.float32), ln2_b=jnp.zeros((HID_DIM,), jnp.float32),
        cls=cls,
        layers=[_init_attn_block(k) for k in ks[3:]])


def _init_bn(key, dim):
    kg, kb, km, kv = jax.random.split(key, 4)
    return dict(g=1.0 + 0.1 * jax.random.normal(kg, (dim,), jnp.float32),
                b=0.1 * jax.random.normal(kb, (dim,), jnp.float32),
                m=0.1 * jax.random.normal(km, (dim,), jnp.float32),
                v=1.0 + 0.1 * jnp.abs(jax.random.normal(kv, (dim,), jnp.float32)))


def _init_head(key):
    ks = jax.random.split(key, 6)
    bn0 = _init_bn(ks[0], 2 * HID_DIM)
    w1, b1 = _linear(ks[1], 2 * HID_DIM, HID_DIM)
    bn1 = _init_bn(ks[2], HID_DIM)
    w2, b2 = _linear(ks[3], HID_DIM, HID_DIM)
    bn2 = _init_bn(ks[4], HID_DIM)
    w3, b3 = _linear(ks[5], HID_DIM, OUTPUT_DIM)
    return dict(bn0=bn0, w1=w1, b1=b1, bn1=bn1, w2=w2, b2=b2, bn2=bn2, w3=w3, b3=b3)


def init_params(key):
    k1, k2, k3, k4, k5 = jax.random.split(key, 5)
    return dict(
        branch1=_init_branch(k1, PATCH_DIM1),
        branch2=_init_branch(k2, PATCH_DIM2),
        cross1=[_init_attn_block(k) for k in jax.random.split(k3, CROSS_LAYERS)],
        cross2=[_init_attn_block(k) for k in jax.random.split(k4, CROSS_LAYERS)],
        head=_init_head(k5))


# ----------------------------- host-side packing -----------------------------
def _positional_encoding(seq, hid):
    pos = jnp.arange(seq, dtype=jnp.float32)[:, None]
    div = jnp.exp(-jnp.arange(0, hid, 2, dtype=jnp.float32) * (math.log(10000.0) / hid))
    pe = jnp.zeros((seq, hid), jnp.float32)
    pe = pe.at[:, 0::2].set(jnp.sin(pos * div))
    pe = pe.at[:, 1::2].set(jnp.cos(pos * div))
    return pe


def pack_params(params):
    """Pack the nested param dict into 4 lane-dense f32 slabs (done once, host-side)."""
    w32 = jnp.zeros((W32_ROWS, HID_DIM), jnp.float32)
    w96 = jnp.zeros((W96_ROWS, 3 * HID_DIM), jnp.float32)
    w64 = jnp.zeros((W64_ROWS, PF_DIM), jnp.float32)
    vec = jnp.zeros((VEC_ROWS, VEC_W), jnp.float32)

    def put32(name, m):
        nonlocal w32
        off, n = W32_LAYOUT[name]
        w32 = w32.at[off:off + n, :].set(m)

    def put96(name, m):
        nonlocal w96
        off, n = W96_LAYOUT[name]
        w96 = w96.at[off:off + n, :].set(m)

    def put64(name, m):
        nonlocal w64
        off, n = W64_LAYOUT[name]
        w64 = w64.at[off:off + n, :].set(m)

    def putv(name, m):
        nonlocal vec
        m = jnp.atleast_2d(m)
        off, n = VEC_LAYOUT[name]
        vec = vec.at[off:off + n, :m.shape[-1]].set(m)

    pe = _positional_encoding(SEQ, HID_DIM)
    for tag, bp in (("emb1", params["branch1"]), ("emb2", params["branch2"])):
        # fold LayerNorm0 affine into the first linear
        w1f = bp["ln0_g"][:, None] * bp["w1"]
        b1f = bp["ln0_b"] @ bp["w1"] + bp["b1"]
        put32(f"{tag}_w1", w1f)
        putv(f"{tag}_b1", b1f)
        putv(f"{tag}_ln1g", bp["ln1_g"]); putv(f"{tag}_ln1b", bp["ln1_b"])
        put32(f"{tag}_w2", bp["w2"]); putv(f"{tag}_b2", bp["b2"])
        putv(f"{tag}_ln2g", bp["ln2_g"]); putv(f"{tag}_ln2b", bp["ln2_b"])
        putv(f"{tag}_clspe", pe.at[0, :].add(bp["cls"]))   # row0 = cls + pe[0]

    def put_block(key, blk):
        put96(f"{key}_wqkv", jnp.concatenate([blk["wq"], blk["wk"], blk["wv"]], axis=1))
        putv(f"{key}_bqkv", jnp.concatenate([blk["bq"], blk["bk"], blk["bv"]], axis=-1))
        put32(f"{key}_wo", blk["wo"]); putv(f"{key}_bo", blk["bo"])
        putv(f"{key}_ln1g", blk["ln1_g"]); putv(f"{key}_ln1b", blk["ln1_b"])
        put64(f"{key}_fw1", blk["fw1"]); putv(f"{key}_fb1", blk["fb1"])
        put32(f"{key}_fw2", blk["fw2"]); putv(f"{key}_fb2", blk["fb2"])
        putv(f"{key}_ln2g", blk["ln2_g"]); putv(f"{key}_ln2b", blk["ln2_b"])

    for l in range(ENC_LAYERS):
        put_block(f"e1_{l}", params["branch1"]["layers"][l])
        put_block(f"e2_{l}", params["branch2"]["layers"][l])
    for l in range(CROSS_LAYERS):
        put_block(f"x1_{l}", params["cross1"][l])
        put_block(f"x2_{l}", params["cross2"][l])

    hd = params["head"]

    def bn_affine(g, b, m, v):           # eval-mode BatchNorm1d -> per-feature affine
        s = g * jax.lax.rsqrt(v + BN_EPS)
        return s, b - m * s

    s0, c0 = bn_affine(**hd["bn0"])
    s1, c1 = bn_affine(**hd["bn1"])
    s2, c2 = bn_affine(**hd["bn2"])
    putv("head_bn0s", s0); putv("head_bn0b", c0)
    put32("head_w1", hd["w1"]); putv("head_b1", hd["b1"])
    putv("head_bn1s", s1); putv("head_bn1b", c1)
    put32("head_w2", hd["w2"]); putv("head_b2", hd["b2"])
    putv("head_bn2s", s2); putv("head_bn2b", c2)
    putv("head_w3t", hd["w3"].reshape(1, HID_DIM))
    putv("head_b3", hd["b3"])
    return {"w32": w32, "w96": w96, "w64": w64, "vec": vec}


# ----------------------------- main -----------------------------
if __name__ == "__main__":
    key = jax.random.PRNGKey(0)
    k_img1, k_img2, k_lab, k_par = jax.random.split(key, 4)
    image1 = jax.random.normal(k_img1, (BATCH, CHANNELS1, IMG_SIZE1, IMG_SIZE1), jnp.float32)
    image2 = jax.random.normal(k_img2, (BATCH, CHANNELS2, IMG_SIZE2, IMG_SIZE2), jnp.float32)
    label = jax.random.normal(k_lab, (BATCH, OUTPUT_DIM), jnp.float32)

    params = init_params(k_par)
    slabs = pack_params(params)           # pack once, outside the jitted forward

    fwd = jax.jit(model_forward)
    out = fwd(image1, image2, label, slabs)
    jax.block_until_ready(out)
    assert out["predicted_y"].shape == (BATCH, OUTPUT_DIM)
    assert out["loss"].shape == ()
    print("KERNEL_OK")
</pallas_src>

<mosaic_0001>
module attributes {stable_mosaic.version = 11 : i64} {
  func.func @model_kernel(%arg0: i32, %arg1: memref<8x256xf32, #tpu.memory_space<vmem>>, %arg2: memref<8x128xf32, #tpu.memory_space<vmem>>, %arg3: memref<1312x32xf32, #tpu.memory_space<vmem>>, %arg4: memref<256x96xf32, #tpu.memory_space<vmem>>, %arg5: memref<256x64xf32, #tpu.memory_space<vmem>>, %arg6: memref<96x128xf32, #tpu.memory_space<vmem>>, %arg7: memref<2x1xf32, #tpu.memory_space<vmem>>) attributes {dimension_semantics = [#tpu.dimension_semantics<arbitrary>], iteration_bounds = array<i64: 1>, scalar_prefetch = 0 : i64, scratch_operands = 0 : i64, tpu.core_type = #tpu.core_type<tc>, window_params = [{pipeline_mode = #tpu.pipeline_mode<synchronous>, transform_indices = @transform_0, window_bounds = array<i64: 8, 256>}, {pipeline_mode = #tpu.pipeline_mode<synchronous>, transform_indices = @transform_1, window_bounds = array<i64: 8, 128>}, {pipeline_mode = #tpu.pipeline_mode<synchronous>, transform_indices = @transform_2, window_bounds = array<i64: 1312, 32>}, {pipeline_mode = #tpu.pipeline_mode<synchronous>, transform_indices = @transform_3, window_bounds = array<i64: 256, 96>}, {pipeline_mode = #tpu.pipeline_mode<synchronous>, transform_indices = @transform_4, window_bounds = array<i64: 256, 64>}, {pipeline_mode = #tpu.pipeline_mode<synchronous>, transform_indices = @transform_5, window_bounds = array<i64: 96, 128>}, {pipeline_mode = #tpu.pipeline_mode<synchronous>, transform_indices = @transform_6, window_bounds = array<i64: 2, 1>}]} {
    %0 = tpu.iota {dimensions = array<i32: 0>} : vector<10x10xi32>
    %1 = arith.sitofp %0 : vector<10x10xi32> to vector<10x10xf32>
    %2 = tpu.iota {dimensions = array<i32: 1>} : vector<10x10xi32>
    %3 = arith.sitofp %2 : vector<10x10xi32> to vector<10x10xf32>
    %cst = arith.constant 2.000000e-01 : f32
    %4 = vector.broadcast %cst : f32 to vector<10x10xf32>
    %5 = arith.mulf %1, %4 : vector<10x10xf32>
    %cst_0 = arith.constant 1.000000e-03 : f32
    %6 = vector.broadcast %cst_0 : f32 to vector<10x10xf32>
    %7 = arith.addf %5, %6 : vector<10x10xf32>
    %8 = math.floor %7 : vector<10x10xf32>
    %cst_1 = arith.constant 2.000000e-01 : f32
    %9 = vector.broadcast %cst_1 : f32 to vector<10x10xf32>
    %10 = arith.mulf %3, %9 : vector<10x10xf32>
    %cst_2 = arith.constant 1.000000e-03 : f32
    %11 = vector.broadcast %cst_2 : f32 to vector<10x10xf32>
    %12 = arith.addf %10, %11 : vector<10x10xf32>
    %13 = math.floor %12 : vector<10x10xf32>
    %14 = arith.cmpf oeq, %8, %13 : vector<10x10xf32>
    %cst_3 = arith.constant 0.000000e+00 : f32
    %cst_4 = arith.constant -1.000000e+30 : f32
    %15 = vector.broadcast %cst_3 : f32 to vector<10x10xf32>
    %16 = vector.broadcast %cst_4 : f32 to vector<10x10xf32>
    %17 = arith.select %14, %15, %16 : vector<10x10xi1>, vector<10x10xf32>
    %c0 = arith.constant 0 : index
    %c0_5 = arith.constant 0 : index
    %18 = vector.load %arg1[%c0, %c0_5] : memref<8x256xf32, #tpu.memory_space<vmem>>, vector<8x256xf32>
    %cst_6 = arith.constant dense<0.000000e+00> : vector<8xf32>
    %19 = vector.multi_reduction <add>, %18, %cst_6 [1] : vector<8x256xf32> to vector<8xf32>
    %20 = vector.shape_cast %19 : vector<8xf32> to vector<8x1xf32>
    %cst_7 = arith.constant 2.560000e+02 : f32
    %21 = vector.broadcast %cst_7 : f32 to vector<8x1xf32>
    %22 = arith.divf %20, %21 : vector<8x1xf32>
    %23 = vector.broadcast %22 : vector<8x1xf32> to vector<8x256xf32>
    %24 = arith.subf %18, %23 : vector<8x256xf32>
    %25 = arith.mulf %24, %24 : vector<8x256xf32>
    %cst_8 = arith.constant dense<0.000000e+00> : vector<8xf32>
    %26 = vector.multi_reduction <add>, %25, %cst_8 [1] : vector<8x256xf32> to vector<8xf32>
    %27 = vector.shape_cast %26 : vector<8xf32> to vector<8x1xf32>
    %cst_9 = arith.constant 2.560000e+02 : f32
    %28 = vector.broadcast %cst_9 : f32 to vector<8x1xf32>
    %29 = arith.divf %27, %28 : vector<8x1xf32>
    %cst_10 = arith.constant 9.99999974E-6 : f32
    %30 = vector.broadcast %cst_10 : f32 to vector<8x1xf32>
    %31 = arith.addf %29, %30 : vector<8x1xf32>
    %32 = math.rsqrt %31 : vector<8x1xf32>
    %33 = vector.broadcast %32 : vector<8x1xf32> to vector<8x256xf32>
    %34 = arith.mulf %24, %33 : vector<8x256xf32>
    %c0_11 = arith.constant 0 : index
    %c0_12 = arith.constant 0 : index
    %35 = vector.load %arg3[%c0_11, %c0_12] : memref<1312x32xf32, #tpu.memory_space<vmem>>, vector<256x32xf32>
    %cst_13 = arith.constant dense<0.000000e+00> : vector<8x32xf32>
    %36 = tpu.matmul %34, %35, %cst_13 {dimension_numbers = #tpu.dot_dimension_numbers<[1], [0], [0], [1], [0, 0, 1, 1], [], []>} : vector<8x256xf32>, vector<256x32xf32>, vector<8x32xf32> -> vector<8x32xf32>
    %c0_14 = arith.constant 0 : index
    %c0_15 = arith.constant 0 : index
    %37 = vector.load %arg6[%c0_14, %c0_15] : memref<96x128xf32, #tpu.memory_space<vmem>>, vector<1x32xf32>
    %38 = vector.broadcast %37 : vector<1x32xf32> to vector<8x32xf32>
    %39 = arith.addf %36, %38 : vector<8x32xf32>
    %c1 = arith.constant 1 : index
    %c0_16 = arith.constant 0 : index
    %40 = vector.load %arg6[%c1, %c0_16] : memref<96x128xf32, #tpu.memory_space<vmem>>, vector<1x32xf32>
    %c2 = arith.constant 2 : index
    %c0_17 = arith.constant 0 : index
    %41 = vector.load %arg6[%c2, %c0_17] : memref<96x128xf32, #tpu.memory_space<vmem>>, vector<1x32xf32>
    %cst_18 = arith.constant dense<0.000000e+00> : vector<8xf32>
    %42 = vector.multi_reduction <add>, %39, %cst_18 [1] : vector<8x32xf32> to vector<8xf32>
    %43 = vector.shape_cast %42 : vector<8xf32> to vector<8x1xf32>
    %cst_19 = arith.constant 3.200000e+01 : f32
    %44 = vector.broadcast %cst_19 : f32 to vector<8x1xf32>
    %45 = arith.divf %43, %44 : vector<8x1xf32>
    %46 = vector.broadcast %45 : vector<8x1xf32> to vector<8x32xf32>
    %47 = arith.subf %39, %46 : vector<8x32xf32>
    %48 = arith.mulf %47, %47 : vector<8x32xf32>
    %cst_20 = arith.constant dense<0.000000e+00> : vector<8xf32>
    %49 = vector.multi_reduction <add>, %48, %cst_20 [1] : vector<8x32xf32> to vector<8xf32>
    %50 = vector.shape_cast %49 : vector<8xf32> to vector<8x1xf32>
    %cst_21 = arith.constant 3.200000e+01 : f32
    %51 = vector.broadcast %cst_21 : f32 to vector<8x1xf32>
    %52 = arith.divf %50, %51 : vector<8x1xf32>
    %cst_22 = arith.constant 9.99999974E-6 : f32
    %53 = vector.broadcast %cst_22 : f32 to vector<8x1xf32>
    %54 = arith.addf %52, %53 : vector<8x1xf32>
    %55 = math.rsqrt %54 : vector<8x1xf32>
    %56 = vector.broadcast %55 : vector<8x1xf32> to vector<8x32xf32>
    %57 = arith.mulf %47, %56 : vector<8x32xf32>
    %58 = vector.broadcast %40 : vector<1x32xf32> to vector<8x32xf32>
    %59 = arith.mulf %57, %58 : vector<8x32xf32>
    %60 = vector.broadcast %41 : vector<1x32xf32> to vector<8x32xf32>
    %61 = arith.addf %59, %60 : vector<8x32xf32>
    %cst_23 = arith.constant 0.000000e+00 : f32
    %62 = vector.broadcast %cst_23 : f32 to vector<8x32xf32>
    %63 = arith.maximumf %61, %62 : vector<8x32xf32>
    %c384 = arith.constant 384 : index
    %c0_24 = arith.constant 0 : index
    %64 = vector.load %arg3[%c384, %c0_24] : memref<1312x32xf32, #tpu.memory_space<vmem>>, vector<32x32xf32>
    %cst_25 = arith.constant dense<0.000000e+00> : vector<8x32xf32>
    %65 = tpu.matmul %63, %64, %cst_25 {dimension_numbers = #tpu.dot_dimension_numbers<[1], [0], [0], [1], [0, 0, 1, 1], [], []>} : vector<8x32xf32>, vector<32x32xf32>, vector<8x32xf32> -> vector<8x32xf32>
    %c3 = arith.constant 3 : index
    %c0_26 = arith.constant 0 : index
    %66 = vector.load %arg6[%c3, %c0_26] : memref<96x128xf32, #tpu.memory_space<vmem>>, vector<1x32xf32>
    %67 = vector.broadcast %66 : vector<1x32xf32> to vector<8x32xf32>
    %68 = arith.addf %65, %67 : vector<8x32xf32>
    %c4 = arith.constant 4 : index
    %c0_27 = arith.constant 0 : index
    %69 = vector.load %arg6[%c4, %c0_27] : memref<96x128xf32, #tpu.memory_space<vmem>>, vector<1x32xf32>
    %c5 = arith.constant 5 : index
    %c0_28 = arith.constant 0 : index
    %70 = vector.load %arg6[%c5, %c0_28] : memref<96x128xf32, #tpu.memory_space<vmem>>, vector<1x32xf32>
    %cst_29 = arith.constant dense<0.000000e+00> : vector<8xf32>
    %71 = vector.multi_reduction <add>, %68, %cst_29 [1] : vector<8x32xf32> to vector<8xf32>
    %72 = vector.shape_cast %71 : vector<8xf32> to vector<8x1xf32>
    %cst_30 = arith.constant 3.200000e+01 : f32
    %73 = vector.broadcast %cst_30 : f32 to vector<8x1xf32>
    %74 = arith.divf %72, %73 : vector<8x1xf32>
    %75 = vector.broadcast %74 : vector<8x1xf32> to vector<8x32xf32>
    %76 = arith.subf %68, %75 : vector<8x32xf32>
    %77 = arith.mulf %76, %76 : vector<8x32xf32>
    %cst_31 = arith.constant dense<0.000000e+00> : vector<8xf32>
    %78 = vector.multi_reduction <add>, %77, %cst_31 [1] : vector<8x32xf32> to vector<8xf32>
    %79 = vector.shape_cast %78 : vector<8xf32> to vector<8x1xf32>
    %cst_32 = arith.constant 3.200000e+01 : f32
    %80 = vector.broadcast %cst_32 : f32 to vector<8x1xf32>
    %81 = arith.divf %79, %80 : vector<8x1xf32>
    %cst_33 = arith.constant 9.99999974E-6 : f32
    %82 = vector.broadcast %cst_33 : f32 to vector<8x1xf32>
    %83 = arith.addf %81, %82 : vector<8x1xf32>
    %84 = math.rsqrt %83 : vector<8x1xf32>
    %85 = vector.broadcast %84 : vector<8x1xf32> to vector<8x32xf32>
    %86 = arith.mulf %76, %85 : vector<8x32xf32>
    %87 = vector.broadcast %69 : vector<1x32xf32> to vector<8x32xf32>
    %88 = arith.mulf %86, %87 : vector<8x32xf32>
    %89 = vector.broadcast %70 : vector<1x32xf32> to vector<8x32xf32>
    %90 = arith.addf %88, %89 : vector<8x32xf32>
    %c6 = arith.constant 6 : index
    %c0_34 = arith.constant 0 : index
    %91 = vector.load %arg6[%c6, %c0_34] : memref<96x128xf32, #tpu.memory_space<vmem>>, vector<5x32xf32>
    %92 = vector.extract_strided_slice %91 {offsets = [0, 0], sizes = [1, 32], strides = [1, 1]} : vector<5x32xf32> to vector<1x32xf32>
    %93 = vector.extract_strided_slice %90 {offsets = [0, 0], sizes = [4, 32], strides = [1, 1]} : vector<8x32xf32> to vector<4x32xf32>
    %94 = vector.extract_strided_slice %91 {offsets = [1, 0], sizes = [4, 32], strides = [1, 1]} : vector<5x32xf32> to vector<4x32xf32>
    %95 = arith.addf %93, %94 : vector<4x32xf32>
    %96 = vector.extract_strided_slice %91 {offsets = [0, 0], sizes = [1, 32], strides = [1, 1]} : vector<5x32xf32> to vector<1x32xf32>
    %97 = vector.extract_strided_slice %90 {offsets = [4, 0], sizes = [4, 32], strides = [1, 1]} : vector<8x32xf32> to vector<4x32xf32>
    %98 = vector.extract_strided_slice %91 {offsets = [1, 0], sizes = [4, 32], strides = [1, 1]} : vector<5x32xf32> to vector<4x32xf32>
    %99 = arith.addf %97, %98 : vector<4x32xf32>
    %100 = tpu.concatenate %92, %95, %96, %99 in 0 : vector<1x32xf32>, vector<4x32xf32>, vector<1x32xf32>, vector<4x32xf32> -> vector<10x32xf32>
    %c0_35 = arith.constant 0 : index
    %c0_36 = arith.constant 0 : index
    %101 = vector.load %arg4[%c0_35, %c0_36] : memref<256x96xf32, #tpu.memory_space<vmem>>, vector<32x96xf32>
    %cst_37 = arith.constant dense<0.000000e+00> : vector<10x96xf32>
    %102 = tpu.matmul %100, %101, %cst_37 {dimension_numbers = #tpu.dot_dimension_numbers<[1], [0], [0], [1], [0, 0, 1, 1], [], []>} : vector<10x32xf32>, vector<32x96xf32>, vector<10x96xf32> -> vector<10x96xf32>
    %c22 = arith.constant 22 : index
    %c0_38 = arith.constant 0 : index
    %103 = vector.load %arg6[%c22, %c0_38] : memref<96x128xf32, #tpu.memory_space<vmem>>, vector<1x96xf32>
    %104 = vector.broadcast %103 : vector<1x96xf32> to vector<10x96xf32>
    %105 = arith.addf %102, %104 : vector<10x96xf32>
    %106 = vector.extract_strided_slice %105 {offsets = [0, 0], sizes = [10, 32], strides = [1, 1]} : vector<10x96xf32> to vector<10x32xf32>
    %107 = vector.extract_strided_slice %105 {offsets = [0, 32], sizes = [10, 32], strides = [1, 1]} : vector<10x96xf32> to vector<10x32xf32>
    %108 = vector.extract_strided_slice %105 {offsets = [0, 64], sizes = [10, 32], strides = [1, 1]} : vector<10x96xf32> to vector<10x32xf32>
    %109 = vector.extract_strided_slice %106 {offsets = [0, 0], sizes = [10, 8], strides = [1, 1]} : vector<10x32xf32> to vector<10x8xf32>
    %110 = vector.extract_strided_slice %107 {offsets = [0, 0], sizes = [10, 8], strides = [1, 1]} : vector<10x32xf32> to vector<10x8xf32>
    %cst_39 = arith.constant dense<0.000000e+00> : vector<10x10xf32>
    %111 = tpu.matmul %109, %110, %cst_39 {dimension_numbers = #tpu.dot_dimension_numbers<[1], [1], [0], [0], [0, 0, 1, 0], [], []>} : vector<10x8xf32>, vector<10x8xf32>, vector<10x10xf32> -> vector<10x10xf32>
    %cst_40 = arith.constant 0.353553385 : f32
    %112 = vector.broadcast %cst_40 : f32 to vector<10x10xf32>
    %113 = arith.mulf %111, %112 : vector<10x10xf32>
    %114 = arith.addf %113, %17 : vector<10x10xf32>
    %cst_41 = arith.constant dense<0xFF800000> : vector<10xf32>
    %115 = vector.multi_reduction <maximumf>, %114, %cst_41 [1] : vector<10x10xf32> to vector<10xf32>
    %116 = vector.shape_cast %115 : vector<10xf32> to vector<10x1xf32>
    %117 = vector.broadcast %116 : vector<10x1xf32> to vector<10x10xf32>
    %118 = arith.subf %114, %117 : vector<10x10xf32>
    %119 = math.exp %118 : vector<10x10xf32>
    %cst_42 = arith.constant dense<0.000000e+00> : vector<10xf32>
    %120 = vector.multi_reduction <add>, %119, %cst_42 [1] : vector<10x10xf32> to vector<10xf32>
    %121 = vector.shape_cast %120 : vector<10xf32> to vector<10x1xf32>
    %122 = vector.broadcast %121 : vector<10x1xf32> to vector<10x10xf32>
    %123 = arith.divf %119, %122 : vector<10x10xf32>
    %124 = vector.extract_strided_slice %108 {offsets = [0, 0], sizes = [10, 8], strides = [1, 1]} : vector<10x32xf32> to vector<10x8xf32>
    %cst_43 = arith.constant dense<0.000000e+00> : vector<10x8xf32>
    %125 = tpu.matmul %123, %124, %cst_43 {dimension_numbers = #tpu.dot_dimension_numbers<[1], [0], [0], [1], [0, 0, 1, 1], [], []>} : vector<10x10xf32>, vector<10x8xf32>, vector<10x8xf32> -> vector<10x8xf32>
    %126 = vector.extract_strided_slice %106 {offsets = [0, 8], sizes = [10, 8], strides = [1, 1]} : vector<10x32xf32> to vector<10x8xf32>
    %127 = vector.extract_strided_slice %107 {offsets = [0, 8], sizes = [10, 8], strides = [1, 1]} : vector<10x32xf32> to vector<10x8xf32>
    %cst_44 = arith.constant dense<0.000000e+00> : vector<10x10xf32>
    %128 = tpu.matmul %126, %127, %cst_44 {dimension_numbers = #tpu.dot_dimension_numbers<[1], [1], [0], [0], [0, 0, 1, 0], [], []>} : vector<10x8xf32>, vector<10x8xf32>, vector<10x10xf32> -> vector<10x10xf32>
    %cst_45 = arith.constant 0.353553385 : f32
    %129 = vector.broadcast %cst_45 : f32 to vector<10x10xf32>
    %130 = arith.mulf %128, %129 : vector<10x10xf32>
    %131 = arith.addf %130, %17 : vector<10x10xf32>
    %cst_46 = arith.constant dense<0xFF800000> : vector<10xf32>
    %132 = vector.multi_reduction <maximumf>, %131, %cst_46 [1] : vector<10x10xf32> to vector<10xf32>
    %133 = vector.shape_cast %132 : vector<10xf32> to vector<10x1xf32>
    %134 = vector.broadcast %133 : vector<10x1xf32> to vector<10x10xf32>
    %135 = arith.subf %131, %134 : vector<10x10xf32>
    %136 = math.exp %135 : vector<10x10xf32>
    %cst_47 = arith.constant dense<0.000000e+00> : vector<10xf32>
    %137 = vector.multi_reduction <add>, %136, %cst_47 [1] : vector<10x10xf32> to vector<10xf32>
    %138 = vector.shape_cast %137 : vector<10xf32> to vector<10x1xf32>
    %139 = vector.broadcast %138 : vector<10x1xf32> to vector<10x10xf32>
    %140 = arith.divf %136, %139 : vector<10x10xf32>
    %141 = vector.extract_strided_slice %108 {offsets = [0, 8], sizes = [10, 8], strides = [1, 1]} : vector<10x32xf32> to vector<10x8xf32>
    %cst_48 = arith.constant dense<0.000000e+00> : vector<10x8xf32>
    %142 = tpu.matmul %140, %141, %cst_48 {dimension_numbers = #tpu.dot_dimension_numbers<[1], [0], [0], [1], [0, 0, 1, 1], [], []>} : vector<10x10xf32>, vector<10x8xf32>, vector<10x8xf32> -> vector<10x8xf32>
    %143 = vector.extract_strided_slice %106 {offsets = [0, 16], sizes = [10, 8], strides = [1, 1]} : vector<10x32xf32> to vector<10x8xf32>
    %144 = vector.extract_strided_slice %107 {offsets = [0, 16], sizes = [10, 8], strides = [1, 1]} : vector<10x32xf32> to vector<10x8xf32>
    %cst_49 = arith.constant dense<0.000000e+00> : vector<10x10xf32>
    %145 = tpu.matmul %143, %144, %cst_49 {dimension_numbers = #tpu.dot_dimension_numbers<[1], [1], [0], [0], [0, 0, 1, 0], [], []>} : vector<10x8xf32>, vector<10x8xf32>, vector<10x10xf32> -> vector<10x10xf32>
    %cst_50 = arith.constant 0.353553385 : f32
    %146 = vector.broadcast %cst_50 : f32 to vector<10x10xf32>
    %147 = arith.mulf %145, %146 : vector<10x10xf32>
    %148 = arith.addf %147, %17 : vector<10x10xf32>
    %cst_51 = arith.constant dense<0xFF800000> : vector<10xf32>
    %149 = vector.multi_reduction <maximumf>, %148, %cst_51 [1] : vector<10x10xf32> to vector<10xf32>
    %150 = vector.shape_cast %149 : vector<10xf32> to vector<10x1xf32>
    %151 = vector.broadcast %150 : vector<10x1xf32> to vector<10x10xf32>
    %152 = arith.subf %148, %151 : vector<10x10xf32>
    %153 = math.exp %152 : vector<10x10xf32>
    %cst_52 = arith.constant dense<0.000000e+00> : vector<10xf32>
    %154 = vector.multi_reduction <add>, %153, %cst_52 [1] : vector<10x10xf32> to vector<10xf32>
    %155 = vector.shape_cast %154 : vector<10xf32> to vector<10x1xf32>
    %156 = vector.broadcast %155 : vector<10x1xf32> to vector<10x10xf32>
    %157 = arith.divf %153, %156 : vector<10x10xf32>
    %158 = vector.extract_strided_slice %108 {offsets = [0, 16], sizes = [10, 8], strides = [1, 1]} : vector<10x32xf32> to vector<10x8xf32>
    %cst_53 = arith.constant dense<0.000000e+00> : vector<10x8xf32>
    %159 = tpu.matmul %157, %158, %cst_53 {dimension_numbers = #tpu.dot_dimension_numbers<[1], [0], [0], [1], [0, 0, 1, 1], [], []>} : vector<10x10xf32>, vector<10x8xf32>, vector<10x8xf32> -> vector<10x8xf32>
    %160 = vector.extract_strided_slice %106 {offsets = [0, 24], sizes = [10, 8], strides = [1, 1]} : vector<10x32xf32> to vector<10x8xf32>
    %161 = vector.extract_strided_slice %107 {offsets = [0, 24], sizes = [10, 8], strides = [1, 1]} : vector<10x32xf32> to vector<10x8xf32>
    %cst_54 = arith.constant dense<0.000000e+00> : vector<10x10xf32>
    %162 = tpu.matmul %160, %161, %cst_54 {dimension_numbers = #tpu.dot_dimension_numbers<[1], [1], [0], [0], [0, 0, 1, 0], [], []>} : vector<10x8xf32>, vector<10x8xf32>, vector<10x10xf32> -> vector<10x10xf32>
    %cst_55 = arith.constant 0.353553385 : f32
    %163 = vector.broadcast %cst_55 : f32 to vector<10x10xf32>
    %164 = arith.mulf %162, %163 : vector<10x10xf32>
    %165 = arith.addf %164, %17 : vector<10x10xf32>
    %cst_56 = arith.constant dense<0xFF800000> : vector<10xf32>
    %166 = vector.multi_reduction <maximumf>, %165, %cst_56 [1] : vector<10x10xf32> to vector<10xf32>
    %167 = vector.shape_cast %166 : vector<10xf32> to vector<10x1xf32>
    %168 = vector.broadcast %167 : vector<10x1xf32> to vector<10x10xf32>
    %169 = arith.subf %165, %168 : vector<10x10xf32>
    %170 = math.exp %169 : vector<10x10xf32>
    %cst_57 = arith.constant dense<0.000000e+00> : vector<10xf32>
    %171 = vector.multi_reduction <add>, %170, %cst_57 [1] : vector<10x10xf32> to vector<10xf32>
    %172 = vector.shape_cast %171 : vector<10xf32> to vector<10x1xf32>
    %173 = vector.broadcast %172 : vector<10x1xf32> to vector<10x10xf32>
    %174 = arith.divf %170, %173 : vector<10x10xf32>
    %175 = vector.extract_strided_slice %108 {offsets = [0, 24], sizes = [10, 8], strides = [1, 1]} : vector<10x32xf32> to vector<10x8xf32>
    %cst_58 = arith.constant dense<0.000000e+00> : vector<10x8xf32>
    %176 = tpu.matmul %174, %175, %cst_58 {dimension_numbers = #tpu.dot_dimension_numbers<[1], [0], [0], [1], [0, 0, 1, 1], [], []>} : vector<10x10xf32>, vector<10x8xf32>, vector<10x8xf32> -> vector<10x8xf32>
    %177 = tpu.concatenate %125, %142, %159, %176 in 1 : vector<10x8xf32>, vector<10x8xf32>, vector<10x8xf32>, vector<10x8xf32> -> vector<10x32xf32>
    %c448 = arith.constant 448 : index
    %c0_59 = arith.constant 0 : index
    %178 = vector.load %arg3[%c448, %c0_59] : memref<1312x32xf32, #tpu.memory_space<vmem>>, vector<32x32xf32>
    %cst_60 = arith.constant dense<0.000000e+00> : vector<10x32xf32>
    %179 = tpu.matmul %177, %178, %cst_60 {dimension_numbers = #tpu.dot_dimension_numbers<[1], [0], [0], [1], [0, 0, 1, 1], [], []>} : vector<10x32xf32>, vector<32x32xf32>, vector<10x32xf32> -> vector<10x32xf32>
    %c23 = arith.constant 23 : index
    %c0_61 = arith.constant 0 : index
    %180 = vector.load %arg6[%c23, %c0_61] : memref<96x128xf32, #tpu.memory_space<vmem>>, vector<1x32xf32>
    %181 = vector.broadcast %180 : vector<1x32xf32> to vector<10x32xf32>
    %182 = arith.addf %179, %181 : vector<10x32xf32>
    %183 = arith.addf %100, %182 : vector<10x32xf32>
    %c24 = arith.constant 24 : index
    %c0_62 = arith.constant 0 : index
    %184 = vector.load %arg6[%c24, %c0_62] : memref<96x128xf32, #tpu.memory_space<vmem>>, vector<1x32xf32>
    %c25 = arith.constant 25 : index
    %c0_63 = arith.constant 0 : index
    %185 = vector.load %arg6[%c25, %c0_63] : memref<96x128xf32, #tpu.memory_space<vmem>>, vector<1x32xf32>
    %cst_64 = arith.constant dense<0.000000e+00> : vector<10xf32>
    %186 = vector.multi_reduction <add>, %183, %cst_64 [1] : vector<10x32xf32> to vector<10xf32>
    %187 = vector.shape_cast %186 : vector<10xf32> to vector<10x1xf32>
    %cst_65 = arith.constant 3.200000e+01 : f32
    %188 = vector.broadcast %cst_65 : f32 to vector<10x1xf32>
    %189 = arith.divf %187, %188 : vector<10x1xf32>
    %190 = vector.broadcast %189 : vector<10x1xf32> to vector<10x32xf32>
    %191 = arith.subf %183, %190 : vector<10x32xf32>
    %192 = arith.mulf %191, %191 : vector<10x32xf32>
    %cst_66 = arith.constant dense<0.000000e+00> : vector<10xf32>
    %193 = vector.multi_reduction <add>, %192, %cst_66 [1] : vector<10x32xf32> to vector<10xf32>
    %194 = vector.shape_cast %193 : vector<10xf32> to vector<10x1xf32>
    %cst_67 = arith.constant 3.200000e+01 : f32
    %195 = vector.broadcast %cst_67 : f32 to vector<10x1xf32>
    %196 = arith.divf %194, %195 : vector<10x1xf32>
    %cst_68 = arith.constant 9.99999974E-6 : f32
    %197 = vector.broadcast %cst_68 : f32 to vector<10x1xf32>
    %198 = arith.addf %196, %197 : vector<10x1xf32>
    %199 = math.rsqrt %198 : vector<10x1xf32>
    %200 = vector.broadcast %199 : vector<10x1xf32> to vector<10x32xf32>
    %201 = arith.mulf %191, %200 : vector<10x32xf32>
    %202 = vector.broadcast %184 : vector<1x32xf32> to vector<10x32xf32>
    %203 = arith.mulf %201, %202 : vector<10x32xf32>
    %204 = vector.broadcast %185 : vector<1x32xf32> to vector<10x32xf32>
    %205 = arith.addf %203, %204 : vector<10x32xf32>
    %c0_69 = arith.constant 0 : index
    %c0_70 = arith.constant 0 : index
    %206 = vector.load %arg5[%c0_69, %c0_70] : memref<256x64xf32, #tpu.memory_space<vmem>>, vector<32x64xf32>
    %cst_71 = arith.constant dense<0.000000e+00> : vector<10x64xf32>
    %207 = tpu.matmul %205, %206, %cst_71 {dimension_numbers = #tpu.dot_dimension_numbers<[1], [0], [0], [1], [0, 0, 1, 1], [], []>} : vector<10x32xf32>, vector<32x64xf32>, vector<10x64xf32> -> vector<10x64xf32>
    %c26 = arith.constant 26 : index
    %c0_72 = arith.constant 0 : index
    %208 = vector.load %arg6[%c26, %c0_72] : memref<96x128xf32, #tpu.memory_space<vmem>>, vector<1x64xf32>
    %209 = vector.broadcast %208 : vector<1x64xf32> to vector<10x64xf32>
    %210 = arith.addf %207, %209 : vector<10x64xf32>
    %cst_73 = arith.constant 0.000000e+00 : f32
    %211 = vector.broadcast %cst_73 : f32 to vector<10x64xf32>
    %212 = arith.maximumf %210, %211 : vector<10x64xf32>
    %c480 = arith.constant 480 : index
    %c0_74 = arith.constant 0 : index
    %213 = vector.load %arg3[%c480, %c0_74] : memref<1312x32xf32, #tpu.memory_space<vmem>>, vector<64x32xf32>
    %cst_75 = arith.constant dense<0.000000e+00> : vector<10x32xf32>
    %214 = tpu.matmul %212, %213, %cst_75 {dimension_numbers = #tpu.dot_dimension_numbers<[1], [0], [0], [1], [0, 0, 1, 1], [], []>} : vector<10x64xf32>, vector<64x32xf32>, vector<10x32xf32> -> vector<10x32xf32>
    %c27 = arith.constant 27 : index
    %c0_76 = arith.constant 0 : index
    %215 = vector.load %arg6[%c27, %c0_76] : memref<96x128xf32, #tpu.memory_space<vmem>>, vector<1x32xf32>
    %216 = vector.broadcast %215 : vector<1x32xf32> to vector<10x32xf32>
    %217 = arith.addf %214, %216 : vector<10x32xf32>
    %218 = arith.addf %205, %217 : vector<10x32xf32>
    %c28 = arith.constant 28 : index
    %c0_77 = arith.constant 0 : index
    %219 = vector.load %arg6[%c28, %c0_77] : memref<96x128xf32, #tpu.memory_space<vmem>>, vector<1x32xf32>
    %c29 = arith.constant 29 : index
    %c0_78 = arith.constant 0 : index
    %220 = vector.load %arg6[%c29, %c0_78] : memref<96x128xf32, #tpu.memory_space<vmem>>, vector<1x32xf32>
    %cst_79 = arith.constant dense<0.000000e+00> : vector<10xf32>
    %221 = vector.multi_reduction <add>, %218, %cst_79 [1] : vector<10x32xf32> to vector<10xf32>
    %222 = vector.shape_cast %221 : vector<10xf32> to vector<10x1xf32>
    %cst_80 = arith.constant 3.200000e+01 : f32
    %223 = vector.broadcast %cst_80 : f32 to vector<10x1xf32>
    %224 = arith.divf %222, %223 : vector<10x1xf32>
    %225 = vector.broadcast %224 : vector<10x1xf32> to vector<10x32xf32>
    %226 = arith.subf %218, %225 : vector<10x32xf32>
    %227 = arith.mulf %226, %226 : vector<10x32xf32>
    %cst_81 = arith.constant dense<0.000000e+00> : vector<10xf32>
    %228 = vector.multi_reduction <add>, %227, %cst_81 [1] : vector<10x32xf32> to vector<10xf32>
    %229 = vector.shape_cast %228 : vector<10xf32> to vector<10x1xf32>
    %cst_82 = arith.constant 3.200000e+01 : f32
    %230 = vector.broadcast %cst_82 : f32 to vector<10x1xf32>
    %231 = arith.divf %229, %230 : vector<10x1xf32>
    %cst_83 = arith.constant 9.99999974E-6 : f32
    %232 = vector.broadcast %cst_83 : f32 to vector<10x1xf32>
    %233 = arith.addf %231, %232 : vector<10x1xf32>
    %234 = math.rsqrt %233 : vector<10x1xf32>
    %235 = vector.broadcast %234 : vector<10x1xf32> to vector<10x32xf32>
    %236 = arith.mulf %226, %235 : vector<10x32xf32>
    %237 = vector.broadcast %219 : vector<1x32xf32> to vector<10x32xf32>
    %238 = arith.mulf %236, %237 : vector<10x32xf32>
    %239 = vector.broadcast %220 : vector<1x32xf32> to vector<10x32xf32>
    %240 = arith.addf %238, %239 : vector<10x32xf32>
    %c32 = arith.constant 32 : index
    %c0_84 = arith.constant 0 : index
    %241 = vector.load %arg4[%c32, %c0_84] : memref<256x96xf32, #tpu.memory_space<vmem>>, vector<32x96xf32>
    %cst_85 = arith.constant dense<0.000000e+00> : vector<10x96xf32>
    %242 = tpu.matmul %240, %241, %cst_85 {dimension_numbers = #tpu.dot_dimension_numbers<[1], [0], [0], [1], [0, 0, 1, 1], [], []>} : vector<10x32xf32>, vector<32x96xf32>, vector<10x96xf32> -> vector<10x96xf32>
    %c30 = arith.constant 30 : index
    %c0_86 = arith.constant 0 : index
    %243 = vector.load %arg6[%c30, %c0_86] : memref<96x128xf32, #tpu.memory_space<vmem>>, vector<1x96xf32>
    %244 = vector.broadcast %243 : vector<1x96xf32> to vector<10x96xf32>
    %245 = arith.addf %242, %244 : vector<10x96xf32>
    %246 = vector.extract_strided_slice %245 {offsets = [0, 0], sizes = [10, 32], strides = [1, 1]} : vector<10x96xf32> to vector<10x32xf32>
    %247 = vector.extract_strided_slice %245 {offsets = [0, 32], sizes = [10, 32], strides = [1, 1]} : vector<10x96xf32> to vector<10x32xf32>
    %248 = vector.extract_strided_slice %245 {offsets = [0, 64], sizes = [10, 32], strides = [1, 1]} : vector<10x96xf32> to vector<10x32xf32>
    %249 = vector.extract_strided_slice %246 {offsets = [0, 0], sizes = [10, 8], strides = [1, 1]} : vector<10x32xf32> to vector<10x8xf32>
    %250 = vector.extract_strided_slice %247 {offsets = [0, 0], sizes = [10, 8], strides = [1, 1]} : vector<10x32xf32> to vector<10x8xf32>
    %cst_87 = arith.constant dense<0.000000e+00> : vector<10x10xf32>
    %251 = tpu.matmul %249, %250, %cst_87 {dimension_numbers = #tpu.dot_dimension_numbers<[1], [1], [0], [0], [0, 0, 1, 0], [], []>} : vector<10x8xf32>, vector<10x8xf32>, vector<10x10xf32> -> vector<10x10xf32>
    %cst_88 = arith.constant 0.353553385 : f32
    %252 = vector.broadcast %cst_88 : f32 to vector<10x10xf32>
    %253 = arith.mulf %251, %252 : vector<10x10xf32>
    %254 = arith.addf %253, %17 : vector<10x10xf32>
    %cst_89 = arith.constant dense<0xFF800000> : vector<10xf32>
    %255 = vector.multi_reduction <maximumf>, %254, %cst_89 [1] : vector<10x10xf32> to vector<10xf32>
    %256 = vector.shape_cast %255 : vector<10xf32> to vector<10x1xf32>
    %257 = vector.broadcast %256 : vector<10x1xf32> to vector<10x10xf32>
    %258 = arith.subf %254, %257 : vector<10x10xf32>
    %259 = math.exp %258 : vector<10x10xf32>
    %cst_90 = arith.constant dense<0.000000e+00> : vector<10xf32>
    %260 = vector.multi_reduction <add>, %259, %cst_90 [1] : vector<10x10xf32> to vector<10xf32>
    %261 = vector.shape_cast %260 : vector<10xf32> to vector<10x1xf32>
    %262 = vector.broadcast %261 : vector<10x1xf32> to vector<10x10xf32>
    %263 = arith.divf %259, %262 : vector<10x10xf32>
    %264 = vector.extract_strided_slice %248 {offsets = [0, 0], sizes = [10, 8], strides = [1, 1]} : vector<10x32xf32> to vector<10x8xf32>
    %cst_91 = arith.constant dense<0.000000e+00> : vector<10x8xf32>
    %265 = tpu.matmul %263, %264, %cst_91 {dimension_numbers = #tpu.dot_dimension_numbers<[1], [0], [0], [1], [0, 0, 1, 1], [], []>} : vector<10x10xf32>, vector<10x8xf32>, vector<10x8xf32> -> vector<10x8xf32>
    %266 = vector.extract_strided_slice %246 {offsets = [0, 8], sizes = [10, 8], strides = [1, 1]} : vector<10x32xf32> to vector<10x8xf32>
    %267 = vector.extract_strided_slice %247 {offsets = [0, 8], sizes = [10, 8], strides = [1, 1]} : vector<10x32xf32> to vector<10x8xf32>
    %cst_92 = arith.constant dense<0.000000e+00> : vector<10x10xf32>
    %268 = tpu.matmul %266, %267, %cst_92 {dimension_numbers = #tpu.dot_dimension_numbers<[1], [1], [0], [0], [0, 0, 1, 0], [], []>} : vector<10x8xf32>, vector<10x8xf32>, vector<10x10xf32> -> vector<10x10xf32>
    %cst_93 = arith.constant 0.353553385 : f32
    %269 = vector.broadcast %cst_93 : f32 to vector<10x10xf32>
    %270 = arith.mulf %268, %269 : vector<10x10xf32>
    %271 = arith.addf %270, %17 : vector<10x10xf32>
    %cst_94 = arith.constant dense<0xFF800000> : vector<10xf32>
    %272 = vector.multi_reduction <maximumf>, %271, %cst_94 [1] : vector<10x10xf32> to vector<10xf32>
    %273 = vector.shape_cast %272 : vector<10xf32> to vector<10x1xf32>
    %274 = vector.broadcast %273 : vector<10x1xf32> to vector<10x10xf32>
    %275 = arith.subf %271, %274 : vector<10x10xf32>
    %276 = math.exp %275 : vector<10x10xf32>
    %cst_95 = arith.constant dense<0.000000e+00> : vector<10xf32>
    %277 = vector.multi_reduction <add>, %276, %cst_95 [1] : vector<10x10xf32> to vector<10xf32>
    %278 = vector.shape_cast %277 : vector<10xf32> to vector<10x1xf32>
    %279 = vector.broadcast %278 : vector<10x1xf32> to vector<10x10xf32>
    %280 = arith.divf %276, %279 : vector<10x10xf32>
    %281 = vector.extract_strided_slice %248 {offsets = [0, 8], sizes = [10, 8], strides = [1, 1]} : vector<10x32xf32> to vector<10x8xf32>
    %cst_96 = arith.constant dense<0.000000e+00> : vector<10x8xf32>
    %282 = tpu.matmul %280, %281, %cst_96 {dimension_numbers = #tpu.dot_dimension_numbers<[1], [0], [0], [1], [0, 0, 1, 1], [], []>} : vector<10x10xf32>, vector<10x8xf32>, vector<10x8xf32> -> vector<10x8xf32>
    %283 = vector.extract_strided_slice %246 {offsets = [0, 16], sizes = [10, 8], strides = [1, 1]} : vector<10x32xf32> to vector<10x8xf32>
    %284 = vector.extract_strided_slice %247 {offsets = [0, 16], sizes = [10, 8], strides = [1, 1]} : vector<10x32xf32> to vector<10x8xf32>
    %cst_97 = arith.constant dense<0.000000e+00> : vector<10x10xf32>
    %285 = tpu.matmul %283, %284, %cst_97 {dimension_numbers = #tpu.dot_dimension_numbers<[1], [1], [0], [0], [0, 0, 1, 0], [], []>} : vector<10x8xf32>, vector<10x8xf32>, vector<10x10xf32> -> vector<10x10xf32>
    %cst_98 = arith.constant 0.353553385 : f32
    %286 = vector.broadcast %cst_98 : f32 to vector<10x10xf32>
    %287 = arith.mulf %285, %286 : vector<10x10xf32>
    %288 = arith.addf %287, %17 : vector<10x10xf32>
    %cst_99 = arith.constant dense<0xFF800000> : vector<10xf32>
    %289 = vector.multi_reduction <maximumf>, %288, %cst_99 [1] : vector<10x10xf32> to vector<10xf32>
    %290 = vector.shape_cast %289 : vector<10xf32> to vector<10x1xf32>
    %291 = vector.broadcast %290 : vector<10x1xf32> to vector<10x10xf32>
    %292 = arith.subf %288, %291 : vector<10x10xf32>
    %293 = math.exp %292 : vector<10x10xf32>
    %cst_100 = arith.constant dense<0.000000e+00> : vector<10xf32>
    %294 = vector.multi_reduction <add>, %293, %cst_100 [1] : vector<10x10xf32> to vector<10xf32>
    %295 = vector.shape_cast %294 : vector<10xf32> to vector<10x1xf32>
    %296 = vector.broadcast %295 : vector<10x1xf32> to vector<10x10xf32>
    %297 = arith.divf %293, %296 : vector<10x10xf32>
    %298 = vector.extract_strided_slice %248 {offsets = [0, 16], sizes = [10, 8], strides = [1, 1]} : vector<10x32xf32> to vector<10x8xf32>
    %cst_101 = arith.constant dense<0.000000e+00> : vector<10x8xf32>
    %299 = tpu.matmul %297, %298, %cst_101 {dimension_numbers = #tpu.dot_dimension_numbers<[1], [0], [0], [1], [0, 0, 1, 1], [], []>} : vector<10x10xf32>, vector<10x8xf32>, vector<10x8xf32> -> vector<10x8xf32>
    %300 = vector.extract_strided_slice %246 {offsets = [0, 24], sizes = [10, 8], strides = [1, 1]} : vector<10x32xf32> to vector<10x8xf32>
    %301 = vector.extract_strided_slice %247 {offsets = [0, 24], sizes = [10, 8], strides = [1, 1]} : vector<10x32xf32> to vector<10x8xf32>
    %cst_102 = arith.constant dense<0.000000e+00> : vector<10x10xf32>
    %302 = tpu.matmul %300, %301, %cst_102 {dimension_numbers = #tpu.dot_dimension_numbers<[1], [1], [0], [0], [0, 0, 1, 0], [], []>} : vector<10x8xf32>, vector<10x8xf32>, vector<10x10xf32> -> vector<10x10xf32>
    %cst_103 = arith.constant 0.353553385 : f32
    %303 = vector.broadcast %cst_103 : f32 to vector<10x10xf32>
    %304 = arith.mulf %302, %303 : vector<10x10xf32>
    %305 = arith.addf %304, %17 : vector<10x10xf32>
    %cst_104 = arith.constant dense<0xFF800000> : vector<10xf32>
    %306 = vector.multi_reduction <maximumf>, %305, %cst_104 [1] : vector<10x10xf32> to vector<10xf32>
    %307 = vector.shape_cast %306 : vector<10xf32> to vector<10x1xf32>
    %308 = vector.broadcast %307 : vector<10x1xf32> to vector<10x10xf32>
    %309 = arith.subf %305, %308 : vector<10x10xf32>
    %310 = math.exp %309 : vector<10x10xf32>
    %cst_105 = arith.constant dense<0.000000e+00> : vector<10xf32>
    %311 = vector.multi_reduction <add>, %310, %cst_105 [1] : vector<10x10xf32> to vector<10xf32>
    %312 = vector.shape_cast %311 : vector<10xf32> to vector<10x1xf32>
    %313 = vector.broadcast %312 : vector<10x1xf32> to vector<10x10xf32>
    %314 = arith.divf %310, %313 : vector<10x10xf32>
    %315 = vector.extract_strided_slice %248 {offsets = [0, 24], sizes = [10, 8], strides = [1, 1]} : vector<10x32xf32> to vector<10x8xf32>
    %cst_106 = arith.constant dense<0.000000e+00> : vector<10x8xf32>
    %316 = tpu.matmul %314, %315, %cst_106 {dimension_numbers = #tpu.dot_dimension_numbers<[1], [0], [0], [1], [0, 0, 1, 1], [], []>} : vector<10x10xf32>, vector<10x8xf32>, vector<10x8xf32> -> vector<10x8xf32>
    %317 = tpu.concatenate %265, %282, %299, %316 in 1 : vector<10x8xf32>, vector<10x8xf32>, vector<10x8xf32>, vector<10x8xf32> -> vector<10x32xf32>
    %c544 = arith.constant 544 : index
    %c0_107 = arith.constant 0 : index
    %318 = vector.load %arg3[%c544, %c0_107] : memref<1312x32xf32, #tpu.memory_space<vmem>>, vector<32x32xf32>
    %cst_108 = arith.constant dense<0.000000e+00> : vector<10x32xf32>
    %319 = tpu.matmul %317, %318, %cst_108 {dimension_numbers = #tpu.dot_dimension_numbers<[1], [0], [0], [1], [0, 0, 1, 1], [], []>} : vector<10x32xf32>, vector<32x32xf32>, vector<10x32xf32> -> vector<10x32xf32>
    %c31 = arith.constant 31 : index
    %c0_109 = arith.constant 0 : index
    %320 = vector.load %arg6[%c31, %c0_109] : memref<96x128xf32, #tpu.memory_space<vmem>>, vector<1x32xf32>
    %321 = vector.broadcast %320 : vector<1x32xf32> to vector<10x32xf32>
    %322 = arith.addf %319, %321 : vector<10x32xf32>
    %323 = arith.addf %240, %322 : vector<10x32xf32>
    %c32_110 = arith.constant 32 : index
    %c0_111 = arith.constant 0 : index
    %324 = vector.load %arg6[%c32_110, %c0_111] : memref<96x128xf32, #tpu.memory_space<vmem>>, vector<1x32xf32>
    %c33 = arith.constant 33 : index
    %c0_112 = arith.constant 0 : index
    %325 = vector.load %arg6[%c33, %c0_112] : memref<96x128xf32, #tpu.memory_space<vmem>>, vector<1x32xf32>
    %cst_113 = arith.constant dense<0.000000e+00> : vector<10xf32>
    %326 = vector.multi_reduction <add>, %323, %cst_113 [1] : vector<10x32xf32> to vector<10xf32>
    %327 = vector.shape_cast %326 : vector<10xf32> to vector<10x1xf32>
    %cst_114 = arith.constant 3.200000e+01 : f32
    %328 = vector.broadcast %cst_114 : f32 to vector<10x1xf32>
    %329 = arith.divf %327, %328 : vector<10x1xf32>
    %330 = vector.broadcast %329 : vector<10x1xf32> to vector<10x32xf32>
    %331 = arith.subf %323, %330 : vector<10x32xf32>
    %332 = arith.mulf %331, %331 : vector<10x32xf32>
    %cst_115 = arith.constant dense<0.000000e+00> : vector<10xf32>
    %333 = vector.multi_reduction <add>, %332, %cst_115 [1] : vector<10x32xf32> to vector<10xf32>
    %334 = vector.shape_cast %333 : vector<10xf32> to vector<10x1xf32>
    %cst_116 = arith.constant 3.200000e+01 : f32
    %335 = vector.broadcast %cst_116 : f32 to vector<10x1xf32>
    %336 = arith.divf %334, %335 : vector<10x1xf32>
    %cst_117 = arith.constant 9.99999974E-6 : f32
    %337 = vector.broadcast %cst_117 : f32 to vector<10x1xf32>
    %338 = arith.addf %336, %337 : vector<10x1xf32>
    %339 = math.rsqrt %338 : vector<10x1xf32>
    %340 = vector.broadcast %339 : vector<10x1xf32> to vector<10x32xf32>
    %341 = arith.mulf %331, %340 : vector<10x32xf32>
    %342 = vector.broadcast %324 : vector<1x32xf32> to vector<10x32xf32>
    %343 = arith.mulf %341, %342 : vector<10x32xf32>
    %344 = vector.broadcast %325 : vector<1x32xf32> to vector<10x32xf32>
    %345 = arith.addf %343, %344 : vector<10x32xf32>
    %c32_118 = arith.constant 32 : index
    %c0_119 = arith.constant 0 : index
    %346 = vector.load %arg5[%c32_118, %c0_119] : memref<256x64xf32, #tpu.memory_space<vmem>>, vector<32x64xf32>
    %cst_120 = arith.constant dense<0.000000e+00> : vector<10x64xf32>
    %347 = tpu.matmul %345, %346, %cst_120 {dimension_numbers = #tpu.dot_dimension_numbers<[1], [0], [0], [1], [0, 0, 1, 1], [], []>} : vector<10x32xf32>, vector<32x64xf32>, vector<10x64xf32> -> vector<10x64xf32>
    %c34 = arith.constant 34 : index
    %c0_121 = arith.constant 0 : index
    %348 = vector.load %arg6[%c34, %c0_121] : memref<96x128xf32, #tpu.memory_space<vmem>>, vector<1x64xf32>
    %349 = vector.broadcast %348 : vector<1x64xf32> to vector<10x64xf32>
    %350 = arith.addf %347, %349 : vector<10x64xf32>
    %cst_122 = arith.constant 0.000000e+00 : f32
    %351 = vector.broadcast %cst_122 : f32 to vector<10x64xf32>
    %352 = arith.maximumf %350, %351 : vector<10x64xf32>
    %c576 = arith.constant 576 : index
    %c0_123 = arith.constant 0 : index
    %353 = vector.load %arg3[%c576, %c0_123] : memref<1312x32xf32, #tpu.memory_space<vmem>>, vector<64x32xf32>
    %cst_124 = arith.constant dense<0.000000e+00> : vector<10x32xf32>
    %354 = tpu.matmul %352, %353, %cst_124 {dimension_numbers = #tpu.dot_dimension_numbers<[1], [0], [0], [1], [0, 0, 1, 1], [], []>} : vector<10x64xf32>, vector<64x32xf32>, vector<10x32xf32> -> vector<10x32xf32>
    %c35 = arith.constant 35 : index
    %c0_125 = arith.constant 0 : index
    %355 = vector.load %arg6[%c35, %c0_125] : memref<96x128xf32, #tpu.memory_space<vmem>>, vector<1x32xf32>
    %356 = vector.broadcast %355 : vector<1x32xf32> to vector<10x32xf32>
    %357 = arith.addf %354, %356 : vector<10x32xf32>
    %358 = arith.addf %345, %357 : vector<10x32xf32>
    %c36 = arith.constant 36 : index
    %c0_126 = arith.constant 0 : index
    %359 = vector.load %arg6[%c36, %c0_126] : memref<96x128xf32, #tpu.memory_space<vmem>>, vector<1x32xf32>
    %c37 = arith.constant 37 : index
    %c0_127 = arith.constant 0 : index
    %360 = vector.load %arg6[%c37, %c0_127] : memref<96x128xf32, #tpu.memory_space<vmem>>, vector<1x32xf32>
    %cst_128 = arith.constant dense<0.000000e+00> : vector<10xf32>
    %361 = vector.multi_reduction <add>, %358, %cst_128 [1] : vector<10x32xf32> to vector<10xf32>
    %362 = vector.shape_cast %361 : vector<10xf32> to vector<10x1xf32>
    %cst_129 = arith.constant 3.200000e+01 : f32
    %363 = vector.broadcast %cst_129 : f32 to vector<10x1xf32>
    %364 = arith.divf %362, %363 : vector<10x1xf32>
    %365 = vector.broadcast %364 : vector<10x1xf32> to vector<10x32xf32>
    %366 = arith.subf %358, %365 : vector<10x32xf32>
    %367 = arith.mulf %366, %366 : vector<10x32xf32>
    %cst_130 = arith.constant dense<0.000000e+00> : vector<10xf32>
    %368 = vector.multi_reduction <add>, %367, %cst_130 [1] : vector<10x32xf32> to vector<10xf32>
    %369 = vector.shape_cast %368 : vector<10xf32> to vector<10x1xf32>
    %cst_131 = arith.constant 3.200000e+01 : f32
    %370 = vector.broadcast %cst_131 : f32 to vector<10x1xf32>
    %371 = arith.divf %369, %370 : vector<10x1xf32>
    %cst_132 = arith.constant 9.99999974E-6 : f32
    %372 = vector.broadcast %cst_132 : f32 to vector<10x1xf32>
    %373 = arith.addf %371, %372 : vector<10x1xf32>
    %374 = math.rsqrt %373 : vector<10x1xf32>
    %375 = vector.broadcast %374 : vector<10x1xf32> to vector<10x32xf32>
    %376 = arith.mulf %366, %375 : vector<10x32xf32>
    %377 = vector.broadcast %359 : vector<1x32xf32> to vector<10x32xf32>
    %378 = arith.mulf %376, %377 : vector<10x32xf32>
    %379 = vector.broadcast %360 : vector<1x32xf32> to vector<10x32xf32>
    %380 = arith.addf %378, %379 : vector<10x32xf32>
    %c0_133 = arith.constant 0 : index
    %c0_134 = arith.constant 0 : index
    %381 = vector.load %arg2[%c0_133, %c0_134] : memref<8x128xf32, #tpu.memory_space<vmem>>, vector<8x128xf32>
    %cst_135 = arith.constant dense<0.000000e+00> : vector<8xf32>
    %382 = vector.multi_reduction <add>, %381, %cst_135 [1] : vector<8x128xf32> to vector<8xf32>
    %383 = vector.shape_cast %382 : vector<8xf32> to vector<8x1xf32>
    %cst_136 = arith.constant 1.280000e+02 : f32
    %384 = vector.broadcast %cst_136 : f32 to vector<8x1xf32>
    %385 = arith.divf %383, %384 : vector<8x1xf32>
    %386 = vector.broadcast %385 : vector<8x1xf32> to vector<8x128xf32>
    %387 = arith.subf %381, %386 : vector<8x128xf32>
    %388 = arith.mulf %387, %387 : vector<8x128xf32>
    %cst_137 = arith.constant dense<0.000000e+00> : vector<8xf32>
    %389 = vector.multi_reduction <add>, %388, %cst_137 [1] : vector<8x128xf32> to vector<8xf32>
    %390 = vector.shape_cast %389 : vector<8xf32> to vector<8x1xf32>
    %cst_138 = arith.constant 1.280000e+02 : f32
    %391 = vector.broadcast %cst_138 : f32 to vector<8x1xf32>
    %392 = arith.divf %390, %391 : vector<8x1xf32>
    %cst_139 = arith.constant 9.99999974E-6 : f32
    %393 = vector.broadcast %cst_139 : f32 to vector<8x1xf32>
    %394 = arith.addf %392, %393 : vector<8x1xf32>
    %395 = math.rsqrt %394 : vector<8x1xf32>
    %396 = vector.broadcast %395 : vector<8x1xf32> to vector<8x128xf32>
    %397 = arith.mulf %387, %396 : vector<8x128xf32>
    %c256 = arith.constant 256 : index
    %c0_140 = arith.constant 0 : index
    %398 = vector.load %arg3[%c256, %c0_140] : memref<1312x32xf32, #tpu.memory_space<vmem>>, vector<128x32xf32>
    %cst_141 = arith.constant dense<0.000000e+00> : vector<8x32xf32>
    %399 = tpu.matmul %397, %398, %cst_141 {dimension_numbers = #tpu.dot_dimension_numbers<[1], [0], [0], [1], [0, 0, 1, 1], [], []>} : vector<8x128xf32>, vector<128x32xf32>, vector<8x32xf32> -> vector<8x32xf32>
    %c11 = arith.constant 11 : index
    %c0_142 = arith.constant 0 : index
    %400 = vector.load %arg6[%c11, %c0_142] : memref<96x128xf32, #tpu.memory_space<vmem>>, vector<1x32xf32>
    %401 = vector.broadcast %400 : vector<1x32xf32> to vector<8x32xf32>
    %402 = arith.addf %399, %401 : vector<8x32xf32>
    %c12 = arith.constant 12 : index
    %c0_143 = arith.constant 0 : index
    %403 = vector.load %arg6[%c12, %c0_143] : memref<96x128xf32, #tpu.memory_space<vmem>>, vector<1x32xf32>
    %c13 = arith.constant 13 : index
    %c0_144 = arith.constant 0 : index
    %404 = vector.load %arg6[%c13, %c0_144] : memref<96x128xf32, #tpu.memory_space<vmem>>, vector<1x32xf32>
    %cst_145 = arith.constant dense<0.000000e+00> : vector<8xf32>
    %405 = vector.multi_reduction <add>, %402, %cst_145 [1] : vector<8x32xf32> to vector<8xf32>
    %406 = vector.shape_cast %405 : vector<8xf32> to vector<8x1xf32>
    %cst_146 = arith.constant 3.200000e+01 : f32
    %407 = vector.broadcast %cst_146 : f32 to vector<8x1xf32>
    %408 = arith.divf %406, %407 : vector<8x1xf32>
    %409 = vector.broadcast %408 : vector<8x1xf32> to vector<8x32xf32>
    %410 = arith.subf %402, %409 : vector<8x32xf32>
    %411 = arith.mulf %410, %410 : vector<8x32xf32>
    %cst_147 = arith.constant dense<0.000000e+00> : vector<8xf32>
    %412 = vector.multi_reduction <add>, %411, %cst_147 [1] : vector<8x32xf32> to vector<8xf32>
    %413 = vector.shape_cast %412 : vector<8xf32> to vector<8x1xf32>
    %cst_148 = arith.constant 3.200000e+01 : f32
    %414 = vector.broadcast %cst_148 : f32 to vector<8x1xf32>
    %415 = arith.divf %413, %414 : vector<8x1xf32>
    %cst_149 = arith.constant 9.99999974E-6 : f32
    %416 = vector.broadcast %cst_149 : f32 to vector<8x1xf32>
    %417 = arith.addf %415, %416 : vector<8x1xf32>
    %418 = math.rsqrt %417 : vector<8x1xf32>
    %419 = vector.broadcast %418 : vector<8x1xf32> to vector<8x32xf32>
    %420 = arith.mulf %410, %419 : vector<8x32xf32>
    %421 = vector.broadcast %403 : vector<1x32xf32> to vector<8x32xf32>
    %422 = arith.mulf %420, %421 : vector<8x32xf32>
    %423 = vector.broadcast %404 : vector<1x32xf32> to vector<8x32xf32>
    %424 = arith.addf %422, %423 : vector<8x32xf32>
    %cst_150 = arith.constant 0.000000e+00 : f32
    %425 = vector.broadcast %cst_150 : f32 to vector<8x32xf32>
    %426 = arith.maximumf %424, %425 : vector<8x32xf32>
    %c416 = arith.constant 416 : index
    %c0_151 = arith.constant 0 : index
    %427 = vector.load %arg3[%c416, %c0_151] : memref<1312x32xf32, #tpu.memory_space<vmem>>, vector<32x32xf32>
    %cst_152 = arith.constant dense<0.000000e+00> : vector<8x32xf32>
    %428 = tpu.matmul %426, %427, %cst_152 {dimension_numbers = #tpu.dot_dimension_numbers<[1], [0], [0], [1], [0, 0, 1, 1], [], []>} : vector<8x32xf32>, vector<32x32xf32>, vector<8x32xf32> -> vector<8x32xf32>
    %c14 = arith.constant 14 : index
    %c0_153 = arith.constant 0 : index
    %429 = vector.load %arg6[%c14, %c0_153] : memref<96x128xf32, #tpu.memory_space<vmem>>, vector<1x32xf32>
    %430 = vector.broadcast %429 : vector<1x32xf32> to vector<8x32xf32>
    %431 = arith.addf %428, %430 : vector<8x32xf32>
    %c15 = arith.constant 15 : index
    %c0_154 = arith.constant 0 : index
    %432 = vector.load %arg6[%c15, %c0_154] : memref<96x128xf32, #tpu.memory_space<vmem>>, vector<1x32xf32>
    %c16 = arith.constant 16 : index
    %c0_155 = arith.constant 0 : index
    %433 = vector.load %arg6[%c16, %c0_155] : memref<96x128xf32, #tpu.memory_space<vmem>>, vector<1x32xf32>
    %cst_156 = arith.constant dense<0.000000e+00> : vector<8xf32>
    %434 = vector.multi_reduction <add>, %431, %cst_156 [1] : vector<8x32xf32> to vector<8xf32>
    %435 = vector.shape_cast %434 : vector<8xf32> to vector<8x1xf32>
    %cst_157 = arith.constant 3.200000e+01 : f32
    %436 = vector.broadcast %cst_157 : f32 to vector<8x1xf32>
    %437 = arith.divf %435, %436 : vector<8x1xf32>
    %438 = vector.broadcast %437 : vector<8x1xf32> to vector<8x32xf32>
    %439 = arith.subf %431, %438 : vector<8x32xf32>
    %440 = arith.mulf %439, %439 : vector<8x32xf32>
    %cst_158 = arith.constant dense<0.000000e+00> : vector<8xf32>
    %441 = vector.multi_reduction <add>, %440, %cst_158 [1] : vector<8x32xf32> to vector<8xf32>
    %442 = vector.shape_cast %441 : vector<8xf32> to vector<8x1xf32>
    %cst_159 = arith.constant 3.200000e+01 : f32
    %443 = vector.broadcast %cst_159 : f32 to vector<8x1xf32>
    %444 = arith.divf %442, %443 : vector<8x1xf32>
    %cst_160 = arith.constant 9.99999974E-6 : f32
    %445 = vector.broadcast %cst_160 : f32 to vector<8x1xf32>
    %446 = arith.addf %444, %445 : vector<8x1xf32>
    %447 = math.rsqrt %446 : vector<8x1xf32>
    %448 = vector.broadcast %447 : vector<8x1xf32> to vector<8x32xf32>
    %449 = arith.mulf %439, %448 : vector<8x32xf32>
    %450 = vector.broadcast %432 : vector<1x32xf32> to vector<8x32xf32>
    %451 = arith.mulf %449, %450 : vector<8x32xf32>
    %452 = vector.broadcast %433 : vector<1x32xf32> to vector<8x32xf32>
    %453 = arith.addf %451, %452 : vector<8x32xf32>
    %c17 = arith.constant 17 : index
    %c0_161 = arith.constant 0 : index
    %454 = vector.load %arg6[%c17, %c0_161] : memref<96x128xf32, #tpu.memory_space<vmem>>, vector<5x32xf32>
    %455 = vector.extract_strided_slice %454 {offsets = [0, 0], sizes = [1, 32], strides = [1, 1]} : vector<5x32xf32> to vector<1x32xf32>
    %456 = vector.extract_strided_slice %453 {offsets = [0, 0], sizes = [4, 32], strides = [1, 1]} : vector<8x32xf32> to vector<4x32xf32>
    %457 = vector.extract_strided_slice %454 {offsets = [1, 0], sizes = [4, 32], strides = [1, 1]} : vector<5x32xf32> to vector<4x32xf32>
    %458 = arith.addf %456, %457 : vector<4x32xf32>
    %459 = vector.extract_strided_slice %454 {offsets = [0, 0], sizes = [1, 32], strides = [1, 1]} : vector<5x32xf32> to vector<1x32xf32>
    %460 = vector.extract_strided_slice %453 {offsets = [4, 0], sizes = [4, 32], strides = [1, 1]} : vector<8x32xf32> to vector<4x32xf32>
    %461 = vector.extract_strided_slice %454 {offsets = [1, 0], sizes = [4, 32], strides = [1, 1]} : vector<5x32xf32> to vector<4x32xf32>
    %462 = arith.addf %460, %461 : vector<4x32xf32>
    %463 = tpu.concatenate %455, %458, %459, %462 in 0 : vector<1x32xf32>, vector<4x32xf32>, vector<1x32xf32>, vector<4x32xf32> -> vector<10x32xf32>
    %c64 = arith.constant 64 : index
    %c0_162 = arith.constant 0 : index
    %464 = vector.load %arg4[%c64, %c0_162] : memref<256x96xf32, #tpu.memory_space<vmem>>, vector<32x96xf32>
    %cst_163 = arith.constant dense<0.000000e+00> : vector<10x96xf32>
    %465 = tpu.matmul %463, %464, %cst_163 {dimension_numbers = #tpu.dot_dimension_numbers<[1], [0], [0], [1], [0, 0, 1, 1], [], []>} : vector<10x32xf32>, vector<32x96xf32>, vector<10x96xf32> -> vector<10x96xf32>
    %c38 = arith.constant 38 : index
    %c0_164 = arith.constant 0 : index
    %466 = vector.load %arg6[%c38, %c0_164] : memref<96x128xf32, #tpu.memory_space<vmem>>, vector<1x96xf32>
    %467 = vector.broadcast %466 : vector<1x96xf32> to vector<10x96xf32>
    %468 = arith.addf %465, %467 : vector<10x96xf32>
    %469 = vector.extract_strided_slice %468 {offsets = [0, 0], sizes = [10, 32], strides = [1, 1]} : vector<10x96xf32> to vector<10x32xf32>
    %470 = vector.extract_strided_slice %468 {offsets = [0, 32], sizes = [10, 32], strides = [1, 1]} : vector<10x96xf32> to vector<10x32xf32>
    %471 = vector.extract_strided_slice %468 {offsets = [0, 64], sizes = [10, 32], strides = [1, 1]} : vector<10x96xf32> to vector<10x32xf32>
    %472 = vector.extract_strided_slice %469 {offsets = [0, 0], sizes = [10, 8], strides = [1, 1]} : vector<10x32xf32> to vector<10x8xf32>
    %473 = vector.extract_strided_slice %470 {offsets = [0, 0], sizes = [10, 8], strides = [1, 1]} : vector<10x32xf32> to vector<10x8xf32>
    %cst_165 = arith.constant dense<0.000000e+00> : vector<10x10xf32>
    %474 = tpu.matmul %472, %473, %cst_165 {dimension_numbers = #tpu.dot_dimension_numbers<[1], [1], [0], [0], [0, 0, 1, 0], [], []>} : vector<10x8xf32>, vector<10x8xf32>, vector<10x10xf32> -> vector<10x10xf32>
    %cst_166 = arith.constant 0.353553385 : f32
    %475 = vector.broadcast %cst_166 : f32 to vector<10x10xf32>
    %476 = arith.mulf %474, %475 : vector<10x10xf32>
    %477 = arith.addf %476, %17 : vector<10x10xf32>
    %cst_167 = arith.constant dense<0xFF800000> : vector<10xf32>
    %478 = vector.multi_reduction <maximumf>, %477, %cst_167 [1] : vector<10x10xf32> to vector<10xf32>
    %479 = vector.shape_cast %478 : vector<10xf32> to vector<10x1xf32>
    %480 = vector.broadcast %479 : vector<10x1xf32> to vector<10x10xf32>
    %481 = arith.subf %477, %480 : vector<10x10xf32>
    %482 = math.exp %481 : vector<10x10xf32>
    %cst_168 = arith.constant dense<0.000000e+00> : vector<10xf32>
    %483 = vector.multi_reduction <add>, %482, %cst_168 [1] : vector<10x10xf32> to vector<10xf32>
    %484 = vector.shape_cast %483 : vector<10xf32> to vector<10x1xf32>
    %485 = vector.broadcast %484 : vector<10x1xf32> to vector<10x10xf32>
    %486 = arith.divf %482, %485 : vector<10x10xf32>
    %487 = vector.extract_strided_slice %471 {offsets = [0, 0], sizes = [10, 8], strides = [1, 1]} : vector<10x32xf32> to vector<10x8xf32>
    %cst_169 = arith.constant dense<0.000000e+00> : vector<10x8xf32>
    %488 = tpu.matmul %486, %487, %cst_169 {dimension_numbers = #tpu.dot_dimension_numbers<[1], [0], [0], [1], [0, 0, 1, 1], [], []>} : vector<10x10xf32>, vector<10x8xf32>, vector<10x8xf32> -> vector<10x8xf32>
    %489 = vector.extract_strided_slice %469 {offsets = [0, 8], sizes = [10, 8], strides = [1, 1]} : vector<10x32xf32> to vector<10x8xf32>
    %490 = vector.extract_strided_slice %470 {offsets = [0, 8], sizes = [10, 8], strides = [1, 1]} : vector<10x32xf32> to vector<10x8xf32>
    %cst_170 = arith.constant dense<0.000000e+00> : vector<10x10xf32>
    %491 = tpu.matmul %489, %490, %cst_170 {dimension_numbers = #tpu.dot_dimension_numbers<[1], [1], [0], [0], [0, 0, 1, 0], [], []>} : vector<10x8xf32>, vector<10x8xf32>, vector<10x10xf32> -> vector<10x10xf32>
    %cst_171 = arith.constant 0.353553385 : f32
    %492 = vector.broadcast %cst_171 : f32 to vector<10x10xf32>
    %493 = arith.mulf %491, %492 : vector<10x10xf32>
    %494 = arith.addf %493, %17 : vector<10x10xf32>
    %cst_172 = arith.constant dense<0xFF800000> : vector<10xf32>
    %495 = vector.multi_reduction <maximumf>, %494, %cst_172 [1] : vector<10x10xf32> to vector<10xf32>
    %496 = vector.shape_cast %495 : vector<10xf32> to vector<10x1xf32>
    %497 = vector.broadcast %496 : vector<10x1xf32> to vector<10x10xf32>
    %498 = arith.subf %494, %497 : vector<10x10xf32>
    %499 = math.exp %498 : vector<10x10xf32>
    %cst_173 = arith.constant dense<0.000000e+00> : vector<10xf32>
    %500 = vector.multi_reduction <add>, %499, %cst_173 [1] : vector<10x10xf32> to vector<10xf32>
    %501 = vector.shape_cast %500 : vector<10xf32> to vector<10x1xf32>
    %502 = vector.broadcast %501 : vector<10x1xf32> to vector<10x10xf32>
    %503 = arith.divf %499, %502 : vector<10x10xf32>
    %504 = vector.extract_strided_slice %471 {offsets = [0, 8], sizes = [10, 8], strides = [1, 1]} : vector<10x32xf32> to vector<10x8xf32>
    %cst_174 = arith.constant dense<0.000000e+00> : vector<10x8xf32>
    %505 = tpu.matmul %503, %504, %cst_174 {dimension_numbers = #tpu.dot_dimension_numbers<[1], [0], [0], [1], [0, 0, 1, 1], [], []>} : vector<10x10xf32>, vector<10x8xf32>, vector<10x8xf32> -> vector<10x8xf32>
    %506 = vector.extract_strided_slice %469 {offsets = [0, 16], sizes = [10, 8], strides = [1, 1]} : vector<10x32xf32> to vector<10x8xf32>
    %507 = vector.extract_strided_slice %470 {offsets = [0, 16], sizes = [10, 8], strides = [1, 1]} : vector<10x32xf32> to vector<10x8xf32>
    %cst_175 = arith.constant dense<0.000000e+00> : vector<10x10xf32>
    %508 = tpu.matmul %506, %507, %cst_175 {dimension_numbers = #tpu.dot_dimension_numbers<[1], [1], [0], [0], [0, 0, 1, 0], [], []>} : vector<10x8xf32>, vector<10x8xf32>, vector<10x10xf32> -> vector<10x10xf32>
    %cst_176 = arith.constant 0.353553385 : f32
    %509 = vector.broadcast %cst_176 : f32 to vector<10x10xf32>
    %510 = arith.mulf %508, %509 : vector<10x10xf32>
    %511 = arith.addf %510, %17 : vector<10x10xf32>
    %cst_177 = arith.constant dense<0xFF800000> : vector<10xf32>
    %512 = vector.multi_reduction <maximumf>, %511, %cst_177 [1] : vector<10x10xf32> to vector<10xf32>
    %513 = vector.shape_cast %512 : vector<10xf32> to vector<10x1xf32>
    %514 = vector.broadcast %513 : vector<10x1xf32> to vector<10x10xf32>
    %515 = arith.subf %511, %514 : vector<10x10xf32>
    %516 = math.exp %515 : vector<10x10xf32>
    %cst_178 = arith.constant dense<0.000000e+00> : vector<10xf32>
    %517 = vector.multi_reduction <add>, %516, %cst_178 [1] : vector<10x10xf32> to vector<10xf32>
    %518 = vector.shape_cast %517 : vector<10xf32> to vector<10x1xf32>
    %519 = vector.broadcast %518 : vector<10x1xf32> to vector<10x10xf32>
    %520 = arith.divf %516, %519 : vector<10x10xf32>
    %521 = vector.extract_strided_slice %471 {offsets = [0, 16], sizes = [10, 8], strides = [1, 1]} : vector<10x32xf32> to vector<10x8xf32>
    %cst_179 = arith.constant dense<0.000000e+00> : vector<10x8xf32>
    %522 = tpu.matmul %520, %521, %cst_179 {dimension_numbers = #tpu.dot_dimension_numbers<[1], [0], [0], [1], [0, 0, 1, 1], [], []>} : vector<10x10xf32>, vector<10x8xf32>, vector<10x8xf32> -> vector<10x8xf32>
    %523 = vector.extract_strided_slice %469 {offsets = [0, 24], sizes = [10, 8], strides = [1, 1]} : vector<10x32xf32> to vector<10x8xf32>
    %524 = vector.extract_strided_slice %470 {offsets = [0, 24], sizes = [10, 8], strides = [1, 1]} : vector<10x32xf32> to vector<10x8xf32>
    %cst_180 = arith.constant dense<0.000000e+00> : vector<10x10xf32>
    %525 = tpu.matmul %523, %524, %cst_180 {dimension_numbers = #tpu.dot_dimension_numbers<[1], [1], [0], [0], [0, 0, 1, 0], [], []>} : vector<10x8xf32>, vector<10x8xf32>, vector<10x10xf32> -> vector<10x10xf32>
    %cst_181 = arith.constant 0.353553385 : f32
    %526 = vector.broadcast %cst_181 : f32 to vector<10x10xf32>
    %527 = arith.mulf %525, %526 : vector<10x10xf32>
    %528 = arith.addf %527, %17 : vector<10x10xf32>
    %cst_182 = arith.constant dense<0xFF800000> : vector<10xf32>
    %529 = vector.multi_reduction <maximumf>, %528, %cst_182 [1] : vector<10x10xf32> to vector<10xf32>
    %530 = vector.shape_cast %529 : vector<10xf32> to vector<10x1xf32>
    %531 = vector.broadcast %530 : vector<10x1xf32> to vector<10x10xf32>
    %532 = arith.subf %528, %531 : vector<10x10xf32>
    %533 = math.exp %532 : vector<10x10xf32>
    %cst_183 = arith.constant dense<0.000000e+00> : vector<10xf32>
    %534 = vector.multi_reduction <add>, %533, %cst_183 [1] : vector<10x10xf32> to vector<10xf32>
    %535 = vector.shape_cast %534 : vector<10xf32> to vector<10x1xf32>
    %536 = vector.broadcast %535 : vector<10x1xf32> to vector<10x10xf32>
    %537 = arith.divf %533, %536 : vector<10x10xf32>
    %538 = vector.extract_strided_slice %471 {offsets = [0, 24], sizes = [10, 8], strides = [1, 1]} : vector<10x32xf32> to vector<10x8xf32>
    %cst_184 = arith.constant dense<0.000000e+00> : vector<10x8xf32>
    %539 = tpu.matmul %537, %538, %cst_184 {dimension_numbers = #tpu.dot_dimension_numbers<[1], [0], [0], [1], [0, 0, 1, 1], [], []>} : vector<10x10xf32>, vector<10x8xf32>, vector<10x8xf32> -> vector<10x8xf32>
    %540 = tpu.concatenate %488, %505, %522, %539 in 1 : vector<10x8xf32>, vector<10x8xf32>, vector<10x8xf32>, vector<10x8xf32> -> vector<10x32xf32>
    %c640 = arith.constant 640 : index
    %c0_185 = arith.constant 0 : index
    %541 = vector.load %arg3[%c640, %c0_185] : memref<1312x32xf32, #tpu.memory_space<vmem>>, vector<32x32xf32>
    %cst_186 = arith.constant dense<0.000000e+00> : vector<10x32xf32>
    %542 = tpu.matmul %540, %541, %cst_186 {dimension_numbers = #tpu.dot_dimension_numbers<[1], [0], [0], [1], [0, 0, 1, 1], [], []>} : vector<10x32xf32>, vector<32x32xf32>, vector<10x32xf32> -> vector<10x32xf32>
    %c39 = arith.constant 39 : index
    %c0_187 = arith.constant 0 : index
    %543 = vector.load %arg6[%c39, %c0_187] : memref<96x128xf32, #tpu.memory_space<vmem>>, vector<1x32xf32>
    %544 = vector.broadcast %543 : vector<1x32xf32> to vector<10x32xf32>
    %545 = arith.addf %542, %544 : vector<10x32xf32>
    %546 = arith.addf %463, %545 : vector<10x32xf32>
    %c40 = arith.constant 40 : index
    %c0_188 = arith.constant 0 : index
    %547 = vector.load %arg6[%c40, %c0_188] : memref<96x128xf32, #tpu.memory_space<vmem>>, vector<1x32xf32>
    %c41 = arith.constant 41 : index
    %c0_189 = arith.constant 0 : index
    %548 = vector.load %arg6[%c41, %c0_189] : memref<96x128xf32, #tpu.memory_space<vmem>>, vector<1x32xf32>
    %cst_190 = arith.constant dense<0.000000e+00> : vector<10xf32>
    %549 = vector.multi_reduction <add>, %546, %cst_190 [1] : vector<10x32xf32> to vector<10xf32>
    %550 = vector.shape_cast %549 : vector<10xf32> to vector<10x1xf32>
    %cst_191 = arith.constant 3.200000e+01 : f32
    %551 = vector.broadcast %cst_191 : f32 to vector<10x1xf32>
    %552 = arith.divf %550, %551 : vector<10x1xf32>
    %553 = vector.broadcast %552 : vector<10x1xf32> to vector<10x32xf32>
    %554 = arith.subf %546, %553 : vector<10x32xf32>
    %555 = arith.mulf %554, %554 : vector<10x32xf32>
    %cst_192 = arith.constant dense<0.000000e+00> : vector<10xf32>
    %556 = vector.multi_reduction <add>, %555, %cst_192 [1] : vector<10x32xf32> to vector<10xf32>
    %557 = vector.shape_cast %556 : vector<10xf32> to vector<10x1xf32>
    %cst_193 = arith.constant 3.200000e+01 : f32
    %558 = vector.broadcast %cst_193 : f32 to vector<10x1xf32>
    %559 = arith.divf %557, %558 : vector<10x1xf32>
    %cst_194 = arith.constant 9.99999974E-6 : f32
    %560 = vector.broadcast %cst_194 : f32 to vector<10x1xf32>
    %561 = arith.addf %559, %560 : vector<10x1xf32>
    %562 = math.rsqrt %561 : vector<10x1xf32>
    %563 = vector.broadcast %562 : vector<10x1xf32> to vector<10x32xf32>
    %564 = arith.mulf %554, %563 : vector<10x32xf32>
    %565 = vector.broadcast %547 : vector<1x32xf32> to vector<10x32xf32>
    %566 = arith.mulf %564, %565 : vector<10x32xf32>
    %567 = vector.broadcast %548 : vector<1x32xf32> to vector<10x32xf32>
    %568 = arith.addf %566, %567 : vector<10x32xf32>
    %c64_195 = arith.constant 64 : index
    %c0_196 = arith.constant 0 : index
    %569 = vector.load %arg5[%c64_195, %c0_196] : memref<256x64xf32, #tpu.memory_space<vmem>>, vector<32x64xf32>
    %cst_197 = arith.constant dense<0.000000e+00> : vector<10x64xf32>
    %570 = tpu.matmul %568, %569, %cst_197 {dimension_numbers = #tpu.dot_dimension_numbers<[1], [0], [0], [1], [0, 0, 1, 1], [], []>} : vector<10x32xf32>, vector<32x64xf32>, vector<10x64xf32> -> vector<10x64xf32>
    %c42 = arith.constant 42 : index
    %c0_198 = arith.constant 0 : index
    %571 = vector.load %arg6[%c42, %c0_198] : memref<96x128xf32, #tpu.memory_space<vmem>>, vector<1x64xf32>
    %572 = vector.broadcast %571 : vector<1x64xf32> to vector<10x64xf32>
    %573 = arith.addf %570, %572 : vector<10x64xf32>
    %cst_199 = arith.constant 0.000000e+00 : f32
    %574 = vector.broadcast %cst_199 : f32 to vector<10x64xf32>
    %575 = arith.maximumf %573, %574 : vector<10x64xf32>
    %c672 = arith.constant 672 : index
    %c0_200 = arith.constant 0 : index
    %576 = vector.load %arg3[%c672, %c0_200] : memref<1312x32xf32, #tpu.memory_space<vmem>>, vector<64x32xf32>
    %cst_201 = arith.constant dense<0.000000e+00> : vector<10x32xf32>
    %577 = tpu.matmul %575, %576, %cst_201 {dimension_numbers = #tpu.dot_dimension_numbers<[1], [0], [0], [1], [0, 0, 1, 1], [], []>} : vector<10x64xf32>, vector<64x32xf32>, vector<10x32xf32> -> vector<10x32xf32>
    %c43 = arith.constant 43 : index
    %c0_202 = arith.constant 0 : index
    %578 = vector.load %arg6[%c43, %c0_202] : memref<96x128xf32, #tpu.memory_space<vmem>>, vector<1x32xf32>
    %579 = vector.broadcast %578 : vector<1x32xf32> to vector<10x32xf32>
    %580 = arith.addf %577, %579 : vector<10x32xf32>
    %581 = arith.addf %568, %580 : vector<10x32xf32>
    %c44 = arith.constant 44 : index
    %c0_203 = arith.constant 0 : index
    %582 = vector.load %arg6[%c44, %c0_203] : memref<96x128xf32, #tpu.memory_space<vmem>>, vector<1x32xf32>
    %c45 = arith.constant 45 : index
    %c0_204 = arith.constant 0 : index
    %583 = vector.load %arg6[%c45, %c0_204] : memref<96x128xf32, #tpu.memory_space<vmem>>, vector<1x32xf32>
    %cst_205 = arith.constant dense<0.000000e+00> : vector<10xf32>
    %584 = vector.multi_reduction <add>, %581, %cst_205 [1] : vector<10x32xf32> to vector<10xf32>
    %585 = vector.shape_cast %584 : vector<10xf32> to vector<10x1xf32>
    %cst_206 = arith.constant 3.200000e+01 : f32
    %586 = vector.broadcast %cst_206 : f32 to vector<10x1xf32>
    %587 = arith.divf %585, %586 : vector<10x1xf32>
    %588 = vector.broadcast %587 : vector<10x1xf32> to vector<10x32xf32>
    %589 = arith.subf %581, %588 : vector<10x32xf32>
    %590 = arith.mulf %589, %589 : vector<10x32xf32>
    %cst_207 = arith.constant dense<0.000000e+00> : vector<10xf32>
    %591 = vector.multi_reduction <add>, %590, %cst_207 [1] : vector<10x32xf32> to vector<10xf32>
    %592 = vector.shape_cast %591 : vector<10xf32> to vector<10x1xf32>
    %cst_208 = arith.constant 3.200000e+01 : f32
    %593 = vector.broadcast %cst_208 : f32 to vector<10x1xf32>
    %594 = arith.divf %592, %593 : vector<10x1xf32>
    %cst_209 = arith.constant 9.99999974E-6 : f32
    %595 = vector.broadcast %cst_209 : f32 to vector<10x1xf32>
    %596 = arith.addf %594, %595 : vector<10x1xf32>
    %597 = math.rsqrt %596 : vector<10x1xf32>
    %598 = vector.broadcast %597 : vector<10x1xf32> to vector<10x32xf32>
    %599 = arith.mulf %589, %598 : vector<10x32xf32>
    %600 = vector.broadcast %582 : vector<1x32xf32> to vector<10x32xf32>
    %601 = arith.mulf %599, %600 : vector<10x32xf32>
    %602 = vector.broadcast %583 : vector<1x32xf32> to vector<10x32xf32>
    %603 = arith.addf %601, %602 : vector<10x32xf32>
    %c96 = arith.constant 96 : index
    %c0_210 = arith.constant 0 : index
    %604 = vector.load %arg4[%c96, %c0_210] : memref<256x96xf32, #tpu.memory_space<vmem>>, vector<32x96xf32>
    %cst_211 = arith.constant dense<0.000000e+00> : vector<10x96xf32>
    %605 = tpu.matmul %603, %604, %cst_211 {dimension_numbers = #tpu.dot_dimension_numbers<[1], [0], [0], [1], [0, 0, 1, 1], [], []>} : vector<10x32xf32>, vector<32x96xf32>, vector<10x96xf32> -> vector<10x96xf32>
    %c46 = arith.constant 46 : index
    %c0_212 = arith.constant 0 : index
    %606 = vector.load %arg6[%c46, %c0_212] : memref<96x128xf32, #tpu.memory_space<vmem>>, vector<1x96xf32>
    %607 = vector.broadcast %606 : vector<1x96xf32> to vector<10x96xf32>
    %608 = arith.addf %605, %607 : vector<10x96xf32>
    %609 = vector.extract_strided_slice %608 {offsets = [0, 0], sizes = [10, 32], strides = [1, 1]} : vector<10x96xf32> to vector<10x32xf32>
    %610 = vector.extract_strided_slice %608 {offsets = [0, 32], sizes = [10, 32], strides = [1, 1]} : vector<10x96xf32> to vector<10x32xf32>
    %611 = vector.extract_strided_slice %608 {offsets = [0, 64], sizes = [10, 32], strides = [1, 1]} : vector<10x96xf32> to vector<10x32xf32>
    %612 = vector.extract_strided_slice %609 {offsets = [0, 0], sizes = [10, 8], strides = [1, 1]} : vector<10x32xf32> to vector<10x8xf32>
    %613 = vector.extract_strided_slice %610 {offsets = [0, 0], sizes = [10, 8], strides = [1, 1]} : vector<10x32xf32> to vector<10x8xf32>
    %cst_213 = arith.constant dense<0.000000e+00> : vector<10x10xf32>
    %614 = tpu.matmul %612, %613, %cst_213 {dimension_numbers = #tpu.dot_dimension_numbers<[1], [1], [0], [0], [0, 0, 1, 0], [], []>} : vector<10x8xf32>, vector<10x8xf32>, vector<10x10xf32> -> vector<10x10xf32>
    %cst_214 = arith.constant 0.353553385 : f32
    %615 = vector.broadcast %cst_214 : f32 to vector<10x10xf32>
    %616 = arith.mulf %614, %615 : vector<10x10xf32>
    %617 = arith.addf %616, %17 : vector<10x10xf32>
    %cst_215 = arith.constant dense<0xFF800000> : vector<10xf32>
    %618 = vector.multi_reduction <maximumf>, %617, %cst_215 [1] : vector<10x10xf32> to vector<10xf32>
    %619 = vector.shape_cast %618 : vector<10xf32> to vector<10x1xf32>
    %620 = vector.broadcast %619 : vector<10x1xf32> to vector<10x10xf32>
    %621 = arith.subf %617, %620 : vector<10x10xf32>
    %622 = math.exp %621 : vector<10x10xf32>
    %cst_216 = arith.constant dense<0.000000e+00> : vector<10xf32>
    %623 = vector.multi_reduction <add>, %622, %cst_216 [1] : vector<10x10xf32> to vector<10xf32>
    %624 = vector.shape_cast %623 : vector<10xf32> to vector<10x1xf32>
    %625 = vector.broadcast %624 : vector<10x1xf32> to vector<10x10xf32>
    %626 = arith.divf %622, %625 : vector<10x10xf32>
    %627 = vector.extract_strided_slice %611 {offsets = [0, 0], sizes = [10, 8], strides = [1, 1]} : vector<10x32xf32> to vector<10x8xf32>
    %cst_217 = arith.constant dense<0.000000e+00> : vector<10x8xf32>
    %628 = tpu.matmul %626, %627, %cst_217 {dimension_numbers = #tpu.dot_dimension_numbers<[1], [0], [0], [1], [0, 0, 1, 1], [], []>} : vector<10x10xf32>, vector<10x8xf32>, vector<10x8xf32> -> vector<10x8xf32>
    %629 = vector.extract_strided_slice %609 {offsets = [0, 8], sizes = [10, 8], strides = [1, 1]} : vector<10x32xf32> to vector<10x8xf32>
    %630 = vector.extract_strided_slice %610 {offsets = [0, 8], sizes = [10, 8], strides = [1, 1]} : vector<10x32xf32> to vector<10x8xf32>
    %cst_218 = arith.constant dense<0.000000e+00> : vector<10x10xf32>
    %631 = tpu.matmul %629, %630, %cst_218 {dimension_numbers = #tpu.dot_dimension_numbers<[1], [1], [0], [0], [0, 0, 1, 0], [], []>} : vector<10x8xf32>, vector<10x8xf32>, vector<10x10xf32> -> vector<10x10xf32>
    %cst_219 = arith.constant 0.353553385 : f32
    %632 = vector.broadcast %cst_219 : f32 to vector<10x10xf32>
    %633 = arith.mulf %631, %632 : vector<10x10xf32>
    %634 = arith.addf %633, %17 : vector<10x10xf32>
    %cst_220 = arith.constant dense<0xFF800000> : vector<10xf32>
    %635 = vector.multi_reduction <maximumf>, %634, %cst_220 [1] : vector<10x10xf32> to vector<10xf32>
    %636 = vector.shape_cast %635 : vector<10xf32> to vector<10x1xf32>
    %637 = vector.broadcast %636 : vector<10x1xf32> to vector<10x10xf32>
    %638 = arith.subf %634, %637 : vector<10x10xf32>
    %639 = math.exp %638 : vector<10x10xf32>
    %cst_221 = arith.constant dense<0.000000e+00> : vector<10xf32>
    %640 = vector.multi_reduction <add>, %639, %cst_221 [1] : vector<10x10xf32> to vector<10xf32>
    %641 = vector.shape_cast %640 : vector<10xf32> to vector<10x1xf32>
    %642 = vector.broadcast %641 : vector<10x1xf32> to vector<10x10xf32>
    %643 = arith.divf %639, %642 : vector<10x10xf32>
    %644 = vector.extract_strided_slice %611 {offsets = [0, 8], sizes = [10, 8], strides = [1, 1]} : vector<10x32xf32> to vector<10x8xf32>
    %cst_222 = arith.constant dense<0.000000e+00> : vector<10x8xf32>
    %645 = tpu.matmul %643, %644, %cst_222 {dimension_numbers = #tpu.dot_dimension_numbers<[1], [0], [0], [1], [0, 0, 1, 1], [], []>} : vector<10x10xf32>, vector<10x8xf32>, vector<10x8xf32> -> vector<10x8xf32>
    %646 = vector.extract_strided_slice %609 {offsets = [0, 16], sizes = [10, 8], strides = [1, 1]} : vector<10x32xf32> to vector<10x8xf32>
    %647 = vector.extract_strided_slice %610 {offsets = [0, 16], sizes = [10, 8], strides = [1, 1]} : vector<10x32xf32> to vector<10x8xf32>
    %cst_223 = arith.constant dense<0.000000e+00> : vector<10x10xf32>
    %648 = tpu.matmul %646, %647, %cst_223 {dimension_numbers = #tpu.dot_dimension_numbers<[1], [1], [0], [0], [0, 0, 1, 0], [], []>} : vector<10x8xf32>, vector<10x8xf32>, vector<10x10xf32> -> vector<10x10xf32>
    %cst_224 = arith.constant 0.353553385 : f32
    %649 = vector.broadcast %cst_224 : f32 to vector<10x10xf32>
    %650 = arith.mulf %648, %649 : vector<10x10xf32>
    %651 = arith.addf %650, %17 : vector<10x10xf32>
    %cst_225 = arith.constant dense<0xFF800000> : vector<10xf32>
    %652 = vector.multi_reduction <maximumf>, %651, %cst_225 [1] : vector<10x10xf32> to vector<10xf32>
    %653 = vector.shape_cast %652 : vector<10xf32> to vector<10x1xf32>
    %654 = vector.broadcast %653 : vector<10x1xf32> to vector<10x10xf32>
    %655 = arith.subf %651, %654 : vector<10x10xf32>
    %656 = math.exp %655 : vector<10x10xf32>
    %cst_226 = arith.constant dense<0.000000e+00> : vector<10xf32>
    %657 = vector.multi_reduction <add>, %656, %cst_226 [1] : vector<10x10xf32> to vector<10xf32>
    %658 = vector.shape_cast %657 : vector<10xf32> to vector<10x1xf32>
    %659 = vector.broadcast %658 : vector<10x1xf32> to vector<10x10xf32>
    %660 = arith.divf %656, %659 : vector<10x10xf32>
    %661 = vector.extract_strided_slice %611 {offsets = [0, 16], sizes = [10, 8], strides = [1, 1]} : vector<10x32xf32> to vector<10x8xf32>
    %cst_227 = arith.constant dense<0.000000e+00> : vector<10x8xf32>
    %662 = tpu.matmul %660, %661, %cst_227 {dimension_numbers = #tpu.dot_dimension_numbers<[1], [0], [0], [1], [0, 0, 1, 1], [], []>} : vector<10x10xf32>, vector<10x8xf32>, vector<10x8xf32> -> vector<10x8xf32>
    %663 = vector.extract_strided_slice %609 {offsets = [0, 24], sizes = [10, 8], strides = [1, 1]} : vector<10x32xf32> to vector<10x8xf32>
    %664 = vector.extract_strided_slice %610 {offsets = [0, 24], sizes = [10, 8], strides = [1, 1]} : vector<10x32xf32> to vector<10x8xf32>
    %cst_228 = arith.constant dense<0.000000e+00> : vector<10x10xf32>
    %665 = tpu.matmul %663, %664, %cst_228 {dimension_numbers = #tpu.dot_dimension_numbers<[1], [1], [0], [0], [0, 0, 1, 0], [], []>} : vector<10x8xf32>, vector<10x8xf32>, vector<10x10xf32> -> vector<10x10xf32>
    %cst_229 = arith.constant 0.353553385 : f32
    %666 = vector.broadcast %cst_229 : f32 to vector<10x10xf32>
    %667 = arith.mulf %665, %666 : vector<10x10xf32>
    %668 = arith.addf %667, %17 : vector<10x10xf32>
    %cst_230 = arith.constant dense<0xFF800000> : vector<10xf32>
    %669 = vector.multi_reduction <maximumf>, %668, %cst_230 [1] : vector<10x10xf32> to vector<10xf32>
    %670 = vector.shape_cast %669 : vector<10xf32> to vector<10x1xf32>
    %671 = vector.broadcast %670 : vector<10x1xf32> to vector<10x10xf32>
    %672 = arith.subf %668, %671 : vector<10x10xf32>
    %673 = math.exp %672 : vector<10x10xf32>
    %cst_231 = arith.constant dense<0.000000e+00> : vector<10xf32>
    %674 = vector.multi_reduction <add>, %673, %cst_231 [1] : vector<10x10xf32> to vector<10xf32>
    %675 = vector.shape_cast %674 : vector<10xf32> to vector<10x1xf32>
    %676 = vector.broadcast %675 : vector<10x1xf32> to vector<10x10xf32>
    %677 = arith.divf %673, %676 : vector<10x10xf32>
    %678 = vector.extract_strided_slice %611 {offsets = [0, 24], sizes = [10, 8], strides = [1, 1]} : vector<10x32xf32> to vector<10x8xf32>
    %cst_232 = arith.constant dense<0.000000e+00> : vector<10x8xf32>
    %679 = tpu.matmul %677, %678, %cst_232 {dimension_numbers = #tpu.dot_dimension_numbers<[1], [0], [0], [1], [0, 0, 1, 1], [], []>} : vector<10x10xf32>, vector<10x8xf32>, vector<10x8xf32> -> vector<10x8xf32>
    %680 = tpu.concatenate %628, %645, %662, %679 in 1 : vector<10x8xf32>, vector<10x8xf32>, vector<10x8xf32>, vector<10x8xf32> -> vector<10x32xf32>
    %c736 = arith.constant 736 : index
    %c0_233 = arith.constant 0 : index
    %681 = vector.load %arg3[%c736, %c0_233] : memref<1312x32xf32, #tpu.memory_space<vmem>>, vector<32x32xf32>
    %cst_234 = arith.constant dense<0.000000e+00> : vector<10x32xf32>
    %682 = tpu.matmul %680, %681, %cst_234 {dimension_numbers = #tpu.dot_dimension_numbers<[1], [0], [0], [1], [0, 0, 1, 1], [], []>} : vector<10x32xf32>, vector<32x32xf32>, vector<10x32xf32> -> vector<10x32xf32>
    %c47 = arith.constant 47 : index
    %c0_235 = arith.constant 0 : index
    %683 = vector.load %arg6[%c47, %c0_235] : memref<96x128xf32, #tpu.memory_space<vmem>>, vector<1x32xf32>
    %684 = vector.broadcast %683 : vector<1x32xf32> to vector<10x32xf32>
    %685 = arith.addf %682, %684 : vector<10x32xf32>
    %686 = arith.addf %603, %685 : vector<10x32xf32>
    %c48 = arith.constant 48 : index
    %c0_236 = arith.constant 0 : index
    %687 = vector.load %arg6[%c48, %c0_236] : memref<96x128xf32, #tpu.memory_space<vmem>>, vector<1x32xf32>
    %c49 = arith.constant 49 : index
    %c0_237 = arith.constant 0 : index
    %688 = vector.load %arg6[%c49, %c0_237] : memref<96x128xf32, #tpu.memory_space<vmem>>, vector<1x32xf32>
    %cst_238 = arith.constant dense<0.000000e+00> : vector<10xf32>
    %689 = vector.multi_reduction <add>, %686, %cst_238 [1] : vector<10x32xf32> to vector<10xf32>
    %690 = vector.shape_cast %689 : vector<10xf32> to vector<10x1xf32>
    %cst_239 = arith.constant 3.200000e+01 : f32
    %691 = vector.broadcast %cst_239 : f32 to vector<10x1xf32>
    %692 = arith.divf %690, %691 : vector<10x1xf32>
    %693 = vector.broadcast %692 : vector<10x1xf32> to vector<10x32xf32>
    %694 = arith.subf %686, %693 : vector<10x32xf32>
    %695 = arith.mulf %694, %694 : vector<10x32xf32>
    %cst_240 = arith.constant dense<0.000000e+00> : vector<10xf32>
    %696 = vector.multi_reduction <add>, %695, %cst_240 [1] : vector<10x32xf32> to vector<10xf32>
    %697 = vector.shape_cast %696 : vector<10xf32> to vector<10x1xf32>
    %cst_241 = arith.constant 3.200000e+01 : f32
    %698 = vector.broadcast %cst_241 : f32 to vector<10x1xf32>
    %699 = arith.divf %697, %698 : vector<10x1xf32>
    %cst_242 = arith.constant 9.99999974E-6 : f32
    %700 = vector.broadcast %cst_242 : f32 to vector<10x1xf32>
    %701 = arith.addf %699, %700 : vector<10x1xf32>
    %702 = math.rsqrt %701 : vector<10x1xf32>
    %703 = vector.broadcast %702 : vector<10x1xf32> to vector<10x32xf32>
    %704 = arith.mulf %694, %703 : vector<10x32xf32>
    %705 = vector.broadcast %687 : vector<1x32xf32> to vector<10x32xf32>
    %706 = arith.mulf %704, %705 : vector<10x32xf32>
    %707 = vector.broadcast %688 : vector<1x32xf32> to vector<10x32xf32>
    %708 = arith.addf %706, %707 : vector<10x32xf32>
    %c96_243 = arith.constant 96 : index
    %c0_244 = arith.constant 0 : index
    %709 = vector.load %arg5[%c96_243, %c0_244] : memref<256x64xf32, #tpu.memory_space<vmem>>, vector<32x64xf32>
    %cst_245 = arith.constant dense<0.000000e+00> : vector<10x64xf32>
    %710 = tpu.matmul %708, %709, %cst_245 {dimension_numbers = #tpu.dot_dimension_numbers<[1], [0], [0], [1], [0, 0, 1, 1], [], []>} : vector<10x32xf32>, vector<32x64xf32>, vector<10x64xf32> -> vector<10x64xf32>
    %c50 = arith.constant 50 : index
    %c0_246 = arith.constant 0 : index
    %711 = vector.load %arg6[%c50, %c0_246] : memref<96x128xf32, #tpu.memory_space<vmem>>, vector<1x64xf32>
    %712 = vector.broadcast %711 : vector<1x64xf32> to vector<10x64xf32>
    %713 = arith.addf %710, %712 : vector<10x64xf32>
    %cst_247 = arith.constant 0.000000e+00 : f32
    %714 = vector.broadcast %cst_247 : f32 to vector<10x64xf32>
    %715 = arith.maximumf %713, %714 : vector<10x64xf32>
    %c768 = arith.constant 768 : index
    %c0_248 = arith.constant 0 : index
    %716 = vector.load %arg3[%c768, %c0_248] : memref<1312x32xf32, #tpu.memory_space<vmem>>, vector<64x32xf32>
    %cst_249 = arith.constant dense<0.000000e+00> : vector<10x32xf32>
    %717 = tpu.matmul %715, %716, %cst_249 {dimension_numbers = #tpu.dot_dimension_numbers<[1], [0], [0], [1], [0, 0, 1, 1], [], []>} : vector<10x64xf32>, vector<64x32xf32>, vector<10x32xf32> -> vector<10x32xf32>
    %c51 = arith.constant 51 : index
    %c0_250 = arith.constant 0 : index
    %718 = vector.load %arg6[%c51, %c0_250] : memref<96x128xf32, #tpu.memory_space<vmem>>, vector<1x32xf32>
    %719 = vector.broadcast %718 : vector<1x32xf32> to vector<10x32xf32>
    %720 = arith.addf %717, %719 : vector<10x32xf32>
    %721 = arith.addf %708, %720 : vector<10x32xf32>
    %c52 = arith.constant 52 : index
    %c0_251 = arith.constant 0 : index
    %722 = vector.load %arg6[%c52, %c0_251] : memref<96x128xf32, #tpu.memory_space<vmem>>, vector<1x32xf32>
    %c53 = arith.constant 53 : index
    %c0_252 = arith.constant 0 : index
    %723 = vector.load %arg6[%c53, %c0_252] : memref<96x128xf32, #tpu.memory_space<vmem>>, vector<1x32xf32>
    %cst_253 = arith.constant dense<0.000000e+00> : vector<10xf32>
    %724 = vector.multi_reduction <add>, %721, %cst_253 [1] : vector<10x32xf32> to vector<10xf32>
    %725 = vector.shape_cast %724 : vector<10xf32> to vector<10x1xf32>
    %cst_254 = arith.constant 3.200000e+01 : f32
    %726 = vector.broadcast %cst_254 : f32 to vector<10x1xf32>
    %727 = arith.divf %725, %726 : vector<10x1xf32>
    %728 = vector.broadcast %727 : vector<10x1xf32> to vector<10x32xf32>
    %729 = arith.subf %721, %728 : vector<10x32xf32>
    %730 = arith.mulf %729, %729 : vector<10x32xf32>
    %cst_255 = arith.constant dense<0.000000e+00> : vector<10xf32>
    %731 = vector.multi_reduction <add>, %730, %cst_255 [1] : vector<10x32xf32> to vector<10xf32>
    %732 = vector.shape_cast %731 : vector<10xf32> to vector<10x1xf32>
    %cst_256 = arith.constant 3.200000e+01 : f32
    %733 = vector.broadcast %cst_256 : f32 to vector<10x1xf32>
    %734 = arith.divf %732, %733 : vector<10x1xf32>
    %cst_257 = arith.constant 9.99999974E-6 : f32
    %735 = vector.broadcast %cst_257 : f32 to vector<10x1xf32>
    %736 = arith.addf %734, %735 : vector<10x1xf32>
    %737 = math.rsqrt %736 : vector<10x1xf32>
    %738 = vector.broadcast %737 : vector<10x1xf32> to vector<10x32xf32>
    %739 = arith.mulf %729, %738 : vector<10x32xf32>
    %740 = vector.broadcast %722 : vector<1x32xf32> to vector<10x32xf32>
    %741 = arith.mulf %739, %740 : vector<10x32xf32>
    %742 = vector.broadcast %723 : vector<1x32xf32> to vector<10x32xf32>
    %743 = arith.addf %741, %742 : vector<10x32xf32>
    %c128 = arith.constant 128 : index
    %c0_258 = arith.constant 0 : index
    %744 = vector.load %arg4[%c128, %c0_258] : memref<256x96xf32, #tpu.memory_space<vmem>>, vector<32x96xf32>
    %c54 = arith.constant 54 : index
    %c0_259 = arith.constant 0 : index
    %745 = vector.load %arg6[%c54, %c0_259] : memref<96x128xf32, #tpu.memory_space<vmem>>, vector<1x96xf32>
    %746 = vector.extract_strided_slice %744 {offsets = [0, 0], sizes = [32, 32], strides = [1, 1]} : vector<32x96xf32> to vector<32x32xf32>
    %cst_260 = arith.constant dense<0.000000e+00> : vector<10x32xf32>
    %747 = tpu.matmul %380, %746, %cst_260 {dimension_numbers = #tpu.dot_dimension_numbers<[1], [0], [0], [1], [0, 0, 1, 1], [], []>} : vector<10x32xf32>, vector<32x32xf32>, vector<10x32xf32> -> vector<10x32xf32>
    %748 = vector.extract_strided_slice %745 {offsets = [0, 0], sizes = [1, 32], strides = [1, 1]} : vector<1x96xf32> to vector<1x32xf32>
    %749 = vector.broadcast %748 : vector<1x32xf32> to vector<10x32xf32>
    %750 = arith.addf %747, %749 : vector<10x32xf32>
    %751 = vector.extract_strided_slice %744 {offsets = [0, 32], sizes = [32, 64], strides = [1, 1]} : vector<32x96xf32> to vector<32x64xf32>
    %cst_261 = arith.constant dense<0.000000e+00> : vector<10x64xf32>
    %752 = tpu.matmul %743, %751, %cst_261 {dimension_numbers = #tpu.dot_dimension_numbers<[1], [0], [0], [1], [0, 0, 1, 1], [], []>} : vector<10x32xf32>, vector<32x64xf32>, vector<10x64xf32> -> vector<10x64xf32>
    %753 = vector.extract_strided_slice %745 {offsets = [0, 32], sizes = [1, 64], strides = [1, 1]} : vector<1x96xf32> to vector<1x64xf32>
    %754 = vector.broadcast %753 : vector<1x64xf32> to vector<10x64xf32>
    %755 = arith.addf %752, %754 : vector<10x64xf32>
    %756 = vector.extract_strided_slice %755 {offsets = [0, 0], sizes = [10, 32], strides = [1, 1]} : vector<10x64xf32> to vector<10x32xf32>
    %757 = vector.extract_strided_slice %755 {offsets = [0, 32], sizes = [10, 32], strides = [1, 1]} : vector<10x64xf32> to vector<10x32xf32>
    %758 = vector.extract_strided_slice %750 {offsets = [0, 0], sizes = [10, 8], strides = [1, 1]} : vector<10x32xf32> to vector<10x8xf32>
    %759 = vector.extract_strided_slice %756 {offsets = [0, 0], sizes = [10, 8], strides = [1, 1]} : vector<10x32xf32> to vector<10x8xf32>
    %cst_262 = arith.constant dense<0.000000e+00> : vector<10x10xf32>
    %760 = tpu.matmul %758, %759, %cst_262 {dimension_numbers = #tpu.dot_dimension_numbers<[1], [1], [0], [0], [0, 0, 1, 0], [], []>} : vector<10x8xf32>, vector<10x8xf32>, vector<10x10xf32> -> vector<10x10xf32>
    %cst_263 = arith.constant 0.353553385 : f32
    %761 = vector.broadcast %cst_263 : f32 to vector<10x10xf32>
    %762 = arith.mulf %760, %761 : vector<10x10xf32>
    %763 = arith.addf %762, %17 : vector<10x10xf32>
    %cst_264 = arith.constant dense<0xFF800000> : vector<10xf32>
    %764 = vector.multi_reduction <maximumf>, %763, %cst_264 [1] : vector<10x10xf32> to vector<10xf32>
    %765 = vector.shape_cast %764 : vector<10xf32> to vector<10x1xf32>
    %766 = vector.broadcast %765 : vector<10x1xf32> to vector<10x10xf32>
    %767 = arith.subf %763, %766 : vector<10x10xf32>
    %768 = math.exp %767 : vector<10x10xf32>
    %cst_265 = arith.constant dense<0.000000e+00> : vector<10xf32>
    %769 = vector.multi_reduction <add>, %768, %cst_265 [1] : vector<10x10xf32> to vector<10xf32>
    %770 = vector.shape_cast %769 : vector<10xf32> to vector<10x1xf32>
    %771 = vector.broadcast %770 : vector<10x1xf32> to vector<10x10xf32>
    %772 = arith.divf %768, %771 : vector<10x10xf32>
    %773 = vector.extract_strided_slice %757 {offsets = [0, 0], sizes = [10, 8], strides = [1, 1]} : vector<10x32xf32> to vector<10x8xf32>
    %cst_266 = arith.constant dense<0.000000e+00> : vector<10x8xf32>
    %774 = tpu.matmul %772, %773, %cst_266 {dimension_numbers = #tpu.dot_dimension_numbers<[1], [0], [0], [1], [0, 0, 1, 1], [], []>} : vector<10x10xf32>, vector<10x8xf32>, vector<10x8xf32> -> vector<10x8xf32>
    %775 = vector.extract_strided_slice %750 {offsets = [0, 8], sizes = [10, 8], strides = [1, 1]} : vector<10x32xf32> to vector<10x8xf32>
    %776 = vector.extract_strided_slice %756 {offsets = [0, 8], sizes = [10, 8], strides = [1, 1]} : vector<10x32xf32> to vector<10x8xf32>
    %cst_267 = arith.constant dense<0.000000e+00> : vector<10x10xf32>
    %777 = tpu.matmul %775, %776, %cst_267 {dimension_numbers = #tpu.dot_dimension_numbers<[1], [1], [0], [0], [0, 0, 1, 0], [], []>} : vector<10x8xf32>, vector<10x8xf32>, vector<10x10xf32> -> vector<10x10xf32>
    %cst_268 = arith.constant 0.353553385 : f32
    %778 = vector.broadcast %cst_268 : f32 to vector<10x10xf32>
    %779 = arith.mulf %777, %778 : vector<10x10xf32>
    %780 = arith.addf %779, %17 : vector<10x10xf32>
    %cst_269 = arith.constant dense<0xFF800000> : vector<10xf32>
    %781 = vector.multi_reduction <maximumf>, %780, %cst_269 [1] : vector<10x10xf32> to vector<10xf32>
    %782 = vector.shape_cast %781 : vector<10xf32> to vector<10x1xf32>
    %783 = vector.broadcast %782 : vector<10x1xf32> to vector<10x10xf32>
    %784 = arith.subf %780, %783 : vector<10x10xf32>
    %785 = math.exp %784 : vector<10x10xf32>
    %cst_270 = arith.constant dense<0.000000e+00> : vector<10xf32>
    %786 = vector.multi_reduction <add>, %785, %cst_270 [1] : vector<10x10xf32> to vector<10xf32>
    %787 = vector.shape_cast %786 : vector<10xf32> to vector<10x1xf32>
    %788 = vector.broadcast %787 : vector<10x1xf32> to vector<10x10xf32>
    %789 = arith.divf %785, %788 : vector<10x10xf32>
    %790 = vector.extract_strided_slice %757 {offsets = [0, 8], sizes = [10, 8], strides = [1, 1]} : vector<10x32xf32> to vector<10x8xf32>
    %cst_271 = arith.constant dense<0.000000e+00> : vector<10x8xf32>
    %791 = tpu.matmul %789, %790, %cst_271 {dimension_numbers = #tpu.dot_dimension_numbers<[1], [0], [0], [1], [0, 0, 1, 1], [], []>} : vector<10x10xf32>, vector<10x8xf32>, vector<10x8xf32> -> vector<10x8xf32>
    %792 = vector.extract_strided_slice %750 {offsets = [0, 16], sizes = [10, 8], strides = [1, 1]} : vector<10x32xf32> to vector<10x8xf32>
    %793 = vector.extract_strided_slice %756 {offsets = [0, 16], sizes = [10, 8], strides = [1, 1]} : vector<10x32xf32> to vector<10x8xf32>
    %cst_272 = arith.constant dense<0.000000e+00> : vector<10x10xf32>
    %794 = tpu.matmul %792, %793, %cst_272 {dimension_numbers = #tpu.dot_dimension_numbers<[1], [1], [0], [0], [0, 0, 1, 0], [], []>} : vector<10x8xf32>, vector<10x8xf32>, vector<10x10xf32> -> vector<10x10xf32>
    %cst_273 = arith.constant 0.353553385 : f32
    %795 = vector.broadcast %cst_273 : f32 to vector<10x10xf32>
    %796 = arith.mulf %794, %795 : vector<10x10xf32>
    %797 = arith.addf %796, %17 : vector<10x10xf32>
    %cst_274 = arith.constant dense<0xFF800000> : vector<10xf32>
    %798 = vector.multi_reduction <maximumf>, %797, %cst_274 [1] : vector<10x10xf32> to vector<10xf32>
    %799 = vector.shape_cast %798 : vector<10xf32> to vector<10x1xf32>
    %800 = vector.broadcast %799 : vector<10x1xf32> to vector<10x10xf32>
    %801 = arith.subf %797, %800 : vector<10x10xf32>
    %802 = math.exp %801 : vector<10x10xf32>
    %cst_275 = arith.constant dense<0.000000e+00> : vector<10xf32>
    %803 = vector.multi_reduction <add>, %802, %cst_275 [1] : vector<10x10xf32> to vector<10xf32>
    %804 = vector.shape_cast %803 : vector<10xf32> to vector<10x1xf32>
    %805 = vector.broadcast %804 : vector<10x1xf32> to vector<10x10xf32>
    %806 = arith.divf %802, %805 : vector<10x10xf32>
    %807 = vector.extract_strided_slice %757 {offsets = [0, 16], sizes = [10, 8], strides = [1, 1]} : vector<10x32xf32> to vector<10x8xf32>
    %cst_276 = arith.constant dense<0.000000e+00> : vector<10x8xf32>
    %808 = tpu.matmul %806, %807, %cst_276 {dimension_numbers = #tpu.dot_dimension_numbers<[1], [0], [0], [1], [0, 0, 1, 1], [], []>} : vector<10x10xf32>, vector<10x8xf32>, vector<10x8xf32> -> vector<10x8xf32>
    %809 = vector.extract_strided_slice %750 {offsets = [0, 24], sizes = [10, 8], strides = [1, 1]} : vector<10x32xf32> to vector<10x8xf32>
    %810 = vector.extract_strided_slice %756 {offsets = [0, 24], sizes = [10, 8], strides = [1, 1]} : vector<10x32xf32> to vector<10x8xf32>
    %cst_277 = arith.constant dense<0.000000e+00> : vector<10x10xf32>
    %811 = tpu.matmul %809, %810, %cst_277 {dimension_numbers = #tpu.dot_dimension_numbers<[1], [1], [0], [0], [0, 0, 1, 0], [], []>} : vector<10x8xf32>, vector<10x8xf32>, vector<10x10xf32> -> vector<10x10xf32>
    %cst_278 = arith.constant 0.353553385 : f32
    %812 = vector.broadcast %cst_278 : f32 to vector<10x10xf32>
    %813 = arith.mulf %811, %812 : vector<10x10xf32>
    %814 = arith.addf %813, %17 : vector<10x10xf32>
    %cst_279 = arith.constant dense<0xFF800000> : vector<10xf32>
    %815 = vector.multi_reduction <maximumf>, %814, %cst_279 [1] : vector<10x10xf32> to vector<10xf32>
    %816 = vector.shape_cast %815 : vector<10xf32> to vector<10x1xf32>
    %817 = vector.broadcast %816 : vector<10x1xf32> to vector<10x10xf32>
    %818 = arith.subf %814, %817 : vector<10x10xf32>
    %819 = math.exp %818 : vector<10x10xf32>
    %cst_280 = arith.constant dense<0.000000e+00> : vector<10xf32>
    %820 = vector.multi_reduction <add>, %819, %cst_280 [1] : vector<10x10xf32> to vector<10xf32>
    %821 = vector.shape_cast %820 : vector<10xf32> to vector<10x1xf32>
    %822 = vector.broadcast %821 : vector<10x1xf32> to vector<10x10xf32>
    %823 = arith.divf %819, %822 : vector<10x10xf32>
    %824 = vector.extract_strided_slice %757 {offsets = [0, 24], sizes = [10, 8], strides = [1, 1]} : vector<10x32xf32> to vector<10x8xf32>
    %cst_281 = arith.constant dense<0.000000e+00> : vector<10x8xf32>
    %825 = tpu.matmul %823, %824, %cst_281 {dimension_numbers = #tpu.dot_dimension_numbers<[1], [0], [0], [1], [0, 0, 1, 1], [], []>} : vector<10x10xf32>, vector<10x8xf32>, vector<10x8xf32> -> vector<10x8xf32>
    %826 = tpu.concatenate %774, %791, %808, %825 in 1 : vector<10x8xf32>, vector<10x8xf32>, vector<10x8xf32>, vector<10x8xf32> -> vector<10x32xf32>
    %c832 = arith.constant 832 : index
    %c0_282 = arith.constant 0 : index
    %827 = vector.load %arg3[%c832, %c0_282] : memref<1312x32xf32, #tpu.memory_space<vmem>>, vector<32x32xf32>
    %cst_283 = arith.constant dense<0.000000e+00> : vector<10x32xf32>
    %828 = tpu.matmul %826, %827, %cst_283 {dimension_numbers = #tpu.dot_dimension_numbers<[1], [0], [0], [1], [0, 0, 1, 1], [], []>} : vector<10x32xf32>, vector<32x32xf32>, vector<10x32xf32> -> vector<10x32xf32>
    %c55 = arith.constant 55 : index
    %c0_284 = arith.constant 0 : index
    %829 = vector.load %arg6[%c55, %c0_284] : memref<96x128xf32, #tpu.memory_space<vmem>>, vector<1x32xf32>
    %830 = vector.broadcast %829 : vector<1x32xf32> to vector<10x32xf32>
    %831 = arith.addf %828, %830 : vector<10x32xf32>
    %832 = arith.addf %380, %831 : vector<10x32xf32>
    %c56 = arith.constant 56 : index
    %c0_285 = arith.constant 0 : index
    %833 = vector.load %arg6[%c56, %c0_285] : memref<96x128xf32, #tpu.memory_space<vmem>>, vector<1x32xf32>
    %c57 = arith.constant 57 : index
    %c0_286 = arith.constant 0 : index
    %834 = vector.load %arg6[%c57, %c0_286] : memref<96x128xf32, #tpu.memory_space<vmem>>, vector<1x32xf32>
    %cst_287 = arith.constant dense<0.000000e+00> : vector<10xf32>
    %835 = vector.multi_reduction <add>, %832, %cst_287 [1] : vector<10x32xf32> to vector<10xf32>
    %836 = vector.shape_cast %835 : vector<10xf32> to vector<10x1xf32>
    %cst_288 = arith.constant 3.200000e+01 : f32
    %837 = vector.broadcast %cst_288 : f32 to vector<10x1xf32>
    %838 = arith.divf %836, %837 : vector<10x1xf32>
    %839 = vector.broadcast %838 : vector<10x1xf32> to vector<10x32xf32>
    %840 = arith.subf %832, %839 : vector<10x32xf32>
    %841 = arith.mulf %840, %840 : vector<10x32xf32>
    %cst_289 = arith.constant dense<0.000000e+00> : vector<10xf32>
    %842 = vector.multi_reduction <add>, %841, %cst_289 [1] : vector<10x32xf32> to vector<10xf32>
    %843 = vector.shape_cast %842 : vector<10xf32> to vector<10x1xf32>
    %cst_290 = arith.constant 3.200000e+01 : f32
    %844 = vector.broadcast %cst_290 : f32 to vector<10x1xf32>
    %845 = arith.divf %843, %844 : vector<10x1xf32>
    %cst_291 = arith.constant 9.99999974E-6 : f32
    %846 = vector.broadcast %cst_291 : f32 to vector<10x1xf32>
    %847 = arith.addf %845, %846 : vector<10x1xf32>
    %848 = math.rsqrt %847 : vector<10x1xf32>
    %849 = vector.broadcast %848 : vector<10x1xf32> to vector<10x32xf32>
    %850 = arith.mulf %840, %849 : vector<10x32xf32>
    %851 = vector.broadcast %833 : vector<1x32xf32> to vector<10x32xf32>
    %852 = arith.mulf %850, %851 : vector<10x32xf32>
    %853 = vector.broadcast %834 : vector<1x32xf32> to vector<10x32xf32>
    %854 = arith.addf %852, %853 : vector<10x32xf32>
    %c128_292 = arith.constant 128 : index
    %c0_293 = arith.constant 0 : index
    %855 = vector.load %arg5[%c128_292, %c0_293] : memref<256x64xf32, #tpu.memory_space<vmem>>, vector<32x64xf32>
    %cst_294 = arith.constant dense<0.000000e+00> : vector<10x64xf32>
    %856 = tpu.matmul %854, %855, %cst_294 {dimension_numbers = #tpu.dot_dimension_numbers<[1], [0], [0], [1], [0, 0, 1, 1], [], []>} : vector<10x32xf32>, vector<32x64xf32>, vector<10x64xf32> -> vector<10x64xf32>
    %c58 = arith.constant 58 : index
    %c0_295 = arith.constant 0 : index
    %857 = vector.load %arg6[%c58, %c0_295] : memref<96x128xf32, #tpu.memory_space<vmem>>, vector<1x64xf32>
    %858 = vector.broadcast %857 : vector<1x64xf32> to vector<10x64xf32>
    %859 = arith.addf %856, %858 : vector<10x64xf32>
    %cst_296 = arith.constant 0.000000e+00 : f32
    %860 = vector.broadcast %cst_296 : f32 to vector<10x64xf32>
    %861 = arith.maximumf %859, %860 : vector<10x64xf32>
    %c864 = arith.constant 864 : index
    %c0_297 = arith.constant 0 : index
    %862 = vector.load %arg3[%c864, %c0_297] : memref<1312x32xf32, #tpu.memory_space<vmem>>, vector<64x32xf32>
    %cst_298 = arith.constant dense<0.000000e+00> : vector<10x32xf32>
    %863 = tpu.matmul %861, %862, %cst_298 {dimension_numbers = #tpu.dot_dimension_numbers<[1], [0], [0], [1], [0, 0, 1, 1], [], []>} : vector<10x64xf32>, vector<64x32xf32>, vector<10x32xf32> -> vector<10x32xf32>
    %c59 = arith.constant 59 : index
    %c0_299 = arith.constant 0 : index
    %864 = vector.load %arg6[%c59, %c0_299] : memref<96x128xf32, #tpu.memory_space<vmem>>, vector<1x32xf32>
    %865 = vector.broadcast %864 : vector<1x32xf32> to vector<10x32xf32>
    %866 = arith.addf %863, %865 : vector<10x32xf32>
    %867 = arith.addf %854, %866 : vector<10x32xf32>
    %c60 = arith.constant 60 : index
    %c0_300 = arith.constant 0 : index
    %868 = vector.load %arg6[%c60, %c0_300] : memref<96x128xf32, #tpu.memory_space<vmem>>, vector<1x32xf32>
    %c61 = arith.constant 61 : index
    %c0_301 = arith.constant 0 : index
    %869 = vector.load %arg6[%c61, %c0_301] : memref<96x128xf32, #tpu.memory_space<vmem>>, vector<1x32xf32>
    %cst_302 = arith.constant dense<0.000000e+00> : vector<10xf32>
    %870 = vector.multi_reduction <add>, %867, %cst_302 [1] : vector<10x32xf32> to vector<10xf32>
    %871 = vector.shape_cast %870 : vector<10xf32> to vector<10x1xf32>
    %cst_303 = arith.constant 3.200000e+01 : f32
    %872 = vector.broadcast %cst_303 : f32 to vector<10x1xf32>
    %873 = arith.divf %871, %872 : vector<10x1xf32>
    %874 = vector.broadcast %873 : vector<10x1xf32> to vector<10x32xf32>
    %875 = arith.subf %867, %874 : vector<10x32xf32>
    %876 = arith.mulf %875, %875 : vector<10x32xf32>
    %cst_304 = arith.constant dense<0.000000e+00> : vector<10xf32>
    %877 = vector.multi_reduction <add>, %876, %cst_304 [1] : vector<10x32xf32> to vector<10xf32>
    %878 = vector.shape_cast %877 : vector<10xf32> to vector<10x1xf32>
    %cst_305 = arith.constant 3.200000e+01 : f32
    %879 = vector.broadcast %cst_305 : f32 to vector<10x1xf32>
    %880 = arith.divf %878, %879 : vector<10x1xf32>
    %cst_306 = arith.constant 9.99999974E-6 : f32
    %881 = vector.broadcast %cst_306 : f32 to vector<10x1xf32>
    %882 = arith.addf %880, %881 : vector<10x1xf32>
    %883 = math.rsqrt %882 : vector<10x1xf32>
    %884 = vector.broadcast %883 : vector<10x1xf32> to vector<10x32xf32>
    %885 = arith.mulf %875, %884 : vector<10x32xf32>
    %886 = vector.broadcast %868 : vector<1x32xf32> to vector<10x32xf32>
    %887 = arith.mulf %885, %886 : vector<10x32xf32>
    %888 = vector.broadcast %869 : vector<1x32xf32> to vector<10x32xf32>
    %889 = arith.addf %887, %888 : vector<10x32xf32>
    %c192 = arith.constant 192 : index
    %c0_307 = arith.constant 0 : index
    %890 = vector.load %arg4[%c192, %c0_307] : memref<256x96xf32, #tpu.memory_space<vmem>>, vector<32x96xf32>
    %c70 = arith.constant 70 : index
    %c0_308 = arith.constant 0 : index
    %891 = vector.load %arg6[%c70, %c0_308] : memref<96x128xf32, #tpu.memory_space<vmem>>, vector<1x96xf32>
    %892 = vector.extract_strided_slice %890 {offsets = [0, 0], sizes = [32, 32], strides = [1, 1]} : vector<32x96xf32> to vector<32x32xf32>
    %cst_309 = arith.constant dense<0.000000e+00> : vector<10x32xf32>
    %893 = tpu.matmul %743, %892, %cst_309 {dimension_numbers = #tpu.dot_dimension_numbers<[1], [0], [0], [1], [0, 0, 1, 1], [], []>} : vector<10x32xf32>, vector<32x32xf32>, vector<10x32xf32> -> vector<10x32xf32>
    %894 = vector.extract_strided_slice %891 {offsets = [0, 0], sizes = [1, 32], strides = [1, 1]} : vector<1x96xf32> to vector<1x32xf32>
    %895 = vector.broadcast %894 : vector<1x32xf32> to vector<10x32xf32>
    %896 = arith.addf %893, %895 : vector<10x32xf32>
    %897 = vector.extract_strided_slice %890 {offsets = [0, 32], sizes = [32, 64], strides = [1, 1]} : vector<32x96xf32> to vector<32x64xf32>
    %cst_310 = arith.constant dense<0.000000e+00> : vector<10x64xf32>
    %898 = tpu.matmul %889, %897, %cst_310 {dimension_numbers = #tpu.dot_dimension_numbers<[1], [0], [0], [1], [0, 0, 1, 1], [], []>} : vector<10x32xf32>, vector<32x64xf32>, vector<10x64xf32> -> vector<10x64xf32>
    %899 = vector.extract_strided_slice %891 {offsets = [0, 32], sizes = [1, 64], strides = [1, 1]} : vector<1x96xf32> to vector<1x64xf32>
    %900 = vector.broadcast %899 : vector<1x64xf32> to vector<10x64xf32>
    %901 = arith.addf %898, %900 : vector<10x64xf32>
    %902 = vector.extract_strided_slice %901 {offsets = [0, 0], sizes = [10, 32], strides = [1, 1]} : vector<10x64xf32> to vector<10x32xf32>
    %903 = vector.extract_strided_slice %901 {offsets = [0, 32], sizes = [10, 32], strides = [1, 1]} : vector<10x64xf32> to vector<10x32xf32>
    %904 = vector.extract_strided_slice %896 {offsets = [0, 0], sizes = [10, 8], strides = [1, 1]} : vector<10x32xf32> to vector<10x8xf32>
    %905 = vector.extract_strided_slice %902 {offsets = [0, 0], sizes = [10, 8], strides = [1, 1]} : vector<10x32xf32> to vector<10x8xf32>
    %cst_311 = arith.constant dense<0.000000e+00> : vector<10x10xf32>
    %906 = tpu.matmul %904, %905, %cst_311 {dimension_numbers = #tpu.dot_dimension_numbers<[1], [1], [0], [0], [0, 0, 1, 0], [], []>} : vector<10x8xf32>, vector<10x8xf32>, vector<10x10xf32> -> vector<10x10xf32>
    %cst_312 = arith.constant 0.353553385 : f32
    %907 = vector.broadcast %cst_312 : f32 to vector<10x10xf32>
    %908 = arith.mulf %906, %907 : vector<10x10xf32>
    %909 = arith.addf %908, %17 : vector<10x10xf32>
    %cst_313 = arith.constant dense<0xFF800000> : vector<10xf32>
    %910 = vector.multi_reduction <maximumf>, %909, %cst_313 [1] : vector<10x10xf32> to vector<10xf32>
    %911 = vector.shape_cast %910 : vector<10xf32> to vector<10x1xf32>
    %912 = vector.broadcast %911 : vector<10x1xf32> to vector<10x10xf32>
    %913 = arith.subf %909, %912 : vector<10x10xf32>
    %914 = math.exp %913 : vector<10x10xf32>
    %cst_314 = arith.constant dense<0.000000e+00> : vector<10xf32>
    %915 = vector.multi_reduction <add>, %914, %cst_314 [1] : vector<10x10xf32> to vector<10xf32>
    %916 = vector.shape_cast %915 : vector<10xf32> to vector<10x1xf32>
    %917 = vector.broadcast %916 : vector<10x1xf32> to vector<10x10xf32>
    %918 = arith.divf %914, %917 : vector<10x10xf32>
    %919 = vector.extract_strided_slice %903 {offsets = [0, 0], sizes = [10, 8], strides = [1, 1]} : vector<10x32xf32> to vector<10x8xf32>
    %cst_315 = arith.constant dense<0.000000e+00> : vector<10x8xf32>
    %920 = tpu.matmul %918, %919, %cst_315 {dimension_numbers = #tpu.dot_dimension_numbers<[1], [0], [0], [1], [0, 0, 1, 1], [], []>} : vector<10x10xf32>, vector<10x8xf32>, vector<10x8xf32> -> vector<10x8xf32>
    %921 = vector.extract_strided_slice %896 {offsets = [0, 8], sizes = [10, 8], strides = [1, 1]} : vector<10x32xf32> to vector<10x8xf32>
    %922 = vector.extract_strided_slice %902 {offsets = [0, 8], sizes = [10, 8], strides = [1, 1]} : vector<10x32xf32> to vector<10x8xf32>
    %cst_316 = arith.constant dense<0.000000e+00> : vector<10x10xf32>
    %923 = tpu.matmul %921, %922, %cst_316 {dimension_numbers = #tpu.dot_dimension_numbers<[1], [1], [0], [0], [0, 0, 1, 0], [], []>} : vector<10x8xf32>, vector<10x8xf32>, vector<10x10xf32> -> vector<10x10xf32>
    %cst_317 = arith.constant 0.353553385 : f32
    %924 = vector.broadcast %cst_317 : f32 to vector<10x10xf32>
    %925 = arith.mulf %923, %924 : vector<10x10xf32>
    %926 = arith.addf %925, %17 : vector<10x10xf32>
    %cst_318 = arith.constant dense<0xFF800000> : vector<10xf32>
    %927 = vector.multi_reduction <maximumf>, %926, %cst_318 [1] : vector<10x10xf32> to vector<10xf32>
    %928 = vector.shape_cast %927 : vector<10xf32> to vector<10x1xf32>
    %929 = vector.broadcast %928 : vector<10x1xf32> to vector<10x10xf32>
    %930 = arith.subf %926, %929 : vector<10x10xf32>
    %931 = math.exp %930 : vector<10x10xf32>
    %cst_319 = arith.constant dense<0.000000e+00> : vector<10xf32>
    %932 = vector.multi_reduction <add>, %931, %cst_319 [1] : vector<10x10xf32> to vector<10xf32>
    %933 = vector.shape_cast %932 : vector<10xf32> to vector<10x1xf32>
    %934 = vector.broadcast %933 : vector<10x1xf32> to vector<10x10xf32>
    %935 = arith.divf %931, %934 : vector<10x10xf32>
    %936 = vector.extract_strided_slice %903 {offsets = [0, 8], sizes = [10, 8], strides = [1, 1]} : vector<10x32xf32> to vector<10x8xf32>
    %cst_320 = arith.constant dense<0.000000e+00> : vector<10x8xf32>
    %937 = tpu.matmul %935, %936, %cst_320 {dimension_numbers = #tpu.dot_dimension_numbers<[1], [0], [0], [1], [0, 0, 1, 1], [], []>} : vector<10x10xf32>, vector<10x8xf32>, vector<10x8xf32> -> vector<10x8xf32>
    %938 = vector.extract_strided_slice %896 {offsets = [0, 16], sizes = [10, 8], strides = [1, 1]} : vector<10x32xf32> to vector<10x8xf32>
    %939 = vector.extract_strided_slice %902 {offsets = [0, 16], sizes = [10, 8], strides = [1, 1]} : vector<10x32xf32> to vector<10x8xf32>
    %cst_321 = arith.constant dense<0.000000e+00> : vector<10x10xf32>
    %940 = tpu.matmul %938, %939, %cst_321 {dimension_numbers = #tpu.dot_dimension_numbers<[1], [1], [0], [0], [0, 0, 1, 0], [], []>} : vector<10x8xf32>, vector<10x8xf32>, vector<10x10xf32> -> vector<10x10xf32>
    %cst_322 = arith.constant 0.353553385 : f32
    %941 = vector.broadcast %cst_322 : f32 to vector<10x10xf32>
    %942 = arith.mulf %940, %941 : vector<10x10xf32>
    %943 = arith.addf %942, %17 : vector<10x10xf32>
    %cst_323 = arith.constant dense<0xFF800000> : vector<10xf32>
    %944 = vector.multi_reduction <maximumf>, %943, %cst_323 [1] : vector<10x10xf32> to vector<10xf32>
    %945 = vector.shape_cast %944 : vector<10xf32> to vector<10x1xf32>
    %946 = vector.broadcast %945 : vector<10x1xf32> to vector<10x10xf32>
    %947 = arith.subf %943, %946 : vector<10x10xf32>
    %948 = math.exp %947 : vector<10x10xf32>
    %cst_324 = arith.constant dense<0.000000e+00> : vector<10xf32>
    %949 = vector.multi_reduction <add>, %948, %cst_324 [1] : vector<10x10xf32> to vector<10xf32>
    %950 = vector.shape_cast %949 : vector<10xf32> to vector<10x1xf32>
    %951 = vector.broadcast %950 : vector<10x1xf32> to vector<10x10xf32>
    %952 = arith.divf %948, %951 : vector<10x10xf32>
    %953 = vector.extract_strided_slice %903 {offsets = [0, 16], sizes = [10, 8], strides = [1, 1]} : vector<10x32xf32> to vector<10x8xf32>
    %cst_325 = arith.constant dense<0.000000e+00> : vector<10x8xf32>
    %954 = tpu.matmul %952, %953, %cst_325 {dimension_numbers = #tpu.dot_dimension_numbers<[1], [0], [0], [1], [0, 0, 1, 1], [], []>} : vector<10x10xf32>, vector<10x8xf32>, vector<10x8xf32> -> vector<10x8xf32>
    %955 = vector.extract_strided_slice %896 {offsets = [0, 24], sizes = [10, 8], strides = [1, 1]} : vector<10x32xf32> to vector<10x8xf32>
    %956 = vector.extract_strided_slice %902 {offsets = [0, 24], sizes = [10, 8], strides = [1, 1]} : vector<10x32xf32> to vector<10x8xf32>
    %cst_326 = arith.constant dense<0.000000e+00> : vector<10x10xf32>
    %957 = tpu.matmul %955, %956, %cst_326 {dimension_numbers = #tpu.dot_dimension_numbers<[1], [1], [0], [0], [0, 0, 1, 0], [], []>} : vector<10x8xf32>, vector<10x8xf32>, vector<10x10xf32> -> vector<10x10xf32>
    %cst_327 = arith.constant 0.353553385 : f32
    %958 = vector.broadcast %cst_327 : f32 to vector<10x10xf32>
    %959 = arith.mulf %957, %958 : vector<10x10xf32>
    %960 = arith.addf %959, %17 : vector<10x10xf32>
    %cst_328 = arith.constant dense<0xFF800000> : vector<10xf32>
    %961 = vector.multi_reduction <maximumf>, %960, %cst_328 [1] : vector<10x10xf32> to vector<10xf32>
    %962 = vector.shape_cast %961 : vector<10xf32> to vector<10x1xf32>
    %963 = vector.broadcast %962 : vector<10x1xf32> to vector<10x10xf32>
    %964 = arith.subf %960, %963 : vector<10x10xf32>
    %965 = math.exp %964 : vector<10x10xf32>
    %cst_329 = arith.constant dense<0.000000e+00> : vector<10xf32>
    %966 = vector.multi_reduction <add>, %965, %cst_329 [1] : vector<10x10xf32> to vector<10xf32>
    %967 = vector.shape_cast %966 : vector<10xf32> to vector<10x1xf32>
    %968 = vector.broadcast %967 : vector<10x1xf32> to vector<10x10xf32>
    %969 = arith.divf %965, %968 : vector<10x10xf32>
    %970 = vector.extract_strided_slice %903 {offsets = [0, 24], sizes = [10, 8], strides = [1, 1]} : vector<10x32xf32> to vector<10x8xf32>
    %cst_330 = arith.constant dense<0.000000e+00> : vector<10x8xf32>
    %971 = tpu.matmul %969, %970, %cst_330 {dimension_numbers = #tpu.dot_dimension_numbers<[1], [0], [0], [1], [0, 0, 1, 1], [], []>} : vector<10x10xf32>, vector<10x8xf32>, vector<10x8xf32> -> vector<10x8xf32>
    %972 = tpu.concatenate %920, %937, %954, %971 in 1 : vector<10x8xf32>, vector<10x8xf32>, vector<10x8xf32>, vector<10x8xf32> -> vector<10x32xf32>
    %c1024 = arith.constant 1024 : index
    %c0_331 = arith.constant 0 : index
    %973 = vector.load %arg3[%c1024, %c0_331] : memref<1312x32xf32, #tpu.memory_space<vmem>>, vector<32x32xf32>
    %cst_332 = arith.constant dense<0.000000e+00> : vector<10x32xf32>
    %974 = tpu.matmul %972, %973, %cst_332 {dimension_numbers = #tpu.dot_dimension_numbers<[1], [0], [0], [1], [0, 0, 1, 1], [], []>} : vector<10x32xf32>, vector<32x32xf32>, vector<10x32xf32> -> vector<10x32xf32>
    %c71 = arith.constant 71 : index
    %c0_333 = arith.constant 0 : index
    %975 = vector.load %arg6[%c71, %c0_333] : memref<96x128xf32, #tpu.memory_space<vmem>>, vector<1x32xf32>
    %976 = vector.broadcast %975 : vector<1x32xf32> to vector<10x32xf32>
    %977 = arith.addf %974, %976 : vector<10x32xf32>
    %978 = arith.addf %743, %977 : vector<10x32xf32>
    %c72 = arith.constant 72 : index
    %c0_334 = arith.constant 0 : index
    %979 = vector.load %arg6[%c72, %c0_334] : memref<96x128xf32, #tpu.memory_space<vmem>>, vector<1x32xf32>
    %c73 = arith.constant 73 : index
    %c0_335 = arith.constant 0 : index
    %980 = vector.load %arg6[%c73, %c0_335] : memref<96x128xf32, #tpu.memory_space<vmem>>, vector<1x32xf32>
    %cst_336 = arith.constant dense<0.000000e+00> : vector<10xf32>
    %981 = vector.multi_reduction <add>, %978, %cst_336 [1] : vector<10x32xf32> to vector<10xf32>
    %982 = vector.shape_cast %981 : vector<10xf32> to vector<10x1xf32>
    %cst_337 = arith.constant 3.200000e+01 : f32
    %983 = vector.broadcast %cst_337 : f32 to vector<10x1xf32>
    %984 = arith.divf %982, %983 : vector<10x1xf32>
    %985 = vector.broadcast %984 : vector<10x1xf32> to vector<10x32xf32>
    %986 = arith.subf %978, %985 : vector<10x32xf32>
    %987 = arith.mulf %986, %986 : vector<10x32xf32>
    %cst_338 = arith.constant dense<0.000000e+00> : vector<10xf32>
    %988 = vector.multi_reduction <add>, %987, %cst_338 [1] : vector<10x32xf32> to vector<10xf32>
    %989 = vector.shape_cast %988 : vector<10xf32> to vector<10x1xf32>
    %cst_339 = arith.constant 3.200000e+01 : f32
    %990 = vector.broadcast %cst_339 : f32 to vector<10x1xf32>
    %991 = arith.divf %989, %990 : vector<10x1xf32>
    %cst_340 = arith.constant 9.99999974E-6 : f32
    %992 = vector.broadcast %cst_340 : f32 to vector<10x1xf32>
    %993 = arith.addf %991, %992 : vector<10x1xf32>
    %994 = math.rsqrt %993 : vector<10x1xf32>
    %995 = vector.broadcast %994 : vector<10x1xf32> to vector<10x32xf32>
    %996 = arith.mulf %986, %995 : vector<10x32xf32>
    %997 = vector.broadcast %979 : vector<1x32xf32> to vector<10x32xf32>
    %998 = arith.mulf %996, %997 : vector<10x32xf32>
    %999 = vector.broadcast %980 : vector<1x32xf32> to vector<10x32xf32>
    %1000 = arith.addf %998, %999 : vector<10x32xf32>
    %c192_341 = arith.constant 192 : index
    %c0_342 = arith.constant 0 : index
    %1001 = vector.load %arg5[%c192_341, %c0_342] : memref<256x64xf32, #tpu.memory_space<vmem>>, vector<32x64xf32>
    %cst_343 = arith.constant dense<0.000000e+00> : vector<10x64xf32>
    %1002 = tpu.matmul %1000, %1001, %cst_343 {dimension_numbers = #tpu.dot_dimension_numbers<[1], [0], [0], [1], [0, 0, 1, 1], [], []>} : vector<10x32xf32>, vector<32x64xf32>, vector<10x64xf32> -> vector<10x64xf32>
    %c74 = arith.constant 74 : index
    %c0_344 = arith.constant 0 : index
    %1003 = vector.load %arg6[%c74, %c0_344] : memref<96x128xf32, #tpu.memory_space<vmem>>, vector<1x64xf32>
    %1004 = vector.broadcast %1003 : vector<1x64xf32> to vector<10x64xf32>
    %1005 = arith.addf %1002, %1004 : vector<10x64xf32>
    %cst_345 = arith.constant 0.000000e+00 : f32
    %1006 = vector.broadcast %cst_345 : f32 to vector<10x64xf32>
    %1007 = arith.maximumf %1005, %1006 : vector<10x64xf32>
    %c1056 = arith.constant 1056 : index
    %c0_346 = arith.constant 0 : index
    %1008 = vector.load %arg3[%c1056, %c0_346] : memref<1312x32xf32, #tpu.memory_space<vmem>>, vector<64x32xf32>
    %cst_347 = arith.constant dense<0.000000e+00> : vector<10x32xf32>
    %1009 = tpu.matmul %1007, %1008, %cst_347 {dimension_numbers = #tpu.dot_dimension_numbers<[1], [0], [0], [1], [0, 0, 1, 1], [], []>} : vector<10x64xf32>, vector<64x32xf32>, vector<10x32xf32> -> vector<10x32xf32>
    %c75 = arith.constant 75 : index
    %c0_348 = arith.constant 0 : index
    %1010 = vector.load %arg6[%c75, %c0_348] : memref<96x128xf32, #tpu.memory_space<vmem>>, vector<1x32xf32>
    %1011 = vector.broadcast %1010 : vector<1x32xf32> to vector<10x32xf32>
    %1012 = arith.addf %1009, %1011 : vector<10x32xf32>
    %1013 = arith.addf %1000, %1012 : vector<10x32xf32>
    %c76 = arith.constant 76 : index
    %c0_349 = arith.constant 0 : index
    %1014 = vector.load %arg6[%c76, %c0_349] : memref<96x128xf32, #tpu.memory_space<vmem>>, vector<1x32xf32>
    %c77 = arith.constant 77 : index
    %c0_350 = arith.constant 0 : index
    %1015 = vector.load %arg6[%c77, %c0_350] : memref<96x128xf32, #tpu.memory_space<vmem>>, vector<1x32xf32>
    %cst_351 = arith.constant dense<0.000000e+00> : vector<10xf32>
    %1016 = vector.multi_reduction <add>, %1013, %cst_351 [1] : vector<10x32xf32> to vector<10xf32>
    %1017 = vector.shape_cast %1016 : vector<10xf32> to vector<10x1xf32>
    %cst_352 = arith.constant 3.200000e+01 : f32
    %1018 = vector.broadcast %cst_352 : f32 to vector<10x1xf32>
    %1019 = arith.divf %1017, %1018 : vector<10x1xf32>
    %1020 = vector.broadcast %1019 : vector<10x1xf32> to vector<10x32xf32>
    %1021 = arith.subf %1013, %1020 : vector<10x32xf32>
    %1022 = arith.mulf %1021, %1021 : vector<10x32xf32>
    %cst_353 = arith.constant dense<0.000000e+00> : vector<10xf32>
    %1023 = vector.multi_reduction <add>, %1022, %cst_353 [1] : vector<10x32xf32> to vector<10xf32>
    %1024 = vector.shape_cast %1023 : vector<10xf32> to vector<10x1xf32>
    %cst_354 = arith.constant 3.200000e+01 : f32
    %1025 = vector.broadcast %cst_354 : f32 to vector<10x1xf32>
    %1026 = arith.divf %1024, %1025 : vector<10x1xf32>
    %cst_355 = arith.constant 9.99999974E-6 : f32
    %1027 = vector.broadcast %cst_355 : f32 to vector<10x1xf32>
    %1028 = arith.addf %1026, %1027 : vector<10x1xf32>
    %1029 = math.rsqrt %1028 : vector<10x1xf32>
    %1030 = vector.broadcast %1029 : vector<10x1xf32> to vector<10x32xf32>
    %1031 = arith.mulf %1021, %1030 : vector<10x32xf32>
    %1032 = vector.broadcast %1014 : vector<1x32xf32> to vector<10x32xf32>
    %1033 = arith.mulf %1031, %1032 : vector<10x32xf32>
    %1034 = vector.broadcast %1015 : vector<1x32xf32> to vector<10x32xf32>
    %1035 = arith.addf %1033, %1034 : vector<10x32xf32>
    %c160 = arith.constant 160 : index
    %c0_356 = arith.constant 0 : index
    %1036 = vector.load %arg4[%c160, %c0_356] : memref<256x96xf32, #tpu.memory_space<vmem>>, vector<32x96xf32>
    %c62 = arith.constant 62 : index
    %c0_357 = arith.constant 0 : index
    %1037 = vector.load %arg6[%c62, %c0_357] : memref<96x128xf32, #tpu.memory_space<vmem>>, vector<1x96xf32>
    %1038 = vector.extract_strided_slice %1036 {offsets = [0, 0], sizes = [32, 32], strides = [1, 1]} : vector<32x96xf32> to vector<32x32xf32>
    %cst_358 = arith.constant dense<0.000000e+00> : vector<10x32xf32>
    %1039 = tpu.matmul %889, %1038, %cst_358 {dimension_numbers = #tpu.dot_dimension_numbers<[1], [0], [0], [1], [0, 0, 1, 1], [], []>} : vector<10x32xf32>, vector<32x32xf32>, vector<10x32xf32> -> vector<10x32xf32>
    %1040 = vector.extract_strided_slice %1037 {offsets = [0, 0], sizes = [1, 32], strides = [1, 1]} : vector<1x96xf32> to vector<1x32xf32>
    %1041 = vector.broadcast %1040 : vector<1x32xf32> to vector<10x32xf32>
    %1042 = arith.addf %1039, %1041 : vector<10x32xf32>
    %1043 = vector.extract_strided_slice %1036 {offsets = [0, 32], sizes = [32, 64], strides = [1, 1]} : vector<32x96xf32> to vector<32x64xf32>
    %cst_359 = arith.constant dense<0.000000e+00> : vector<10x64xf32>
    %1044 = tpu.matmul %1035, %1043, %cst_359 {dimension_numbers = #tpu.dot_dimension_numbers<[1], [0], [0], [1], [0, 0, 1, 1], [], []>} : vector<10x32xf32>, vector<32x64xf32>, vector<10x64xf32> -> vector<10x64xf32>
    %1045 = vector.extract_strided_slice %1037 {offsets = [0, 32], sizes = [1, 64], strides = [1, 1]} : vector<1x96xf32> to vector<1x64xf32>
    %1046 = vector.broadcast %1045 : vector<1x64xf32> to vector<10x64xf32>
    %1047 = arith.addf %1044, %1046 : vector<10x64xf32>
    %1048 = vector.extract_strided_slice %1047 {offsets = [0, 0], sizes = [10, 32], strides = [1, 1]} : vector<10x64xf32> to vector<10x32xf32>
    %1049 = vector.extract_strided_slice %1047 {offsets = [0, 32], sizes = [10, 32], strides = [1, 1]} : vector<10x64xf32> to vector<10x32xf32>
    %1050 = vector.extract_strided_slice %1042 {offsets = [0, 0], sizes = [10, 8], strides = [1, 1]} : vector<10x32xf32> to vector<10x8xf32>
    %1051 = vector.extract_strided_slice %1048 {offsets = [0, 0], sizes = [10, 8], strides = [1, 1]} : vector<10x32xf32> to vector<10x8xf32>
    %cst_360 = arith.constant dense<0.000000e+00> : vector<10x10xf32>
    %1052 = tpu.matmul %1050, %1051, %cst_360 {dimension_numbers = #tpu.dot_dimension_numbers<[1], [1], [0], [0], [0, 0, 1, 0], [], []>} : vector<10x8xf32>, vector<10x8xf32>, vector<10x10xf32> -> vector<10x10xf32>
    %cst_361 = arith.constant 0.353553385 : f32
    %1053 = vector.broadcast %cst_361 : f32 to vector<10x10xf32>
    %1054 = arith.mulf %1052, %1053 : vector<10x10xf32>
    %1055 = arith.addf %1054, %17 : vector<10x10xf32>
    %cst_362 = arith.constant dense<0xFF800000> : vector<10xf32>
    %1056 = vector.multi_reduction <maximumf>, %1055, %cst_362 [1] : vector<10x10xf32> to vector<10xf32>
    %1057 = vector.shape_cast %1056 : vector<10xf32> to vector<10x1xf32>
    %1058 = vector.broadcast %1057 : vector<10x1xf32> to vector<10x10xf32>
    %1059 = arith.subf %1055, %1058 : vector<10x10xf32>
    %1060 = math.exp %1059 : vector<10x10xf32>
    %cst_363 = arith.constant dense<0.000000e+00> : vector<10xf32>
    %1061 = vector.multi_reduction <add>, %1060, %cst_363 [1] : vector<10x10xf32> to vector<10xf32>
    %1062 = vector.shape_cast %1061 : vector<10xf32> to vector<10x1xf32>
    %1063 = vector.broadcast %1062 : vector<10x1xf32> to vector<10x10xf32>
    %1064 = arith.divf %1060, %1063 : vector<10x10xf32>
    %1065 = vector.extract_strided_slice %1049 {offsets = [0, 0], sizes = [10, 8], strides = [1, 1]} : vector<10x32xf32> to vector<10x8xf32>
    %cst_364 = arith.constant dense<0.000000e+00> : vector<10x8xf32>
    %1066 = tpu.matmul %1064, %1065, %cst_364 {dimension_numbers = #tpu.dot_dimension_numbers<[1], [0], [0], [1], [0, 0, 1, 1], [], []>} : vector<10x10xf32>, vector<10x8xf32>, vector<10x8xf32> -> vector<10x8xf32>
    %1067 = vector.extract_strided_slice %1042 {offsets = [0, 8], sizes = [10, 8], strides = [1, 1]} : vector<10x32xf32> to vector<10x8xf32>
    %1068 = vector.extract_strided_slice %1048 {offsets = [0, 8], sizes = [10, 8], strides = [1, 1]} : vector<10x32xf32> to vector<10x8xf32>
    %cst_365 = arith.constant dense<0.000000e+00> : vector<10x10xf32>
    %1069 = tpu.matmul %1067, %1068, %cst_365 {dimension_numbers = #tpu.dot_dimension_numbers<[1], [1], [0], [0], [0, 0, 1, 0], [], []>} : vector<10x8xf32>, vector<10x8xf32>, vector<10x10xf32> -> vector<10x10xf32>
    %cst_366 = arith.constant 0.353553385 : f32
    %1070 = vector.broadcast %cst_366 : f32 to vector<10x10xf32>
    %1071 = arith.mulf %1069, %1070 : vector<10x10xf32>
    %1072 = arith.addf %1071, %17 : vector<10x10xf32>
    %cst_367 = arith.constant dense<0xFF800000> : vector<10xf32>
    %1073 = vector.multi_reduction <maximumf>, %1072, %cst_367 [1] : vector<10x10xf32> to vector<10xf32>
    %1074 = vector.shape_cast %1073 : vector<10xf32> to vector<10x1xf32>
    %1075 = vector.broadcast %1074 : vector<10x1xf32> to vector<10x10xf32>
    %1076 = arith.subf %1072, %1075 : vector<10x10xf32>
    %1077 = math.exp %1076 : vector<10x10xf32>
    %cst_368 = arith.constant dense<0.000000e+00> : vector<10xf32>
    %1078 = vector.multi_reduction <add>, %1077, %cst_368 [1] : vector<10x10xf32> to vector<10xf32>
    %1079 = vector.shape_cast %1078 : vector<10xf32> to vector<10x1xf32>
    %1080 = vector.broadcast %1079 : vector<10x1xf32> to vector<10x10xf32>
    %1081 = arith.divf %1077, %1080 : vector<10x10xf32>
    %1082 = vector.extract_strided_slice %1049 {offsets = [0, 8], sizes = [10, 8], strides = [1, 1]} : vector<10x32xf32> to vector<10x8xf32>
    %cst_369 = arith.constant dense<0.000000e+00> : vector<10x8xf32>
    %1083 = tpu.matmul %1081, %1082, %cst_369 {dimension_numbers = #tpu.dot_dimension_numbers<[1], [0], [0], [1], [0, 0, 1, 1], [], []>} : vector<10x10xf32>, vector<10x8xf32>, vector<10x8xf32> -> vector<10x8xf32>
    %1084 = vector.extract_strided_slice %1042 {offsets = [0, 16], sizes = [10, 8], strides = [1, 1]} : vector<10x32xf32> to vector<10x8xf32>
    %1085 = vector.extract_strided_slice %1048 {offsets = [0, 16], sizes = [10, 8], strides = [1, 1]} : vector<10x32xf32> to vector<10x8xf32>
    %cst_370 = arith.constant dense<0.000000e+00> : vector<10x10xf32>
    %1086 = tpu.matmul %1084, %1085, %cst_370 {dimension_numbers = #tpu.dot_dimension_numbers<[1], [1], [0], [0], [0, 0, 1, 0], [], []>} : vector<10x8xf32>, vector<10x8xf32>, vector<10x10xf32> -> vector<10x10xf32>
    %cst_371 = arith.constant 0.353553385 : f32
    %1087 = vector.broadcast %cst_371 : f32 to vector<10x10xf32>
    %1088 = arith.mulf %1086, %1087 : vector<10x10xf32>
    %1089 = arith.addf %1088, %17 : vector<10x10xf32>
    %cst_372 = arith.constant dense<0xFF800000> : vector<10xf32>
    %1090 = vector.multi_reduction <maximumf>, %1089, %cst_372 [1] : vector<10x10xf32> to vector<10xf32>
    %1091 = vector.shape_cast %1090 : vector<10xf32> to vector<10x1xf32>
    %1092 = vector.broadcast %1091 : vector<10x1xf32> to vector<10x10xf32>
    %1093 = arith.subf %1089, %1092 : vector<10x10xf32>
    %1094 = math.exp %1093 : vector<10x10xf32>
    %cst_373 = arith.constant dense<0.000000e+00> : vector<10xf32>
    %1095 = vector.multi_reduction <add>, %1094, %cst_373 [1] : vector<10x10xf32> to vector<10xf32>
    %1096 = vector.shape_cast %1095 : vector<10xf32> to vector<10x1xf32>
    %1097 = vector.broadcast %1096 : vector<10x1xf32> to vector<10x10xf32>
    %1098 = arith.divf %1094, %1097 : vector<10x10xf32>
    %1099 = vector.extract_strided_slice %1049 {offsets = [0, 16], sizes = [10, 8], strides = [1, 1]} : vector<10x32xf32> to vector<10x8xf32>
    %cst_374 = arith.constant dense<0.000000e+00> : vector<10x8xf32>
    %1100 = tpu.matmul %1098, %1099, %cst_374 {dimension_numbers = #tpu.dot_dimension_numbers<[1], [0], [0], [1], [0, 0, 1, 1], [], []>} : vector<10x10xf32>, vector<10x8xf32>, vector<10x8xf32> -> vector<10x8xf32>
    %1101 = vector.extract_strided_slice %1042 {offsets = [0, 24], sizes = [10, 8], strides = [1, 1]} : vector<10x32xf32> to vector<10x8xf32>
    %1102 = vector.extract_strided_slice %1048 {offsets = [0, 24], sizes = [10, 8], strides = [1, 1]} : vector<10x32xf32> to vector<10x8xf32>
    %cst_375 = arith.constant dense<0.000000e+00> : vector<10x10xf32>
    %1103 = tpu.matmul %1101, %1102, %cst_375 {dimension_numbers = #tpu.dot_dimension_numbers<[1], [1], [0], [0], [0, 0, 1, 0], [], []>} : vector<10x8xf32>, vector<10x8xf32>, vector<10x10xf32> -> vector<10x10xf32>
    %cst_376 = arith.constant 0.353553385 : f32
    %1104 = vector.broadcast %cst_376 : f32 to vector<10x10xf32>
    %1105 = arith.mulf %1103, %1104 : vector<10x10xf32>
    %1106 = arith.addf %1105, %17 : vector<10x10xf32>
    %cst_377 = arith.constant dense<0xFF800000> : vector<10xf32>
    %1107 = vector.multi_reduction <maximumf>, %1106, %cst_377 [1] : vector<10x10xf32> to vector<10xf32>
    %1108 = vector.shape_cast %1107 : vector<10xf32> to vector<10x1xf32>
    %1109 = vector.broadcast %1108 : vector<10x1xf32> to vector<10x10xf32>
    %1110 = arith.subf %1106, %1109 : vector<10x10xf32>
    %1111 = math.exp %1110 : vector<10x10xf32>
    %cst_378 = arith.constant dense<0.000000e+00> : vector<10xf32>
    %1112 = vector.multi_reduction <add>, %1111, %cst_378 [1] : vector<10x10xf32> to vector<10xf32>
    %1113 = vector.shape_cast %1112 : vector<10xf32> to vector<10x1xf32>
    %1114 = vector.broadcast %1113 : vector<10x1xf32> to vector<10x10xf32>
    %1115 = arith.divf %1111, %1114 : vector<10x10xf32>
    %1116 = vector.extract_strided_slice %1049 {offsets = [0, 24], sizes = [10, 8], strides = [1, 1]} : vector<10x32xf32> to vector<10x8xf32>
    %cst_379 = arith.constant dense<0.000000e+00> : vector<10x8xf32>
    %1117 = tpu.matmul %1115, %1116, %cst_379 {dimension_numbers = #tpu.dot_dimension_numbers<[1], [0], [0], [1], [0, 0, 1, 1], [], []>} : vector<10x10xf32>, vector<10x8xf32>, vector<10x8xf32> -> vector<10x8xf32>
    %1118 = tpu.concatenate %1066, %1083, %1100, %1117 in 1 : vector<10x8xf32>, vector<10x8xf32>, vector<10x8xf32>, vector<10x8xf32> -> vector<10x32xf32>
    %c928 = arith.constant 928 : index
    %c0_380 = arith.constant 0 : index
    %1119 = vector.load %arg3[%c928, %c0_380] : memref<1312x32xf32, #tpu.memory_space<vmem>>, vector<32x32xf32>
    %cst_381 = arith.constant dense<0.000000e+00> : vector<10x32xf32>
    %1120 = tpu.matmul %1118, %1119, %cst_381 {dimension_numbers = #tpu.dot_dimension_numbers<[1], [0], [0], [1], [0, 0, 1, 1], [], []>} : vector<10x32xf32>, vector<32x32xf32>, vector<10x32xf32> -> vector<10x32xf32>
    %c63 = arith.constant 63 : index
    %c0_382 = arith.constant 0 : index
    %1121 = vector.load %arg6[%c63, %c0_382] : memref<96x128xf32, #tpu.memory_space<vmem>>, vector<1x32xf32>
    %1122 = vector.broadcast %1121 : vector<1x32xf32> to vector<10x32xf32>
    %1123 = arith.addf %1120, %1122 : vector<10x32xf32>
    %1124 = arith.addf %889, %1123 : vector<10x32xf32>
    %c64_383 = arith.constant 64 : index
    %c0_384 = arith.constant 0 : index
    %1125 = vector.load %arg6[%c64_383, %c0_384] : memref<96x128xf32, #tpu.memory_space<vmem>>, vector<1x32xf32>
    %c65 = arith.constant 65 : index
    %c0_385 = arith.constant 0 : index
    %1126 = vector.load %arg6[%c65, %c0_385] : memref<96x128xf32, #tpu.memory_space<vmem>>, vector<1x32xf32>
    %cst_386 = arith.constant dense<0.000000e+00> : vector<10xf32>
    %1127 = vector.multi_reduction <add>, %1124, %cst_386 [1] : vector<10x32xf32> to vector<10xf32>
    %1128 = vector.shape_cast %1127 : vector<10xf32> to vector<10x1xf32>
    %cst_387 = arith.constant 3.200000e+01 : f32
    %1129 = vector.broadcast %cst_387 : f32 to vector<10x1xf32>
    %1130 = arith.divf %1128, %1129 : vector<10x1xf32>
    %1131 = vector.broadcast %1130 : vector<10x1xf32> to vector<10x32xf32>
    %1132 = arith.subf %1124, %1131 : vector<10x32xf32>
    %1133 = arith.mulf %1132, %1132 : vector<10x32xf32>
    %cst_388 = arith.constant dense<0.000000e+00> : vector<10xf32>
    %1134 = vector.multi_reduction <add>, %1133, %cst_388 [1] : vector<10x32xf32> to vector<10xf32>
    %1135 = vector.shape_cast %1134 : vector<10xf32> to vector<10x1xf32>
    %cst_389 = arith.constant 3.200000e+01 : f32
    %1136 = vector.broadcast %cst_389 : f32 to vector<10x1xf32>
    %1137 = arith.divf %1135, %1136 : vector<10x1xf32>
    %cst_390 = arith.constant 9.99999974E-6 : f32
    %1138 = vector.broadcast %cst_390 : f32 to vector<10x1xf32>
    %1139 = arith.addf %1137, %1138 : vector<10x1xf32>
    %1140 = math.rsqrt %1139 : vector<10x1xf32>
    %1141 = vector.broadcast %1140 : vector<10x1xf32> to vector<10x32xf32>
    %1142 = arith.mulf %1132, %1141 : vector<10x32xf32>
    %1143 = vector.broadcast %1125 : vector<1x32xf32> to vector<10x32xf32>
    %1144 = arith.mulf %1142, %1143 : vector<10x32xf32>
    %1145 = vector.broadcast %1126 : vector<1x32xf32> to vector<10x32xf32>
    %1146 = arith.addf %1144, %1145 : vector<10x32xf32>
    %c160_391 = arith.constant 160 : index
    %c0_392 = arith.constant 0 : index
    %1147 = vector.load %arg5[%c160_391, %c0_392] : memref<256x64xf32, #tpu.memory_space<vmem>>, vector<32x64xf32>
    %cst_393 = arith.constant dense<0.000000e+00> : vector<10x64xf32>
    %1148 = tpu.matmul %1146, %1147, %cst_393 {dimension_numbers = #tpu.dot_dimension_numbers<[1], [0], [0], [1], [0, 0, 1, 1], [], []>} : vector<10x32xf32>, vector<32x64xf32>, vector<10x64xf32> -> vector<10x64xf32>
    %c66 = arith.constant 66 : index
    %c0_394 = arith.constant 0 : index
    %1149 = vector.load %arg6[%c66, %c0_394] : memref<96x128xf32, #tpu.memory_space<vmem>>, vector<1x64xf32>
    %1150 = vector.broadcast %1149 : vector<1x64xf32> to vector<10x64xf32>
    %1151 = arith.addf %1148, %1150 : vector<10x64xf32>
    %cst_395 = arith.constant 0.000000e+00 : f32
    %1152 = vector.broadcast %cst_395 : f32 to vector<10x64xf32>
    %1153 = arith.maximumf %1151, %1152 : vector<10x64xf32>
    %c960 = arith.constant 960 : index
    %c0_396 = arith.constant 0 : index
    %1154 = vector.load %arg3[%c960, %c0_396] : memref<1312x32xf32, #tpu.memory_space<vmem>>, vector<64x32xf32>
    %cst_397 = arith.constant dense<0.000000e+00> : vector<10x32xf32>
    %1155 = tpu.matmul %1153, %1154, %cst_397 {dimension_numbers = #tpu.dot_dimension_numbers<[1], [0], [0], [1], [0, 0, 1, 1], [], []>} : vector<10x64xf32>, vector<64x32xf32>, vector<10x32xf32> -> vector<10x32xf32>
    %c67 = arith.constant 67 : index
    %c0_398 = arith.constant 0 : index
    %1156 = vector.load %arg6[%c67, %c0_398] : memref<96x128xf32, #tpu.memory_space<vmem>>, vector<1x32xf32>
    %1157 = vector.broadcast %1156 : vector<1x32xf32> to vector<10x32xf32>
    %1158 = arith.addf %1155, %1157 : vector<10x32xf32>
    %1159 = arith.addf %1146, %1158 : vector<10x32xf32>
    %c68 = arith.constant 68 : index
    %c0_399 = arith.constant 0 : index
    %1160 = vector.load %arg6[%c68, %c0_399] : memref<96x128xf32, #tpu.memory_space<vmem>>, vector<1x32xf32>
    %c69 = arith.constant 69 : index
    %c0_400 = arith.constant 0 : index
    %1161 = vector.load %arg6[%c69, %c0_400] : memref<96x128xf32, #tpu.memory_space<vmem>>, vector<1x32xf32>
    %cst_401 = arith.constant dense<0.000000e+00> : vector<10xf32>
    %1162 = vector.multi_reduction <add>, %1159, %cst_401 [1] : vector<10x32xf32> to vector<10xf32>
    %1163 = vector.shape_cast %1162 : vector<10xf32> to vector<10x1xf32>
    %cst_402 = arith.constant 3.200000e+01 : f32
    %1164 = vector.broadcast %cst_402 : f32 to vector<10x1xf32>
    %1165 = arith.divf %1163, %1164 : vector<10x1xf32>
    %1166 = vector.broadcast %1165 : vector<10x1xf32> to vector<10x32xf32>
    %1167 = arith.subf %1159, %1166 : vector<10x32xf32>
    %1168 = arith.mulf %1167, %1167 : vector<10x32xf32>
    %cst_403 = arith.constant dense<0.000000e+00> : vector<10xf32>
    %1169 = vector.multi_reduction <add>, %1168, %cst_403 [1] : vector<10x32xf32> to vector<10xf32>
    %1170 = vector.shape_cast %1169 : vector<10xf32> to vector<10x1xf32>
    %cst_404 = arith.constant 3.200000e+01 : f32
    %1171 = vector.broadcast %cst_404 : f32 to vector<10x1xf32>
    %1172 = arith.divf %1170, %1171 : vector<10x1xf32>
    %cst_405 = arith.constant 9.99999974E-6 : f32
    %1173 = vector.broadcast %cst_405 : f32 to vector<10x1xf32>
    %1174 = arith.addf %1172, %1173 : vector<10x1xf32>
    %1175 = math.rsqrt %1174 : vector<10x1xf32>
    %1176 = vector.broadcast %1175 : vector<10x1xf32> to vector<10x32xf32>
    %1177 = arith.mulf %1167, %1176 : vector<10x32xf32>
    %1178 = vector.broadcast %1160 : vector<1x32xf32> to vector<10x32xf32>
    %1179 = arith.mulf %1177, %1178 : vector<10x32xf32>
    %1180 = vector.broadcast %1161 : vector<1x32xf32> to vector<10x32xf32>
    %1181 = arith.addf %1179, %1180 : vector<10x32xf32>
    %c224 = arith.constant 224 : index
    %c0_406 = arith.constant 0 : index
    %1182 = vector.load %arg4[%c224, %c0_406] : memref<256x96xf32, #tpu.memory_space<vmem>>, vector<32x96xf32>
    %c78 = arith.constant 78 : index
    %c0_407 = arith.constant 0 : index
    %1183 = vector.load %arg6[%c78, %c0_407] : memref<96x128xf32, #tpu.memory_space<vmem>>, vector<1x96xf32>
    %1184 = vector.extract_strided_slice %1182 {offsets = [0, 0], sizes = [32, 32], strides = [1, 1]} : vector<32x96xf32> to vector<32x32xf32>
    %cst_408 = arith.constant dense<0.000000e+00> : vector<10x32xf32>
    %1185 = tpu.matmul %1035, %1184, %cst_408 {dimension_numbers = #tpu.dot_dimension_numbers<[1], [0], [0], [1], [0, 0, 1, 1], [], []>} : vector<10x32xf32>, vector<32x32xf32>, vector<10x32xf32> -> vector<10x32xf32>
    %1186 = vector.extract_strided_slice %1183 {offsets = [0, 0], sizes = [1, 32], strides = [1, 1]} : vector<1x96xf32> to vector<1x32xf32>
    %1187 = vector.broadcast %1186 : vector<1x32xf32> to vector<10x32xf32>
    %1188 = arith.addf %1185, %1187 : vector<10x32xf32>
    %1189 = vector.extract_strided_slice %1182 {offsets = [0, 32], sizes = [32, 64], strides = [1, 1]} : vector<32x96xf32> to vector<32x64xf32>
    %cst_409 = arith.constant dense<0.000000e+00> : vector<10x64xf32>
    %1190 = tpu.matmul %1181, %1189, %cst_409 {dimension_numbers = #tpu.dot_dimension_numbers<[1], [0], [0], [1], [0, 0, 1, 1], [], []>} : vector<10x32xf32>, vector<32x64xf32>, vector<10x64xf32> -> vector<10x64xf32>
    %1191 = vector.extract_strided_slice %1183 {offsets = [0, 32], sizes = [1, 64], strides = [1, 1]} : vector<1x96xf32> to vector<1x64xf32>
    %1192 = vector.broadcast %1191 : vector<1x64xf32> to vector<10x64xf32>
    %1193 = arith.addf %1190, %1192 : vector<10x64xf32>
    %1194 = vector.extract_strided_slice %1193 {offsets = [0, 0], sizes = [10, 32], strides = [1, 1]} : vector<10x64xf32> to vector<10x32xf32>
    %1195 = vector.extract_strided_slice %1193 {offsets = [0, 32], sizes = [10, 32], strides = [1, 1]} : vector<10x64xf32> to vector<10x32xf32>
    %1196 = vector.extract_strided_slice %1188 {offsets = [0, 0], sizes = [10, 8], strides = [1, 1]} : vector<10x32xf32> to vector<10x8xf32>
    %1197 = vector.extract_strided_slice %1194 {offsets = [0, 0], sizes = [10, 8], strides = [1, 1]} : vector<10x32xf32> to vector<10x8xf32>
    %cst_410 = arith.constant dense<0.000000e+00> : vector<10x10xf32>
    %1198 = tpu.matmul %1196, %1197, %cst_410 {dimension_numbers = #tpu.dot_dimension_numbers<[1], [1], [0], [0], [0, 0, 1, 0], [], []>} : vector<10x8xf32>, vector<10x8xf32>, vector<10x10xf32> -> vector<10x10xf32>
    %cst_411 = arith.constant 0.353553385 : f32
    %1199 = vector.broadcast %cst_411 : f32 to vector<10x10xf32>
    %1200 = arith.mulf %1198, %1199 : vector<10x10xf32>
    %1201 = arith.addf %1200, %17 : vector<10x10xf32>
    %cst_412 = arith.constant dense<0xFF800000> : vector<10xf32>
    %1202 = vector.multi_reduction <maximumf>, %1201, %cst_412 [1] : vector<10x10xf32> to vector<10xf32>
    %1203 = vector.shape_cast %1202 : vector<10xf32> to vector<10x1xf32>
    %1204 = vector.broadcast %1203 : vector<10x1xf32> to vector<10x10xf32>
    %1205 = arith.subf %1201, %1204 : vector<10x10xf32>
    %1206 = math.exp %1205 : vector<10x10xf32>
    %cst_413 = arith.constant dense<0.000000e+00> : vector<10xf32>
    %1207 = vector.multi_reduction <add>, %1206, %cst_413 [1] : vector<10x10xf32> to vector<10xf32>
    %1208 = vector.shape_cast %1207 : vector<10xf32> to vector<10x1xf32>
    %1209 = vector.broadcast %1208 : vector<10x1xf32> to vector<10x10xf32>
    %1210 = arith.divf %1206, %1209 : vector<10x10xf32>
    %1211 = vector.extract_strided_slice %1195 {offsets = [0, 0], sizes = [10, 8], strides = [1, 1]} : vector<10x32xf32> to vector<10x8xf32>
    %cst_414 = arith.constant dense<0.000000e+00> : vector<10x8xf32>
    %1212 = tpu.matmul %1210, %1211, %cst_414 {dimension_numbers = #tpu.dot_dimension_numbers<[1], [0], [0], [1], [0, 0, 1, 1], [], []>} : vector<10x10xf32>, vector<10x8xf32>, vector<10x8xf32> -> vector<10x8xf32>
    %1213 = vector.extract_strided_slice %1188 {offsets = [0, 8], sizes = [10, 8], strides = [1, 1]} : vector<10x32xf32> to vector<10x8xf32>
    %1214 = vector.extract_strided_slice %1194 {offsets = [0, 8], sizes = [10, 8], strides = [1, 1]} : vector<10x32xf32> to vector<10x8xf32>
    %cst_415 = arith.constant dense<0.000000e+00> : vector<10x10xf32>
    %1215 = tpu.matmul %1213, %1214, %cst_415 {dimension_numbers = #tpu.dot_dimension_numbers<[1], [1], [0], [0], [0, 0, 1, 0], [], []>} : vector<10x8xf32>, vector<10x8xf32>, vector<10x10xf32> -> vector<10x10xf32>
    %cst_416 = arith.constant 0.353553385 : f32
    %1216 = vector.broadcast %cst_416 : f32 to vector<10x10xf32>
    %1217 = arith.mulf %1215, %1216 : vector<10x10xf32>
    %1218 = arith.addf %1217, %17 : vector<10x10xf32>
    %cst_417 = arith.constant dense<0xFF800000> : vector<10xf32>
    %1219 = vector.multi_reduction <maximumf>, %1218, %cst_417 [1] : vector<10x10xf32> to vector<10xf32>
    %1220 = vector.shape_cast %1219 : vector<10xf32> to vector<10x1xf32>
    %1221 = vector.broadcast %1220 : vector<10x1xf32> to vector<10x10xf32>
    %1222 = arith.subf %1218, %1221 : vector<10x10xf32>
    %1223 = math.exp %1222 : vector<10x10xf32>
    %cst_418 = arith.constant dense<0.000000e+00> : vector<10xf32>
    %1224 = vector.multi_reduction <add>, %1223, %cst_418 [1] : vector<10x10xf32> to vector<10xf32>
    %1225 = vector.shape_cast %1224 : vector<10xf32> to vector<10x1xf32>
    %1226 = vector.broadcast %1225 : vector<10x1xf32> to vector<10x10xf32>
    %1227 = arith.divf %1223, %1226 : vector<10x10xf32>
    %1228 = vector.extract_strided_slice %1195 {offsets = [0, 8], sizes = [10, 8], strides = [1, 1]} : vector<10x32xf32> to vector<10x8xf32>
    %cst_419 = arith.constant dense<0.000000e+00> : vector<10x8xf32>
    %1229 = tpu.matmul %1227, %1228, %cst_419 {dimension_numbers = #tpu.dot_dimension_numbers<[1], [0], [0], [1], [0, 0, 1, 1], [], []>} : vector<10x10xf32>, vector<10x8xf32>, vector<10x8xf32> -> vector<10x8xf32>
    %1230 = vector.extract_strided_slice %1188 {offsets = [0, 16], sizes = [10, 8], strides = [1, 1]} : vector<10x32xf32> to vector<10x8xf32>
    %1231 = vector.extract_strided_slice %1194 {offsets = [0, 16], sizes = [10, 8], strides = [1, 1]} : vector<10x32xf32> to vector<10x8xf32>
    %cst_420 = arith.constant dense<0.000000e+00> : vector<10x10xf32>
    %1232 = tpu.matmul %1230, %1231, %cst_420 {dimension_numbers = #tpu.dot_dimension_numbers<[1], [1], [0], [0], [0, 0, 1, 0], [], []>} : vector<10x8xf32>, vector<10x8xf32>, vector<10x10xf32> -> vector<10x10xf32>
    %cst_421 = arith.constant 0.353553385 : f32
    %1233 = vector.broadcast %cst_421 : f32 to vector<10x10xf32>
    %1234 = arith.mulf %1232, %1233 : vector<10x10xf32>
    %1235 = arith.addf %1234, %17 : vector<10x10xf32>
    %cst_422 = arith.constant dense<0xFF800000> : vector<10xf32>
    %1236 = vector.multi_reduction <maximumf>, %1235, %cst_422 [1] : vector<10x10xf32> to vector<10xf32>
    %1237 = vector.shape_cast %1236 : vector<10xf32> to vector<10x1xf32>
    %1238 = vector.broadcast %1237 : vector<10x1xf32> to vector<10x10xf32>
    %1239 = arith.subf %1235, %1238 : vector<10x10xf32>
    %1240 = math.exp %1239 : vector<10x10xf32>
    %cst_423 = arith.constant dense<0.000000e+00> : vector<10xf32>
    %1241 = vector.multi_reduction <add>, %1240, %cst_423 [1] : vector<10x10xf32> to vector<10xf32>
    %1242 = vector.shape_cast %1241 : vector<10xf32> to vector<10x1xf32>
    %1243 = vector.broadcast %1242 : vector<10x1xf32> to vector<10x10xf32>
    %1244 = arith.divf %1240, %1243 : vector<10x10xf32>
    %1245 = vector.extract_strided_slice %1195 {offsets = [0, 16], sizes = [10, 8], strides = [1, 1]} : vector<10x32xf32> to vector<10x8xf32>
    %cst_424 = arith.constant dense<0.000000e+00> : vector<10x8xf32>
    %1246 = tpu.matmul %1244, %1245, %cst_424 {dimension_numbers = #tpu.dot_dimension_numbers<[1], [0], [0], [1], [0, 0, 1, 1], [], []>} : vector<10x10xf32>, vector<10x8xf32>, vector<10x8xf32> -> vector<10x8xf32>
    %1247 = vector.extract_strided_slice %1188 {offsets = [0, 24], sizes = [10, 8], strides = [1, 1]} : vector<10x32xf32> to vector<10x8xf32>
    %1248 = vector.extract_strided_slice %1194 {offsets = [0, 24], sizes = [10, 8], strides = [1, 1]} : vector<10x32xf32> to vector<10x8xf32>
    %cst_425 = arith.constant dense<0.000000e+00> : vector<10x10xf32>
    %1249 = tpu.matmul %1247, %1248, %cst_425 {dimension_numbers = #tpu.dot_dimension_numbers<[1], [1], [0], [0], [0, 0, 1, 0], [], []>} : vector<10x8xf32>, vector<10x8xf32>, vector<10x10xf32> -> vector<10x10xf32>
    %cst_426 = arith.constant 0.353553385 : f32
    %1250 = vector.broadcast %cst_426 : f32 to vector<10x10xf32>
    %1251 = arith.mulf %1249, %1250 : vector<10x10xf32>
    %1252 = arith.addf %1251, %17 : vector<10x10xf32>
    %cst_427 = arith.constant dense<0xFF800000> : vector<10xf32>
    %1253 = vector.multi_reduction <maximumf>, %1252, %cst_427 [1] : vector<10x10xf32> to vector<10xf32>
    %1254 = vector.shape_cast %1253 : vector<10xf32> to vector<10x1xf32>
    %1255 = vector.broadcast %1254 : vector<10x1xf32> to vector<10x10xf32>
    %1256 = arith.subf %1252, %1255 : vector<10x10xf32>
    %1257 = math.exp %1256 : vector<10x10xf32>
    %cst_428 = arith.constant dense<0.000000e+00> : vector<10xf32>
    %1258 = vector.multi_reduction <add>, %1257, %cst_428 [1] : vector<10x10xf32> to vector<10xf32>
    %1259 = vector.shape_cast %1258 : vector<10xf32> to vector<10x1xf32>
    %1260 = vector.broadcast %1259 : vector<10x1xf32> to vector<10x10xf32>
    %1261 = arith.divf %1257, %1260 : vector<10x10xf32>
    %1262 = vector.extract_strided_slice %1195 {offsets = [0, 24], sizes = [10, 8], strides = [1, 1]} : vector<10x32xf32> to vector<10x8xf32>
    %cst_429 = arith.constant dense<0.000000e+00> : vector<10x8xf32>
    %1263 = tpu.matmul %1261, %1262, %cst_429 {dimension_numbers = #tpu.dot_dimension_numbers<[1], [0], [0], [1], [0, 0, 1, 1], [], []>} : vector<10x10xf32>, vector<10x8xf32>, vector<10x8xf32> -> vector<10x8xf32>
    %1264 = tpu.concatenate %1212, %1229, %1246, %1263 in 1 : vector<10x8xf32>, vector<10x8xf32>, vector<10x8xf32>, vector<10x8xf32> -> vector<10x32xf32>
    %c1120 = arith.constant 1120 : index
    %c0_430 = arith.constant 0 : index
    %1265 = vector.load %arg3[%c1120, %c0_430] : memref<1312x32xf32, #tpu.memory_space<vmem>>, vector<32x32xf32>
    %cst_431 = arith.constant dense<0.000000e+00> : vector<10x32xf32>
    %1266 = tpu.matmul %1264, %1265, %cst_431 {dimension_numbers = #tpu.dot_dimension_numbers<[1], [0], [0], [1], [0, 0, 1, 1], [], []>} : vector<10x32xf32>, vector<32x32xf32>, vector<10x32xf32> -> vector<10x32xf32>
    %c79 = arith.constant 79 : index
    %c0_432 = arith.constant 0 : index
    %1267 = vector.load %arg6[%c79, %c0_432] : memref<96x128xf32, #tpu.memory_space<vmem>>, vector<1x32xf32>
    %1268 = vector.broadcast %1267 : vector<1x32xf32> to vector<10x32xf32>
    %1269 = arith.addf %1266, %1268 : vector<10x32xf32>
    %1270 = arith.addf %1035, %1269 : vector<10x32xf32>
    %c80 = arith.constant 80 : index
    %c0_433 = arith.constant 0 : index
    %1271 = vector.load %arg6[%c80, %c0_433] : memref<96x128xf32, #tpu.memory_space<vmem>>, vector<1x32xf32>
    %c81 = arith.constant 81 : index
    %c0_434 = arith.constant 0 : index
    %1272 = vector.load %arg6[%c81, %c0_434] : memref<96x128xf32, #tpu.memory_space<vmem>>, vector<1x32xf32>
    %cst_435 = arith.constant dense<0.000000e+00> : vector<10xf32>
    %1273 = vector.multi_reduction <add>, %1270, %cst_435 [1] : vector<10x32xf32> to vector<10xf32>
    %1274 = vector.shape_cast %1273 : vector<10xf32> to vector<10x1xf32>
    %cst_436 = arith.constant 3.200000e+01 : f32
    %1275 = vector.broadcast %cst_436 : f32 to vector<10x1xf32>
    %1276 = arith.divf %1274, %1275 : vector<10x1xf32>
    %1277 = vector.broadcast %1276 : vector<10x1xf32> to vector<10x32xf32>
    %1278 = arith.subf %1270, %1277 : vector<10x32xf32>
    %1279 = arith.mulf %1278, %1278 : vector<10x32xf32>
    %cst_437 = arith.constant dense<0.000000e+00> : vector<10xf32>
    %1280 = vector.multi_reduction <add>, %1279, %cst_437 [1] : vector<10x32xf32> to vector<10xf32>
    %1281 = vector.shape_cast %1280 : vector<10xf32> to vector<10x1xf32>
    %cst_438 = arith.constant 3.200000e+01 : f32
    %1282 = vector.broadcast %cst_438 : f32 to vector<10x1xf32>
    %1283 = arith.divf %1281, %1282 : vector<10x1xf32>
    %cst_439 = arith.constant 9.99999974E-6 : f32
    %1284 = vector.broadcast %cst_439 : f32 to vector<10x1xf32>
    %1285 = arith.addf %1283, %1284 : vector<10x1xf32>
    %1286 = math.rsqrt %1285 : vector<10x1xf32>
    %1287 = vector.broadcast %1286 : vector<10x1xf32> to vector<10x32xf32>
    %1288 = arith.mulf %1278, %1287 : vector<10x32xf32>
    %1289 = vector.broadcast %1271 : vector<1x32xf32> to vector<10x32xf32>
    %1290 = arith.mulf %1288, %1289 : vector<10x32xf32>
    %1291 = vector.broadcast %1272 : vector<1x32xf32> to vector<10x32xf32>
    %1292 = arith.addf %1290, %1291 : vector<10x32xf32>
    %c224_440 = arith.constant 224 : index
    %c0_441 = arith.constant 0 : index
    %1293 = vector.load %arg5[%c224_440, %c0_441] : memref<256x64xf32, #tpu.memory_space<vmem>>, vector<32x64xf32>
    %cst_442 = arith.constant dense<0.000000e+00> : vector<10x64xf32>
    %1294 = tpu.matmul %1292, %1293, %cst_442 {dimension_numbers = #tpu.dot_dimension_numbers<[1], [0], [0], [1], [0, 0, 1, 1], [], []>} : vector<10x32xf32>, vector<32x64xf32>, vector<10x64xf32> -> vector<10x64xf32>
    %c82 = arith.constant 82 : index
    %c0_443 = arith.constant 0 : index
    %1295 = vector.load %arg6[%c82, %c0_443] : memref<96x128xf32, #tpu.memory_space<vmem>>, vector<1x64xf32>
    %1296 = vector.broadcast %1295 : vector<1x64xf32> to vector<10x64xf32>
    %1297 = arith.addf %1294, %1296 : vector<10x64xf32>
    %cst_444 = arith.constant 0.000000e+00 : f32
    %1298 = vector.broadcast %cst_444 : f32 to vector<10x64xf32>
    %1299 = arith.maximumf %1297, %1298 : vector<10x64xf32>
    %c1152 = arith.constant 1152 : index
    %c0_445 = arith.constant 0 : index
    %1300 = vector.load %arg3[%c1152, %c0_445] : memref<1312x32xf32, #tpu.memory_space<vmem>>, vector<64x32xf32>
    %cst_446 = arith.constant dense<0.000000e+00> : vector<10x32xf32>
    %1301 = tpu.matmul %1299, %1300, %cst_446 {dimension_numbers = #tpu.dot_dimension_numbers<[1], [0], [0], [1], [0, 0, 1, 1], [], []>} : vector<10x64xf32>, vector<64x32xf32>, vector<10x32xf32> -> vector<10x32xf32>
    %c83 = arith.constant 83 : index
    %c0_447 = arith.constant 0 : index
    %1302 = vector.load %arg6[%c83, %c0_447] : memref<96x128xf32, #tpu.memory_space<vmem>>, vector<1x32xf32>
    %1303 = vector.broadcast %1302 : vector<1x32xf32> to vector<10x32xf32>
    %1304 = arith.addf %1301, %1303 : vector<10x32xf32>
    %1305 = arith.addf %1292, %1304 : vector<10x32xf32>
    %c84 = arith.constant 84 : index
    %c0_448 = arith.constant 0 : index
    %1306 = vector.load %arg6[%c84, %c0_448] : memref<96x128xf32, #tpu.memory_space<vmem>>, vector<1x32xf32>
    %c85 = arith.constant 85 : index
    %c0_449 = arith.constant 0 : index
    %1307 = vector.load %arg6[%c85, %c0_449] : memref<96x128xf32, #tpu.memory_space<vmem>>, vector<1x32xf32>
    %cst_450 = arith.constant dense<0.000000e+00> : vector<10xf32>
    %1308 = vector.multi_reduction <add>, %1305, %cst_450 [1] : vector<10x32xf32> to vector<10xf32>
    %1309 = vector.shape_cast %1308 : vector<10xf32> to vector<10x1xf32>
    %cst_451 = arith.constant 3.200000e+01 : f32
    %1310 = vector.broadcast %cst_451 : f32 to vector<10x1xf32>
    %1311 = arith.divf %1309, %1310 : vector<10x1xf32>
    %1312 = vector.broadcast %1311 : vector<10x1xf32> to vector<10x32xf32>
    %1313 = arith.subf %1305, %1312 : vector<10x32xf32>
    %1314 = arith.mulf %1313, %1313 : vector<10x32xf32>
    %cst_452 = arith.constant dense<0.000000e+00> : vector<10xf32>
    %1315 = vector.multi_reduction <add>, %1314, %cst_452 [1] : vector<10x32xf32> to vector<10xf32>
    %1316 = vector.shape_cast %1315 : vector<10xf32> to vector<10x1xf32>
    %cst_453 = arith.constant 3.200000e+01 : f32
    %1317 = vector.broadcast %cst_453 : f32 to vector<10x1xf32>
    %1318 = arith.divf %1316, %1317 : vector<10x1xf32>
    %cst_454 = arith.constant 9.99999974E-6 : f32
    %1319 = vector.broadcast %cst_454 : f32 to vector<10x1xf32>
    %1320 = arith.addf %1318, %1319 : vector<10x1xf32>
    %1321 = math.rsqrt %1320 : vector<10x1xf32>
    %1322 = vector.broadcast %1321 : vector<10x1xf32> to vector<10x32xf32>
    %1323 = arith.mulf %1313, %1322 : vector<10x32xf32>
    %1324 = vector.broadcast %1306 : vector<1x32xf32> to vector<10x32xf32>
    %1325 = arith.mulf %1323, %1324 : vector<10x32xf32>
    %1326 = vector.broadcast %1307 : vector<1x32xf32> to vector<10x32xf32>
    %1327 = arith.addf %1325, %1326 : vector<10x32xf32>
    %1328 = vector.extract_strided_slice %1181 {offsets = [0, 0], sizes = [5, 32], strides = [1, 1]} : vector<10x32xf32> to vector<5x32xf32>
    %cst_455 = arith.constant dense<0.000000e+00> : vector<32xf32>
    %1329 = vector.multi_reduction <add>, %1328, %cst_455 [0] : vector<5x32xf32> to vector<32xf32>
    %1330 = vector.shape_cast %1329 : vector<32xf32> to vector<1x32xf32>
    %cst_456 = arith.constant 5.000000e+00 : f32
    %1331 = vector.broadcast %cst_456 : f32 to vector<1x32xf32>
    %1332 = arith.divf %1330, %1331 : vector<1x32xf32>
    %1333 = vector.extract_strided_slice %1327 {offsets = [0, 0], sizes = [5, 32], strides = [1, 1]} : vector<10x32xf32> to vector<5x32xf32>
    %cst_457 = arith.constant dense<0.000000e+00> : vector<32xf32>
    %1334 = vector.multi_reduction <add>, %1333, %cst_457 [0] : vector<5x32xf32> to vector<32xf32>
    %1335 = vector.shape_cast %1334 : vector<32xf32> to vector<1x32xf32>
    %cst_458 = arith.constant 5.000000e+00 : f32
    %1336 = vector.broadcast %cst_458 : f32 to vector<1x32xf32>
    %1337 = arith.divf %1335, %1336 : vector<1x32xf32>
    %1338 = tpu.concatenate %1332, %1337 in 1 : vector<1x32xf32>, vector<1x32xf32> -> vector<1x64xf32>
    %1339 = vector.extract_strided_slice %1181 {offsets = [5, 0], sizes = [5, 32], strides = [1, 1]} : vector<10x32xf32> to vector<5x32xf32>
    %cst_459 = arith.constant dense<0.000000e+00> : vector<32xf32>
    %1340 = vector.multi_reduction <add>, %1339, %cst_459 [0] : vector<5x32xf32> to vector<32xf32>
    %1341 = vector.shape_cast %1340 : vector<32xf32> to vector<1x32xf32>
    %cst_460 = arith.constant 5.000000e+00 : f32
    %1342 = vector.broadcast %cst_460 : f32 to vector<1x32xf32>
    %1343 = arith.divf %1341, %1342 : vector<1x32xf32>
    %1344 = vector.extract_strided_slice %1327 {offsets = [5, 0], sizes = [5, 32], strides = [1, 1]} : vector<10x32xf32> to vector<5x32xf32>
    %cst_461 = arith.constant dense<0.000000e+00> : vector<32xf32>
    %1345 = vector.multi_reduction <add>, %1344, %cst_461 [0] : vector<5x32xf32> to vector<32xf32>
    %1346 = vector.shape_cast %1345 : vector<32xf32> to vector<1x32xf32>
    %cst_462 = arith.constant 5.000000e+00 : f32
    %1347 = vector.broadcast %cst_462 : f32 to vector<1x32xf32>
    %1348 = arith.divf %1346, %1347 : vector<1x32xf32>
    %1349 = tpu.concatenate %1343, %1348 in 1 : vector<1x32xf32>, vector<1x32xf32> -> vector<1x64xf32>
    %1350 = tpu.concatenate %1338, %1349 in 0 : vector<1x64xf32>, vector<1x64xf32> -> vector<2x64xf32>
    %c86 = arith.constant 86 : index
    %c0_463 = arith.constant 0 : index
    %1351 = vector.load %arg6[%c86, %c0_463] : memref<96x128xf32, #tpu.memory_space<vmem>>, vector<1x64xf32>
    %1352 = vector.broadcast %1351 : vector<1x64xf32> to vector<2x64xf32>
    %1353 = arith.mulf %1350, %1352 : vector<2x64xf32>
    %c87 = arith.constant 87 : index
    %c0_464 = arith.constant 0 : index
    %1354 = vector.load %arg6[%c87, %c0_464] : memref<96x128xf32, #tpu.memory_space<vmem>>, vector<1x64xf32>
    %1355 = vector.broadcast %1354 : vector<1x64xf32> to vector<2x64xf32>
    %1356 = arith.addf %1353, %1355 : vector<2x64xf32>
    %c1216 = arith.constant 1216 : index
    %c0_465 = arith.constant 0 : index
    %1357 = vector.load %arg3[%c1216, %c0_465] : memref<1312x32xf32, #tpu.memory_space<vmem>>, vector<64x32xf32>
    %cst_466 = arith.constant dense<0.000000e+00> : vector<2x32xf32>
    %1358 = tpu.matmul %1356, %1357, %cst_466 {dimension_numbers = #tpu.dot_dimension_numbers<[1], [0], [0], [1], [0, 0, 1, 1], [], []>} : vector<2x64xf32>, vector<64x32xf32>, vector<2x32xf32> -> vector<2x32xf32>
    %c88 = arith.constant 88 : index
    %c0_467 = arith.constant 0 : index
    %1359 = vector.load %arg6[%c88, %c0_467] : memref<96x128xf32, #tpu.memory_space<vmem>>, vector<1x32xf32>
    %1360 = vector.broadcast %1359 : vector<1x32xf32> to vector<2x32xf32>
    %1361 = arith.addf %1358, %1360 : vector<2x32xf32>
    %c89 = arith.constant 89 : index
    %c0_468 = arith.constant 0 : index
    %1362 = vector.load %arg6[%c89, %c0_468] : memref<96x128xf32, #tpu.memory_space<vmem>>, vector<1x32xf32>
    %1363 = vector.broadcast %1362 : vector<1x32xf32> to vector<2x32xf32>
    %1364 = arith.mulf %1361, %1363 : vector<2x32xf32>
    %c90 = arith.constant 90 : index
    %c0_469 = arith.constant 0 : index
    %1365 = vector.load %arg6[%c90, %c0_469] : memref<96x128xf32, #tpu.memory_space<vmem>>, vector<1x32xf32>
    %1366 = vector.broadcast %1365 : vector<1x32xf32> to vector<2x32xf32>
    %1367 = arith.addf %1364, %1366 : vector<2x32xf32>
    %cst_470 = arith.constant 0.000000e+00 : f32
    %1368 = vector.broadcast %cst_470 : f32 to vector<2x32xf32>
    %1369 = arith.maximumf %1367, %1368 : vector<2x32xf32>
    %c1280 = arith.constant 1280 : index
    %c0_471 = arith.constant 0 : index
    %1370 = vector.load %arg3[%c1280, %c0_471] : memref<1312x32xf32, #tpu.memory_space<vmem>>, vector<32x32xf32>
    %cst_472 = arith.constant dense<0.000000e+00> : vector<2x32xf32>
    %1371 = tpu.matmul %1369, %1370, %cst_472 {dimension_numbers = #tpu.dot_dimension_numbers<[1], [0], [0], [1], [0, 0, 1, 1], [], []>} : vector<2x32xf32>, vector<32x32xf32>, vector<2x32xf32> -> vector<2x32xf32>
    %c91 = arith.constant 91 : index
    %c0_473 = arith.constant 0 : index
    %1372 = vector.load %arg6[%c91, %c0_473] : memref<96x128xf32, #tpu.memory_space<vmem>>, vector<1x32xf32>
    %1373 = vector.broadcast %1372 : vector<1x32xf32> to vector<2x32xf32>
    %1374 = arith.addf %1371, %1373 : vector<2x32xf32>
    %c92 = arith.constant 92 : index
    %c0_474 = arith.constant 0 : index
    %1375 = vector.load %arg6[%c92, %c0_474] : memref<96x128xf32, #tpu.memory_space<vmem>>, vector<1x32xf32>
    %1376 = vector.broadcast %1375 : vector<1x32xf32> to vector<2x32xf32>
    %1377 = arith.mulf %1374, %1376 : vector<2x32xf32>
    %c93 = arith.constant 93 : index
    %c0_475 = arith.constant 0 : index
    %1378 = vector.load %arg6[%c93, %c0_475] : memref<96x128xf32, #tpu.memory_space<vmem>>, vector<1x32xf32>
    %1379 = vector.broadcast %1378 : vector<1x32xf32> to vector<2x32xf32>
    %1380 = arith.addf %1377, %1379 : vector<2x32xf32>
    %cst_476 = arith.constant 0.000000e+00 : f32
    %1381 = vector.broadcast %cst_476 : f32 to vector<2x32xf32>
    %1382 = arith.maximumf %1380, %1381 : vector<2x32xf32>
    %c94 = arith.constant 94 : index
    %c0_477 = arith.constant 0 : index
    %1383 = vector.load %arg6[%c94, %c0_477] : memref<96x128xf32, #tpu.memory_space<vmem>>, vector<1x32xf32>
    %c95 = arith.constant 95 : index
    %c0_478 = arith.constant 0 : index
    %1384 = vector.load %arg6[%c95, %c0_478] : memref<96x128xf32, #tpu.memory_space<vmem>>, vector<1x1xf32>
    %1385 = vector.broadcast %1383 : vector<1x32xf32> to vector<2x32xf32>
    %1386 = arith.mulf %1382, %1385 : vector<2x32xf32>
    %cst_479 = arith.constant dense<0.000000e+00> : vector<2xf32>
    %1387 = vector.multi_reduction <add>, %1386, %cst_479 [1] : vector<2x32xf32> to vector<2xf32>
    %1388 = vector.shape_cast %1387 : vector<2xf32> to vector<2x1xf32>
    %1389 = vector.broadcast %1384 : vector<1x1xf32> to vector<2x1xf32>
    %1390 = arith.addf %1388, %1389 : vector<2x1xf32>
    %c0_480 = arith.constant 0 : index
    %c0_481 = arith.constant 0 : index
    %1391 = vector.load %arg7[%c0_480, %c0_481] : memref<2x1xf32, #tpu.memory_space<vmem>>, vector<2x1xf32>
    tpu.vector_store %arg7[%c0_480, %c0_481], %1390 {strides = array<i32>} : memref<2x1xf32, #tpu.memory_space<vmem>>, vector<2x1xf32>,
    return
  }
  func.func @transform_0(%arg0: i32) -> (i32, i32) {
    %c0_i32 = arith.constant 0 : i32
    %c0_i32_0 = arith.constant 0 : i32
    %c0_i32_1 = arith.constant 0 : i32
    return %c0_i32, %c0_i32_0 : i32, i32
  }
  func.func @transform_1(%arg0: i32) -> (i32, i32) {
    %c0_i32 = arith.constant 0 : i32
    %c0_i32_0 = arith.constant 0 : i32
    %c0_i32_1 = arith.constant 0 : i32
    return %c0_i32, %c0_i32_0 : i32, i32
  }
  func.func @transform_2(%arg0: i32) -> (i32, i32) {
    %c0_i32 = arith.constant 0 : i32
    %c0_i32_0 = arith.constant 0 : i32
    %c0_i32_1 = arith.constant 0 : i32
    return %c0_i32, %c0_i32_0 : i32, i32
  }
  func.func @transform_3(%arg0: i32) -> (i32, i32) {
    %c0_i32 = arith.constant 0 : i32
    %c0_i32_0 = arith.constant 0 : i32
    %c0_i32_1 = arith.constant 0 : i32
    return %c0_i32, %c0_i32_0 : i32, i32
  }
  func.func @transform_4(%arg0: i32) -> (i32, i32) {
    %c0_i32 = arith.constant 0 : i32
    %c0_i32_0 = arith.constant 0 : i32
    %c0_i32_1 = arith.constant 0 : i32
    return %c0_i32, %c0_i32_0 : i32, i32
  }
  func.func @transform_5(%arg0: i32) -> (i32, i32) {
    %c0_i32 = arith.constant 0 : i32
    %c0_i32_0 = arith.constant 0 : i32
    %c0_i32_1 = arith.constant 0 : i32
    return %c0_i32, %c0_i32_0 : i32, i32
  }
  func.func @transform_6(%arg0: i32) -> (i32, i32) {
    %c0_i32 = arith.constant 0 : i32
    %c0_i32_0 = arith.constant 0 : i32
    %c0_i32_1 = arith.constant 0 : i32
    return %c0_i32, %c0_i32_0 : i32, i32
  }
}

</mosaic_0001>

<bundles_post_ra>
// kernel: model_forward.1
= control target key start
LH: loop header
LB: loop body
LE: loop exit
PB: predicated region body
PF: predicated region fallthrough
CT: control target
= control target key end

     0   :  { %vm172_vm0 = vcmask 261120   ;;  %v13948_v60 = vmov 0.0   ;;  %vm13949_vm1 = vmmov 0   ;;  %vm321_vm2 = vcmask 1040384   ;;  %s13950_s21 = smov 96   ;;  %s13952_s22 = smov 64   ;;  %s16465_s0 = inlined_call_operand.vmem [shape: f32[8,256], index: 0, kind: input, shape index: {}]   ;;  %s16466_s2 = inlined_call_operand.vmem [shape: f32[1312,32], index: 2, kind: input, shape index: {}]   ;;  %s16467_s5 = inlined_call_operand.vmem [shape: f32[96,128], index: 5, kind: input, shape index: {}]   ;;  %s16468_s3 = inlined_call_operand.vmem [shape: f32[256,96], index: 3, kind: input, shape index: {}]   ;;  %s16469_s4 = inlined_call_operand.vmem [shape: f32[256,64], index: 4, kind: input, shape index: {}]   ;;  %s16470_s1 = inlined_call_operand.vmem [shape: f32[8,128], index: 1, kind: input, shape index: {}]   ;;  %s16471_s6 = inlined_call_operand.vmem [shape: f32[2,1], index: 6, kind: output, shape index: {}]  }
   0x1   :  { %v44_v0 = vld [vmem:[%s16465_s0] sm:$0xff]  ;;  %v45_v1 = vld [vmem:[%s16465_s0 + $0x8] sm:$0xff]  ;;  %v94_v3 = vld [vmem:[%s16466_s2 + $0xf8] sm:$0xff]  ;;  %12603 = vmatprep.subr.mxu1 %v13948_v60  ;;  %12611 = vmatprep.mubr.msk.f32.mxu1 %vm13949_vm1, %v13948_v60  ;;  %vm323_vm3 = vcmask 1044480   ;;  %vm325_vm4 = vcmask 1045504   ;;  %vm422_vm5 = vcmask 64512  }
   0x2   :  { %v46_v2 = vadd.f32 %v45_v1, %v44_v0  ;;  %v78_v4 = vld [vmem:[%s16466_s2 + $0x78] sm:$0xff]  ;;  %v93_v5 = vld [vmem:[%s16466_s2 + $0xf0] sm:$0xff]  ;;  %12023 = vmatprep.subr.mxu0 %v94_v3  ;;  %v92_v7 = vld [vmem:[%s16466_s2 + $0xe8] sm:$0xff]  ;;  %vm514_vm8 = vcmask 74752   ;;  %vm510_vm9 = vcmask 80896   ;;  %s13953_s23 = smov 88  }
   0x3   :  { %v77_v6 = vld [vmem:[%s16466_s2 + $0x70] sm:$0xff]  ;;  %12024 = vmatpush3.msra.mxu0 %v78_v4  ;;  %v76_v8 = vld [vmem:[%s16466_s2 + $0x68] sm:$0xff]  ;;  %v91_v9 = vld [vmem:[%s16466_s2 + $0xe0] sm:$0xff]  ;;  %vm545_vm10 = vcmask 1041408   ;;  %s13954_s24 = smov 120   ;;  %s13955_s25 = smov 80  }
   0x4   :  { %47 = vadd.xlane.f32.xlu0 %v46_v2  ;;  %12025 = vmatprep.subr.mxu0 %v93_v5  ;;  %v75_v10 = vld [vmem:[%s16466_s2 + $0x60] sm:$0xff]  ;;  %v90_v11 = vld [vmem:[%s16466_s2 + $0xd8] sm:$0xff]  ;;  %v89_v13 = vld [vmem:[%s16466_s2 + $0xd0] sm:$0xff]  ;;  %s13956_s26 = smov 112   ;;  %s13957_s27 = smov 56   ;;  %vm1264_vm11 = vcmask 130048  }
   0x5   :  { %12026 = vmatpush3.msra.mxu0 %v77_v6  ;;  %v74_v12 = vld [vmem:[%s16466_s2 + $0x58] sm:$0xff]  ;;  %v73_v21 = vld [vmem:[%s16466_s2 + $0x50] sm:$0xff]  ;;  %v88_v22 = vld [vmem:[%s16466_s2 + $0xc8] sm:$0xff]  ;;  %s13958_s28 = smov 48   ;;  %s13959_s29 = smov 72   ;;  %vm1267_vm12 = vcmask 195584  }
   0x6   :  { %12027 = vmatprep.subr.mxu0 %v92_v7  ;;  %v72_v23 = vld [vmem:[%s16466_s2 + $0x48] sm:$0xff]  ;;  %v87_v24 = vld [vmem:[%s16466_s2 + $0xc0] sm:$0xff]  ;;  %v86_v26 = vld [vmem:[%s16466_s2 + $0xb8] sm:$0xff]  ;;  %s13960_s30 = smov 104   ;;  %s13961_s7 = smov 40   ;;  %vm1367_vm13 = vcmask 254976  }
   0x7   :  { %12028 = vmatpush3.msra.mxu0 %v76_v8  ;;  %v71_v25 = vld [vmem:[%s16466_s2 + $0x40] sm:$0xff]  ;;  %v70_v27 = vld [vmem:[%s16466_s2 + $0x38] sm:$0xff]  ;;  %v85_v28 = vld [vmem:[%s16466_s2 + $0xb0] sm:$0xff]  ;;  %s13962_s8 = smov 8   ;;  %s13963_s0 = smov 16   ;;  %vm1508_vm14 = vcmask 523264  }
   0x8   :  { %12029 = vmatprep.subr.mxu0 %v91_v9  ;;  %v69_v29 = vld [vmem:[%s16466_s2 + $0x30] sm:$0xff]  ;;  %v84_v30 = vld [vmem:[%s16466_s2 + $0xa8] sm:$0xff]  ;;  %v83_v32 = vld [vmem:[%s16466_s2 + $0xa0] sm:$0xff]  ;;  %s13964_s17 = smov 24   ;;  %vm11374_vm15 = vcmask 1042432  }
   0x9   :  { %12030 = vmatpush3.msra.mxu0 %v75_v10  ;;  %v68_v31 = vld [vmem:[%s16466_s2 + $0x28] sm:$0xff]  ;;  %v67_v33 = vld [vmem:[%s16466_s2 + $0x20] sm:$0xff]  ;;  %v82_v34 = vld [vmem:[%s16466_s2 + $0x98] sm:$0xff] }
   0xa   :  { %12031 = vmatprep.subr.mxu0 %v90_v11  ;;  %v66_v35 = vld [vmem:[%s16466_s2 + $0x18] sm:$0xff]  ;;  %v81_v36 = vld [vmem:[%s16466_s2 + $0x90] sm:$0xff]  ;;  %v80_v38 = vld [vmem:[%s16466_s2 + $0x88] sm:$0xff] }
   0xb   :  { %12032 = vmatpush3.msra.mxu0 %v74_v12  ;;  %v65_v37 = vld [vmem:[%s16466_s2 + $0x10] sm:$0xff]  ;;  %v64_v39 = vld [vmem:[%s16466_s2 + $0x8] sm:$0xff]  ;;  %v79_v40 = vld [vmem:[%s16466_s2 + $0x80] sm:$0xff] }
   0xc   :  { %12033 = vmatprep.subr.mxu0 %v89_v13  ;;  %v63_v41 = vld [vmem:[%s16466_s2] sm:$0xff]  ;;  %v201_v59 = vld [vmem:[%s16466_s2 + $0x198] sm:$0xff]  ;;  %v200_v61 = vld [vmem:[%s16466_s2 + $0x190] sm:$0xff] }
   0xd   :  { %12034 = vmatpush3.msra.mxu0 %v73_v21  ;;  %v11637_v50 = vld [vmem:[%s16467_s5] ss:$0 sm:$0xff]  ;;  %12604 = vmatpush3.msra.mxu1 %v201_v59  ;;  %v199_v62 = vld [vmem:[%s16466_s2 + $0x188] sm:$0xff]  ;;  %v11638_v4 = vld [vmem:[%s16467_s5 + $0x1] ss:$0 sm:$0xff] }
   0xe   :  { %12035 = vmatprep.subr.mxu0 %v88_v22  ;;  %12605 = vmatprep.subr.mxu1 %v13948_v60  ;;  %v198_v63 = vld [vmem:[%s16466_s2 + $0x180] sm:$0xff]  ;;  %v329_v21 = vld [vmem:[%s16468_s3 + $0x10] sm:$0xff]  ;;  %v328_v22 = vld [vmem:[%s16468_s3 + $0x8] sm:$0xff] }
   0xf   :  { %12036 = vmatpush3.msra.mxu0 %v72_v23  ;;  %12606 = vmatpush3.msra.mxu1 %v200_v61  ;;  %v11639_v6 = vld [vmem:[%s16467_s5 + $0x2] ss:$0 sm:$0xff]  ;;  %v11640_v10 = vld [vmem:[%s16467_s5 + $0x3] ss:$0 sm:$0xff] }
  0x10   :  { %12037 = vmatprep.subr.mxu0 %v87_v24  ;;  %12607 = vmatprep.subr.mxu1 %v13948_v60  ;;  %v327_v23 = vld [vmem:[%s16468_s3] sm:$0xff] }
  0x11   :  { %12038 = vmatpush3.msra.mxu0 %v71_v25  ;;  %12608 = vmatpush3.msra.mxu1 %v199_v62 }
  0x12   :  { %12039 = vmatprep.subr.mxu0 %v86_v26  ;;  %12609 = vmatprep.subr.mxu1 %v13948_v60 }
  0x13   :  { %12040 = vmatpush3.msra.mxu0 %v70_v27  ;;  %12610 = vmatpush3.msra.mxu1 %v198_v63 }
  0x14   :  { %12041 = vmatprep.subr.mxu0 %v85_v28  ;;  %v11642_v28 = vld [vmem:[%s16467_s5 + $0x4] ss:$0 sm:$0xff] }
  0x15   :  { %12042 = vmatpush3.msra.mxu0 %v69_v29  ;;  %v305_v29 = vld [vmem:[%s16467_s5 + $0x6] sm:$0x1f] }
  0x16   :  { %12043 = vmatprep.subr.mxu0 %v84_v30 }
  0x17   :  { %12044 = vmatpush3.msra.mxu0 %v68_v31  ;;  %v11643_v31 = vld [vmem:[%s16467_s5 + $0x5] ss:$0 sm:$0xff] }
  0x18   :  { %12045 = vmatprep.subr.mxu0 %v83_v32 }
  0x19   :  { %12046 = vmatpush3.msra.mxu0 %v67_v33  ;;  %v307_v33 = vrot.slane %v305_v29, 1 }
  0x1a   :  { %12047 = vmatprep.subr.mxu0 %v82_v34  ;;  %v310_v34 = vrot.slane %v305_v29, 5 }
  0x1b   :  { %12048 = vmatpush3.msra.mxu0 %v66_v35 }
  0x1c   :  { %12049 = vmatprep.subr.mxu0 %v81_v36 }
  0x1d   :  { %12050 = vmatpush3.msra.mxu0 %v65_v37 }
  0x1e   :  { %12051 = vmatprep.subr.mxu0 %v80_v38  ;;  %v316_v38 = vrot.slane %v305_v29, 3 }
  0x1f   :  { %12052 = vmatpush3.msra.mxu0 %v64_v39 }
  0x20   :  { %12053 = vmatprep.subr.mxu0 %v79_v40 }
  0x21   :  { %12054 = vmatpush3.msra.mxu0 %v63_v41 }
  0x8d   :  { %v48_v14 = vpop.xlane.xlu0 %47 }
  0x8e   :  { %v50_v15 = vmul.f32 0.00390625, %v48_v14 }
  0x90   :  { %v51_v16 = vsub.f32 %v44_v0, %v50_v15  ;;  %v52_v17 = vsub.f32 %v45_v1, %v50_v15 }
  0x92   :  { %v53_v18 = vmul.f32 %v51_v16, %v51_v16  ;;  %v54_v19 = vmul.f32 %v52_v17, %v52_v17 }
  0x94   :  { %v55_v20 = vadd.f32 %v54_v19, %v53_v18 }
  0x96   :  { %56 = vadd.xlane.f32.xlu0 %v55_v20  ;;  %v330_v20 = vld [vmem:[%s16468_s3 + $0x18] sm:$0xff] }
  0x97   :  { %12614 = vmatprep.subr.mxu1 %v330_v20 }
 0x11f   :  { %v57_v42 = vpop.xlane.xlu0 %56 }
 0x120   :  { %v58_v43 = vmul.f32 0.00390625, %v57_v42 }
 0x122   :  { %v59_v44 = vadd.f32 1e-05, %v58_v43 }
 0x124   :  { %13616 = vrsqrt.f32 %v59_v44  ;;  %v11644_v44 = vld [vmem:[%s16467_s5 + $0x16] ss:$0 sm:$0xff] }
 0x131   :  { %v13617_v45 = vpop.eup %13616 }
 0x132   :  { %v62_v46 = vmul.f32 %v13617_v45, %v52_v17  ;;  %v61_v47 = vmul.f32 %v13617_v45, %v51_v16 }
 0x134   :  { %164 = vmatprep.mubr.f32.mxu0 %v62_v46 }
 0x135   :  { %165 = vmatmul.mubr.f32.vlgmr.msra.gmra.mxu0 %v61_v47 }
 0x1f5   :  { %v12055_v48 = vpop.f32.mrf.mxu0 }
 0x1f7   :  { %v12056_v49 = vpop.f32.mrf.mxu0 }
 0x1f8   :  { %v12057_v51 = vadd.f32 %v12056_v49, %v12055_v48 }
 0x1fa   :  { %v167_v52 = vadd.f32 %v12057_v51, %v11637_v50  ;;  %v23_v51 = vlaneseq }
 0x1fc   :  { %v173_v53 = vsel %vm172_vm0, %v167_v52, 0.0 }
 0x1fd   :  { %174 = vadd.xlane.f32.xlu1 %v173_v53 }
 0x286   :  { %v175_v54 = vpop.xlane.xlu1 %174 }
 0x287   :  { %v177_v55 = vmul.f32 0.03125, %v175_v54  ;;  %v29_v54 = vand.u32 127, %v23_v51 }
 0x289   :  { %v178_v56 = vsub.f32 %v167_v52, %v177_v55  ;;  %v24_v52 = vshrl.u32 %v23_v51, 7 }
 0x28b   :  { %v179_v57 = vmul.f32 %v178_v56, %v178_v56  ;;  %v25_v53 = vadd.s32 8, %v24_v52 }
 0x28d   :  { %v180_v58 = vsel %vm172_vm0, %v179_v57, 0.0  ;;  %v27_v55 = vcvt.s32.f32 %v25_v53  ;;  %v26_v57 = vcvt.s32.f32 %v24_v52 }
 0x28e   :  { %181 = vadd.xlane.f32.xlu1 %v180_v58 }
 0x28f   :  { %v32_v58 = vmul.f32 0.2, %v27_v55  ;;  %v31_v61 = vmul.f32 0.2, %v26_v57 }
 0x291   :  { %v34_v62 = vadd.f32 0.001, %v32_v58 }
 0x317   :  { %v182_v0 = vpop.xlane.xlu1 %181 }
 0x318   :  { %v183_v1 = vmul.f32 0.03125, %v182_v0  ;;  %v33_v0 = vadd.f32 0.001, %v31_v61 }
 0x31a   :  { %v184_v2 = vadd.f32 1e-05, %v183_v1  ;;  %v36_v1 = vfloor.f32 %v34_v62 }
 0x31c   :  { %13618 = vrsqrt.f32 %v184_v2 }
 0x329   :  { %v13619_v3 = vpop.eup %13618 }
 0x32a   :  { %v186_v5 = vmul.f32 %v13619_v3, %v178_v56  ;;  %v30_v56 = vcvt.s32.f32 %v29_v54  ;;  %v35_v3 = vfloor.f32 %v33_v0 }
 0x32c   :  { %v191_v7 = vmul.f32 %v11638_v4, %v186_v5  ;;  %v37_v59 = vmul.f32 0.2, %v30_v56  ;;  %v13951_v5 = vmov -1e+30  }
 0x32e   :  { %v196_v8 = vadd.f32 %v11639_v6, %v191_v7  ;;  %v38_v63 = vadd.f32 0.001, %v37_v59 }
 0x330   :  { %v197_v9 = vmax.f32 %v196_v8, 0.0  ;;  %v39_v2 = vfloor.f32 %v38_v63 }
 0x332   :  { %12612 = vmatmul.mubr.msk.f32.vlgmr.msra.gmra.mxu1 %vm172_vm0, %v197_v9  ;;  %vm41_vm6 = vcmp.eq.f32.partialorder %v36_v1, %v39_v2  ;;  %vm40_vm7 = vcmp.eq.f32.partialorder %v35_v3, %v39_v2 }
 0x333   :  { %12615 = vmatpush3.msra.mxu1 %v330_v20  ;;  %v14190_v6 = vsel %vm41_vm6, 0.0, %v13951_v5  ;;  %v14192_v9 = vsel %vm40_vm7, 0.0, %v13951_v5 }
 0x334   :  { %12616 = vmatprep.subr.mxu1 %v329_v21 }
 0x335   :  { %12617 = vmatpush3.msra.mxu1 %v329_v21 }
 0x336   :  { %12618 = vmatprep.subr.mxu1 %v328_v22 }
 0x337   :  { %12619 = vmatpush3.msra.mxu1 %v328_v22 }
 0x338   :  { %12620 = vmatprep.subr.mxu1 %v327_v23 }
 0x339   :  { %12621 = vmatpush3.msra.mxu1 %v327_v23 }
 0x3f2   :  { %v276_v11 = vpop.f32.mrf.mxu1 }
 0x3f3   :  { %v277_v12 = vadd.f32 %v11640_v10, %v276_v11 }
 0x3f4   :  { %v12613_v13 = vpop.f32.mrf.mxu1 }
 0x3f5   :  { %v282_v14 = vsel %vm172_vm0, %v277_v12, 0.0 }
 0x3f6   :  { %283 = vadd.xlane.f32.xlu0 %v282_v14 }
 0x47f   :  { %v284_v15 = vpop.xlane.xlu0 %283 }
 0x480   :  { %v285_v16 = vmul.f32 0.03125, %v284_v15 }
 0x482   :  { %v286_v17 = vsub.f32 %v277_v12, %v285_v16 }
 0x484   :  { %v287_v18 = vmul.f32 %v286_v17, %v286_v17 }
 0x486   :  { %v288_v19 = vsel %vm172_vm0, %v287_v18, 0.0 }
 0x487   :  { %289 = vadd.xlane.f32.xlu1 %v288_v19 }
 0x510   :  { %v290_v24 = vpop.xlane.xlu1 %289 }
 0x511   :  { %v291_v25 = vmul.f32 0.03125, %v290_v24 }
 0x513   :  { %v292_v26 = vadd.f32 1e-05, %v291_v25 }
 0x515   :  { %13620 = vrsqrt.f32 %v292_v26 }
 0x522   :  { %v13621_v27 = vpop.eup %13620 }
 0x523   :  { %v294_v30 = vmul.f32 %v13621_v27, %v286_v17 }
 0x525   :  { %v299_v32 = vmul.f32 %v11642_v28, %v294_v30 }
 0x527   :  { %v304_v35 = vadd.f32 %v11643_v31, %v299_v32 }
 0x529   :  { %v309_v36 = vadd.f32 %v307_v33, %v304_v35  ;;  %v312_v37 = vadd.f32 %v310_v34, %v304_v35 }
 0x52b   :  { %v314_v39 = vrot.slane %v309_v36, 7  ;;  %v14159_v40 = vrot.slane %v312_v37, 6 }
 0x52d   :  { %v322_v41 = vsel %vm321_vm2, %v305_v29, %v314_v39 }
 0x52e   :  { %v324_v42 = vsel %vm323_vm3, %v322_v41, %v316_v38 }
 0x52f   :  { %v14165_v43 = vsel %vm325_vm4, %v324_v42, %v14159_v40 }
 0x530   :  { %12622 = vmatprep.mubr.msk.f32.mxu1 %vm172_vm0, %v14165_v43 }
 0x531   :  { %12623 = vmatmul.mubr.msk.f32.vlgmr.msra.gmra.mxu1 %vm172_vm0, %v14159_v40 }
 0x5f1   :  { %v12624_v45 = vpop.f32.mrf.mxu1 }
 0x5f2   :  { %v14174_v46 = vadd.f32 %v12624_v45, %v11644_v44 }
 0x5f3   :  { %v407_v47 = vpop.f32.mrf.mxu1 }
 0x5f4   :  { %v14176_v48 = vadd.f32 %v11644_v44, %v407_v47  ;;  %420 = vrot.lane.b32.xlu0 %v14174_v46, %s13950_s21 }
 0x5f6   :  { %418 = vrot.lane.b32.xlu1 %v14176_v48, %s13950_s21  ;;  %12629 = vmatprep.mubr.msk.f32.mxu1 %vm422_vm5, %v14176_v48 }
 0x666   :  { %v421_v49 = vpop.permute.xlu0 %420 }
 0x667   :  { %12625 = vmatprep.subr.msk.mxu1 %vm422_vm5, %v421_v49 }
 0x668   :  { %12626 = vmatpush3.xpose.msk.msra.mxu1 %vm422_vm5, %v421_v49  ;;  %v419_v50 = vpop.permute.xlu1 %418 }
 0x669   :  { %12627 = vmatprep.subr.msk.mxu1 %vm422_vm5, %v419_v50 }
 0x66c   :  { %12628 = vmatpush3.xpose.msk.msra.mxu1 %vm422_vm5, %v419_v50 }
 0x66f   :  { %12630 = vmatmul.mubr.msk.f32.vlgmr.msra.gmra.mxu1 %vm422_vm5, %v14174_v46 }
 0x72f   :  { %v12631_v4 = vpop.f32.mrf.mxu1 }
 0x730   :  { %v507_v7 = vmul.f32 0.35355338, %v12631_v4 }
 0x731   :  { %v497_v8 = vpop.f32.mrf.mxu1 }
 0x732   :  { %v506_v10 = vmul.f32 0.35355338, %v497_v8  ;;  %v509_v11 = vadd.f32 %v507_v7, %v14190_v6 }
 0x734   :  { %v515_v12 = vsel %vm514_vm8, %v509_v11, -inf  ;;  %v508_v13 = vadd.f32 %v506_v10, %v14192_v9 }
 0x735   :  { %516 = vmax.xlane.f32.xlu0 %v515_v12 }
 0x736   :  { %v511_v14 = vsel %vm510_vm9, %v508_v13, -inf }
 0x737   :  { %512 = vmax.xlane.f32.xlu1 %v511_v14 }
 0x748   :  { %534 = vrot.lane.b32.xlu1 %v14176_v48, %s13952_s22 }
 0x74b   :  { %536 = vrot.lane.b32.xlu0 %v14174_v46, %s13952_s22 }
 0x74c   :  { %629 = vrot.lane.b32.xlu1 %v14174_v46, %s13953_s23 }
 0x750   :  { %627 = vrot.lane.b32.xlu1 %v14176_v48, %s13953_s23 }
 0x7be   :  { %v517_v15 = vpop.xlane.xlu0 %516 }
 0x7bf   :  { %v519_v16 = vsub.f32 %v509_v11, %v517_v15 }
 0x7c0   :  { %v513_v17 = vpop.xlane.xlu1 %512 }
 0x7c1   :  { %v522_v18 = vmul.f32 1.442695, %v519_v16  ;;  %v518_v19 = vsub.f32 %v508_v13, %v513_v17 }
 0x7c2   :  { %v537_v20 = vpop.permute.xlu0 %536 }
 0x7c3   :  { %13622 = vpow2.f32 %v522_v18  ;;  %v520_v21 = vmul.f32 1.442695, %v518_v19  ;;  %12632 = vmatprep.subr.msk.mxu1 %vm545_vm10, %v537_v20 }
 0x7c4   :  { %12633 = vmatpush3.msk.msra.mxu1 %vm545_vm10, %v537_v20  ;;  %v535_v22 = vpop.permute.xlu1 %534 }
 0x7c5   :  { %13624 = vpow2.f32 %v520_v21  ;;  %12634 = vmatprep.subr.mxu1 %v535_v22 }
 0x7c6   :  { %12635 = vmatpush3.msra.mxu1 %v535_v22 }
 0x7c8   :  { %v630_v23 = vpop.permute.xlu1 %629 }
 0x7c9   :  { %12639 = vmatprep.subr.msk.mxu1 %vm422_vm5, %v630_v23 }
 0x7cc   :  { %v628_v28 = vpop.permute.xlu1 %627 }
 0x7d0   :  { %v13623_v24 = vpop.eup %13622 }
 0x7d1   :  { %v527_v25 = vsel %vm514_vm8, %v13623_v24, 0.0 }
 0x7d2   :  { %v13625_v26 = vpop.eup %13624  ;;  %528 = vadd.xlane.f32.xlu1 %v527_v25 }
 0x7d3   :  { %v524_v27 = vsel %vm510_vm9, %v13625_v26, 0.0 }
 0x7d4   :  { %525 = vadd.xlane.f32.xlu0 %v524_v27 }
 0x7e3   :  { %623 = vrot.lane.b32.xlu1 %v14176_v48, %s13954_s24 }
 0x7e7   :  { %832 = vrot.lane.b32.xlu1 %v14176_v48, %s13955_s25 }
 0x7ea   :  { %834 = vrot.lane.b32.xlu0 %v14174_v46, %s13955_s25 }
 0x7eb   :  { %830 = vrot.lane.b32.xlu1 %v14174_v46, %s13956_s26 }
 0x7ee   :  { %625 = vrot.lane.b32.xlu0 %v14174_v46, %s13954_s24 }
 0x7f2   :  { %828 = vrot.lane.b32.xlu0 %v14176_v48, %s13956_s26 }
 0x85b   :  { %v529_v29 = vpop.xlane.xlu1 %528 }
 0x85c   :  { %13626 = vrcp.f32 %v529_v29 }
 0x85d   :  { %v526_v30 = vpop.xlane.xlu0 %525 }
 0x85e   :  { %13628 = vrcp.f32 %v526_v30 }
 0x85f   :  { %v624_v31 = vpop.permute.xlu1 %623 }
 0x861   :  { %v835_v32 = vpop.permute.xlu0 %834 }
 0x862   :  { %12653 = vmatprep.subr.msk.mxu0 %vm422_vm5, %v835_v32 }
 0x863   :  { %12654 = vmatpush3.xpose.msk.msra.mxu0 %vm422_vm5, %v835_v32  ;;  %v833_v33 = vpop.permute.xlu1 %832 }
 0x864   :  { %12655 = vmatprep.subr.msk.mxu0 %vm422_vm5, %v833_v33 }
 0x865   :  { %v626_v34 = vpop.permute.xlu0 %625 }
 0x867   :  { %12656 = vmatpush3.xpose.msk.msra.mxu0 %vm422_vm5, %v833_v33  ;;  %v831_v37 = vpop.permute.xlu1 %830 }
 0x869   :  { %v829_v35 = vpop.permute.xlu0 %828  ;;  %v13627_v36 = vpop.eup %13626 }
 0x86a   :  { %12657 = vmatprep.mubr.msk.f32.mxu0 %vm422_vm5, %v829_v35  ;;  %v533_v41 = vmul.f32 %v13627_v36, %v13623_v24 }
 0x86b   :  { %v13629_v38 = vpop.eup %13628  ;;  %12658 = vmatmul.mubr.msk.f32.vlgmr.msra.gmra.mxu0 %vm422_vm5, %v831_v37 }
 0x86c   :  { %v531_v39 = vmul.f32 %v13629_v38, %v13625_v26 }
 0x86e   :  { %12636 = vmatprep.mubr.msk.f32.mxu1 %vm510_vm9, %v531_v39 }
 0x86f   :  { %12637 = vmatmul.mubr.msk.f32.vlgmr.msra.gmra.mxu1 %vm510_vm9, %v533_v41 }
 0x870   :  { %12640 = vmatpush3.xpose.msk.msra.mxu1 %vm422_vm5, %v630_v23  ;;  %12643 = vmatprep.mubr.msk.f32.mxu1 %vm422_vm5, %v624_v31 }
 0x871   :  { %12641 = vmatprep.subr.msk.mxu1 %vm422_vm5, %v628_v28 }
 0x874   :  { %12642 = vmatpush3.xpose.msk.msra.mxu1 %vm422_vm5, %v628_v28 }
 0x877   :  { %12644 = vmatmul.mubr.msk.f32.vlgmr.msra.gmra.mxu1 %vm422_vm5, %v626_v34 }
 0x92b   :  { %v12659_v44 = vpop.f32.mrf.mxu0 }
 0x92c   :  { %v920_v57 = vmul.f32 0.35355338, %v12659_v44 }
 0x92d   :  { %v910_v47 = vpop.f32.mrf.mxu0 }
 0x92e   :  { %v919_v52 = vmul.f32 0.35355338, %v910_v47  ;;  %v922_v62 = vadd.f32 %v920_v57, %v14190_v6 }
 0x92f   :  { %v14236_v42 = vpop.f32.mrf.mxu1 }
 0x930   :  { %v921_v59 = vadd.f32 %v919_v52, %v14192_v9  ;;  %v926_v63 = vsel %vm514_vm8, %v922_v62, -inf }
 0x931   :  { %v14238_v45 = vpop.f32.mrf.mxu1 }
 0x932   :  { %v923_v61 = vsel %vm510_vm9, %v921_v59, -inf }
 0x937   :  { %v12645_v49 = vpop.f32.mrf.mxu1 }
 0x938   :  { %v715_v50 = vmul.f32 0.35355338, %v12645_v49 }
 0x939   :  { %v705_v51 = vpop.f32.mrf.mxu1 }
 0x93a   :  { %v714_v53 = vmul.f32 0.35355338, %v705_v51  ;;  %v717_v54 = vadd.f32 %v715_v50, %v14190_v6 }
 0x93c   :  { %v721_v55 = vsel %vm514_vm8, %v717_v54, -inf  ;;  %v716_v56 = vadd.f32 %v714_v53, %v14192_v9 }
 0x93d   :  { %722 = vmax.xlane.f32.xlu1 %v721_v55 }
 0x93e   :  { %v718_v58 = vsel %vm510_vm9, %v716_v56, -inf }
 0x93f   :  { %719 = vmax.xlane.f32.xlu0 %v718_v58 }
 0x943   :  { %924 = vmax.xlane.f32.xlu0 %v923_v61 }
 0x947   :  { %927 = vmax.xlane.f32.xlu0 %v926_v63 }
 0x9c6   :  { %v723_v2 = vpop.xlane.xlu1 %722 }
 0x9c7   :  { %v725_v5 = vsub.f32 %v717_v54, %v723_v2 }
 0x9c8   :  { %v720_v0 = vpop.xlane.xlu0 %719 }
 0x9c9   :  { %v724_v1 = vsub.f32 %v716_v56, %v720_v0  ;;  %v728_v12 = vmul.f32 1.442695, %v725_v5 }
 0x9cb   :  { %v726_v7 = vmul.f32 1.442695, %v724_v1 }
 0x9cc   :  { %v925_v3 = vpop.xlane.xlu0 %924 }
 0x9cd   :  { %v929_v4 = vsub.f32 %v921_v59, %v925_v3 }
 0x9cf   :  { %v931_v8 = vmul.f32 1.442695, %v929_v4 }
 0x9d0   :  { %v928_v10 = vpop.xlane.xlu0 %927 }
 0x9d1   :  { %13630 = vpow2.f32 %v931_v8  ;;  %v930_v11 = vsub.f32 %v922_v62, %v928_v10 }
 0x9d2   :  { %13632 = vpow2.f32 %v726_v7 }
 0x9d3   :  { %v933_v13 = vmul.f32 1.442695, %v930_v11 }
 0x9d5   :  { %13634 = vpow2.f32 %v933_v13 }
 0x9d6   :  { %13636 = vpow2.f32 %v728_v12 }
 0x9de   :  { %v13631_v14 = vpop.eup %13630 }
 0x9df   :  { %v935_v15 = vsel %vm510_vm9, %v13631_v14, 0.0  ;;  %v13633_v16 = vpop.eup %13632 }
 0x9e0   :  { %936 = vadd.xlane.f32.xlu0 %v935_v15  ;;  %v730_v18 = vsel %vm510_vm9, %v13633_v16, 0.0 }
 0x9e2   :  { %v13635_v17 = vpop.eup %13634 }
 0x9e3   :  { %v938_v19 = vsel %vm514_vm8, %v13635_v17, 0.0  ;;  %v13637_v20 = vpop.eup %13636 }
 0x9e4   :  { %731 = vadd.xlane.f32.xlu0 %v730_v18  ;;  %939 = vadd.xlane.f32.xlu1 %v938_v19  ;;  %v733_v21 = vsel %vm514_vm8, %v13637_v20, 0.0  ;;  %v1270_v18 = vld [vmem:[%s16466_s2 + $0x1c0] sm:$0xff] }
 0x9e8   :  { %734 = vadd.xlane.f32.xlu1 %v733_v21 }
 0x9f9   :  { %740 = vrot.lane.b32.xlu1 %v14176_v48, %s13957_s27 }
 0x9fa   :  { %742 = vrot.lane.b32.xlu0 %v14174_v46, %s13957_s27 }
 0x9fd   :  { %947 = vrot.lane.b32.xlu1 %v14174_v46, %s13958_s28 }
 0x9fe   :  { %1039 = vrot.lane.b32.xlu0 %v14174_v46, %s13959_s29 }
 0xa01   :  { %945 = vrot.lane.b32.xlu1 %v14176_v48, %s13958_s28 }
 0xa02   :  { %1033 = vrot.lane.b32.xlu0 %v14176_v48, %s13960_s30 }
 0xa05   :  { %1037 = vrot.lane.b32.xlu1 %v14176_v48, %s13959_s29 }
 0xa09   :  { %1035 = vrot.lane.b32.xlu1 %v14174_v46, %s13960_s30 }
 0xa69   :  { %v937_v22 = vpop.xlane.xlu0 %936 }
 0xa6d   :  { %v732_v23 = vpop.xlane.xlu0 %731  ;;  %v940_v24 = vpop.xlane.xlu1 %939 }
 0xa6e   :  { %13638 = vrcp.f32 %v732_v23 }
 0xa6f   :  { %13640 = vrcp.f32 %v937_v22 }
 0xa71   :  { %v743_v25 = vpop.permute.xlu0 %742  ;;  %v735_v26 = vpop.xlane.xlu1 %734 }
 0xa72   :  { %13642 = vrcp.f32 %v735_v26  ;;  %12646 = vmatprep.subr.msk.mxu1 %vm545_vm10, %v743_v25 }
 0xa73   :  { %12647 = vmatpush3.msk.msra.mxu1 %vm545_vm10, %v743_v25  ;;  %13644 = vrcp.f32 %v940_v24 }
 0xa75   :  { %v741_v27 = vpop.permute.xlu1 %740  ;;  %v1040_v33 = vpop.permute.xlu0 %1039 }
 0xa76   :  { %12648 = vmatprep.subr.mxu1 %v741_v27 }
 0xa77   :  { %12649 = vmatpush3.msra.mxu1 %v741_v27 }
 0xa79   :  { %v948_v28 = vpop.permute.xlu1 %947  ;;  %v1034_v39 = vpop.permute.xlu0 %1033 }
 0xa7a   :  { %12660 = vmatprep.subr.msk.mxu1 %vm545_vm10, %v948_v28 }
 0xa7b   :  { %v13639_v29 = vpop.eup %13638 }
 0xa7c   :  { %v737_v30 = vmul.f32 %v13639_v29, %v13633_v16  ;;  %v13641_v31 = vpop.eup %13640  ;;  %v1272_v16 = vld [vmem:[%s16466_s2 + $0x1d0] sm:$0xff] }
 0xa7d   :  { %v946_v36 = vpop.permute.xlu1 %945  ;;  %v942_v37 = vmul.f32 %v13641_v31, %v13631_v14 }
 0xa7e   :  { %12650 = vmatprep.mubr.msk.f32.mxu1 %vm510_vm9, %v737_v30 }
 0xa7f   :  { %v13643_v32 = vpop.eup %13642 }
 0xa80   :  { %v739_v34 = vmul.f32 %v13643_v32, %v13637_v20  ;;  %v13645_v35 = vpop.eup %13644 }
 0xa81   :  { %v944_v38 = vmul.f32 %v13645_v35, %v13635_v17  ;;  %v1038_v41 = vpop.permute.xlu1 %1037  ;;  %v1271_v17 = vld [vmem:[%s16466_s2 + $0x1c8] sm:$0xff] }
 0xa82   :  { %12651 = vmatmul.mubr.msk.f32.vlgmr.msra.gmra.mxu1 %vm510_vm9, %v739_v34 }
 0xa83   :  { %12661 = vmatpush3.msk.msra.mxu1 %vm545_vm10, %v948_v28  ;;  %12664 = vmatprep.mubr.msk.f32.mxu1 %vm510_vm9, %v942_v37 }
 0xa84   :  { %12662 = vmatprep.subr.mxu1 %v946_v36 }
 0xa85   :  { %12663 = vmatpush3.msra.mxu1 %v946_v36  ;;  %v1036_v44 = vpop.permute.xlu1 %1035 }
 0xa86   :  { %12667 = vmatprep.subr.msk.mxu1 %vm422_vm5, %v1040_v33  ;;  %12665 = vmatmul.mubr.msk.f32.vlgmr.msra.gmra.mxu1 %vm510_vm9, %v944_v38 }
 0xa87   :  { %12668 = vmatpush3.xpose.msk.msra.mxu1 %vm422_vm5, %v1040_v33  ;;  %12671 = vmatprep.mubr.msk.f32.mxu1 %vm422_vm5, %v1034_v39 }
 0xa88   :  { %12669 = vmatprep.subr.msk.mxu1 %vm422_vm5, %v1038_v41 }
 0xa8b   :  { %12670 = vmatpush3.xpose.msk.msra.mxu1 %vm422_vm5, %v1038_v41 }
 0xa8e   :  { %12672 = vmatmul.mubr.msk.f32.vlgmr.msra.gmra.mxu1 %vm422_vm5, %v1036_v44 }
 0xb42   :  { %v12652_v47 = vpop.f32.mrf.mxu1 }
 0xb44   :  { %v819_v49 = vpop.f32.mrf.mxu1 }
 0xb46   :  { %v12666_v50 = vpop.f32.mrf.mxu1 }
 0xb48   :  { %v1024_v51 = vpop.f32.mrf.mxu1 }
 0xb4e   :  { %v12673_v52 = vpop.f32.mrf.mxu1 }
 0xb4f   :  { %v1125_v53 = vmul.f32 0.35355338, %v12673_v52 }
 0xb50   :  { %v1115_v54 = vpop.f32.mrf.mxu1 }
 0xb51   :  { %v1124_v55 = vmul.f32 0.35355338, %v1115_v54  ;;  %v1127_v56 = vadd.f32 %v1125_v53, %v14190_v6 }
 0xb53   :  { %v1131_v57 = vsel %vm514_vm8, %v1127_v56, -inf  ;;  %v1126_v58 = vadd.f32 %v1124_v55, %v14192_v9  ;;  %v1405_v55 = vld [vmem:[%s16469_s4 + $0x10] sm:$0xff] }
 0xb54   :  { %1132 = vmax.xlane.f32.xlu1 %v1131_v57  ;;  %v1403_v57 = vld [vmem:[%s16469_s4] sm:$0xff] }
 0xb55   :  { %v1128_v59 = vsel %vm510_vm9, %v1126_v58, -inf }
 0xb56   :  { %1129 = vmax.xlane.f32.xlu0 %v1128_v59  ;;  %v1501_v59 = vld [vmem:[%s16466_s2 + $0x210] sm:$0xff] }
 0xb65   :  { %1150 = vrot.lane.b32.xlu1 %v14176_v48, %s13961_s7 }
 0xb69   :  { %1240 = vrot.lane.b32.xlu1 %v819_v49, %s13962_s8 }
 0xb6d   :  { %1242 = vrot.lane.b32.xlu1 %v12652_v47, %s13962_s8 }
 0xb71   :  { %1250 = vrot.lane.b32.xlu1 %v12666_v50, %s13963_s0 }
 0xbdd   :  { %v1133_v61 = vpop.xlane.xlu1 %1132 }
 0xbde   :  { %v1135_v62 = vsub.f32 %v1127_v56, %v1133_v61  ;;  %v1404_v56 = vld [vmem:[%s16469_s4 + $0x8] sm:$0xff] }
 0xbdf   :  { %v1130_v63 = vpop.xlane.xlu0 %1129  ;;  %v1500_v61 = vld [vmem:[%s16466_s2 + $0x208] sm:$0xff] }
 0xbe0   :  { %v1138_v0 = vmul.f32 1.442695, %v1135_v62  ;;  %v1134_v1 = vsub.f32 %v1126_v58, %v1130_v63  ;;  %v1502_v58 = vld [vmem:[%s16466_s2 + $0x218] sm:$0xff]  ;;  %v1499_v62 = vld [vmem:[%s16466_s2 + $0x200] sm:$0xff] }
 0xbe1   :  { %v1151_v11 = vpop.permute.xlu1 %1150 }
 0xbe2   :  { %13646 = vpow2.f32 %v1138_v0  ;;  %v1136_v2 = vmul.f32 1.442695, %v1134_v1 }
 0xbe4   :  { %13648 = vpow2.f32 %v1136_v2 }
 0xbe5   :  { %v1241_v21 = vpop.permute.xlu1 %1240 }
 0xbe6   :  { %v1262_v25 = vsel %vm422_vm5, %v14238_v45, %v1241_v21  ;;  %v11675_v45 = vld [vmem:[%s16467_s5 + $0x17] ss:$0 sm:$0xff] }
 0xbe9   :  { %v1243_v22 = vpop.permute.xlu1 %1242 }
 0xbea   :  { %v1263_v27 = vsel %vm422_vm5, %v14236_v42, %v1243_v22 }
 0xbed   :  { %v1251_v23 = vpop.permute.xlu1 %1250 }
 0xbee   :  { %v1266_v30 = vsel %vm1264_vm11, %v1263_v27, %v1251_v23 }
 0xbef   :  { %v13647_v3 = vpop.eup %13646 }
 0xbf0   :  { %v1143_v4 = vsel %vm514_vm8, %v13647_v3, 0.0 }
 0xbf1   :  { %v13649_v48 = vpop.eup %13648  ;;  %1144 = vadd.xlane.f32.xlu0 %v1143_v4 }
 0xbf2   :  { %v1140_v5 = vsel %vm510_vm9, %v13649_v48, 0.0 }
 0xbf5   :  { %1141 = vadd.xlane.f32.xlu0 %v1140_v5  ;;  %v11678_v5 = vld [vmem:[%s16467_s5 + $0x18] ss:$0 sm:$0xff] }
 0xc0b   :  { %1152 = vrot.lane.b32.xlu0 %v14174_v46, %s13961_s7  ;;  %v1273_v46 = vld [vmem:[%s16466_s2 + $0x1d8] sm:$0xff] }
 0xc0f   :  { %1248 = vrot.lane.b32.xlu0 %v1024_v51, %s13963_s0 }
 0xc7a   :  { %v1145_v7 = vpop.xlane.xlu0 %1144 }
 0xc7b   :  { %13650 = vrcp.f32 %v1145_v7 }
 0xc7e   :  { %v1142_v8 = vpop.xlane.xlu0 %1141 }
 0xc7f   :  { %13652 = vrcp.f32 %v1142_v8  ;;  %v11679_v8 = vld [vmem:[%s16467_s5 + $0x19] ss:$0 sm:$0xff] }
 0xc82   :  { %v1153_v10 = vpop.permute.xlu0 %1152 }
 0xc83   :  { %12674 = vmatprep.subr.msk.mxu0 %vm545_vm10, %v1153_v10 }
 0xc84   :  { %12675 = vmatpush3.msk.msra.mxu0 %vm545_vm10, %v1153_v10 }
 0xc85   :  { %12676 = vmatprep.subr.mxu0 %v1151_v11 }
 0xc86   :  { %12677 = vmatpush3.msra.mxu0 %v1151_v11  ;;  %v1249_v24 = vpop.permute.xlu0 %1248 }
 0xc87   :  { %12681 = vmatprep.subr.mxu0 %v1273_v46  ;;  %v1265_v28 = vsel %vm1264_vm11, %v1262_v25, %v1249_v24 }
 0xc88   :  { %v13651_v12 = vpop.eup %13650 }
 0xc89   :  { %v1149_v15 = vmul.f32 %v13651_v12, %v13647_v3 }
 0xc8c   :  { %v13653_v13 = vpop.eup %13652 }
 0xc8d   :  { %v1147_v14 = vmul.f32 %v13653_v13, %v13649_v48 }
 0xc8f   :  { %12678 = vmatprep.mubr.msk.f32.mxu0 %vm510_vm9, %v1147_v14 }
 0xc90   :  { %12679 = vmatmul.mubr.msk.f32.vlgmr.msra.gmra.mxu0 %vm510_vm9, %v1149_v15 }
 0xc91   :  { %12682 = vmatpush3.msra.mxu0 %v1273_v46  ;;  %v1498_v46 = vld [vmem:[%s16466_s2 + $0x1f8] sm:$0xff] }
 0xc92   :  { %12683 = vmatprep.subr.mxu0 %v1272_v16 }
 0xc93   :  { %12684 = vmatpush3.msra.mxu0 %v1272_v16  ;;  %v1497_v16 = vld [vmem:[%s16466_s2 + $0x1f0] sm:$0xff] }
 0xc94   :  { %12685 = vmatprep.subr.mxu0 %v1271_v17 }
 0xc95   :  { %12686 = vmatpush3.msra.mxu0 %v1271_v17  ;;  %v1496_v17 = vld [vmem:[%s16466_s2 + $0x1e8] sm:$0xff] }
 0xc96   :  { %12687 = vmatprep.subr.mxu0 %v1270_v18 }
 0xc97   :  { %12688 = vmatpush3.msra.mxu0 %v1270_v18  ;;  %v1495_v18 = vld [vmem:[%s16466_s2 + $0x1e0] sm:$0xff] }
 0xc98   :  { %12703 = vmatprep.subr.mxu0 %v1502_v58 }
 0xd50   :  { %v12680_v19 = vpop.f32.mrf.mxu0 }
 0xd51   :  { %1258 = vrot.lane.b32.xlu1 %v12680_v19, %s13964_s17  ;;  %v11680_v19 = vld [vmem:[%s16467_s5 + $0x1a] ss:$0 sm:$0xff] }
 0xd52   :  { %v1229_v20 = vpop.f32.mrf.mxu0 }
 0xd53   :  { %1256 = vrot.lane.b32.xlu0 %v1229_v20, %s13964_s17 }
 0xdc3   :  { %v1259_v26 = vpop.permute.xlu1 %1258 }
 0xdc4   :  { %v1269_v32 = vsel %vm1267_vm12, %v1266_v30, %v1259_v26  ;;  %v11683_v26 = vld [vmem:[%s16467_s5 + $0x1b] ss:$0 sm:$0xff] }
 0xdc5   :  { %v1257_v29 = vpop.permute.xlu0 %1256 }
 0xdc6   :  { %v1268_v31 = vsel %vm1267_vm12, %v1265_v28, %v1257_v29 }
 0xdc7   :  { %12689 = vmatprep.mubr.msk.f32.mxu0 %vm172_vm0, %v1268_v31 }
 0xdc8   :  { %12690 = vmatmul.mubr.msk.f32.vlgmr.msra.gmra.mxu0 %vm172_vm0, %v1269_v32 }
 0xdc9   :  { %12704 = vmatpush3.msra.mxu0 %v1502_v58  ;;  %v11686_v58 = vld [vmem:[%s16467_s5 + $0x1c] ss:$0 sm:$0xff] }
 0xdca   :  { %12705 = vmatprep.subr.mxu0 %v1501_v59 }
 0xdcb   :  { %12706 = vmatpush3.msra.mxu0 %v1501_v59 }
 0xdcc   :  { %12707 = vmatprep.subr.mxu0 %v1500_v61 }
 0xdcd   :  { %12708 = vmatpush3.msra.mxu0 %v1500_v61 }
 0xdce   :  { %12709 = vmatprep.subr.mxu0 %v1499_v62 }
 0xdcf   :  { %12710 = vmatpush3.msra.mxu0 %v1499_v62 }
 0xdd0   :  { %12711 = vmatprep.subr.mxu0 %v1498_v46 }
 0xdd1   :  { %12712 = vmatpush3.msra.mxu0 %v1498_v46 }
 0xdd2   :  { %12713 = vmatprep.subr.mxu0 %v1497_v16 }
 0xdd3   :  { %12714 = vmatpush3.msra.mxu0 %v1497_v16 }
 0xdd4   :  { %12715 = vmatprep.subr.mxu0 %v1496_v17 }
 0xdd5   :  { %12716 = vmatpush3.msra.mxu0 %v1496_v17 }
 0xdd6   :  { %12717 = vmatprep.subr.mxu0 %v1495_v18 }
 0xdd7   :  { %12718 = vmatpush3.msra.mxu0 %v1495_v18 }
 0xe88   :  { %v12691_v33 = vpop.f32.mrf.mxu0 }
 0xe89   :  { %v1357_v34 = vadd.f32 %v12691_v33, %v11675_v45 }
 0xe8a   :  { %v1351_v42 = vpop.f32.mrf.mxu0 }
 0xe8b   :  { %v1352_v35 = vadd.f32 %v11675_v45, %v1351_v42  ;;  %v1361_v36 = vadd.f32 %v1357_v34, %v14159_v40 }
 0xe8d   :  { %v1368_v37 = vsel %vm1367_vm13, %v1361_v36, 0.0  ;;  %v1360_v38 = vadd.f32 %v1352_v35, %v14165_v43  ;;  %v1406_v43 = vld [vmem:[%s16469_s4 + $0x18] sm:$0xff] }
 0xe8e   :  { %1369 = vadd.xlane.f32.xlu1 %v1368_v37  ;;  %12692 = vmatprep.subr.mxu1 %v1406_v43 }
 0xe8f   :  { %v1364_v39 = vsel %vm172_vm0, %v1360_v38, 0.0  ;;  %12693 = vmatpush3.msra.mxu1 %v1406_v43 }
 0xe90   :  { %1365 = vadd.xlane.f32.xlu0 %v1364_v39  ;;  %12694 = vmatprep.subr.mxu1 %v1405_v55 }
 0xe91   :  { %12695 = vmatpush3.msra.mxu1 %v1405_v55 }
 0xe92   :  { %12696 = vmatprep.subr.mxu1 %v1404_v56 }
 0xe93   :  { %12697 = vmatpush3.msra.mxu1 %v1404_v56 }
 0xe94   :  { %12698 = vmatprep.subr.mxu1 %v1403_v57 }
 0xe95   :  { %12699 = vmatpush3.msra.mxu1 %v1403_v57 }
 0xf17   :  { %v1370_v41 = vpop.xlane.xlu1 %1369 }
 0xf18   :  { %v1372_v44 = vmul.f32 0.03125, %v1370_v41 }
 0xf19   :  { %v1366_v47 = vpop.xlane.xlu0 %1365 }
 0xf1a   :  { %v1371_v49 = vmul.f32 0.03125, %v1366_v47  ;;  %v1374_v50 = vsub.f32 %v1361_v36, %v1372_v44 }
 0xf1c   :  { %v1373_v51 = vsub.f32 %v1360_v38, %v1371_v49  ;;  %v1376_v54 = vmul.f32 %v1374_v50, %v1374_v50  ;;  %v1635_v49 = vld [vmem:[%s16468_s3 + $0x38] sm:$0xff] }
 0xf1d   :  { %12722 = vmatprep.subr.mxu1 %v1635_v49 }
 0xf1e   :  { %v1375_v52 = vmul.f32 %v1373_v51, %v1373_v51  ;;  %v1380_v40 = vsel %vm1367_vm13, %v1376_v54, 0.0 }
 0xf20   :  { %v1377_v53 = vsel %vm172_vm0, %v1375_v52, 0.0  ;;  %v1632_v52 = vld [vmem:[%s16468_s3 + $0x20] sm:$0xff] }
 0xf21   :  { %1378 = vadd.xlane.f32.xlu0 %v1377_v53 }
 0xf25   :  { %1381 = vadd.xlane.f32.xlu0 %v1380_v40 }
 0xfaa   :  { %v1379_v63 = vpop.xlane.xlu0 %1378 }
 0xfab   :  { %v1383_v0 = vmul.f32 0.03125, %v1379_v63 }
 0xfad   :  { %v1385_v1 = vadd.f32 1e-05, %v1383_v0  ;;  %v11687_v0 = vld [vmem:[%s16467_s5 + $0x1d] ss:$0 sm:$0xff] }
 0xfae   :  { %v1382_v2 = vpop.xlane.xlu0 %1381 }
 0xfaf   :  { %13654 = vrsqrt.f32 %v1385_v1  ;;  %v1384_v3 = vmul.f32 0.03125, %v1382_v2 }
 0xfb1   :  { %v1386_v4 = vadd.f32 1e-05, %v1384_v3 }
 0xfb3   :  { %13656 = vrsqrt.f32 %v1386_v4  ;;  %v11688_v4 = vld [vmem:[%s16467_s5 + $0x1e] ss:$0 sm:$0xff] }
 0xfbc   :  { %v13655_v48 = vpop.eup %13654 }
 0xfbd   :  { %v1389_v7 = vmul.f32 %v13655_v48, %v1373_v51  ;;  %v1633_v51 = vld [vmem:[%s16468_s3 + $0x28] sm:$0xff] }
 0xfbf   :  { %v1395_v10 = vmul.f32 %v11678_v5, %v1389_v7 }
 0xfc0   :  { %v13657_v11 = vpop.eup %13656 }
 0xfc1   :  { %v1390_v12 = vmul.f32 %v13657_v11, %v1374_v50  ;;  %v1401_v13 = vadd.f32 %v11679_v8, %v1395_v10  ;;  %v1634_v50 = vld [vmem:[%s16468_s3 + $0x30] sm:$0xff] }
 0xfc3   :  { %v1396_v14 = vmul.f32 %v11678_v5, %v1390_v12  ;;  %12700 = vmatprep.mubr.msk.f32.mxu1 %vm172_vm0, %v1401_v13 }
 0xfc5   :  { %v1402_v15 = vadd.f32 %v11679_v8, %v1396_v14 }
 0xfc7   :  { %12701 = vmatmul.mubr.msk.f32.vlgmr.msra.gmra.mxu1 %vm172_vm0, %v1402_v15 }
 0xfc8   :  { %12723 = vmatpush3.msra.mxu1 %v1635_v49 }
 0xfc9   :  { %12724 = vmatprep.subr.mxu1 %v1634_v50 }
 0xfca   :  { %12725 = vmatpush3.msra.mxu1 %v1634_v50 }
 0xfcb   :  { %12726 = vmatprep.subr.mxu1 %v1633_v51 }
 0xfcc   :  { %12727 = vmatpush3.msra.mxu1 %v1633_v51 }
 0xfcd   :  { %12728 = vmatprep.subr.mxu1 %v1632_v52 }
 0xfce   :  { %12729 = vmatpush3.msra.mxu1 %v1632_v52 }
0x1087   :  { %v12702_v20 = vpop.f32.mrf.mxu1 }
0x1088   :  { %v1490_v21 = vadd.f32 %v12702_v20, %v11680_v19 }
0x1089   :  { %v1484_v22 = vpop.f32.mrf.mxu1 }
0x108a   :  { %v1485_v23 = vadd.f32 %v11680_v19, %v1484_v22  ;;  %v1494_v25 = vmax.f32 %v1490_v21, 0.0 }
0x108c   :  { %v1493_v24 = vmax.f32 %v1485_v23, 0.0 }
0x108e   :  { %12719 = vmatprep.mubr.msk.f32.mxu0 %vm1508_vm14, %v1493_v24 }
0x108f   :  { %12720 = vmatmul.mubr.msk.f32.vlgmr.msra.gmra.mxu0 %vm1508_vm14, %v1494_v25 }
0x114f   :  { %v12721_v27 = vpop.f32.mrf.mxu0 }
0x1150   :  { %v1587_v28 = vadd.f32 %v12721_v27, %v11683_v26 }
0x1151   :  { %v1581_v29 = vpop.f32.mrf.mxu0 }
0x1152   :  { %v1582_v30 = vadd.f32 %v11683_v26, %v1581_v29  ;;  %v1591_v31 = vadd.f32 %v1587_v28, %v1402_v15 }
0x1154   :  { %v1597_v32 = vsel %vm1367_vm13, %v1591_v31, 0.0  ;;  %v1590_v45 = vadd.f32 %v1582_v30, %v1401_v13 }
0x1155   :  { %1598 = vadd.xlane.f32.xlu1 %v1597_v32 }
0x1156   :  { %v1594_v33 = vsel %vm172_vm0, %v1590_v45, 0.0 }
0x1157   :  { %1595 = vadd.xlane.f32.xlu0 %v1594_v33 }
0x11de   :  { %v1599_v34 = vpop.xlane.xlu1 %1598 }
0x11df   :  { %v1601_v42 = vmul.f32 0.03125, %v1599_v34 }
0x11e0   :  { %v1596_v35 = vpop.xlane.xlu0 %1595 }
0x11e1   :  { %v1603_v36 = vsub.f32 %v1591_v31, %v1601_v42  ;;  %v1600_v37 = vmul.f32 0.03125, %v1596_v35 }
0x11e3   :  { %v1602_v38 = vsub.f32 %v1590_v45, %v1600_v37  ;;  %v1605_v39 = vmul.f32 %v1603_v36, %v1603_v36 }
0x11e5   :  { %v1609_v41 = vsel %vm1367_vm13, %v1605_v39, 0.0  ;;  %v1604_v44 = vmul.f32 %v1602_v38, %v1602_v38 }
0x11e6   :  { %1610 = vadd.xlane.f32.xlu1 %v1609_v41 }
0x11e7   :  { %v1606_v47 = vsel %vm172_vm0, %v1604_v44, 0.0 }
0x11e8   :  { %1607 = vadd.xlane.f32.xlu0 %v1606_v47 }
0x126f   :  { %v1611_v53 = vpop.xlane.xlu1 %1610 }
0x1270   :  { %v1613_v54 = vmul.f32 0.03125, %v1611_v53 }
0x1271   :  { %v1608_v40 = vpop.xlane.xlu0 %1607 }
0x1272   :  { %v1615_v43 = vadd.f32 1e-05, %v1613_v54  ;;  %v1612_v55 = vmul.f32 0.03125, %v1608_v40 }
0x1274   :  { %13658 = vrsqrt.f32 %v1615_v43  ;;  %v1614_v56 = vadd.f32 1e-05, %v1612_v55 }
0x1276   :  { %13660 = vrsqrt.f32 %v1614_v56 }
0x1281   :  { %v13659_v57 = vpop.eup %13658 }
0x1282   :  { %v1619_v59 = vmul.f32 %v13659_v57, %v1603_v36 }
0x1283   :  { %v13661_v61 = vpop.eup %13660 }
0x1284   :  { %v1618_v62 = vmul.f32 %v13661_v61, %v1602_v38  ;;  %v1625_v63 = vmul.f32 %v11686_v58, %v1619_v59 }
0x1286   :  { %v1624_v1 = vmul.f32 %v11686_v58, %v1618_v62  ;;  %v14409_v3 = vadd.f32 %v11687_v0, %v1625_v63 }
0x1288   :  { %v14407_v2 = vadd.f32 %v11687_v0, %v1624_v1 }
0x128a   :  { %12730 = vmatprep.mubr.msk.f32.mxu1 %vm172_vm0, %v14407_v2 }
0x128b   :  { %12731 = vmatmul.mubr.msk.f32.vlgmr.msra.gmra.mxu1 %vm172_vm0, %v14409_v3 }
0x134b   :  { %v12732_v48 = vpop.f32.mrf.mxu1 }
0x134c   :  { %v14418_v5 = vadd.f32 %v12732_v48, %v11688_v4 }
0x134d   :  { %v1713_v7 = vpop.f32.mrf.mxu1 }
0x134e   :  { %v14420_v8 = vadd.f32 %v11688_v4, %v1713_v7  ;;  %1726 = vrot.lane.b32.xlu0 %v14418_v5, %s13950_s21 }
0x1350   :  { %1724 = vrot.lane.b32.xlu1 %v14420_v8, %s13950_s21  ;;  %12737 = vmatprep.mubr.msk.f32.mxu1 %vm422_vm5, %v14420_v8 }
0x1352   :  { %1925 = vrot.lane.b32.xlu0 %v14420_v8, %s13954_s24 }
0x1354   :  { %1931 = vrot.lane.b32.xlu1 %v14418_v5, %s13953_s23 }
0x1358   :  { %1929 = vrot.lane.b32.xlu1 %v14420_v8, %s13953_s23 }
0x135c   :  { %1927 = vrot.lane.b32.xlu1 %v14418_v5, %s13954_s24 }
0x13c0   :  { %v1727_v10 = vpop.permute.xlu0 %1726 }
0x13c1   :  { %12733 = vmatprep.subr.msk.mxu1 %vm422_vm5, %v1727_v10 }
0x13c2   :  { %12734 = vmatpush3.xpose.msk.msra.mxu1 %vm422_vm5, %v1727_v10  ;;  %v1725_v11 = vpop.permute.xlu1 %1724 }
0x13c3   :  { %12735 = vmatprep.subr.msk.mxu1 %vm422_vm5, %v1725_v11 }
0x13c4   :  { %v1926_v13 = vpop.permute.xlu0 %1925 }
0x13c6   :  { %12736 = vmatpush3.xpose.msk.msra.mxu1 %vm422_vm5, %v1725_v11  ;;  %v1932_v12 = vpop.permute.xlu1 %1931 }
0x13c7   :  { %12747 = vmatprep.subr.msk.mxu1 %vm422_vm5, %v1932_v12 }
0x13c9   :  { %12738 = vmatmul.mubr.msk.f32.vlgmr.msra.gmra.mxu1 %vm422_vm5, %v14418_v5 }
0x13ca   :  { %v1930_v14 = vpop.permute.xlu1 %1929  ;;  %12748 = vmatpush3.xpose.msk.msra.mxu1 %vm422_vm5, %v1932_v12  ;;  %12751 = vmatprep.mubr.msk.f32.mxu1 %vm422_vm5, %v1926_v13 }
0x13cb   :  { %12749 = vmatprep.subr.msk.mxu1 %vm422_vm5, %v1930_v14 }
0x13ce   :  { %12750 = vmatpush3.xpose.msk.msra.mxu1 %vm422_vm5, %v1930_v14  ;;  %v1928_v15 = vpop.permute.xlu1 %1927 }
0x13d1   :  { %12752 = vmatmul.mubr.msk.f32.vlgmr.msra.gmra.mxu1 %vm422_vm5, %v1928_v15 }
0x1489   :  { %v12739_v46 = vpop.f32.mrf.mxu1 }
0x148a   :  { %v1812_v16 = vmul.f32 0.35355338, %v12739_v46 }
0x148b   :  { %v1802_v17 = vpop.f32.mrf.mxu1 }
0x148c   :  { %v1811_v18 = vmul.f32 0.35355338, %v1802_v17  ;;  %v1814_v19 = vadd.f32 %v1812_v16, %v14190_v6 }
0x148e   :  { %v1818_v20 = vsel %vm514_vm8, %v1814_v19, -inf  ;;  %v1813_v21 = vadd.f32 %v1811_v18, %v14192_v9 }
0x148f   :  { %1819 = vmax.xlane.f32.xlu1 %v1818_v20 }
0x1490   :  { %v1815_v22 = vsel %vm510_vm9, %v1813_v21, -inf }
0x1491   :  { %v12753_v23 = vpop.f32.mrf.mxu1  ;;  %1816 = vmax.xlane.f32.xlu0 %v1815_v22 }
0x1492   :  { %v2017_v25 = vmul.f32 0.35355338, %v12753_v23 }
0x1493   :  { %v2007_v24 = vpop.f32.mrf.mxu1 }
0x1494   :  { %v2016_v26 = vmul.f32 0.35355338, %v2007_v24  ;;  %v2019_v29 = vadd.f32 %v2017_v25, %v14190_v6 }
0x1496   :  { %v2018_v27 = vadd.f32 %v2016_v26, %v14192_v9  ;;  %v2023_v30 = vsel %vm514_vm8, %v2019_v29, -inf }
0x1498   :  { %v2020_v28 = vsel %vm510_vm9, %v2018_v27, -inf }
0x1499   :  { %2021 = vmax.xlane.f32.xlu0 %v2020_v28 }
0x149d   :  { %2024 = vmax.xlane.f32.xlu0 %v2023_v30 }
0x14a0   :  { %1837 = vrot.lane.b32.xlu1 %v14420_v8, %s13952_s22 }
0x14a4   :  { %2044 = vrot.lane.b32.xlu1 %v14418_v5, %s13957_s27 }
0x14a8   :  { %2042 = vrot.lane.b32.xlu1 %v14420_v8, %s13957_s27 }
0x14b3   :  { %1839 = vrot.lane.b32.xlu0 %v14418_v5, %s13952_s22 }
0x1518   :  { %v1820_v31 = vpop.xlane.xlu1 %1819 }
0x1519   :  { %v1822_v32 = vsub.f32 %v1814_v19, %v1820_v31 }
0x151a   :  { %v1817_v45 = vpop.xlane.xlu0 %1816 }
0x151b   :  { %v1825_v33 = vmul.f32 1.442695, %v1822_v32  ;;  %v1821_v34 = vsub.f32 %v1813_v21, %v1817_v45 }
0x151c   :  { %v1838_v41 = vpop.permute.xlu1 %1837 }
0x151d   :  { %13662 = vpow2.f32 %v1825_v33  ;;  %v1823_v42 = vmul.f32 1.442695, %v1821_v34 }
0x151f   :  { %13664 = vpow2.f32 %v1823_v42 }
0x1520   :  { %v2045_v53 = vpop.permute.xlu1 %2044 }
0x1522   :  { %v2022_v35 = vpop.xlane.xlu0 %2021 }
0x1523   :  { %v2026_v36 = vsub.f32 %v2018_v27, %v2022_v35 }
0x1524   :  { %v2043_v56 = vpop.permute.xlu1 %2042 }
0x1525   :  { %v2028_v37 = vmul.f32 1.442695, %v2026_v36 }
0x1526   :  { %v2025_v38 = vpop.xlane.xlu0 %2024 }
0x1527   :  { %13666 = vpow2.f32 %v2028_v37  ;;  %v2027_v39 = vsub.f32 %v2019_v29, %v2025_v38 }
0x1529   :  { %v2030_v44 = vmul.f32 1.442695, %v2027_v39 }
0x152a   :  { %v13663_v47 = vpop.eup %13662  ;;  %v1840_v49 = vpop.permute.xlu0 %1839 }
0x152b   :  { %13668 = vpow2.f32 %v2030_v44  ;;  %12740 = vmatprep.subr.msk.mxu0 %vm545_vm10, %v1840_v49  ;;  %v1830_v50 = vsel %vm514_vm8, %v13663_v47, 0.0 }
0x152c   :  { %v13665_v51 = vpop.eup %13664  ;;  %1831 = vadd.xlane.f32.xlu1 %v1830_v50  ;;  %12741 = vmatpush3.msk.msra.mxu0 %vm545_vm10, %v1840_v49 }
0x152d   :  { %12742 = vmatprep.subr.mxu0 %v1838_v41  ;;  %v1827_v52 = vsel %vm510_vm9, %v13665_v51, 0.0 }
0x152e   :  { %1828 = vadd.xlane.f32.xlu0 %v1827_v52  ;;  %12743 = vmatpush3.msra.mxu0 %v1838_v41 }
0x152f   :  { %12754 = vmatprep.subr.msk.mxu0 %vm545_vm10, %v2045_v53 }
0x1534   :  { %v13667_v54 = vpop.eup %13666 }
0x1535   :  { %v2032_v40 = vsel %vm510_vm9, %v13667_v54, 0.0 }
0x1536   :  { %2033 = vadd.xlane.f32.xlu0 %v2032_v40 }
0x1538   :  { %v13669_v43 = vpop.eup %13668 }
0x1539   :  { %v2035_v55 = vsel %vm514_vm8, %v13669_v43, 0.0 }
0x153a   :  { %2036 = vadd.xlane.f32.xlu1 %v2035_v55 }
0x154b   :  { %2134 = vrot.lane.b32.xlu1 %v14420_v8, %s13955_s25 }
0x154c   :  { %2136 = vrot.lane.b32.xlu0 %v14418_v5, %s13955_s25 }
0x154f   :  { %2132 = vrot.lane.b32.xlu1 %v14418_v5, %s13956_s26 }
0x1550   :  { %2130 = vrot.lane.b32.xlu0 %v14420_v8, %s13956_s26 }
0x15b5   :  { %v1832_v57 = vpop.xlane.xlu1 %1831 }
0x15b6   :  { %13670 = vrcp.f32 %v1832_v57 }
0x15b7   :  { %v1829_v58 = vpop.xlane.xlu0 %1828 }
0x15b8   :  { %13672 = vrcp.f32 %v1829_v58 }
0x15bf   :  { %v2034_v59 = vpop.xlane.xlu0 %2033 }
0x15c0   :  { %13674 = vrcp.f32 %v2034_v59 }
0x15c3   :  { %v2037_v61 = vpop.xlane.xlu1 %2036  ;;  %v13671_v62 = vpop.eup %13670 }
0x15c4   :  { %13676 = vrcp.f32 %v2037_v61  ;;  %v1836_v1 = vmul.f32 %v13671_v62, %v13663_v47  ;;  %v2137_v4 = vpop.permute.xlu0 %2136 }
0x15c5   :  { %v13673_v63 = vpop.eup %13672 }
0x15c6   :  { %v1834_v0 = vmul.f32 %v13673_v63, %v13665_v51 }
0x15c7   :  { %v2135_v13 = vpop.permute.xlu1 %2134 }
0x15c8   :  { %12744 = vmatprep.mubr.msk.f32.mxu0 %vm510_vm9, %v1834_v0  ;;  %v2131_v12 = vpop.permute.xlu0 %2130 }
0x15c9   :  { %12745 = vmatmul.mubr.msk.f32.vlgmr.msra.gmra.mxu0 %vm510_vm9, %v1836_v1 }
0x15ca   :  { %12755 = vmatpush3.msk.msra.mxu0 %vm545_vm10, %v2045_v53 }
0x15cb   :  { %12756 = vmatprep.subr.mxu0 %v2043_v56  ;;  %v2133_v14 = vpop.permute.xlu1 %2132 }
0x15cc   :  { %12757 = vmatpush3.msra.mxu0 %v2043_v56 }
0x15cd   :  { %v13675_v48 = vpop.eup %13674  ;;  %12761 = vmatprep.subr.msk.mxu0 %vm422_vm5, %v2137_v4 }
0x15ce   :  { %v2039_v7 = vmul.f32 %v13675_v48, %v13667_v54 }
0x15d0   :  { %12758 = vmatprep.mubr.msk.f32.mxu0 %vm510_vm9, %v2039_v7 }
0x15d1   :  { %v13677_v10 = vpop.eup %13676 }
0x15d2   :  { %v2041_v11 = vmul.f32 %v13677_v10, %v13669_v43 }
0x15d4   :  { %12759 = vmatmul.mubr.msk.f32.vlgmr.msra.gmra.mxu0 %vm510_vm9, %v2041_v11 }
0x15d5   :  { %12762 = vmatpush3.xpose.msk.msra.mxu0 %vm422_vm5, %v2137_v4  ;;  %12765 = vmatprep.mubr.msk.f32.mxu0 %vm422_vm5, %v2131_v12 }
0x15d6   :  { %12763 = vmatprep.subr.msk.mxu0 %vm422_vm5, %v2135_v13 }
0x15d9   :  { %12764 = vmatpush3.xpose.msk.msra.mxu0 %vm422_vm5, %v2135_v13 }
0x15dc   :  { %12766 = vmatmul.mubr.msk.f32.vlgmr.msra.gmra.mxu0 %vm422_vm5, %v2133_v14 }
0x1689   :  { %v14490_v15 = vpop.f32.mrf.mxu0 }
0x168b   :  { %v14492_v46 = vpop.f32.mrf.mxu0 }
0x1694   :  { %v14494_v16 = vpop.f32.mrf.mxu0 }
0x1696   :  { %v14496_v17 = vpop.f32.mrf.mxu0 }
0x169c   :  { %v12767_v18 = vpop.f32.mrf.mxu0 }
0x169d   :  { %v2222_v19 = vmul.f32 0.35355338, %v12767_v18 }
0x169e   :  { %v2212_v20 = vpop.f32.mrf.mxu0 }
0x169f   :  { %v2221_v21 = vmul.f32 0.35355338, %v2212_v20  ;;  %v2224_v22 = vadd.f32 %v2222_v19, %v14190_v6  ;;  %v2572_v20 = vld [vmem:[%s16466_s2 + $0x230] sm:$0xff] }
0x16a1   :  { %v2228_v23 = vsel %vm514_vm8, %v2224_v22, -inf  ;;  %v2223_v24 = vadd.f32 %v2221_v21, %v14192_v9  ;;  %v2571_v21 = vld [vmem:[%s16466_s2 + $0x228] sm:$0xff] }
0x16a2   :  { %2229 = vmax.xlane.f32.xlu1 %v2228_v23 }
0x16a3   :  { %v2225_v25 = vsel %vm510_vm9, %v2223_v24, -inf }
0x16a4   :  { %2226 = vmax.xlane.f32.xlu0 %v2225_v25 }
0x16b3   :  { %2247 = vrot.lane.b32.xlu1 %v14420_v8, %s13958_s28 }
0x16b7   :  { %2341 = vrot.lane.b32.xlu1 %v14418_v5, %s13959_s29 }
0x16bb   :  { %2339 = vrot.lane.b32.xlu1 %v14420_v8, %s13959_s29 }
0x16bf   :  { %2337 = vrot.lane.b32.xlu1 %v14418_v5, %s13960_s30 }
0x172b   :  { %v2230_v26 = vpop.xlane.xlu1 %2229 }
0x172c   :  { %v2232_v27 = vsub.f32 %v2224_v22, %v2230_v26  ;;  %v2570_v22 = vld [vmem:[%s16466_s2 + $0x220] sm:$0xff] }
0x172d   :  { %v2227_v28 = vpop.xlane.xlu0 %2226 }
0x172e   :  { %v2235_v29 = vmul.f32 1.442695, %v2232_v27  ;;  %v2231_v30 = vsub.f32 %v2223_v24, %v2227_v28 }
0x172f   :  { %v2248_v36 = vpop.permute.xlu1 %2247 }
0x1730   :  { %13678 = vpow2.f32 %v2235_v29  ;;  %v2233_v31 = vmul.f32 1.442695, %v2231_v30 }
0x1732   :  { %13680 = vpow2.f32 %v2233_v31 }
0x1733   :  { %v2342_v38 = vpop.permute.xlu1 %2341 }
0x1737   :  { %v2340_v50 = vpop.permute.xlu1 %2339 }
0x173b   :  { %v2338_v51 = vpop.permute.xlu1 %2337 }
0x173d   :  { %v13679_v32 = vpop.eup %13678 }
0x173e   :  { %v2240_v45 = vsel %vm514_vm8, %v13679_v32, 0.0 }
0x173f   :  { %v13681_v33 = vpop.eup %13680  ;;  %2241 = vadd.xlane.f32.xlu0 %v2240_v45 }
0x1740   :  { %v2237_v34 = vsel %vm510_vm9, %v13681_v33, 0.0 }
0x1743   :  { %2238 = vadd.xlane.f32.xlu0 %v2237_v34 }
0x1759   :  { %2249 = vrot.lane.b32.xlu0 %v14418_v5, %s13958_s28 }
0x175d   :  { %2335 = vrot.lane.b32.xlu0 %v14420_v8, %s13960_s30 }
0x17c8   :  { %v2242_v42 = vpop.xlane.xlu0 %2241 }
0x17c9   :  { %13682 = vrcp.f32 %v2242_v42 }
0x17cc   :  { %v2239_v35 = vpop.xlane.xlu0 %2238 }
0x17cd   :  { %13684 = vrcp.f32 %v2239_v35 }
0x17d0   :  { %v2250_v37 = vpop.permute.xlu0 %2249 }
0x17d1   :  { %12768 = vmatprep.subr.msk.mxu1 %vm545_vm10, %v2250_v37 }
0x17d2   :  { %12769 = vmatpush3.msk.msra.mxu1 %vm545_vm10, %v2250_v37 }
0x17d3   :  { %12770 = vmatprep.subr.mxu1 %v2248_v36 }
0x17d4   :  { %12771 = vmatpush3.msra.mxu1 %v2248_v36  ;;  %v2336_v49 = vpop.permute.xlu0 %2335 }
0x17d5   :  { %12775 = vmatprep.subr.msk.mxu1 %vm422_vm5, %v2342_v38 }
0x17d6   :  { %v13683_v39 = vpop.eup %13682 }
0x17d7   :  { %v2246_v47 = vmul.f32 %v13683_v39, %v13679_v32 }
0x17da   :  { %v13685_v41 = vpop.eup %13684 }
0x17db   :  { %v2244_v44 = vmul.f32 %v13685_v41, %v13681_v33 }
0x17dd   :  { %12772 = vmatprep.mubr.msk.f32.mxu1 %vm510_vm9, %v2244_v44 }
0x17de   :  { %12773 = vmatmul.mubr.msk.f32.vlgmr.msra.gmra.mxu1 %vm510_vm9, %v2246_v47  ;;  %v2930_v47 = vld [vmem:[%s16470_s1] sm:$0xff] }
0x17df   :  { %12776 = vmatpush3.xpose.msk.msra.mxu1 %vm422_vm5, %v2342_v38  ;;  %12779 = vmatprep.mubr.msk.f32.mxu1 %vm422_vm5, %v2336_v49 }
0x17e0   :  { %12777 = vmatprep.subr.msk.mxu1 %vm422_vm5, %v2340_v50 }
0x17e3   :  { %12778 = vmatpush3.xpose.msk.msra.mxu1 %vm422_vm5, %v2340_v50 }
0x17e6   :  { %12780 = vmatmul.mubr.msk.f32.vlgmr.msra.gmra.mxu1 %vm422_vm5, %v2338_v51 }
0x189e   :  { %v12774_v52 = vpop.f32.mrf.mxu1 }
0x18a0   :  { %v2326_v53 = vpop.f32.mrf.mxu1 }
0x18a6   :  { %v12781_v54 = vpop.f32.mrf.mxu1 }
0x18a7   :  { %v2427_v40 = vmul.f32 0.35355338, %v12781_v54 }
0x18a8   :  { %v2417_v43 = vpop.f32.mrf.mxu1 }
0x18a9   :  { %v2426_v55 = vmul.f32 0.35355338, %v2417_v43  ;;  %v2429_v56 = vadd.f32 %v2427_v40, %v14190_v6 }
0x18ab   :  { %v2433_v57 = vsel %vm514_vm8, %v2429_v56, -inf  ;;  %v2428_v58 = vadd.f32 %v2426_v55, %v14192_v9 }
0x18ac   :  { %2434 = vmax.xlane.f32.xlu1 %v2433_v57 }
0x18ad   :  { %v2430_v59 = vsel %vm510_vm9, %v2428_v58, -inf }
0x18ae   :  { %2431 = vmax.xlane.f32.xlu0 %v2430_v59  ;;  %v2705_v59 = vld [vmem:[%s16469_s4 + $0x38] sm:$0xff] }
0x18af   :  { %12800 = vmatprep.subr.mxu1 %v2705_v59 }
0x18b0   :  { %12801 = vmatpush3.msra.mxu1 %v2705_v59 }
0x18bd   :  { %2452 = vrot.lane.b32.xlu1 %v14420_v8, %s13961_s7 }
0x18c1   :  { %2542 = vrot.lane.b32.xlu1 %v14496_v17, %s13962_s8 }
0x18c5   :  { %2544 = vrot.lane.b32.xlu1 %v14494_v16, %s13962_s8 }
0x18c9   :  { %2552 = vrot.lane.b32.xlu1 %v12774_v52, %s13963_s0 }
0x1935   :  { %v2435_v61 = vpop.xlane.xlu1 %2434 }
0x1936   :  { %v2437_v62 = vsub.f32 %v2429_v56, %v2435_v61  ;;  %v2704_v61 = vld [vmem:[%s16469_s4 + $0x30] sm:$0xff] }
0x1937   :  { %v2432_v63 = vpop.xlane.xlu0 %2431  ;;  %12802 = vmatprep.subr.mxu1 %v2704_v61 }
0x1938   :  { %v2440_v0 = vmul.f32 1.442695, %v2437_v62  ;;  %v2436_v1 = vsub.f32 %v2428_v58, %v2432_v63  ;;  %v2703_v62 = vld [vmem:[%s16469_s4 + $0x28] sm:$0xff]  ;;  %12803 = vmatpush3.msra.mxu1 %v2704_v61  ;;  %v2702_v63 = vld [vmem:[%s16469_s4 + $0x20] sm:$0xff] }
0x1939   :  { %v2453_v14 = vpop.permute.xlu1 %2452  ;;  %12804 = vmatprep.subr.mxu1 %v2703_v62 }
0x193a   :  { %13686 = vpow2.f32 %v2440_v0  ;;  %v2438_v4 = vmul.f32 1.442695, %v2436_v1  ;;  %12805 = vmatpush3.msra.mxu1 %v2703_v62  ;;  %v2801_v0 = vld [vmem:[%s16466_s2 + $0x278] sm:$0xff]  ;;  %v2800_v1 = vld [vmem:[%s16466_s2 + $0x270] sm:$0xff] }
0x193b   :  { %12806 = vmatprep.subr.mxu1 %v2702_v63 }
0x193c   :  { %13688 = vpow2.f32 %v2438_v4  ;;  %12807 = vmatpush3.msra.mxu1 %v2702_v63  ;;  %v2799_v4 = vld [vmem:[%s16466_s2 + $0x268] sm:$0xff] }
0x193d   :  { %v2543_v25 = vpop.permute.xlu1 %2542  ;;  %12830 = vmatprep.subr.mxu1 %v13948_v60 }
0x193e   :  { %v2564_v29 = vsel %vm422_vm5, %v14492_v46, %v2543_v25  ;;  %v11719_v46 = vld [vmem:[%s16467_s5 + $0x1f] ss:$0 sm:$0xff]  ;;  %v2957_v25 = vld [vmem:[%s16466_s2 + $0x170] sm:$0xff] }
0x1941   :  { %v2545_v26 = vpop.permute.xlu1 %2544 }
0x1942   :  { %v2565_v31 = vsel %vm422_vm5, %v14490_v15, %v2545_v26  ;;  %v2956_v26 = vld [vmem:[%s16466_s2 + $0x168] sm:$0xff] }
0x1945   :  { %v2553_v27 = vpop.permute.xlu1 %2552 }
0x1946   :  { %v2567_v33 = vsel %vm1264_vm11, %v2565_v31, %v2553_v27  ;;  %v2953_v31 = vld [vmem:[%s16466_s2 + $0x150] sm:$0xff] }
0x1947   :  { %v13687_v48 = vpop.eup %13686 }
0x1948   :  { %v2445_v7 = vsel %vm514_vm8, %v13687_v48, 0.0 }
0x1949   :  { %v13689_v8 = vpop.eup %13688  ;;  %2446 = vadd.xlane.f32.xlu0 %v2445_v7 }
0x194a   :  { %v2442_v10 = vsel %vm510_vm9, %v13689_v8, 0.0 }
0x194d   :  { %2443 = vadd.xlane.f32.xlu0 %v2442_v10 }
0x1963   :  { %2454 = vrot.lane.b32.xlu0 %v14418_v5, %s13961_s7  ;;  %v2573_v5 = vld [vmem:[%s16466_s2 + $0x238] sm:$0xff] }
0x1967   :  { %2550 = vrot.lane.b32.xlu0 %v2326_v53, %s13963_s0 }
0x19d2   :  { %v2447_v11 = vpop.xlane.xlu0 %2446 }
0x19d3   :  { %13690 = vrcp.f32 %v2447_v11 }
0x19d6   :  { %v2444_v12 = vpop.xlane.xlu0 %2443 }
0x19d7   :  { %13692 = vrcp.f32 %v2444_v12 }
0x19da   :  { %v2455_v13 = vpop.permute.xlu0 %2454 }
0x19db   :  { %12782 = vmatprep.subr.msk.mxu0 %vm545_vm10, %v2455_v13 }
0x19dc   :  { %12783 = vmatpush3.msk.msra.mxu0 %vm545_vm10, %v2455_v13 }
0x19dd   :  { %12784 = vmatprep.subr.mxu0 %v2453_v14 }
0x19de   :  { %12785 = vmatpush3.msra.mxu0 %v2453_v14  ;;  %v2551_v28 = vpop.permute.xlu0 %2550 }
0x19df   :  { %12789 = vmatprep.subr.mxu0 %v2573_v5  ;;  %v2566_v32 = vsel %vm1264_vm11, %v2564_v29, %v2551_v28  ;;  %v2955_v28 = vld [vmem:[%s16466_s2 + $0x160] sm:$0xff] }
0x19e0   :  { %v13691_v16 = vpop.eup %13690 }
0x19e1   :  { %v2451_v19 = vmul.f32 %v13691_v16, %v13687_v48  ;;  %v2798_v48 = vld [vmem:[%s16466_s2 + $0x260] sm:$0xff] }
0x19e2   :  { %v11722_v16 = vld [vmem:[%s16467_s5 + $0x20] ss:$0 sm:$0xff] }
0x19e4   :  { %v13693_v17 = vpop.eup %13692 }
0x19e5   :  { %v2449_v18 = vmul.f32 %v13693_v17, %v13689_v8 }
0x19e7   :  { %12786 = vmatprep.mubr.msk.f32.mxu0 %vm510_vm9, %v2449_v18  ;;  %v11723_v18 = vld [vmem:[%s16467_s5 + $0x21] ss:$0 sm:$0xff] }
0x19e8   :  { %12787 = vmatmul.mubr.msk.f32.vlgmr.msra.gmra.mxu0 %vm510_vm9, %v2451_v19 }
0x19e9   :  { %12790 = vmatpush3.msra.mxu0 %v2573_v5 }
0x19ea   :  { %12791 = vmatprep.subr.mxu0 %v2572_v20 }
0x19eb   :  { %12792 = vmatpush3.msra.mxu0 %v2572_v20 }
0x19ec   :  { %12793 = vmatprep.subr.mxu0 %v2571_v21 }
0x19ed   :  { %12794 = vmatpush3.msra.mxu0 %v2571_v21 }
0x19ee   :  { %12795 = vmatprep.subr.mxu0 %v2570_v22 }
0x19ef   :  { %12796 = vmatpush3.msra.mxu0 %v2570_v22 }
0x19f0   :  { %12811 = vmatprep.subr.mxu0 %v2801_v0 }
0x1aa8   :  { %v12788_v23 = vpop.f32.mrf.mxu0 }
0x1aa9   :  { %2560 = vrot.lane.b32.xlu1 %v12788_v23, %s13964_s17 }
0x1aaa   :  { %v2531_v24 = vpop.f32.mrf.mxu0 }
0x1aab   :  { %2558 = vrot.lane.b32.xlu0 %v2531_v24, %s13964_s17  ;;  %v2958_v24 = vld [vmem:[%s16466_s2 + $0x178] sm:$0xff] }
0x1b1b   :  { %v2561_v30 = vpop.permute.xlu1 %2560 }
0x1b1c   :  { %v2569_v42 = vsel %vm1267_vm12, %v2567_v33, %v2561_v30  ;;  %v2954_v30 = vld [vmem:[%s16466_s2 + $0x158] sm:$0xff]  ;;  %v2951_v33 = vld [vmem:[%s16466_s2 + $0x140] sm:$0xff] }
0x1b1d   :  { %v2559_v45 = vpop.permute.xlu0 %2558 }
0x1b1e   :  { %v2568_v34 = vsel %vm1267_vm12, %v2566_v32, %v2559_v45  ;;  %v2952_v45 = vld [vmem:[%s16466_s2 + $0x148] sm:$0xff] }
0x1b1f   :  { %12797 = vmatprep.mubr.msk.f32.mxu0 %vm172_vm0, %v2568_v34  ;;  %v2950_v34 = vld [vmem:[%s16466_s2 + $0x138] sm:$0xff] }
0x1b20   :  { %12798 = vmatmul.mubr.msk.f32.vlgmr.msra.gmra.mxu0 %vm172_vm0, %v2569_v42  ;;  %v2949_v42 = vld [vmem:[%s16466_s2 + $0x130] sm:$0xff] }
0x1b21   :  { %12812 = vmatpush3.msra.mxu0 %v2801_v0 }
0x1b22   :  { %12813 = vmatprep.subr.mxu0 %v2800_v1 }
0x1b23   :  { %12814 = vmatpush3.msra.mxu0 %v2800_v1  ;;  %v3063_v1 = vld [vmem:[%s16466_s2 + $0x1b8] sm:$0xff] }
0x1b24   :  { %12815 = vmatprep.subr.mxu0 %v2799_v4 }
0x1b25   :  { %12816 = vmatpush3.msra.mxu0 %v2799_v4  ;;  %v3062_v4 = vld [vmem:[%s16466_s2 + $0x1b0] sm:$0xff] }
0x1b26   :  { %12817 = vmatprep.subr.mxu0 %v2798_v48 }
0x1b27   :  { %12818 = vmatpush3.msra.mxu0 %v2798_v48  ;;  %v3061_v48 = vld [vmem:[%s16466_s2 + $0x1a8] sm:$0xff] }
0x1be0   :  { %v12799_v35 = vpop.f32.mrf.mxu0 }
0x1be1   :  { %v2657_v36 = vadd.f32 %v12799_v35, %v11719_v46  ;;  %v2947_v35 = vld [vmem:[%s16466_s2 + $0x120] sm:$0xff] }
0x1be2   :  { %v2651_v15 = vpop.f32.mrf.mxu0 }
0x1be3   :  { %v2661_v37 = vadd.f32 %v2657_v36, %v14409_v3  ;;  %v2652_v38 = vadd.f32 %v11719_v46, %v2651_v15  ;;  %v2948_v46 = vld [vmem:[%s16466_s2 + $0x128] sm:$0xff]  ;;  %v2946_v36 = vld [vmem:[%s16466_s2 + $0x118] sm:$0xff]  ;;  %v2945_v15 = vld [vmem:[%s16466_s2 + $0x110] sm:$0xff] }
0x1be5   :  { %v2660_v39 = vadd.f32 %v2652_v38, %v14407_v2  ;;  %v2667_v41 = vsel %vm1367_vm13, %v2661_v37, 0.0 }
0x1be6   :  { %2668 = vadd.xlane.f32.xlu1 %v2667_v41 }
0x1be7   :  { %v2664_v44 = vsel %vm172_vm0, %v2660_v39, 0.0 }
0x1be8   :  { %2665 = vadd.xlane.f32.xlu0 %v2664_v44  ;;  %v2797_v44 = vld [vmem:[%s16466_s2 + $0x258] sm:$0xff] }
0x1be9   :  { %12819 = vmatprep.subr.mxu0 %v2797_v44 }
0x1bea   :  { %12820 = vmatpush3.msra.mxu0 %v2797_v44 }
0x1bec   :  { %2931 = vadd.xlane.f32.xlu0 %v2930_v47 }
0x1c6f   :  { %v2669_v49 = vpop.xlane.xlu1 %2668 }
0x1c70   :  { %v2671_v50 = vmul.f32 0.03125, %v2669_v49  ;;  %v2795_v49 = vld [vmem:[%s16466_s2 + $0x248] sm:$0xff] }
0x1c71   :  { %v2666_v51 = vpop.xlane.xlu0 %2665 }
0x1c72   :  { %v2670_v52 = vmul.f32 0.03125, %v2666_v51  ;;  %v2673_v53 = vsub.f32 %v2661_v37, %v2671_v50  ;;  %v2944_v37 = vld [vmem:[%s16466_s2 + $0x108] sm:$0xff]  ;;  %v2794_v50 = vld [vmem:[%s16466_s2 + $0x240] sm:$0xff] }
0x1c73   :  { %v11724_v51 = vld [vmem:[%s16467_s5 + $0x22] ss:$0 sm:$0xff] }
0x1c74   :  { %v2672_v3 = vsub.f32 %v2660_v39, %v2670_v52  ;;  %v2675_v56 = vmul.f32 %v2673_v53, %v2673_v53  ;;  %v2943_v39 = vld [vmem:[%s16466_s2 + $0x100] sm:$0xff] }
0x1c75   :  { %v2932_v54 = vpop.xlane.xlu0 %2931 }
0x1c76   :  { %v2934_v40 = vmul.f32 0.0078125, %v2932_v54  ;;  %v2674_v2 = vmul.f32 %v2672_v3, %v2672_v3  ;;  %v2679_v58 = vsel %vm1367_vm13, %v2675_v56, 0.0 }
0x1c78   :  { %v14580_v43 = vsub.f32 %v2930_v47, %v2934_v40  ;;  %v2676_v55 = vsel %vm172_vm0, %v2674_v2, 0.0  ;;  %v2796_v47 = vld [vmem:[%s16466_s2 + $0x250] sm:$0xff] }
0x1c79   :  { %2677 = vadd.xlane.f32.xlu0 %v2676_v55  ;;  %12821 = vmatprep.subr.mxu0 %v2796_v47 }
0x1c7a   :  { %v2936_v57 = vmul.f32 %v14580_v43, %v14580_v43  ;;  %12822 = vmatpush3.msra.mxu0 %v2796_v47 }
0x1c7b   :  { %12823 = vmatprep.subr.mxu0 %v2795_v49 }
0x1c7c   :  { %2937 = vadd.xlane.f32.xlu1 %v2936_v57  ;;  %12824 = vmatpush3.msra.mxu0 %v2795_v49 }
0x1c7d   :  { %2680 = vadd.xlane.f32.xlu0 %v2679_v58  ;;  %12825 = vmatprep.subr.mxu0 %v2794_v50 }
0x1c7e   :  { %12826 = vmatpush3.msra.mxu0 %v2794_v50 }
0x1c7f   :  { %12865 = vmatprep.subr.mxu0 %v13948_v60 }
0x1d02   :  { %v2678_v7 = vpop.xlane.xlu0 %2677 }
0x1d03   :  { %v2682_v8 = vmul.f32 0.03125, %v2678_v7  ;;  %v3060_v7 = vld [vmem:[%s16466_s2 + $0x1a0] sm:$0xff] }
0x1d05   :  { %v2684_v10 = vadd.f32 1e-05, %v2682_v8  ;;  %v2938_v27 = vpop.xlane.xlu1 %2937 }
0x1d06   :  { %v2681_v11 = vpop.xlane.xlu0 %2680  ;;  %v2939_v29 = vmul.f32 0.0078125, %v2938_v27 }
0x1d07   :  { %13694 = vrsqrt.f32 %v2684_v10  ;;  %v2683_v12 = vmul.f32 0.03125, %v2681_v11 }
0x1d08   :  { %v2940_v32 = vadd.f32 1e-05, %v2939_v29 }
0x1d09   :  { %v2685_v13 = vadd.f32 1e-05, %v2683_v12 }
0x1d0b   :  { %13696 = vrsqrt.f32 %v2685_v13  ;;  %v11733_v13 = vld [vmem:[%s16467_s5 + $0xc] ss:$0 sm:$0xff] }
0x1d0c   :  { %13698 = vrsqrt.f32 %v2940_v32 }
0x1d14   :  { %v13695_v14 = vpop.eup %13694 }
0x1d15   :  { %v2688_v17 = vmul.f32 %v13695_v14, %v2672_v3 }
0x1d17   :  { %v2694_v19 = vmul.f32 %v11722_v16, %v2688_v17 }
0x1d18   :  { %v13697_v5 = vpop.eup %13696 }
0x1d19   :  { %v2689_v20 = vmul.f32 %v13697_v5, %v2673_v53  ;;  %v14617_v21 = vadd.f32 %v11723_v18, %v2694_v19  ;;  %v13699_v38 = vpop.eup %13698 }
0x1d1a   :  { %v2942_v41 = vmul.f32 %v13699_v38, %v14580_v43  ;;  %v11732_v43 = vld [vmem:[%s16467_s5 + $0xb] ss:$0 sm:$0xff]  ;;  %v3167_v38 = vld [vmem:[%s16467_s5 + $0x11] sm:$0x1f] }
0x1d1b   :  { %v2695_v22 = vmul.f32 %v11722_v16, %v2689_v20  ;;  %12808 = vmatprep.mubr.msk.f32.mxu1 %vm172_vm0, %v14617_v21  ;;  %v11734_v16 = vld [vmem:[%s16467_s5 + $0xd] ss:$0 sm:$0xff]  ;;  %v3169_v47 = vrot.slane %v3167_v38, 1  ;;  %v3172_v49 = vrot.slane %v3167_v38, 5 }
0x1d1d   :  { %v14621_v23 = vadd.f32 %v11723_v18, %v2695_v22  ;;  %v11735_v22 = vld [vmem:[%s16467_s5 + $0xe] ss:$0 sm:$0xff] }
0x1d1f   :  { %12809 = vmatmul.mubr.msk.f32.vlgmr.msra.gmra.mxu1 %vm172_vm0, %v14621_v23 }
0x1d20   :  { %12831 = vmatpush3.msra.mxu1 %v2958_v24  ;;  %12862 = vmatprep.mubr.msk.f32.mxu1 %vm13949_vm1, %v13948_v60 }
0x1d21   :  { %12832 = vmatprep.subr.mxu1 %v13948_v60 }
0x1d22   :  { %12833 = vmatpush3.msra.mxu1 %v2957_v25 }
0x1d23   :  { %12834 = vmatprep.subr.mxu1 %v13948_v60 }
0x1d24   :  { %12835 = vmatpush3.msra.mxu1 %v2956_v26 }
0x1d25   :  { %12836 = vmatprep.subr.mxu1 %v13948_v60 }
0x1d26   :  { %12837 = vmatpush3.msra.mxu1 %v2955_v28 }
0x1d27   :  { %12838 = vmatprep.subr.mxu1 %v13948_v60 }
0x1d28   :  { %12839 = vmatpush3.msra.mxu1 %v2954_v30 }
0x1d29   :  { %12840 = vmatprep.subr.mxu1 %v13948_v60 }
0x1d2a   :  { %12841 = vmatpush3.msra.mxu1 %v2953_v31 }
0x1d2b   :  { %12842 = vmatprep.subr.mxu1 %v13948_v60 }
0x1d2c   :  { %12843 = vmatpush3.msra.mxu1 %v2952_v45  ;;  %v3189_v45 = vld [vmem:[%s16468_s3 + $0x58] sm:$0xff] }
0x1d2d   :  { %12844 = vmatprep.subr.mxu1 %v13948_v60 }
0x1d2e   :  { %12845 = vmatpush3.msra.mxu1 %v2951_v33  ;;  %v3188_v33 = vld [vmem:[%s16468_s3 + $0x50] sm:$0xff] }
0x1d2f   :  { %12846 = vmatprep.subr.mxu1 %v13948_v60 }
0x1d30   :  { %12847 = vmatpush3.msra.mxu1 %v2950_v34  ;;  %v3187_v34 = vld [vmem:[%s16468_s3 + $0x48] sm:$0xff] }
0x1d31   :  { %12848 = vmatprep.subr.mxu1 %v13948_v60 }
0x1d32   :  { %12849 = vmatpush3.msra.mxu1 %v2949_v42  ;;  %v3186_v42 = vld [vmem:[%s16468_s3 + $0x40] sm:$0xff] }
0x1d33   :  { %12850 = vmatprep.subr.mxu1 %v13948_v60 }
0x1d34   :  { %12851 = vmatpush3.msra.mxu1 %v2948_v46 }
0x1d35   :  { %12852 = vmatprep.subr.mxu1 %v13948_v60 }
0x1d36   :  { %12853 = vmatpush3.msra.mxu1 %v2947_v35 }
0x1d37   :  { %12854 = vmatprep.subr.mxu1 %v13948_v60 }
0x1d38   :  { %12855 = vmatpush3.msra.mxu1 %v2946_v36 }
0x1d39   :  { %12856 = vmatprep.subr.mxu1 %v13948_v60 }
0x1d3a   :  { %12857 = vmatpush3.msra.mxu1 %v2945_v15 }
0x1d3b   :  { %12858 = vmatprep.subr.mxu1 %v13948_v60 }
0x1d3c   :  { %12859 = vmatpush3.msra.mxu1 %v2944_v37  ;;  %v11737_v37 = vld [vmem:[%s16467_s5 + $0xf] ss:$0 sm:$0xff] }
0x1d3d   :  { %12860 = vmatprep.subr.mxu1 %v13948_v60 }
0x1d3e   :  { %12861 = vmatpush3.msra.mxu1 %v2943_v39 }
0x1d3f   :  { %12863 = vmatmul.mubr.f32.vlgmr.msra.gmra.mxu1 %v2942_v41  ;;  %v11738_v41 = vld [vmem:[%s16467_s5 + $0x10] ss:$0 sm:$0xff] }
0x1ddf   :  { %v12810_v52 = vpop.f32.mrf.mxu1 }
0x1de0   :  { %v2789_v53 = vadd.f32 %v12810_v52, %v11724_v51 }
0x1de1   :  { %v2783_v3 = vpop.f32.mrf.mxu1 }
0x1de2   :  { %v2784_v54 = vadd.f32 %v11724_v51, %v2783_v3  ;;  %v2793_v2 = vmax.f32 %v2789_v53, 0.0  ;;  %v3178_v53 = vrot.slane %v3167_v38, 3 }
0x1de4   :  { %v2792_v40 = vmax.f32 %v2784_v54, 0.0 }
0x1de6   :  { %12827 = vmatprep.mubr.msk.f32.mxu0 %vm1508_vm14, %v2792_v40 }
0x1de7   :  { %12828 = vmatmul.mubr.msk.f32.vlgmr.msra.gmra.mxu0 %vm1508_vm14, %v2793_v2 }
0x1de8   :  { %12873 = vmatprep.mubr.msk.f32.mxu0 %vm13949_vm1, %v13948_v60  ;;  %12866 = vmatpush3.msra.mxu0 %v3063_v1 }
0x1de9   :  { %12867 = vmatprep.subr.mxu0 %v13948_v60 }
0x1dea   :  { %12868 = vmatpush3.msra.mxu0 %v3062_v4 }
0x1deb   :  { %12869 = vmatprep.subr.mxu0 %v13948_v60 }
0x1dec   :  { %12870 = vmatpush3.msra.mxu0 %v3061_v48 }
0x1ded   :  { %12871 = vmatprep.subr.mxu0 %v13948_v60 }
0x1dee   :  { %12872 = vmatpush3.msra.mxu0 %v3060_v7 }
0x1def   :  { %12876 = vmatprep.subr.mxu0 %v3189_v45 }
0x1dff   :  { %v3030_v55 = vpop.f32.mrf.mxu1 }
0x1e00   :  { %v3031_v56 = vadd.f32 %v11732_v43, %v3030_v55  ;;  %v11739_v55 = vld [vmem:[%s16467_s5 + $0x26] ss:$0 sm:$0xff] }
0x1e01   :  { %v12864_v57 = vpop.f32.mrf.mxu1 }
0x1e02   :  { %v3036_v58 = vsel %vm172_vm0, %v3031_v56, 0.0 }
0x1e03   :  { %3037 = vadd.xlane.f32.xlu0 %v3036_v58 }
0x1e8c   :  { %v3038_v59 = vpop.xlane.xlu0 %3037 }
0x1e8d   :  { %v3039_v61 = vmul.f32 0.03125, %v3038_v59 }
0x1e8f   :  { %v3040_v62 = vsub.f32 %v3031_v56, %v3039_v61 }
0x1e91   :  { %v3041_v63 = vmul.f32 %v3040_v62, %v3040_v62 }
0x1e93   :  { %v3042_v0 = vsel %vm172_vm0, %v3041_v63, 0.0 }
0x1e94   :  { %3043 = vadd.xlane.f32.xlu1 %v3042_v0 }
0x1ea7   :  { %v14738_v5 = vpop.f32.mrf.mxu0 }
0x1ea9   :  { %v14740_v20 = vpop.f32.mrf.mxu0 }
0x1f1d   :  { %v3044_v8 = vpop.xlane.xlu1 %3043 }
0x1f1e   :  { %v3045_v10 = vmul.f32 0.03125, %v3044_v8 }
0x1f20   :  { %v3046_v11 = vadd.f32 1e-05, %v3045_v10 }
0x1f22   :  { %13700 = vrsqrt.f32 %v3046_v11 }
0x1f2f   :  { %v13701_v12 = vpop.eup %13700 }
0x1f30   :  { %v3048_v14 = vmul.f32 %v13701_v12, %v3040_v62 }
0x1f32   :  { %v3053_v17 = vmul.f32 %v11733_v13, %v3048_v14 }
0x1f34   :  { %v3058_v18 = vadd.f32 %v11734_v16, %v3053_v17 }
0x1f36   :  { %v3059_v19 = vmax.f32 %v3058_v18, 0.0 }
0x1f38   :  { %12874 = vmatmul.mubr.msk.f32.vlgmr.msra.gmra.mxu0 %vm172_vm0, %v3059_v19 }
0x1f39   :  { %12877 = vmatpush3.msra.mxu0 %v3189_v45 }
0x1f3a   :  { %12878 = vmatprep.subr.mxu0 %v3188_v33 }
0x1f3b   :  { %12879 = vmatpush3.msra.mxu0 %v3188_v33 }
0x1f3c   :  { %12880 = vmatprep.subr.mxu0 %v3187_v34 }
0x1f3d   :  { %12881 = vmatpush3.msra.mxu0 %v3187_v34 }
0x1f3e   :  { %12882 = vmatprep.subr.mxu0 %v3186_v42 }
0x1f3f   :  { %12883 = vmatpush3.msra.mxu0 %v3186_v42 }
0x1ff8   :  { %v3138_v24 = vpop.f32.mrf.mxu0 }
0x1ff9   :  { %v3139_v25 = vadd.f32 %v11735_v22, %v3138_v24 }
0x1ffa   :  { %v12875_v26 = vpop.f32.mrf.mxu0 }
0x1ffb   :  { %v3144_v27 = vsel %vm172_vm0, %v3139_v25, 0.0 }
0x1ffc   :  { %3145 = vadd.xlane.f32.xlu0 %v3144_v27 }
0x2085   :  { %v3146_v28 = vpop.xlane.xlu0 %3145 }
0x2086   :  { %v3147_v29 = vmul.f32 0.03125, %v3146_v28 }
0x2088   :  { %v3148_v30 = vsub.f32 %v3139_v25, %v3147_v29 }
0x208a   :  { %v3149_v31 = vmul.f32 %v3148_v30, %v3148_v30 }
0x208c   :  { %v3150_v32 = vsel %vm172_vm0, %v3149_v31, 0.0 }
0x208d   :  { %3151 = vadd.xlane.f32.xlu1 %v3150_v32 }
0x2116   :  { %v3152_v46 = vpop.xlane.xlu1 %3151 }
0x2117   :  { %v3153_v35 = vmul.f32 0.03125, %v3152_v46 }
0x2119   :  { %v3154_v36 = vadd.f32 1e-05, %v3153_v35 }
0x211b   :  { %13702 = vrsqrt.f32 %v3154_v36 }
0x2128   :  { %v13703_v15 = vpop.eup %13702 }
0x2129   :  { %v3156_v39 = vmul.f32 %v13703_v15, %v3148_v30 }
0x212b   :  { %v3161_v44 = vmul.f32 %v11737_v37, %v3156_v39 }
0x212d   :  { %v3166_v50 = vadd.f32 %v11738_v41, %v3161_v44 }
0x212f   :  { %v3171_v51 = vadd.f32 %v3169_v47, %v3166_v50  ;;  %v3174_v52 = vadd.f32 %v3172_v49, %v3166_v50 }
0x2131   :  { %v3176_v3 = vrot.slane %v3171_v51, 7  ;;  %v14768_v54 = vrot.slane %v3174_v52, 6 }
0x2133   :  { %v3183_v40 = vsel %vm321_vm2, %v3167_v38, %v3176_v3 }
0x2134   :  { %v3184_v2 = vsel %vm323_vm3, %v3183_v40, %v3178_v53 }
0x2135   :  { %v14774_v43 = vsel %vm325_vm4, %v3184_v2, %v14768_v54 }
0x2136   :  { %12884 = vmatprep.mubr.msk.f32.mxu0 %vm172_vm0, %v14774_v43 }
0x2137   :  { %12885 = vmatmul.mubr.msk.f32.vlgmr.msra.gmra.mxu0 %vm172_vm0, %v14768_v54 }
0x21f7   :  { %v12886_v56 = vpop.f32.mrf.mxu0 }
0x21f8   :  { %v14783_v57 = vadd.f32 %v12886_v56, %v11739_v55 }
0x21f9   :  { %v3266_v58 = vpop.f32.mrf.mxu0 }
0x21fa   :  { %v14785_v59 = vadd.f32 %v11739_v55, %v3266_v58  ;;  %3279 = vrot.lane.b32.xlu0 %v14783_v57, %s13950_s21 }
0x21fc   :  { %3277 = vrot.lane.b32.xlu1 %v14785_v59, %s13950_s21  ;;  %12891 = vmatprep.mubr.msk.f32.mxu0 %vm422_vm5, %v14785_v59 }
0x226c   :  { %v3280_v61 = vpop.permute.xlu0 %3279 }
0x226d   :  { %12887 = vmatprep.subr.msk.mxu0 %vm422_vm5, %v3280_v61 }
0x226e   :  { %12888 = vmatpush3.xpose.msk.msra.mxu0 %vm422_vm5, %v3280_v61  ;;  %v3278_v62 = vpop.permute.xlu1 %3277 }
0x226f   :  { %12889 = vmatprep.subr.msk.mxu0 %vm422_vm5, %v3278_v62 }
0x2272   :  { %12890 = vmatpush3.xpose.msk.msra.mxu0 %vm422_vm5, %v3278_v62 }
0x2275   :  { %12892 = vmatmul.mubr.msk.f32.vlgmr.msra.gmra.mxu0 %vm422_vm5, %v14783_v57 }
0x2335   :  { %v12893_v63 = vpop.f32.mrf.mxu0 }
0x2336   :  { %v3365_v0 = vmul.f32 0.35355338, %v12893_v63 }
0x2337   :  { %v3355_v1 = vpop.f32.mrf.mxu0 }
0x2338   :  { %v3367_v4 = vadd.f32 %v3365_v0, %v14190_v6  ;;  %v3364_v48 = vmul.f32 0.35355338, %v3355_v1 }
0x233a   :  { %v3366_v7 = vadd.f32 %v3364_v48, %v14192_v9  ;;  %v3371_v8 = vsel %vm514_vm8, %v3367_v4, -inf }
0x233b   :  { %3372 = vmax.xlane.f32.xlu0 %v3371_v8 }
0x233c   :  { %v3368_v10 = vsel %vm510_vm9, %v3366_v7, -inf }
0x233d   :  { %3369 = vmax.xlane.f32.xlu1 %v3368_v10 }
0x23c4   :  { %v3373_v11 = vpop.xlane.xlu0 %3372 }
0x23c5   :  { %v3375_v12 = vsub.f32 %v3367_v4, %v3373_v11 }
0x23c6   :  { %v3370_v13 = vpop.xlane.xlu1 %3369 }
0x23c7   :  { %v3378_v14 = vmul.f32 1.442695, %v3375_v12  ;;  %v3374_v16 = vsub.f32 %v3366_v7, %v3370_v13 }
0x23c9   :  { %13704 = vpow2.f32 %v3378_v14  ;;  %v3376_v17 = vmul.f32 1.442695, %v3374_v16 }
0x23cb   :  { %13706 = vpow2.f32 %v3376_v17 }
0x23d6   :  { %v13705_v18 = vpop.eup %13704 }
0x23d7   :  { %v3383_v19 = vsel %vm514_vm8, %v13705_v18, 0.0 }
0x23d8   :  { %v13707_v22 = vpop.eup %13706  ;;  %3384 = vadd.xlane.f32.xlu1 %v3383_v19 }
0x23d9   :  { %v3380_v24 = vsel %vm510_vm9, %v13707_v22, 0.0 }
0x23da   :  { %3381 = vadd.xlane.f32.xlu0 %v3380_v24 }
0x23e9   :  { %3390 = vrot.lane.b32.xlu1 %v14785_v59, %s13952_s22 }
0x23ed   :  { %3484 = vrot.lane.b32.xlu1 %v14783_v57, %s13953_s23 }
0x23f0   :  { %3392 = vrot.lane.b32.xlu0 %v14783_v57, %s13952_s22 }
0x23f1   :  { %3482 = vrot.lane.b32.xlu1 %v14785_v59, %s13953_s23 }
0x23f4   :  { %3478 = vrot.lane.b32.xlu0 %v14785_v59, %s13954_s24 }
0x23f5   :  { %3480 = vrot.lane.b32.xlu1 %v14783_v57, %s13954_s24 }
0x2461   :  { %v3385_v25 = vpop.xlane.xlu1 %3384 }
0x2462   :  { %13708 = vrcp.f32 %v3385_v25 }
0x2463   :  { %v3382_v26 = vpop.xlane.xlu0 %3381 }
0x2464   :  { %13710 = vrcp.f32 %v3382_v26 }
0x2465   :  { %v3391_v27 = vpop.permute.xlu1 %3390 }
0x2467   :  { %v3393_v28 = vpop.permute.xlu0 %3392 }
0x2468   :  { %12894 = vmatprep.subr.msk.mxu1 %vm545_vm10, %v3393_v28 }
0x2469   :  { %12895 = vmatpush3.msk.msra.mxu1 %vm545_vm10, %v3393_v28  ;;  %v3485_v29 = vpop.permute.xlu1 %3484 }
0x246a   :  { %12896 = vmatprep.subr.mxu1 %v3391_v27 }
0x246b   :  { %12897 = vmatpush3.msra.mxu1 %v3391_v27  ;;  %v3479_v33 = vpop.permute.xlu0 %3478 }
0x246c   :  { %12901 = vmatprep.subr.msk.mxu1 %vm422_vm5, %v3485_v29 }
0x246d   :  { %v3483_v34 = vpop.permute.xlu1 %3482 }
0x246f   :  { %v13709_v30 = vpop.eup %13708 }
0x2470   :  { %v3389_v45 = vmul.f32 %v13709_v30, %v13705_v18 }
0x2471   :  { %v13711_v31 = vpop.eup %13710  ;;  %v3481_v42 = vpop.permute.xlu1 %3480 }
0x2472   :  { %v3387_v32 = vmul.f32 %v13711_v31, %v13707_v22 }
0x2474   :  { %12898 = vmatprep.mubr.msk.f32.mxu1 %vm510_vm9, %v3387_v32 }
0x2475   :  { %12899 = vmatmul.mubr.msk.f32.vlgmr.msra.gmra.mxu1 %vm510_vm9, %v3389_v45 }
0x2476   :  { %12902 = vmatpush3.xpose.msk.msra.mxu1 %vm422_vm5, %v3485_v29  ;;  %12905 = vmatprep.mubr.msk.f32.mxu1 %vm422_vm5, %v3479_v33 }
0x2477   :  { %12903 = vmatprep.subr.msk.mxu1 %vm422_vm5, %v3483_v34 }
0x247a   :  { %12904 = vmatpush3.xpose.msk.msra.mxu1 %vm422_vm5, %v3483_v34 }
0x247d   :  { %12906 = vmatmul.mubr.msk.f32.vlgmr.msra.gmra.mxu1 %vm422_vm5, %v3481_v42 }
0x2535   :  { %v14827_v46 = vpop.f32.mrf.mxu1 }
0x2537   :  { %v14829_v35 = vpop.f32.mrf.mxu1 }
0x253d   :  { %v12907_v36 = vpop.f32.mrf.mxu1 }
0x253e   :  { %v3570_v15 = vmul.f32 0.35355338, %v12907_v36 }
0x253f   :  { %v3560_v37 = vpop.f32.mrf.mxu1 }
0x2540   :  { %v3572_v38 = vadd.f32 %v3570_v15, %v14190_v6  ;;  %v3569_v39 = vmul.f32 0.35355338, %v3560_v37 }
0x2542   :  { %v3571_v41 = vadd.f32 %v3569_v39, %v14192_v9  ;;  %v3576_v44 = vsel %vm514_vm8, %v3572_v38, -inf }
0x2543   :  { %3577 = vmax.xlane.f32.xlu1 %v3576_v44 }
0x2544   :  { %v3573_v47 = vsel %vm510_vm9, %v3571_v41, -inf }
0x2545   :  { %3574 = vmax.xlane.f32.xlu0 %v3573_v47 }
0x2554   :  { %3595 = vrot.lane.b32.xlu1 %v14785_v59, %s13957_s27 }
0x2558   :  { %3689 = vrot.lane.b32.xlu1 %v14783_v57, %s13955_s25 }
0x255c   :  { %3687 = vrot.lane.b32.xlu1 %v14785_v59, %s13955_s25 }
0x2560   :  { %3685 = vrot.lane.b32.xlu1 %v14783_v57, %s13956_s26 }
0x25cc   :  { %v3578_v49 = vpop.xlane.xlu1 %3577 }
0x25cd   :  { %v3580_v50 = vsub.f32 %v3572_v38, %v3578_v49 }
0x25ce   :  { %v3575_v51 = vpop.xlane.xlu0 %3574 }
0x25cf   :  { %v3583_v52 = vmul.f32 1.442695, %v3580_v50  ;;  %v3579_v53 = vsub.f32 %v3571_v41, %v3575_v51 }
0x25d0   :  { %v3596_v62 = vpop.permute.xlu1 %3595 }
0x25d1   :  { %13712 = vpow2.f32 %v3583_v52  ;;  %v3581_v3 = vmul.f32 1.442695, %v3579_v53 }
0x25d3   :  { %13714 = vpow2.f32 %v3581_v3 }
0x25d4   :  { %v3690_v0 = vpop.permute.xlu1 %3689 }
0x25d8   :  { %v3688_v10 = vpop.permute.xlu1 %3687 }
0x25dc   :  { %v3686_v11 = vpop.permute.xlu1 %3685 }
0x25de   :  { %v13713_v40 = vpop.eup %13712 }
0x25df   :  { %v3588_v2 = vsel %vm514_vm8, %v13713_v40, 0.0 }
0x25e0   :  { %v13715_v55 = vpop.eup %13714  ;;  %3589 = vadd.xlane.f32.xlu0 %v3588_v2 }
0x25e1   :  { %v3585_v56 = vsel %vm510_vm9, %v13715_v55, 0.0 }
0x25e4   :  { %3586 = vadd.xlane.f32.xlu0 %v3585_v56 }
0x25fa   :  { %3597 = vrot.lane.b32.xlu0 %v14783_v57, %s13957_s27 }
0x25fe   :  { %3683 = vrot.lane.b32.xlu0 %v14785_v59, %s13956_s26 }
0x2669   :  { %v3590_v58 = vpop.xlane.xlu0 %3589 }
0x266a   :  { %13716 = vrcp.f32 %v3590_v58 }
0x266d   :  { %v3587_v61 = vpop.xlane.xlu0 %3586 }
0x266e   :  { %13718 = vrcp.f32 %v3587_v61 }
0x2671   :  { %v3598_v63 = vpop.permute.xlu0 %3597 }
0x2672   :  { %12908 = vmatprep.subr.msk.mxu0 %vm545_vm10, %v3598_v63 }
0x2673   :  { %12909 = vmatpush3.msk.msra.mxu0 %vm545_vm10, %v3598_v63 }
0x2674   :  { %12910 = vmatprep.subr.mxu0 %v3596_v62 }
0x2675   :  { %12911 = vmatpush3.msra.mxu0 %v3596_v62  ;;  %v3684_v8 = vpop.permute.xlu0 %3683 }
0x2676   :  { %12915 = vmatprep.subr.msk.mxu0 %vm422_vm5, %v3690_v0 }
0x2677   :  { %v13717_v1 = vpop.eup %13716 }
0x2678   :  { %v3594_v7 = vmul.f32 %v13717_v1, %v13713_v40 }
0x267b   :  { %v13719_v4 = vpop.eup %13718 }
0x267c   :  { %v3592_v48 = vmul.f32 %v13719_v4, %v13715_v55 }
0x267e   :  { %12912 = vmatprep.mubr.msk.f32.mxu0 %vm510_vm9, %v3592_v48 }
0x267f   :  { %12913 = vmatmul.mubr.msk.f32.vlgmr.msra.gmra.mxu0 %vm510_vm9, %v3594_v7 }
0x2680   :  { %12916 = vmatpush3.xpose.msk.msra.mxu0 %vm422_vm5, %v3690_v0  ;;  %12919 = vmatprep.mubr.msk.f32.mxu0 %vm422_vm5, %v3684_v8 }
0x2681   :  { %12917 = vmatprep.subr.msk.mxu0 %vm422_vm5, %v3688_v10 }
0x2684   :  { %12918 = vmatpush3.xpose.msk.msra.mxu0 %vm422_vm5, %v3688_v10 }
0x2687   :  { %12920 = vmatmul.mubr.msk.f32.vlgmr.msra.gmra.mxu0 %vm422_vm5, %v3686_v11 }
0x273f   :  { %v14859_v12 = vpop.f32.mrf.mxu0 }
0x2741   :  { %v14861_v13 = vpop.f32.mrf.mxu0 }
0x2747   :  { %v12921_v14 = vpop.f32.mrf.mxu0 }
0x2748   :  { %v3775_v16 = vmul.f32 0.35355338, %v12921_v14 }
0x2749   :  { %v3765_v17 = vpop.f32.mrf.mxu0 }
0x274a   :  { %v3777_v18 = vadd.f32 %v3775_v16, %v14190_v6  ;;  %v3774_v19 = vmul.f32 0.35355338, %v3765_v17 }
0x274c   :  { %v3776_v22 = vadd.f32 %v3774_v19, %v14192_v9  ;;  %v3781_v24 = vsel %vm514_vm8, %v3777_v18, -inf }
0x274d   :  { %3782 = vmax.xlane.f32.xlu1 %v3781_v24  ;;  %v4125_v24 = vld [vmem:[%s16466_s2 + $0x290] sm:$0xff] }
0x274e   :  { %v3778_v25 = vsel %vm510_vm9, %v3776_v22, -inf }
0x274f   :  { %3779 = vmax.xlane.f32.xlu0 %v3778_v25  ;;  %v4124_v25 = vld [vmem:[%s16466_s2 + $0x288] sm:$0xff] }
0x275e   :  { %3800 = vrot.lane.b32.xlu1 %v14785_v59, %s13958_s28 }
0x2762   :  { %3894 = vrot.lane.b32.xlu1 %v14783_v57, %s13959_s29 }
0x2766   :  { %3892 = vrot.lane.b32.xlu1 %v14785_v59, %s13959_s29 }
0x276a   :  { %3890 = vrot.lane.b32.xlu1 %v14783_v57, %s13960_s30 }
0x27d6   :  { %v3783_v26 = vpop.xlane.xlu1 %3782 }
0x27d7   :  { %v3785_v27 = vsub.f32 %v3777_v18, %v3783_v26  ;;  %v4123_v26 = vld [vmem:[%s16466_s2 + $0x280] sm:$0xff] }
0x27d8   :  { %v3780_v28 = vpop.xlane.xlu0 %3779 }
0x27d9   :  { %v3788_v29 = vmul.f32 1.442695, %v3785_v27  ;;  %v3784_v30 = vsub.f32 %v3776_v22, %v3780_v28 }
0x27da   :  { %v3801_v15 = vpop.permute.xlu1 %3800 }
0x27db   :  { %13720 = vpow2.f32 %v3788_v29  ;;  %v3786_v31 = vmul.f32 1.442695, %v3784_v30 }
0x27dd   :  { %13722 = vpow2.f32 %v3786_v31 }
0x27de   :  { %v3895_v38 = vpop.permute.xlu1 %3894 }
0x27e2   :  { %v3893_v50 = vpop.permute.xlu1 %3892 }
0x27e6   :  { %v3891_v51 = vpop.permute.xlu1 %3890 }
0x27e8   :  { %v13721_v32 = vpop.eup %13720 }
0x27e9   :  { %v3793_v45 = vsel %vm514_vm8, %v13721_v32, 0.0 }
0x27ea   :  { %v13723_v33 = vpop.eup %13722  ;;  %3794 = vadd.xlane.f32.xlu0 %v3793_v45 }
0x27eb   :  { %v3790_v34 = vsel %vm510_vm9, %v13723_v33, 0.0 }
0x27ee   :  { %3791 = vadd.xlane.f32.xlu0 %v3790_v34 }
0x2804   :  { %3802 = vrot.lane.b32.xlu0 %v14783_v57, %s13958_s28 }
0x2808   :  { %3888 = vrot.lane.b32.xlu0 %v14785_v59, %s13960_s30 }
0x2873   :  { %v3795_v42 = vpop.xlane.xlu0 %3794 }
0x2874   :  { %13724 = vrcp.f32 %v3795_v42 }
0x2877   :  { %v3792_v36 = vpop.xlane.xlu0 %3791 }
0x2878   :  { %13726 = vrcp.f32 %v3792_v36 }
0x287b   :  { %v3803_v37 = vpop.permute.xlu0 %3802 }
0x287c   :  { %12922 = vmatprep.subr.msk.mxu1 %vm545_vm10, %v3803_v37 }
0x287d   :  { %12923 = vmatpush3.msk.msra.mxu1 %vm545_vm10, %v3803_v37 }
0x287e   :  { %12924 = vmatprep.subr.mxu1 %v3801_v15 }
0x287f   :  { %12925 = vmatpush3.msra.mxu1 %v3801_v15  ;;  %v3889_v49 = vpop.permute.xlu0 %3888 }
0x2880   :  { %12929 = vmatprep.subr.msk.mxu1 %vm422_vm5, %v3895_v38 }
0x2881   :  { %v13725_v39 = vpop.eup %13724 }
0x2882   :  { %v3799_v47 = vmul.f32 %v13725_v39, %v13721_v32 }
0x2885   :  { %v13727_v41 = vpop.eup %13726 }
0x2886   :  { %v3797_v44 = vmul.f32 %v13727_v41, %v13723_v33 }
0x2888   :  { %12926 = vmatprep.mubr.msk.f32.mxu1 %vm510_vm9, %v3797_v44 }
0x2889   :  { %12927 = vmatmul.mubr.msk.f32.vlgmr.msra.gmra.mxu1 %vm510_vm9, %v3799_v47 }
0x288a   :  { %12930 = vmatpush3.xpose.msk.msra.mxu1 %vm422_vm5, %v3895_v38  ;;  %12933 = vmatprep.mubr.msk.f32.mxu1 %vm422_vm5, %v3889_v49 }
0x288b   :  { %12931 = vmatprep.subr.msk.mxu1 %vm422_vm5, %v3893_v50 }
0x288e   :  { %12932 = vmatpush3.xpose.msk.msra.mxu1 %vm422_vm5, %v3893_v50 }
0x2891   :  { %12934 = vmatmul.mubr.msk.f32.vlgmr.msra.gmra.mxu1 %vm422_vm5, %v3891_v51 }
0x2949   :  { %v12928_v52 = vpop.f32.mrf.mxu1 }
0x294b   :  { %v3879_v53 = vpop.f32.mrf.mxu1 }
0x2951   :  { %v12935_v3 = vpop.f32.mrf.mxu1 }
0x2952   :  { %v3980_v40 = vmul.f32 0.35355338, %v12935_v3 }
0x2953   :  { %v3970_v2 = vpop.f32.mrf.mxu1 }
0x2954   :  { %v3982_v55 = vadd.f32 %v3980_v40, %v14190_v6  ;;  %v3979_v56 = vmul.f32 0.35355338, %v3970_v2 }
0x2956   :  { %v3981_v58 = vadd.f32 %v3979_v56, %v14192_v9  ;;  %v3986_v61 = vsel %vm514_vm8, %v3982_v55, -inf }
0x2957   :  { %3987 = vmax.xlane.f32.xlu1 %v3986_v61 }
0x2958   :  { %v3983_v62 = vsel %vm510_vm9, %v3981_v58, -inf }
0x2959   :  { %3984 = vmax.xlane.f32.xlu0 %v3983_v62  ;;  %v4257_v62 = vld [vmem:[%s16469_s4 + $0x50] sm:$0xff] }
0x2968   :  { %4005 = vrot.lane.b32.xlu1 %v14785_v59, %s13961_s7 }
0x296c   :  { %4095 = vrot.lane.b32.xlu1 %v14861_v13, %s13962_s8 }
0x2970   :  { %4097 = vrot.lane.b32.xlu1 %v14859_v12, %s13962_s8 }
0x2974   :  { %4105 = vrot.lane.b32.xlu1 %v12928_v52, %s13963_s0 }
0x29e0   :  { %v3988_v63 = vpop.xlane.xlu1 %3987 }
0x29e1   :  { %v3990_v0 = vsub.f32 %v3982_v55, %v3988_v63  ;;  %v4256_v63 = vld [vmem:[%s16469_s4 + $0x48] sm:$0xff] }
0x29e2   :  { %v3985_v1 = vpop.xlane.xlu0 %3984 }
0x29e3   :  { %v3993_v4 = vmul.f32 1.442695, %v3990_v0  ;;  %v3989_v48 = vsub.f32 %v3981_v58, %v3985_v1  ;;  %v4255_v0 = vld [vmem:[%s16469_s4 + $0x40] sm:$0xff]  ;;  %v4354_v1 = vld [vmem:[%s16466_s2 + $0x2d8] sm:$0xff] }
0x29e4   :  { %v4006_v16 = vpop.permute.xlu1 %4005 }
0x29e5   :  { %13728 = vpow2.f32 %v3993_v4  ;;  %v3991_v7 = vmul.f32 1.442695, %v3989_v48  ;;  %v4353_v4 = vld [vmem:[%s16466_s2 + $0x2d0] sm:$0xff]  ;;  %v4352_v48 = vld [vmem:[%s16466_s2 + $0x2c8] sm:$0xff] }
0x29e7   :  { %13730 = vpow2.f32 %v3991_v7  ;;  %v4351_v7 = vld [vmem:[%s16466_s2 + $0x2c0] sm:$0xff] }
0x29e8   :  { %v4096_v29 = vpop.permute.xlu1 %4095 }
0x29e9   :  { %v4117_v45 = vsel %vm422_vm5, %v14829_v35, %v4096_v29  ;;  %v11770_v35 = vld [vmem:[%s16467_s5 + $0x27] ss:$0 sm:$0xff]  ;;  %v4348_v29 = vld [vmem:[%s16466_s2 + $0x2a8] sm:$0xff] }
0x29ec   :  { %v4098_v30 = vpop.permute.xlu1 %4097 }
0x29ed   :  { %v4118_v34 = vsel %vm422_vm5, %v14827_v46, %v4098_v30  ;;  %v4347_v30 = vld [vmem:[%s16466_s2 + $0x2a0] sm:$0xff] }
0x29f0   :  { %v4106_v31 = vpop.permute.xlu1 %4105 }
0x29f1   :  { %v4120_v15 = vsel %vm1264_vm11, %v4118_v34, %v4106_v31  ;;  %v11775_v31 = vld [vmem:[%s16467_s5 + $0x2a] ss:$0 sm:$0xff] }
0x29f2   :  { %v13729_v8 = vpop.eup %13728 }
0x29f3   :  { %v3998_v10 = vsel %vm514_vm8, %v13729_v8, 0.0 }
0x29f4   :  { %v13731_v59 = vpop.eup %13730  ;;  %3999 = vadd.xlane.f32.xlu0 %v3998_v10 }
0x29f5   :  { %v3995_v11 = vsel %vm510_vm9, %v13731_v59, 0.0 }
0x29f8   :  { %3996 = vadd.xlane.f32.xlu0 %v3995_v11 }
0x2a0e   :  { %4007 = vrot.lane.b32.xlu0 %v14783_v57, %s13961_s7  ;;  %v4126_v57 = vld [vmem:[%s16466_s2 + $0x298] sm:$0xff] }
0x2a12   :  { %4103 = vrot.lane.b32.xlu0 %v3879_v53, %s13963_s0 }
0x2a7d   :  { %v4000_v12 = vpop.xlane.xlu0 %3999 }
0x2a7e   :  { %13732 = vrcp.f32 %v4000_v12 }
0x2a81   :  { %v3997_v13 = vpop.xlane.xlu0 %3996 }
0x2a82   :  { %13734 = vrcp.f32 %v3997_v13 }
0x2a85   :  { %v4008_v14 = vpop.permute.xlu0 %4007 }
0x2a86   :  { %12936 = vmatprep.subr.msk.mxu0 %vm545_vm10, %v4008_v14 }
0x2a87   :  { %12937 = vmatpush3.msk.msra.mxu0 %vm545_vm10, %v4008_v14 }
0x2a88   :  { %12938 = vmatprep.subr.mxu0 %v4006_v16 }
0x2a89   :  { %12939 = vmatpush3.msra.mxu0 %v4006_v16  ;;  %v4104_v32 = vpop.permute.xlu0 %4103  ;;  %v11773_v16 = vld [vmem:[%s16467_s5 + $0x28] ss:$0 sm:$0xff] }
0x2a8a   :  { %12943 = vmatprep.subr.mxu0 %v4126_v57  ;;  %v4119_v42 = vsel %vm1264_vm11, %v4117_v45, %v4104_v32 }
0x2a8b   :  { %v13733_v17 = vpop.eup %13732 }
0x2a8c   :  { %v4004_v22 = vmul.f32 %v13733_v17, %v13729_v8 }
0x2a8f   :  { %v13735_v18 = vpop.eup %13734 }
0x2a90   :  { %v4002_v19 = vmul.f32 %v13735_v18, %v13731_v59  ;;  %v11774_v18 = vld [vmem:[%s16467_s5 + $0x29] ss:$0 sm:$0xff] }
0x2a92   :  { %12940 = vmatprep.mubr.msk.f32.mxu0 %vm510_vm9, %v4002_v19 }
0x2a93   :  { %12941 = vmatmul.mubr.msk.f32.vlgmr.msra.gmra.mxu0 %vm510_vm9, %v4004_v22 }
0x2a94   :  { %12944 = vmatpush3.msra.mxu0 %v4126_v57 }
0x2a95   :  { %12945 = vmatprep.subr.mxu0 %v4125_v24 }
0x2a96   :  { %12946 = vmatpush3.msra.mxu0 %v4125_v24 }
0x2a97   :  { %12947 = vmatprep.subr.mxu0 %v4124_v25 }
0x2a98   :  { %12948 = vmatpush3.msra.mxu0 %v4124_v25 }
0x2a99   :  { %12949 = vmatprep.subr.mxu0 %v4123_v26 }
0x2a9a   :  { %12950 = vmatpush3.msra.mxu0 %v4123_v26 }
0x2a9b   :  { %12965 = vmatprep.subr.mxu0 %v4354_v1 }
0x2b53   :  { %v12942_v27 = vpop.f32.mrf.mxu0 }
0x2b54   :  { %4113 = vrot.lane.b32.xlu1 %v12942_v27, %s13964_s17  ;;  %v4350_v27 = vld [vmem:[%s16466_s2 + $0x2b8] sm:$0xff] }
0x2b55   :  { %v4084_v28 = vpop.f32.mrf.mxu0 }
0x2b56   :  { %4111 = vrot.lane.b32.xlu0 %v4084_v28, %s13964_s17  ;;  %v4349_v28 = vld [vmem:[%s16466_s2 + $0x2b0] sm:$0xff] }
0x2bc6   :  { %v4114_v33 = vpop.permute.xlu1 %4113 }
0x2bc7   :  { %v4122_v38 = vsel %vm1267_vm12, %v4120_v15, %v4114_v33  ;;  %v11778_v15 = vld [vmem:[%s16467_s5 + $0x2b] ss:$0 sm:$0xff] }
0x2bc8   :  { %v4112_v36 = vpop.permute.xlu0 %4111 }
0x2bc9   :  { %v4121_v37 = vsel %vm1267_vm12, %v4119_v42, %v4112_v36 }
0x2bca   :  { %12951 = vmatprep.mubr.msk.f32.mxu0 %vm172_vm0, %v4121_v37 }
0x2bcb   :  { %12952 = vmatmul.mubr.msk.f32.vlgmr.msra.gmra.mxu0 %vm172_vm0, %v4122_v38 }
0x2bcc   :  { %12966 = vmatpush3.msra.mxu0 %v4354_v1 }
0x2bcd   :  { %12967 = vmatprep.subr.mxu0 %v4353_v4 }
0x2bce   :  { %12968 = vmatpush3.msra.mxu0 %v4353_v4 }
0x2bcf   :  { %12969 = vmatprep.subr.mxu0 %v4352_v48 }
0x2bd0   :  { %12970 = vmatpush3.msra.mxu0 %v4352_v48 }
0x2bd1   :  { %12971 = vmatprep.subr.mxu0 %v4351_v7 }
0x2bd2   :  { %12972 = vmatpush3.msra.mxu0 %v4351_v7 }
0x2bd3   :  { %12973 = vmatprep.subr.mxu0 %v4350_v27 }
0x2bd4   :  { %12974 = vmatpush3.msra.mxu0 %v4350_v27 }
0x2bd5   :  { %12975 = vmatprep.subr.mxu0 %v4349_v28 }
0x2bd6   :  { %12976 = vmatpush3.msra.mxu0 %v4349_v28 }
0x2bd7   :  { %12977 = vmatprep.subr.mxu0 %v4348_v29 }
0x2bd8   :  { %12978 = vmatpush3.msra.mxu0 %v4348_v29 }
0x2bd9   :  { %12979 = vmatprep.subr.mxu0 %v4347_v30 }
0x2bda   :  { %12980 = vmatpush3.msra.mxu0 %v4347_v30 }
0x2c8b   :  { %v12953_v39 = vpop.f32.mrf.mxu0 }
0x2c8c   :  { %v4210_v41 = vadd.f32 %v12953_v39, %v11770_v35 }
0x2c8d   :  { %v4204_v46 = vpop.f32.mrf.mxu0 }
0x2c8e   :  { %v4214_v44 = vadd.f32 %v4210_v41, %v14768_v54  ;;  %v4205_v47 = vadd.f32 %v11770_v35, %v4204_v46 }
0x2c90   :  { %v4213_v49 = vadd.f32 %v4205_v47, %v14774_v43  ;;  %v4220_v50 = vsel %vm1367_vm13, %v4214_v44, 0.0  ;;  %v4258_v43 = vld [vmem:[%s16469_s4 + $0x58] sm:$0xff] }
0x2c91   :  { %4221 = vadd.xlane.f32.xlu1 %v4220_v50  ;;  %12954 = vmatprep.subr.mxu1 %v4258_v43 }
0x2c92   :  { %v4217_v51 = vsel %vm172_vm0, %v4213_v49, 0.0  ;;  %12955 = vmatpush3.msra.mxu1 %v4258_v43  ;;  %v4483_v43 = vld [vmem:[%s16468_s3 + $0x60] sm:$0xff] }
0x2c93   :  { %4218 = vadd.xlane.f32.xlu0 %v4217_v51  ;;  %12956 = vmatprep.subr.mxu1 %v4257_v62 }
0x2c94   :  { %12957 = vmatpush3.msra.mxu1 %v4257_v62 }
0x2c95   :  { %12958 = vmatprep.subr.mxu1 %v4256_v63 }
0x2c96   :  { %12959 = vmatpush3.msra.mxu1 %v4256_v63 }
0x2c97   :  { %12960 = vmatprep.subr.mxu1 %v4255_v0 }
0x2c98   :  { %12961 = vmatpush3.msra.mxu1 %v4255_v0 }
0x2d1a   :  { %v4222_v52 = vpop.xlane.xlu1 %4221 }
0x2d1b   :  { %v4224_v53 = vmul.f32 0.03125, %v4222_v52 }
0x2d1c   :  { %v4219_v3 = vpop.xlane.xlu0 %4218 }
0x2d1d   :  { %v4223_v40 = vmul.f32 0.03125, %v4219_v3  ;;  %v4226_v2 = vsub.f32 %v4214_v44, %v4224_v53 }
0x2d1f   :  { %v4225_v55 = vsub.f32 %v4213_v49, %v4223_v40  ;;  %v4228_v61 = vmul.f32 %v4226_v2, %v4226_v2 }
0x2d21   :  { %v4227_v56 = vmul.f32 %v4225_v55, %v4225_v55  ;;  %v4232_v54 = vsel %vm1367_vm13, %v4228_v61, 0.0  ;;  %v4485_v61 = vld [vmem:[%s16468_s3 + $0x70] sm:$0xff] }
0x2d23   :  { %v4229_v58 = vsel %vm172_vm0, %v4227_v56, 0.0 }
0x2d24   :  { %4230 = vadd.xlane.f32.xlu0 %v4229_v58  ;;  %v4486_v58 = vld [vmem:[%s16468_s3 + $0x78] sm:$0xff] }
0x2d25   :  { %12984 = vmatprep.subr.mxu1 %v4486_v58 }
0x2d28   :  { %4233 = vadd.xlane.f32.xlu0 %v4232_v54  ;;  %v4484_v54 = vld [vmem:[%s16468_s3 + $0x68] sm:$0xff] }
0x2dad   :  { %v4231_v8 = vpop.xlane.xlu0 %4230 }
0x2dae   :  { %v4235_v10 = vmul.f32 0.03125, %v4231_v8  ;;  %v11781_v8 = vld [vmem:[%s16467_s5 + $0x2c] ss:$0 sm:$0xff] }
0x2db0   :  { %v4237_v59 = vadd.f32 1e-05, %v4235_v10 }
0x2db1   :  { %v4234_v11 = vpop.xlane.xlu0 %4233 }
0x2db2   :  { %13736 = vrsqrt.f32 %v4237_v59  ;;  %v4236_v12 = vmul.f32 0.03125, %v4234_v11 }
0x2db4   :  { %v4238_v13 = vadd.f32 1e-05, %v4236_v12 }
0x2db6   :  { %13738 = vrsqrt.f32 %v4238_v13  ;;  %v11782_v13 = vld [vmem:[%s16467_s5 + $0x2d] ss:$0 sm:$0xff] }
0x2dbf   :  { %v13737_v14 = vpop.eup %13736 }
0x2dc0   :  { %v4241_v17 = vmul.f32 %v13737_v14, %v4225_v55 }
0x2dc2   :  { %v4247_v19 = vmul.f32 %v11773_v16, %v4241_v17 }
0x2dc3   :  { %v13739_v22 = vpop.eup %13738 }
0x2dc4   :  { %v4242_v57 = vmul.f32 %v13739_v22, %v4226_v2  ;;  %v4253_v24 = vadd.f32 %v11774_v18, %v4247_v19 }
0x2dc6   :  { %v4248_v25 = vmul.f32 %v11773_v16, %v4242_v57  ;;  %12962 = vmatprep.mubr.msk.f32.mxu1 %vm172_vm0, %v4253_v24 }
0x2dc8   :  { %v4254_v26 = vadd.f32 %v11774_v18, %v4248_v25  ;;  %v11783_v18 = vld [vmem:[%s16467_s5 + $0x2e] ss:$0 sm:$0xff] }
0x2dca   :  { %12963 = vmatmul.mubr.msk.f32.vlgmr.msra.gmra.mxu1 %vm172_vm0, %v4254_v26 }
0x2dcb   :  { %12985 = vmatpush3.msra.mxu1 %v4486_v58 }
0x2dcc   :  { %12986 = vmatprep.subr.mxu1 %v4485_v61 }
0x2dcd   :  { %12987 = vmatpush3.msra.mxu1 %v4485_v61 }
0x2dce   :  { %12988 = vmatprep.subr.mxu1 %v4484_v54 }
0x2dcf   :  { %12989 = vmatpush3.msra.mxu1 %v4484_v54 }
0x2dd0   :  { %12990 = vmatprep.subr.mxu1 %v4483_v43 }
0x2dd1   :  { %12991 = vmatpush3.msra.mxu1 %v4483_v43 }
0x2e8a   :  { %v12964_v32 = vpop.f32.mrf.mxu1 }
0x2e8b   :  { %v4342_v45 = vadd.f32 %v12964_v32, %v11775_v31 }
0x2e8c   :  { %v4336_v33 = vpop.f32.mrf.mxu1 }
0x2e8d   :  { %v4337_v34 = vadd.f32 %v11775_v31, %v4336_v33  ;;  %v4346_v36 = vmax.f32 %v4342_v45, 0.0 }
0x2e8f   :  { %v4345_v42 = vmax.f32 %v4337_v34, 0.0 }
0x2e91   :  { %12981 = vmatprep.mubr.msk.f32.mxu0 %vm1508_vm14, %v4345_v42 }
0x2e92   :  { %12982 = vmatmul.mubr.msk.f32.vlgmr.msra.gmra.mxu0 %vm1508_vm14, %v4346_v36 }
0x2f52   :  { %v12983_v37 = vpop.f32.mrf.mxu0 }
0x2f53   :  { %v4438_v38 = vadd.f32 %v12983_v37, %v11778_v15 }
0x2f54   :  { %v4432_v35 = vpop.f32.mrf.mxu0 }
0x2f55   :  { %v4442_v39 = vadd.f32 %v4438_v38, %v4254_v26  ;;  %v4433_v41 = vadd.f32 %v11778_v15, %v4432_v35 }
0x2f57   :  { %v4441_v46 = vadd.f32 %v4433_v41, %v4253_v24  ;;  %v4448_v44 = vsel %vm1367_vm13, %v4442_v39, 0.0 }
0x2f58   :  { %4449 = vadd.xlane.f32.xlu1 %v4448_v44 }
0x2f59   :  { %v4445_v47 = vsel %vm172_vm0, %v4441_v46, 0.0 }
0x2f5a   :  { %4446 = vadd.xlane.f32.xlu0 %v4445_v47 }
0x2fe1   :  { %v4450_v49 = vpop.xlane.xlu1 %4449 }
0x2fe2   :  { %v4452_v50 = vmul.f32 0.03125, %v4450_v49 }
0x2fe3   :  { %v4447_v51 = vpop.xlane.xlu0 %4446 }
0x2fe4   :  { %v4454_v52 = vsub.f32 %v4442_v39, %v4452_v50  ;;  %v4451_v53 = vmul.f32 0.03125, %v4447_v51 }
0x2fe6   :  { %v4453_v3 = vsub.f32 %v4441_v46, %v4451_v53  ;;  %v4456_v40 = vmul.f32 %v4454_v52, %v4454_v52 }
0x2fe8   :  { %v4460_v2 = vsel %vm1367_vm13, %v4456_v40, 0.0  ;;  %v4455_v55 = vmul.f32 %v4453_v3, %v4453_v3 }
0x2fe9   :  { %4461 = vadd.xlane.f32.xlu1 %v4460_v2 }
0x2fea   :  { %v4457_v56 = vsel %vm172_vm0, %v4455_v55, 0.0 }
0x2feb   :  { %4458 = vadd.xlane.f32.xlu0 %v4457_v56 }
0x3072   :  { %v4462_v62 = vpop.xlane.xlu1 %4461 }
0x3073   :  { %v4464_v63 = vmul.f32 0.03125, %v4462_v62 }
0x3074   :  { %v4459_v0 = vpop.xlane.xlu0 %4458 }
0x3075   :  { %v4466_v1 = vadd.f32 1e-05, %v4464_v63  ;;  %v4463_v4 = vmul.f32 0.03125, %v4459_v0 }
0x3077   :  { %13740 = vrsqrt.f32 %v4466_v1  ;;  %v4465_v48 = vadd.f32 1e-05, %v4463_v4 }
0x3079   :  { %13742 = vrsqrt.f32 %v4465_v48 }
0x3084   :  { %v13741_v7 = vpop.eup %13740 }
0x3085   :  { %v4470_v10 = vmul.f32 %v13741_v7, %v4454_v52 }
0x3086   :  { %v13743_v59 = vpop.eup %13742 }
0x3087   :  { %v4469_v11 = vmul.f32 %v13743_v59, %v4453_v3  ;;  %v4476_v12 = vmul.f32 %v11781_v8, %v4470_v10 }
0x3089   :  { %v4475_v14 = vmul.f32 %v11781_v8, %v4469_v11  ;;  %v15020_v17 = vadd.f32 %v11782_v13, %v4476_v12 }
0x308b   :  { %v15018_v16 = vadd.f32 %v11782_v13, %v4475_v14 }
0x308d   :  { %12992 = vmatprep.mubr.msk.f32.mxu1 %vm172_vm0, %v15018_v16 }
0x308e   :  { %12993 = vmatmul.mubr.msk.f32.vlgmr.msra.gmra.mxu1 %vm172_vm0, %v15020_v17 }
0x314e   :  { %v12994_v19 = vpop.f32.mrf.mxu1 }
0x314f   :  { %v15029_v22 = vadd.f32 %v12994_v19, %v11783_v18 }
0x3150   :  { %v4564_v57 = vpop.f32.mrf.mxu1 }
0x3151   :  { %v15031_v24 = vadd.f32 %v11783_v18, %v4564_v57  ;;  %4577 = vrot.lane.b32.xlu0 %v15029_v22, %s13950_s21 }
0x3153   :  { %4575 = vrot.lane.b32.xlu1 %v15031_v24, %s13950_s21  ;;  %12999 = vmatprep.mubr.msk.f32.mxu1 %vm422_vm5, %v15031_v24 }
0x3155   :  { %4776 = vrot.lane.b32.xlu0 %v15031_v24, %s13954_s24 }
0x3157   :  { %4782 = vrot.lane.b32.xlu1 %v15029_v22, %s13953_s23 }
0x315b   :  { %4780 = vrot.lane.b32.xlu1 %v15031_v24, %s13953_s23 }
0x315f   :  { %4778 = vrot.lane.b32.xlu1 %v15029_v22, %s13954_s24 }
0x31c3   :  { %v4578_v25 = vpop.permute.xlu0 %4577 }
0x31c4   :  { %12995 = vmatprep.subr.msk.mxu1 %vm422_vm5, %v4578_v25 }
0x31c5   :  { %12996 = vmatpush3.xpose.msk.msra.mxu1 %vm422_vm5, %v4578_v25  ;;  %v4576_v26 = vpop.permute.xlu1 %4575 }
0x31c6   :  { %12997 = vmatprep.subr.msk.mxu1 %vm422_vm5, %v4576_v26 }
0x31c7   :  { %v4777_v28 = vpop.permute.xlu0 %4776 }
0x31c9   :  { %12998 = vmatpush3.xpose.msk.msra.mxu1 %vm422_vm5, %v4576_v26  ;;  %v4783_v27 = vpop.permute.xlu1 %4782 }
0x31ca   :  { %13009 = vmatprep.subr.msk.mxu1 %vm422_vm5, %v4783_v27 }
0x31cc   :  { %13000 = vmatmul.mubr.msk.f32.vlgmr.msra.gmra.mxu1 %vm422_vm5, %v15029_v22 }
0x31cd   :  { %v4781_v29 = vpop.permute.xlu1 %4780  ;;  %13010 = vmatpush3.xpose.msk.msra.mxu1 %vm422_vm5, %v4783_v27  ;;  %13013 = vmatprep.mubr.msk.f32.mxu1 %vm422_vm5, %v4777_v28 }
0x31ce   :  { %13011 = vmatprep.subr.msk.mxu1 %vm422_vm5, %v4781_v29 }
0x31d1   :  { %13012 = vmatpush3.xpose.msk.msra.mxu1 %vm422_vm5, %v4781_v29  ;;  %v4779_v30 = vpop.permute.xlu1 %4778 }
0x31d4   :  { %13014 = vmatmul.mubr.msk.f32.vlgmr.msra.gmra.mxu1 %vm422_vm5, %v4779_v30 }
0x328c   :  { %v13001_v31 = vpop.f32.mrf.mxu1 }
0x328d   :  { %v4663_v32 = vmul.f32 0.35355338, %v13001_v31 }
0x328e   :  { %v4653_v45 = vpop.f32.mrf.mxu1 }
0x328f   :  { %v4665_v33 = vadd.f32 %v4663_v32, %v14190_v6  ;;  %v4662_v34 = vmul.f32 0.35355338, %v4653_v45 }
0x3291   :  { %v4664_v42 = vadd.f32 %v4662_v34, %v14192_v9  ;;  %v4669_v36 = vsel %vm514_vm8, %v4665_v33, -inf }
0x3292   :  { %4670 = vmax.xlane.f32.xlu1 %v4669_v36 }
0x3293   :  { %v4666_v15 = vsel %vm510_vm9, %v4664_v42, -inf }
0x3294   :  { %v13015_v37 = vpop.f32.mrf.mxu1  ;;  %4667 = vmax.xlane.f32.xlu0 %v4666_v15 }
0x3295   :  { %v4868_v35 = vmul.f32 0.35355338, %v13015_v37 }
0x3296   :  { %v4858_v38 = vpop.f32.mrf.mxu1 }
0x3297   :  { %v4867_v39 = vmul.f32 0.35355338, %v4858_v38  ;;  %v4870_v46 = vadd.f32 %v4868_v35, %v14190_v6 }
0x3299   :  { %v4869_v41 = vadd.f32 %v4867_v39, %v14192_v9  ;;  %v4874_v47 = vsel %vm514_vm8, %v4870_v46, -inf }
0x329b   :  { %v4871_v44 = vsel %vm510_vm9, %v4869_v41, -inf }
0x329c   :  { %4872 = vmax.xlane.f32.xlu0 %v4871_v44 }
0x32a0   :  { %4875 = vmax.xlane.f32.xlu0 %v4874_v47 }
0x32a3   :  { %4688 = vrot.lane.b32.xlu1 %v15031_v24, %s13952_s22 }
0x32a7   :  { %4895 = vrot.lane.b32.xlu1 %v15029_v22, %s13957_s27 }
0x32ab   :  { %4893 = vrot.lane.b32.xlu1 %v15031_v24, %s13957_s27 }
0x32b6   :  { %4690 = vrot.lane.b32.xlu0 %v15029_v22, %s13952_s22 }
0x331b   :  { %v4671_v49 = vpop.xlane.xlu1 %4670 }
0x331c   :  { %v4673_v50 = vsub.f32 %v4665_v33, %v4671_v49 }
0x331d   :  { %v4668_v51 = vpop.xlane.xlu0 %4667 }
0x331e   :  { %v4676_v52 = vmul.f32 1.442695, %v4673_v50  ;;  %v4672_v53 = vsub.f32 %v4664_v42, %v4668_v51 }
0x331f   :  { %v4689_v61 = vpop.permute.xlu1 %4688 }
0x3320   :  { %13744 = vpow2.f32 %v4676_v52  ;;  %v4674_v3 = vmul.f32 1.442695, %v4672_v53 }
0x3322   :  { %13746 = vpow2.f32 %v4674_v3 }
0x3323   :  { %v4896_v4 = vpop.permute.xlu1 %4895 }
0x3325   :  { %v4873_v40 = vpop.xlane.xlu0 %4872 }
0x3326   :  { %v4877_v2 = vsub.f32 %v4869_v41, %v4873_v40 }
0x3327   :  { %v4894_v59 = vpop.permute.xlu1 %4893 }
0x3328   :  { %v4879_v55 = vmul.f32 1.442695, %v4877_v2 }
0x3329   :  { %v4876_v56 = vpop.xlane.xlu0 %4875 }
0x332a   :  { %13748 = vpow2.f32 %v4879_v55  ;;  %v4878_v58 = vsub.f32 %v4870_v46, %v4876_v56 }
0x332c   :  { %v4881_v54 = vmul.f32 1.442695, %v4878_v58 }
0x332d   :  { %v13745_v43 = vpop.eup %13744  ;;  %v4691_v62 = vpop.permute.xlu0 %4690 }
0x332e   :  { %13750 = vpow2.f32 %v4881_v54  ;;  %13002 = vmatprep.subr.msk.mxu0 %vm545_vm10, %v4691_v62  ;;  %v4681_v63 = vsel %vm514_vm8, %v13745_v43, 0.0 }
0x332f   :  { %v13747_v0 = vpop.eup %13746  ;;  %4682 = vadd.xlane.f32.xlu1 %v4681_v63  ;;  %13003 = vmatpush3.msk.msra.mxu0 %vm545_vm10, %v4691_v62 }
0x3330   :  { %13004 = vmatprep.subr.mxu0 %v4689_v61  ;;  %v4678_v1 = vsel %vm510_vm9, %v13747_v0, 0.0 }
0x3331   :  { %4679 = vadd.xlane.f32.xlu0 %v4678_v1  ;;  %13005 = vmatpush3.msra.mxu0 %v4689_v61 }
0x3332   :  { %13016 = vmatprep.subr.msk.mxu0 %vm545_vm10, %v4896_v4 }
0x3337   :  { %v13749_v48 = vpop.eup %13748 }
0x3338   :  { %v4883_v7 = vsel %vm510_vm9, %v13749_v48, 0.0 }
0x3339   :  { %4884 = vadd.xlane.f32.xlu0 %v4883_v7 }
0x333b   :  { %v13751_v8 = vpop.eup %13750 }
0x333c   :  { %v4886_v10 = vsel %vm514_vm8, %v13751_v8, 0.0 }
0x333d   :  { %4887 = vadd.xlane.f32.xlu1 %v4886_v10 }
0x334e   :  { %4985 = vrot.lane.b32.xlu1 %v15031_v24, %s13955_s25 }
0x334f   :  { %4987 = vrot.lane.b32.xlu0 %v15029_v22, %s13955_s25 }
0x3352   :  { %4983 = vrot.lane.b32.xlu1 %v15029_v22, %s13956_s26 }
0x3353   :  { %4981 = vrot.lane.b32.xlu0 %v15031_v24, %s13956_s26 }
0x33b8   :  { %v4683_v11 = vpop.xlane.xlu1 %4682 }
0x33b9   :  { %13752 = vrcp.f32 %v4683_v11 }
0x33ba   :  { %v4680_v12 = vpop.xlane.xlu0 %4679 }
0x33bb   :  { %13754 = vrcp.f32 %v4680_v12 }
0x33c2   :  { %v4885_v13 = vpop.xlane.xlu0 %4884 }
0x33c3   :  { %13756 = vrcp.f32 %v4885_v13 }
0x33c6   :  { %v4888_v14 = vpop.xlane.xlu1 %4887  ;;  %v13753_v18 = vpop.eup %13752 }
0x33c7   :  { %13758 = vrcp.f32 %v4888_v14  ;;  %v4687_v25 = vmul.f32 %v13753_v18, %v13745_v43  ;;  %v4988_v26 = vpop.permute.xlu0 %4987 }
0x33c8   :  { %v13755_v19 = vpop.eup %13754 }
0x33c9   :  { %v4685_v57 = vmul.f32 %v13755_v19, %v13747_v0 }
0x33ca   :  { %v4986_v32 = vpop.permute.xlu1 %4985 }
0x33cb   :  { %13006 = vmatprep.mubr.msk.f32.mxu0 %vm510_vm9, %v4685_v57  ;;  %v4982_v31 = vpop.permute.xlu0 %4981 }
0x33cc   :  { %13007 = vmatmul.mubr.msk.f32.vlgmr.msra.gmra.mxu0 %vm510_vm9, %v4687_v25 }
0x33cd   :  { %13017 = vmatpush3.msk.msra.mxu0 %vm545_vm10, %v4896_v4 }
0x33ce   :  { %13018 = vmatprep.subr.mxu0 %v4894_v59  ;;  %v4984_v45 = vpop.permute.xlu1 %4983 }
0x33cf   :  { %13019 = vmatpush3.msra.mxu0 %v4894_v59 }
0x33d0   :  { %v13757_v27 = vpop.eup %13756  ;;  %13023 = vmatprep.subr.msk.mxu0 %vm422_vm5, %v4988_v26 }
0x33d1   :  { %v4890_v28 = vmul.f32 %v13757_v27, %v13749_v48 }
0x33d3   :  { %13020 = vmatprep.mubr.msk.f32.mxu0 %vm510_vm9, %v4890_v28 }
0x33d4   :  { %v13759_v29 = vpop.eup %13758 }
0x33d5   :  { %v4892_v30 = vmul.f32 %v13759_v29, %v13751_v8 }
0x33d7   :  { %13021 = vmatmul.mubr.msk.f32.vlgmr.msra.gmra.mxu0 %vm510_vm9, %v4892_v30 }
0x33d8   :  { %13024 = vmatpush3.xpose.msk.msra.mxu0 %vm422_vm5, %v4988_v26  ;;  %13027 = vmatprep.mubr.msk.f32.mxu0 %vm422_vm5, %v4982_v31 }
0x33d9   :  { %13025 = vmatprep.subr.msk.mxu0 %vm422_vm5, %v4986_v32 }
0x33dc   :  { %13026 = vmatpush3.xpose.msk.msra.mxu0 %vm422_vm5, %v4986_v32 }
0x33df   :  { %13028 = vmatmul.mubr.msk.f32.vlgmr.msra.gmra.mxu0 %vm422_vm5, %v4984_v45 }
0x348c   :  { %v15101_v33 = vpop.f32.mrf.mxu0 }
0x348e   :  { %v15103_v34 = vpop.f32.mrf.mxu0 }
0x3497   :  { %v15105_v42 = vpop.f32.mrf.mxu0 }
0x3499   :  { %v15107_v36 = vpop.f32.mrf.mxu0 }
0x349f   :  { %v13029_v15 = vpop.f32.mrf.mxu0 }
0x34a0   :  { %v5073_v37 = vmul.f32 0.35355338, %v13029_v15 }
0x34a1   :  { %v5063_v38 = vpop.f32.mrf.mxu0 }
0x34a2   :  { %v5075_v35 = vadd.f32 %v5073_v37, %v14190_v6  ;;  %v5072_v39 = vmul.f32 0.35355338, %v5063_v38 }
0x34a4   :  { %v5074_v41 = vadd.f32 %v5072_v39, %v14192_v9  ;;  %v5079_v46 = vsel %vm514_vm8, %v5075_v35, -inf }
0x34a5   :  { %5080 = vmax.xlane.f32.xlu1 %v5079_v46  ;;  %v5423_v46 = vld [vmem:[%s16466_s2 + $0x2f0] sm:$0xff] }
0x34a6   :  { %v5076_v44 = vsel %vm510_vm9, %v5074_v41, -inf }
0x34a7   :  { %5077 = vmax.xlane.f32.xlu0 %v5076_v44  ;;  %v5422_v44 = vld [vmem:[%s16466_s2 + $0x2e8] sm:$0xff] }
0x34b6   :  { %5098 = vrot.lane.b32.xlu1 %v15031_v24, %s13958_s28 }
0x34ba   :  { %5192 = vrot.lane.b32.xlu1 %v15029_v22, %s13959_s29 }
0x34be   :  { %5190 = vrot.lane.b32.xlu1 %v15031_v24, %s13959_s29 }
0x34c2   :  { %5188 = vrot.lane.b32.xlu1 %v15029_v22, %s13960_s30 }
0x352e   :  { %v5081_v47 = vpop.xlane.xlu1 %5080 }
0x352f   :  { %v5083_v49 = vsub.f32 %v5075_v35, %v5081_v47  ;;  %v5421_v47 = vld [vmem:[%s16466_s2 + $0x2e0] sm:$0xff] }
0x3530   :  { %v5078_v50 = vpop.xlane.xlu0 %5077 }
0x3531   :  { %v5086_v51 = vmul.f32 1.442695, %v5083_v49  ;;  %v5082_v52 = vsub.f32 %v5074_v41, %v5078_v50 }
0x3532   :  { %v5099_v61 = vpop.permute.xlu1 %5098 }
0x3533   :  { %13760 = vpow2.f32 %v5086_v51  ;;  %v5084_v53 = vmul.f32 1.442695, %v5082_v52 }
0x3535   :  { %13762 = vpow2.f32 %v5084_v53 }
0x3536   :  { %v5193_v43 = vpop.permute.xlu1 %5192 }
0x353a   :  { %v5191_v48 = vpop.permute.xlu1 %5190 }
0x353e   :  { %v5189_v7 = vpop.permute.xlu1 %5188 }
0x3540   :  { %v13761_v3 = vpop.eup %13760 }
0x3541   :  { %v5091_v40 = vsel %vm514_vm8, %v13761_v3, 0.0 }
0x3542   :  { %v13763_v2 = vpop.eup %13762  ;;  %5092 = vadd.xlane.f32.xlu0 %v5091_v40 }
0x3543   :  { %v5088_v55 = vsel %vm510_vm9, %v13763_v2, 0.0 }
0x3546   :  { %5089 = vadd.xlane.f32.xlu0 %v5088_v55 }
0x355c   :  { %5100 = vrot.lane.b32.xlu0 %v15029_v22, %s13958_s28 }
0x3560   :  { %5186 = vrot.lane.b32.xlu0 %v15031_v24, %s13960_s30 }
0x35cb   :  { %v5093_v56 = vpop.xlane.xlu0 %5092 }
0x35cc   :  { %13764 = vrcp.f32 %v5093_v56 }
0x35cf   :  { %v5090_v58 = vpop.xlane.xlu0 %5089 }
0x35d0   :  { %13766 = vrcp.f32 %v5090_v58 }
0x35d3   :  { %v5101_v54 = vpop.permute.xlu0 %5100 }
0x35d4   :  { %13030 = vmatprep.subr.msk.mxu1 %vm545_vm10, %v5101_v54 }
0x35d5   :  { %13031 = vmatpush3.msk.msra.mxu1 %vm545_vm10, %v5101_v54 }
0x35d6   :  { %13032 = vmatprep.subr.mxu1 %v5099_v61 }
0x35d7   :  { %13033 = vmatpush3.msra.mxu1 %v5099_v61  ;;  %v5187_v4 = vpop.permute.xlu0 %5186 }
0x35d8   :  { %13037 = vmatprep.subr.msk.mxu1 %vm422_vm5, %v5193_v43 }
0x35d9   :  { %v13765_v62 = vpop.eup %13764 }
0x35da   :  { %v5097_v1 = vmul.f32 %v13765_v62, %v13761_v3 }
0x35dd   :  { %v13767_v63 = vpop.eup %13766 }
0x35de   :  { %v5095_v0 = vmul.f32 %v13767_v63, %v13763_v2 }
0x35e0   :  { %13034 = vmatprep.mubr.msk.f32.mxu1 %vm510_vm9, %v5095_v0 }
0x35e1   :  { %13035 = vmatmul.mubr.msk.f32.vlgmr.msra.gmra.mxu1 %vm510_vm9, %v5097_v1 }
0x35e2   :  { %13038 = vmatpush3.xpose.msk.msra.mxu1 %vm422_vm5, %v5193_v43  ;;  %13041 = vmatprep.mubr.msk.f32.mxu1 %vm422_vm5, %v5187_v4 }
0x35e3   :  { %13039 = vmatprep.subr.msk.mxu1 %vm422_vm5, %v5191_v48 }
0x35e6   :  { %13040 = vmatpush3.xpose.msk.msra.mxu1 %vm422_vm5, %v5191_v48 }
0x35e9   :  { %13042 = vmatmul.mubr.msk.f32.vlgmr.msra.gmra.mxu1 %vm422_vm5, %v5189_v7 }
0x36a1   :  { %v13036_v8 = vpop.f32.mrf.mxu1 }
0x36a3   :  { %v5177_v10 = vpop.f32.mrf.mxu1 }
0x36a9   :  { %v13043_v59 = vpop.f32.mrf.mxu1 }
0x36aa   :  { %v5278_v11 = vmul.f32 0.35355338, %v13043_v59 }
0x36ab   :  { %v5268_v12 = vpop.f32.mrf.mxu1 }
0x36ac   :  { %v5280_v13 = vadd.f32 %v5278_v11, %v14190_v6  ;;  %v5277_v14 = vmul.f32 0.35355338, %v5268_v12 }
0x36ae   :  { %v5279_v18 = vadd.f32 %v5277_v14, %v14192_v9  ;;  %v5284_v19 = vsel %vm514_vm8, %v5280_v13, -inf }
0x36af   :  { %5285 = vmax.xlane.f32.xlu1 %v5284_v19 }
0x36b0   :  { %v5281_v57 = vsel %vm510_vm9, %v5279_v18, -inf }
0x36b1   :  { %5282 = vmax.xlane.f32.xlu0 %v5281_v57 }
0x36c0   :  { %5303 = vrot.lane.b32.xlu1 %v15031_v24, %s13961_s7 }
0x36c4   :  { %5393 = vrot.lane.b32.xlu1 %v15107_v36, %s13962_s8 }
0x36c8   :  { %5395 = vrot.lane.b32.xlu1 %v15105_v42, %s13962_s8 }
0x36cc   :  { %5403 = vrot.lane.b32.xlu1 %v13036_v8, %s13963_s0 }
0x3738   :  { %v5286_v25 = vpop.xlane.xlu1 %5285 }
0x3739   :  { %v5288_v26 = vsub.f32 %v5280_v13, %v5286_v25 }
0x373a   :  { %v5283_v27 = vpop.xlane.xlu0 %5282 }
0x373b   :  { %v5291_v28 = vmul.f32 1.442695, %v5288_v26  ;;  %v5287_v29 = vsub.f32 %v5279_v18, %v5283_v27 }
0x373c   :  { %v5304_v37 = vpop.permute.xlu1 %5303 }
0x373d   :  { %13768 = vpow2.f32 %v5291_v28  ;;  %v5289_v30 = vmul.f32 1.442695, %v5287_v29  ;;  %v5556_v28 = vld [vmem:[%s16469_s4 + $0x78] sm:$0xff]  ;;  %v5553_v29 = vld [vmem:[%s16469_s4 + $0x60] sm:$0xff] }
0x373e   :  { %13062 = vmatprep.subr.mxu1 %v5556_v28 }
0x373f   :  { %13770 = vpow2.f32 %v5289_v30  ;;  %13063 = vmatpush3.msra.mxu1 %v5556_v28  ;;  %v5652_v30 = vld [vmem:[%s16466_s2 + $0x338] sm:$0xff] }
0x3740   :  { %v5394_v51 = vpop.permute.xlu1 %5393 }
0x3741   :  { %v5415_v40 = vsel %vm422_vm5, %v15103_v34, %v5394_v51  ;;  %v11727_v34 = vld [vmem:[%s16467_s5 + $0x23] ss:$0 sm:$0xff] }
0x3742   :  { %v2885_v63 = vadd.f32 %v14738_v5, %v11727_v34  ;;  %v2880_v19 = vadd.f32 %v11727_v34, %v14740_v20  ;;  %v5555_v20 = vld [vmem:[%s16469_s4 + $0x70] sm:$0xff] }
0x3743   :  { %13064 = vmatprep.subr.mxu1 %v5555_v20 }
0x3744   :  { %v5396_v52 = vpop.permute.xlu1 %5395  ;;  %v15190_v7 = vadd.f32 %v2885_v63, %v14621_v23  ;;  %v15200_v25 = vadd.f32 %v2880_v19, %v14617_v21  ;;  %v5554_v21 = vld [vmem:[%s16469_s4 + $0x68] sm:$0xff]  ;;  %13065 = vmatpush3.msra.mxu1 %v5555_v20  ;;  %v11822_v63 = vld [vmem:[%s16467_s5 + $0x33] ss:$0 sm:$0xff] }
0x3745   :  { %v5416_v55 = vsel %vm422_vm5, %v15101_v33, %v5396_v52  ;;  %v11814_v33 = vld [vmem:[%s16467_s5 + $0x2f] ss:$0 sm:$0xff]  ;;  %13066 = vmatprep.subr.mxu1 %v5554_v21  ;;  %v5648_v52 = vld [vmem:[%s16466_s2 + $0x318] sm:$0xff]  ;;  %v5783_v19 = vld [vmem:[%s16468_s3 + $0x90] sm:$0xff] }
0x3746   :  { %v2895_v11 = vsel %vm1367_vm13, %v15190_v7, 0.0  ;;  %v2892_v27 = vsel %vm172_vm0, %v15200_v25, 0.0  ;;  %13067 = vmatpush3.msra.mxu1 %v5554_v21 }
0x3747   :  { %13068 = vmatprep.subr.mxu1 %v5553_v29 }
0x3748   :  { %v5404_v53 = vpop.permute.xlu1 %5403  ;;  %13069 = vmatpush3.msra.mxu1 %v5553_v29 }
0x3749   :  { %v5418_v61 = vsel %vm1264_vm11, %v5416_v55, %v5404_v53  ;;  %v5647_v53 = vld [vmem:[%s16466_s2 + $0x310] sm:$0xff] }
0x374a   :  { %v13769_v31 = vpop.eup %13768 }
0x374b   :  { %v5296_v32 = vsel %vm514_vm8, %v13769_v31, 0.0 }
0x374c   :  { %v13771_v24 = vpop.eup %13770  ;;  %5297 = vadd.xlane.f32.xlu0 %v5296_v32  ;;  %v5650_v32 = vld [vmem:[%s16466_s2 + $0x328] sm:$0xff] }
0x374d   :  { %v5293_v45 = vsel %vm510_vm9, %v13771_v24, 0.0 }
0x3750   :  { %5294 = vadd.xlane.f32.xlu0 %v5293_v45 }
0x3766   :  { %5305 = vrot.lane.b32.xlu0 %v15029_v22, %s13961_s7  ;;  %v5424_v22 = vld [vmem:[%s16466_s2 + $0x2f8] sm:$0xff] }
0x376a   :  { %5401 = vrot.lane.b32.xlu0 %v5177_v10, %s13963_s0 }
0x37d5   :  { %v5298_v42 = vpop.xlane.xlu0 %5297 }
0x37d6   :  { %13772 = vrcp.f32 %v5298_v42 }
0x37d9   :  { %v5295_v36 = vpop.xlane.xlu0 %5294 }
0x37da   :  { %13774 = vrcp.f32 %v5295_v36 }
0x37dd   :  { %v5306_v15 = vpop.permute.xlu0 %5305 }
0x37de   :  { %13044 = vmatprep.subr.msk.mxu0 %vm545_vm10, %v5306_v15 }
0x37df   :  { %13045 = vmatpush3.msk.msra.mxu0 %vm545_vm10, %v5306_v15 }
0x37e0   :  { %13046 = vmatprep.subr.mxu0 %v5304_v37 }
0x37e1   :  { %13047 = vmatpush3.msra.mxu0 %v5304_v37  ;;  %v5402_v3 = vpop.permute.xlu0 %5401 }
0x37e2   :  { %13051 = vmatprep.subr.mxu0 %v5424_v22  ;;  %v5417_v56 = vsel %vm1264_vm11, %v5415_v40, %v5402_v3  ;;  %v5646_v3 = vld [vmem:[%s16466_s2 + $0x308] sm:$0xff]  ;;  %v5645_v40 = vld [vmem:[%s16466_s2 + $0x300] sm:$0xff] }
0x37e3   :  { %v13773_v38 = vpop.eup %13772 }
0x37e4   :  { %v5302_v41 = vmul.f32 %v13773_v38, %v13769_v31  ;;  %v5651_v31 = vld [vmem:[%s16466_s2 + $0x330] sm:$0xff] }
0x37e7   :  { %v13775_v35 = vpop.eup %13774 }
0x37e8   :  { %v5300_v39 = vmul.f32 %v13775_v35, %v13771_v24  ;;  %v5649_v24 = vld [vmem:[%s16466_s2 + $0x320] sm:$0xff] }
0x37ea   :  { %13048 = vmatprep.mubr.msk.f32.mxu0 %vm510_vm9, %v5300_v39  ;;  %v11817_v39 = vld [vmem:[%s16467_s5 + $0x30] ss:$0 sm:$0xff] }
0x37eb   :  { %13049 = vmatmul.mubr.msk.f32.vlgmr.msra.gmra.mxu0 %vm510_vm9, %v5302_v41 }
0x37ec   :  { %13052 = vmatpush3.msra.mxu0 %v5424_v22  ;;  %v11818_v22 = vld [vmem:[%s16467_s5 + $0x31] ss:$0 sm:$0xff] }
0x37ed   :  { %13053 = vmatprep.subr.mxu0 %v5423_v46 }
0x37ee   :  { %13054 = vmatpush3.msra.mxu0 %v5423_v46 }
0x37ef   :  { %13055 = vmatprep.subr.mxu0 %v5422_v44 }
0x37f0   :  { %13056 = vmatpush3.msra.mxu0 %v5422_v44 }
0x37f1   :  { %13057 = vmatprep.subr.mxu0 %v5421_v47 }
0x37f2   :  { %13058 = vmatpush3.msra.mxu0 %v5421_v47 }
0x37f3   :  { %13073 = vmatprep.subr.mxu0 %v5652_v30 }
0x38ab   :  { %v13050_v49 = vpop.f32.mrf.mxu0 }
0x38ac   :  { %5411 = vrot.lane.b32.xlu1 %v13050_v49, %s13964_s17 }
0x38ad   :  { %v5382_v50 = vpop.f32.mrf.mxu0 }
0x38ae   :  { %5409 = vrot.lane.b32.xlu0 %v5382_v50, %s13964_s17 }
0x391e   :  { %v5412_v2 = vpop.permute.xlu1 %5411 }
0x391f   :  { %v5420_v43 = vsel %vm1267_vm12, %v5418_v61, %v5412_v2  ;;  %v11819_v2 = vld [vmem:[%s16467_s5 + $0x32] ss:$0 sm:$0xff] }
0x3920   :  { %v5410_v58 = vpop.permute.xlu0 %5409 }
0x3921   :  { %v5419_v54 = vsel %vm1267_vm12, %v5417_v56, %v5410_v58 }
0x3922   :  { %13059 = vmatprep.mubr.msk.f32.mxu0 %vm172_vm0, %v5419_v54 }
0x3923   :  { %13060 = vmatmul.mubr.msk.f32.vlgmr.msra.gmra.mxu0 %vm172_vm0, %v5420_v43 }
0x3924   :  { %13074 = vmatpush3.msra.mxu0 %v5652_v30 }
0x3925   :  { %13075 = vmatprep.subr.mxu0 %v5651_v31 }
0x3926   :  { %13076 = vmatpush3.msra.mxu0 %v5651_v31 }
0x3927   :  { %13077 = vmatprep.subr.mxu0 %v5650_v32 }
0x3928   :  { %13078 = vmatpush3.msra.mxu0 %v5650_v32 }
0x3929   :  { %13079 = vmatprep.subr.mxu0 %v5649_v24 }
0x392a   :  { %13080 = vmatpush3.msra.mxu0 %v5649_v24 }
0x392b   :  { %13081 = vmatprep.subr.mxu0 %v5648_v52 }
0x392c   :  { %13082 = vmatpush3.msra.mxu0 %v5648_v52 }
0x392d   :  { %13083 = vmatprep.subr.mxu0 %v5647_v53 }
0x392e   :  { %13084 = vmatpush3.msra.mxu0 %v5647_v53 }
0x392f   :  { %13085 = vmatprep.subr.mxu0 %v5646_v3 }
0x3930   :  { %13086 = vmatpush3.msra.mxu0 %v5646_v3 }
0x3931   :  { %13087 = vmatprep.subr.mxu0 %v5645_v40 }
0x3932   :  { %13088 = vmatpush3.msra.mxu0 %v5645_v40 }
0x39e3   :  { %v13061_v62 = vpop.f32.mrf.mxu0 }
0x39e4   :  { %v5508_v0 = vadd.f32 %v13061_v62, %v11814_v33 }
0x39e5   :  { %v5502_v1 = vpop.f32.mrf.mxu0 }
0x39e6   :  { %v5512_v4 = vadd.f32 %v5508_v0, %v15020_v17  ;;  %v5503_v48 = vadd.f32 %v11814_v33, %v5502_v1 }
0x39e8   :  { %v5511_v8 = vadd.f32 %v5503_v48, %v15018_v16  ;;  %v5518_v10 = vsel %vm1367_vm13, %v5512_v4, 0.0 }
0x39e9   :  { %5519 = vadd.xlane.f32.xlu1 %v5518_v10 }
0x39ea   :  { %v5515_v59 = vsel %vm172_vm0, %v5511_v8, 0.0 }
0x39eb   :  { %5516 = vadd.xlane.f32.xlu0 %v5515_v59 }
0x39ed   :  { %2896 = vadd.xlane.f32.xlu1 %v2895_v11 }
0x3a72   :  { %v5520_v5 = vpop.xlane.xlu1 %5519 }
0x3a73   :  { %v5522_v12 = vmul.f32 0.03125, %v5520_v5 }
0x3a74   :  { %v5517_v13 = vpop.xlane.xlu0 %5516 }
0x3a75   :  { %v5521_v17 = vmul.f32 0.03125, %v5517_v13  ;;  %v5524_v14 = vsub.f32 %v5512_v4, %v5522_v12 }
0x3a76   :  { %v2897_v34 = vpop.xlane.xlu1 %2896 }
0x3a77   :  { %v5523_v18 = vsub.f32 %v5511_v8, %v5521_v17  ;;  %v5526_v57 = vmul.f32 %v5524_v14, %v5524_v14  ;;  %v2899_v62 = vmul.f32 0.03125, %v2897_v34  ;;  %v11825_v34 = vld [vmem:[%s16467_s5 + $0x34] ss:$0 sm:$0xff] }
0x3a79   :  { %v5525_v23 = vmul.f32 %v5523_v18, %v5523_v18  ;;  %v5530_v26 = vsel %vm1367_vm13, %v5526_v57, 0.0  ;;  %v2901_v4 = vsub.f32 %v15190_v7, %v2899_v62  ;;  %v5781_v57 = vld [vmem:[%s16468_s3 + $0x80] sm:$0xff] }
0x3a7b   :  { %v5527_v16 = vsel %vm172_vm0, %v5525_v23, 0.0  ;;  %v2903_v13 = vmul.f32 %v2901_v4, %v2901_v4  ;;  %v5784_v23 = vld [vmem:[%s16468_s3 + $0x98] sm:$0xff] }
0x3a7c   :  { %5528 = vadd.xlane.f32.xlu0 %v5527_v16  ;;  %13092 = vmatprep.subr.mxu1 %v5784_v23  ;;  %v5782_v16 = vld [vmem:[%s16468_s3 + $0x88] sm:$0xff] }
0x3a80   :  { %5531 = vadd.xlane.f32.xlu0 %v5530_v26 }
0x3a84   :  { %2893 = vadd.xlane.f32.xlu0 %v2892_v27 }
0x3b05   :  { %v5529_v45 = vpop.xlane.xlu0 %5528 }
0x3b06   :  { %v5533_v42 = vmul.f32 0.03125, %v5529_v45 }
0x3b08   :  { %v5535_v36 = vadd.f32 1e-05, %v5533_v42 }
0x3b09   :  { %v5532_v15 = vpop.xlane.xlu0 %5531 }
0x3b0a   :  { %13776 = vrsqrt.f32 %v5535_v36  ;;  %v5534_v37 = vmul.f32 0.03125, %v5532_v15 }
0x3b0c   :  { %v5536_v38 = vadd.f32 1e-05, %v5534_v37 }
0x3b0d   :  { %v2894_v33 = vpop.xlane.xlu0 %2893 }
0x3b0e   :  { %13778 = vrsqrt.f32 %v5536_v38  ;;  %v2898_v0 = vmul.f32 0.03125, %v2894_v33 }
0x3b10   :  { %v2900_v10 = vsub.f32 %v15200_v25, %v2898_v0 }
0x3b17   :  { %v13777_v35 = vpop.eup %13776 }
0x3b18   :  { %v5539_v41 = vmul.f32 %v13777_v35, %v5523_v18  ;;  %v2907_v18 = vsel %vm1367_vm13, %v2903_v13, 0.0  ;;  %v11730_v35 = vld [vmem:[%s16467_s5 + $0x24] ss:$0 sm:$0xff] }
0x3b1a   :  { %v5545_v46 = vmul.f32 %v11817_v39, %v5539_v41 }
0x3b1b   :  { %v13779_v44 = vpop.eup %13778 }
0x3b1c   :  { %v5540_v47 = vmul.f32 %v13779_v44, %v5524_v14  ;;  %v5551_v49 = vadd.f32 %v11818_v22, %v5545_v46  ;;  %v2902_v14 = vmul.f32 %v2900_v10, %v2900_v10  ;;  %v11731_v44 = vld [vmem:[%s16467_s5 + $0x25] ss:$0 sm:$0xff] }
0x3b1e   :  { %v5546_v50 = vmul.f32 %v11817_v39, %v5540_v47  ;;  %13070 = vmatprep.mubr.msk.f32.mxu1 %vm172_vm0, %v5551_v49  ;;  %v2904_v7 = vsel %vm172_vm0, %v2902_v14, 0.0 }
0x3b20   :  { %v5552_v51 = vadd.f32 %v11818_v22, %v5546_v50 }
0x3b22   :  { %13071 = vmatmul.mubr.msk.f32.vlgmr.msra.gmra.mxu1 %vm172_vm0, %v5552_v51 }
0x3b23   :  { %13093 = vmatpush3.msra.mxu1 %v5784_v23 }
0x3b24   :  { %13094 = vmatprep.subr.mxu1 %v5783_v19 }
0x3b25   :  { %13095 = vmatpush3.msra.mxu1 %v5783_v19 }
0x3b26   :  { %13096 = vmatprep.subr.mxu1 %v5782_v16 }
0x3b27   :  { %13097 = vmatpush3.msra.mxu1 %v5782_v16 }
0x3b28   :  { %13098 = vmatprep.subr.mxu1 %v5781_v57 }
0x3b29   :  { %13099 = vmatpush3.msra.mxu1 %v5781_v57 }
0x3be2   :  { %v13072_v55 = vpop.f32.mrf.mxu1 }
0x3be3   :  { %v5640_v56 = vadd.f32 %v13072_v55, %v11819_v2 }
0x3be4   :  { %v5634_v58 = vpop.f32.mrf.mxu1 }
0x3be5   :  { %v5635_v61 = vadd.f32 %v11819_v2, %v5634_v58  ;;  %v5644_v43 = vmax.f32 %v5640_v56, 0.0 }
0x3be7   :  { %v5643_v54 = vmax.f32 %v5635_v61, 0.0 }
0x3be9   :  { %13089 = vmatprep.mubr.msk.f32.mxu0 %vm1508_vm14, %v5643_v54 }
0x3bea   :  { %13090 = vmatmul.mubr.msk.f32.vlgmr.msra.gmra.mxu0 %vm1508_vm14, %v5644_v43 }
0x3caa   :  { %v13091_v1 = vpop.f32.mrf.mxu0 }
0x3cab   :  { %v5736_v48 = vadd.f32 %v13091_v1, %v11822_v63  ;;  %v11826_v1 = vld [vmem:[%s16467_s5 + $0x35] ss:$0 sm:$0xff] }
0x3cac   :  { %v5730_v8 = vpop.f32.mrf.mxu0 }
0x3cad   :  { %v5740_v59 = vadd.f32 %v5736_v48, %v5552_v51  ;;  %v5731_v11 = vadd.f32 %v11822_v63, %v5730_v8  ;;  %v11827_v51 = vld [vmem:[%s16467_s5 + $0x36] ss:$0 sm:$0xff] }
0x3caf   :  { %v5739_v5 = vadd.f32 %v5731_v11, %v5551_v49  ;;  %v5746_v12 = vsel %vm1367_vm13, %v5740_v59, 0.0 }
0x3cb0   :  { %5747 = vadd.xlane.f32.xlu1 %v5746_v12 }
0x3cb1   :  { %v5743_v17 = vsel %vm172_vm0, %v5739_v5, 0.0 }
0x3cb2   :  { %5744 = vadd.xlane.f32.xlu0 %v5743_v17 }
0x3cb4   :  { %2908 = vadd.xlane.f32.xlu1 %v2907_v18 }
0x3cb6   :  { %2905 = vadd.xlane.f32.xlu0 %v2904_v7 }
0x3d39   :  { %v5748_v25 = vpop.xlane.xlu1 %5747 }
0x3d3a   :  { %v5750_v26 = vmul.f32 0.03125, %v5748_v25 }
0x3d3b   :  { %v5745_v27 = vpop.xlane.xlu0 %5744 }
0x3d3c   :  { %v5752_v28 = vsub.f32 %v5740_v59, %v5750_v26  ;;  %v5749_v20 = vmul.f32 0.03125, %v5745_v27 }
0x3d3d   :  { %v2909_v21 = vpop.xlane.xlu1 %2908 }
0x3d3e   :  { %v5751_v29 = vsub.f32 %v5739_v5, %v5749_v20  ;;  %v2911_v30 = vmul.f32 0.03125, %v2909_v21  ;;  %v5754_v31 = vmul.f32 %v5752_v28, %v5752_v28 }
0x3d3f   :  { %v2906_v32 = vpop.xlane.xlu0 %2905 }
0x3d40   :  { %v2913_v24 = vadd.f32 1e-05, %v2911_v30  ;;  %v2910_v45 = vmul.f32 0.03125, %v2906_v32  ;;  %v5758_v42 = vsel %vm1367_vm13, %v5754_v31, 0.0  ;;  %v5753_v36 = vmul.f32 %v5751_v29, %v5751_v29 }
0x3d41   :  { %5759 = vadd.xlane.f32.xlu1 %v5758_v42 }
0x3d42   :  { %13780 = vrsqrt.f32 %v2913_v24  ;;  %v2912_v15 = vadd.f32 1e-05, %v2910_v45  ;;  %v5755_v37 = vsel %vm172_vm0, %v5753_v36, 0.0 }
0x3d43   :  { %5756 = vadd.xlane.f32.xlu0 %v5755_v37 }
0x3d44   :  { %13782 = vrsqrt.f32 %v2912_v15 }
0x3d4f   :  { %v13781_v38 = vpop.eup %13780 }
0x3d50   :  { %v2917_v39 = vmul.f32 %v13781_v38, %v2901_v4 }
0x3d51   :  { %v13783_v41 = vpop.eup %13782 }
0x3d52   :  { %v2916_v22 = vmul.f32 %v13783_v41, %v2900_v10  ;;  %5879 = vrot.lane.b32.xlu1 %v5783_v19, %s13950_s21  ;;  %v2923_v46 = vmul.f32 %v11730_v35, %v2917_v39 }
0x3d54   :  { %v2922_v47 = vmul.f32 %v11730_v35, %v2916_v22  ;;  %v15287_v50 = vadd.f32 %v11731_v44, %v2923_v46 }
0x3d56   :  { %v15284_v49 = vadd.f32 %v11731_v44, %v2922_v47  ;;  %5877 = vrot.lane.b32.xlu1 %v5782_v16, %s13950_s21 }
0x3d58   :  { %13100 = vmatprep.mubr.msk.f32.mxu1 %vm172_vm0, %v15284_v49 }
0x3d59   :  { %13101 = vmatmul.mubr.msk.f32.vlgmr.msra.gmra.mxu1 %vm172_vm0, %v15287_v50  ;;  %5881 = vrot.lane.b32.xlu0 %v5784_v23, %s13950_s21 }
0x3d5a   :  { %5875 = vrot.lane.b32.xlu1 %v5781_v57, %s13950_s21 }
0x3d5d   :  { %5888 = vrot.lane.b32.xlu0 %v11827_v51, %s13950_s21 }
0x3dca   :  { %v5760_v52 = vpop.xlane.xlu1 %5759 }
0x3dcb   :  { %v5762_v53 = vmul.f32 0.03125, %v5760_v52 }
0x3dcc   :  { %v5757_v3 = vpop.xlane.xlu0 %5756 }
0x3dcd   :  { %v5764_v40 = vadd.f32 1e-05, %v5762_v53  ;;  %v5761_v2 = vmul.f32 0.03125, %v5757_v3 }
0x3dce   :  { %v5880_v55 = vpop.permute.xlu1 %5879 }
0x3dcf   :  { %13784 = vrsqrt.f32 %v5764_v40  ;;  %v5763_v56 = vadd.f32 1e-05, %v5761_v2 }
0x3dd0   :  { %v5882_v58 = vpop.permute.xlu0 %5881 }
0x3dd1   :  { %13786 = vrsqrt.f32 %v5763_v56  ;;  %13103 = vmatprep.subr.mxu1 %v5882_v58 }
0x3dd2   :  { %13104 = vmatpush3.msra.mxu1 %v5882_v58  ;;  %v5878_v61 = vpop.permute.xlu1 %5877 }
0x3dd3   :  { %13105 = vmatprep.subr.mxu1 %v5880_v55 }
0x3dd4   :  { %13106 = vmatpush3.msra.mxu1 %v5880_v55  ;;  %v5889_v5 = vpop.permute.xlu0 %5888 }
0x3dd5   :  { %13107 = vmatprep.subr.mxu1 %v5878_v61 }
0x3dd6   :  { %13108 = vmatpush3.msra.mxu1 %v5878_v61  ;;  %v5876_v54 = vpop.permute.xlu1 %5875 }
0x3dd7   :  { %13109 = vmatprep.subr.mxu1 %v5876_v54 }
0x3dd8   :  { %13110 = vmatpush3.msra.mxu1 %v5876_v54 }
0x3ddc   :  { %v13785_v43 = vpop.eup %13784 }
0x3ddd   :  { %v5768_v33 = vmul.f32 %v13785_v43, %v5752_v28 }
0x3dde   :  { %v13787_v62 = vpop.eup %13786 }
0x3ddf   :  { %v5767_v63 = vmul.f32 %v13787_v62, %v5751_v29  ;;  %v5774_v0 = vmul.f32 %v11825_v34, %v5768_v33 }
0x3de1   :  { %v5773_v4 = vmul.f32 %v11825_v34, %v5767_v63  ;;  %v15307_v8 = vadd.f32 %v11826_v1, %v5774_v0 }
0x3de3   :  { %v15305_v48 = vadd.f32 %v11826_v1, %v5773_v4 }
0x3de5   :  { %13111 = vmatprep.mubr.msk.f32.mxu1 %vm172_vm0, %v15305_v48 }
0x3de6   :  { %13112 = vmatmul.mubr.msk.f32.vlgmr.msra.gmra.mxu1 %vm172_vm0, %v15307_v8 }
0x3e19   :  { %v13102_v10 = vpop.f32.mrf.mxu1 }
0x3e1a   :  { %v15329_v18 = vadd.f32 %v13102_v10, %v11827_v51 }
0x3e1b   :  { %v5862_v59 = vpop.f32.mrf.mxu1 }
0x3e1c   :  { %v15313_v11 = vadd.f32 %v11827_v51, %v5862_v59 }
0x3e1e   :  { %13118 = vmatprep.mubr.msk.f32.mxu0 %vm422_vm5, %v15313_v11 }
0x3ea6   :  { %v13113_v12 = vpop.f32.mrf.mxu1 }
0x3ea7   :  { %v15317_v13 = vadd.f32 %v13113_v12, %v5889_v5 }
0x3ea8   :  { %v5963_v17 = vpop.f32.mrf.mxu1 }
0x3ea9   :  { %v15319_v14 = vadd.f32 %v5963_v17, %v5889_v5  ;;  %13114 = vmatprep.subr.msk.mxu0 %vm422_vm5, %v15317_v13 }
0x3eaa   :  { %13115 = vmatpush3.xpose.msk.msra.mxu0 %vm422_vm5, %v15317_v13 }
0x3eab   :  { %13116 = vmatprep.subr.msk.mxu0 %vm422_vm5, %v15319_v14 }
0x3eae   :  { %13117 = vmatpush3.xpose.msk.msra.mxu0 %vm422_vm5, %v15319_v14 }
0x3eb1   :  { %13119 = vmatmul.mubr.msk.f32.vlgmr.msra.gmra.mxu0 %vm422_vm5, %v15329_v18 }
0x3f71   :  { %v13120_v7 = vpop.f32.mrf.mxu0 }
0x3f72   :  { %v6060_v23 = vmul.f32 0.35355338, %v13120_v7 }
0x3f73   :  { %v6050_v19 = vpop.f32.mrf.mxu0 }
0x3f74   :  { %v6062_v16 = vadd.f32 %v6060_v23, %v14190_v6  ;;  %v6059_v57 = vmul.f32 0.35355338, %v6050_v19 }
0x3f76   :  { %v6061_v25 = vadd.f32 %v6059_v57, %v14192_v9  ;;  %v6066_v26 = vsel %vm514_vm8, %v6062_v16, -inf }
0x3f77   :  { %6067 = vmax.xlane.f32.xlu0 %v6066_v26 }
0x3f78   :  { %v6063_v27 = vsel %vm510_vm9, %v6061_v25, -inf }
0x3f79   :  { %6064 = vmax.xlane.f32.xlu1 %v6063_v27 }
0x3f8a   :  { %6087 = vrot.lane.b32.xlu1 %v15317_v13, %s13950_s21 }
0x3f8e   :  { %6179 = vrot.lane.b32.xlu1 %v15317_v13, %s13954_s24 }
0x3f92   :  { %6177 = vrot.lane.b32.xlu1 %v15319_v14, %s13954_s24 }
0x3f96   :  { %6173 = vrot.lane.b32.xlu1 %v15313_v11, %s13954_s24 }
0x4000   :  { %v6068_v28 = vpop.xlane.xlu0 %6067 }
0x4001   :  { %v6070_v20 = vsub.f32 %v6062_v16, %v6068_v28 }
0x4002   :  { %v6065_v21 = vpop.xlane.xlu1 %6064 }
0x4003   :  { %v6073_v29 = vmul.f32 1.442695, %v6070_v20  ;;  %v6069_v30 = vsub.f32 %v6061_v25, %v6065_v21 }
0x4005   :  { %13788 = vpow2.f32 %v6073_v29  ;;  %v6071_v31 = vmul.f32 1.442695, %v6069_v30 }
0x4006   :  { %v6088_v32 = vpop.permute.xlu1 %6087 }
0x4007   :  { %13790 = vpow2.f32 %v6071_v31  ;;  %13121 = vmatprep.subr.msk.mxu1 %vm545_vm10, %v6088_v32 }
0x4008   :  { %13122 = vmatpush3.msk.msra.mxu1 %vm545_vm10, %v6088_v32 }
0x400a   :  { %v6180_v35 = vpop.permute.xlu1 %6179 }
0x400e   :  { %v6178_v39 = vpop.permute.xlu1 %6177 }
0x4012   :  { %v13789_v24 = vpop.eup %13788  ;;  %v6174_v47 = vpop.permute.xlu1 %6173 }
0x4013   :  { %v6078_v45 = vsel %vm514_vm8, %v13789_v24, 0.0 }
0x4014   :  { %v13791_v42 = vpop.eup %13790  ;;  %6079 = vadd.xlane.f32.xlu0 %v6078_v45 }
0x4015   :  { %v6075_v36 = vsel %vm510_vm9, %v13791_v42, 0.0 }
0x4018   :  { %6076 = vadd.xlane.f32.xlu0 %v6075_v36 }
0x402e   :  { %6085 = vrot.lane.b32.xlu0 %v15319_v14, %s13950_s21 }
0x4032   :  { %6175 = vrot.lane.b32.xlu0 %v15329_v18, %s13954_s24 }
0x409d   :  { %v6080_v15 = vpop.xlane.xlu0 %6079 }
0x409e   :  { %13792 = vrcp.f32 %v6080_v15 }
0x40a1   :  { %v6077_v37 = vpop.xlane.xlu0 %6076 }
0x40a2   :  { %13794 = vrcp.f32 %v6077_v37 }
0x40a5   :  { %v6086_v38 = vpop.permute.xlu0 %6085 }
0x40a6   :  { %13123 = vmatprep.subr.mxu1 %v6086_v38 }
0x40a7   :  { %13124 = vmatpush3.msra.mxu1 %v6086_v38 }
0x40a8   :  { %13128 = vmatprep.subr.msk.mxu1 %vm422_vm5, %v6180_v35 }
0x40a9   :  { %v6176_v51 = vpop.permute.xlu0 %6175 }
0x40ab   :  { %v13793_v41 = vpop.eup %13792 }
0x40ac   :  { %v6084_v44 = vmul.f32 %v13793_v41, %v13789_v24 }
0x40af   :  { %v13795_v22 = vpop.eup %13794 }
0x40b0   :  { %v6082_v46 = vmul.f32 %v13795_v22, %v13791_v42 }
0x40b2   :  { %13125 = vmatprep.mubr.msk.f32.mxu1 %vm510_vm9, %v6082_v46 }
0x40b3   :  { %13126 = vmatmul.mubr.msk.f32.vlgmr.msra.gmra.mxu1 %vm510_vm9, %v6084_v44 }
0x40b4   :  { %13129 = vmatpush3.xpose.msk.msra.mxu1 %vm422_vm5, %v6180_v35  ;;  %13132 = vmatprep.mubr.msk.f32.mxu1 %vm422_vm5, %v6174_v47 }
0x40b5   :  { %13130 = vmatprep.subr.msk.mxu1 %vm422_vm5, %v6178_v39 }
0x40b8   :  { %13131 = vmatpush3.xpose.msk.msra.mxu1 %vm422_vm5, %v6178_v39 }
0x40bb   :  { %13133 = vmatmul.mubr.msk.f32.vlgmr.msra.gmra.mxu1 %vm422_vm5, %v6176_v51 }
0x4173   :  { %v15361_v52 = vpop.f32.mrf.mxu1 }
0x4175   :  { %v15363_v53 = vpop.f32.mrf.mxu1 }
0x417b   :  { %v13134_v3 = vpop.f32.mrf.mxu1 }
0x417c   :  { %v6265_v40 = vmul.f32 0.35355338, %v13134_v3 }
0x417d   :  { %v6255_v2 = vpop.f32.mrf.mxu1 }
0x417e   :  { %v6267_v55 = vadd.f32 %v6265_v40, %v14190_v6  ;;  %v6264_v56 = vmul.f32 0.35355338, %v6255_v2 }
0x4180   :  { %v6266_v58 = vadd.f32 %v6264_v56, %v14192_v9  ;;  %v6271_v61 = vsel %vm514_vm8, %v6267_v55, -inf }
0x4181   :  { %6272 = vmax.xlane.f32.xlu0 %v6271_v61 }
0x4182   :  { %v6268_v54 = vsel %vm510_vm9, %v6266_v58, -inf }
0x4183   :  { %6269 = vmax.xlane.f32.xlu1 %v6268_v54 }
0x4194   :  { %6292 = vrot.lane.b32.xlu1 %v15317_v13, %s13953_s23 }
0x4198   :  { %6384 = vrot.lane.b32.xlu1 %v15317_v13, %s13956_s26 }
0x419c   :  { %6382 = vrot.lane.b32.xlu1 %v15319_v14, %s13956_s26 }
0x41a0   :  { %6378 = vrot.lane.b32.xlu1 %v15313_v11, %s13956_s26 }
0x420a   :  { %v6273_v43 = vpop.xlane.xlu0 %6272 }
0x420b   :  { %v6275_v34 = vsub.f32 %v6267_v55, %v6273_v43 }
0x420c   :  { %v6270_v33 = vpop.xlane.xlu1 %6269 }
0x420d   :  { %v6278_v62 = vmul.f32 1.442695, %v6275_v34  ;;  %v6274_v63 = vsub.f32 %v6266_v58, %v6270_v33 }
0x420f   :  { %13796 = vpow2.f32 %v6278_v62  ;;  %v6276_v0 = vmul.f32 1.442695, %v6274_v63 }
0x4210   :  { %v6293_v1 = vpop.permute.xlu1 %6292 }
0x4211   :  { %13798 = vpow2.f32 %v6276_v0  ;;  %13135 = vmatprep.subr.msk.mxu0 %vm545_vm10, %v6293_v1 }
0x4212   :  { %13136 = vmatpush3.msk.msra.mxu0 %vm545_vm10, %v6293_v1 }
0x4214   :  { %v6385_v23 = vpop.permute.xlu1 %6384 }
0x4218   :  { %v6383_v19 = vpop.permute.xlu1 %6382 }
0x421c   :  { %v13797_v4 = vpop.eup %13796  ;;  %v6379_v27 = vpop.permute.xlu1 %6378 }
0x421d   :  { %v6283_v10 = vsel %vm514_vm8, %v13797_v4, 0.0 }
0x421e   :  { %v13799_v59 = vpop.eup %13798  ;;  %6284 = vadd.xlane.f32.xlu0 %v6283_v10 }
0x421f   :  { %v6280_v5 = vsel %vm510_vm9, %v13799_v59, 0.0 }
0x4222   :  { %6281 = vadd.xlane.f32.xlu0 %v6280_v5 }
0x4238   :  { %6290 = vrot.lane.b32.xlu0 %v15319_v14, %s13953_s23 }
0x423c   :  { %6380 = vrot.lane.b32.xlu0 %v15329_v18, %s13956_s26 }
0x42a7   :  { %v6285_v12 = vpop.xlane.xlu0 %6284 }
0x42a8   :  { %13800 = vrcp.f32 %v6285_v12 }
0x42ab   :  { %v6282_v17 = vpop.xlane.xlu0 %6281 }
0x42ac   :  { %13802 = vrcp.f32 %v6282_v17 }
0x42af   :  { %v6291_v7 = vpop.permute.xlu0 %6290 }
0x42b0   :  { %13137 = vmatprep.subr.mxu0 %v6291_v7 }
0x42b1   :  { %13138 = vmatpush3.msra.mxu0 %v6291_v7 }
0x42b2   :  { %13142 = vmatprep.subr.msk.mxu0 %vm422_vm5, %v6385_v23 }
0x42b3   :  { %v6381_v28 = vpop.permute.xlu0 %6380 }
0x42b5   :  { %v13801_v16 = vpop.eup %13800 }
0x42b6   :  { %v6289_v26 = vmul.f32 %v13801_v16, %v13797_v4 }
0x42b9   :  { %v13803_v57 = vpop.eup %13802 }
0x42ba   :  { %v6287_v25 = vmul.f32 %v13803_v57, %v13799_v59 }
0x42bc   :  { %13139 = vmatprep.mubr.msk.f32.mxu0 %vm510_vm9, %v6287_v25 }
0x42bd   :  { %13140 = vmatmul.mubr.msk.f32.vlgmr.msra.gmra.mxu0 %vm510_vm9, %v6289_v26 }
0x42be   :  { %13143 = vmatpush3.xpose.msk.msra.mxu0 %vm422_vm5, %v6385_v23  ;;  %13146 = vmatprep.mubr.msk.f32.mxu0 %vm422_vm5, %v6379_v27 }
0x42bf   :  { %13144 = vmatprep.subr.msk.mxu0 %vm422_vm5, %v6383_v19 }
0x42c2   :  { %13145 = vmatpush3.xpose.msk.msra.mxu0 %vm422_vm5, %v6383_v19 }
0x42c5   :  { %13147 = vmatmul.mubr.msk.f32.vlgmr.msra.gmra.mxu0 %vm422_vm5, %v6381_v28 }
0x437d   :  { %v15393_v20 = vpop.f32.mrf.mxu0 }
0x437f   :  { %v15395_v21 = vpop.f32.mrf.mxu0 }
0x4385   :  { %v13148_v29 = vpop.f32.mrf.mxu0 }
0x4386   :  { %v6470_v30 = vmul.f32 0.35355338, %v13148_v29 }
0x4387   :  { %v6460_v31 = vpop.f32.mrf.mxu0 }
0x4388   :  { %v6472_v32 = vadd.f32 %v6470_v30, %v14190_v6  ;;  %v6469_v24 = vmul.f32 0.35355338, %v6460_v31 }
0x438a   :  { %v6471_v45 = vadd.f32 %v6469_v24, %v14192_v9  ;;  %v6476_v42 = vsel %vm514_vm8, %v6472_v32, -inf  ;;  %v6820_v24 = vld [vmem:[%s16466_s2 + $0x350] sm:$0xff] }
0x438b   :  { %6477 = vmax.xlane.f32.xlu0 %v6476_v42  ;;  %v6818_v42 = vld [vmem:[%s16466_s2 + $0x340] sm:$0xff] }
0x438c   :  { %v6473_v36 = vsel %vm510_vm9, %v6471_v45, -inf }
0x438d   :  { %6474 = vmax.xlane.f32.xlu1 %v6473_v36 }
0x439e   :  { %6497 = vrot.lane.b32.xlu1 %v15317_v13, %s13955_s25 }
0x43a2   :  { %6589 = vrot.lane.b32.xlu1 %v15317_v13, %s13960_s30 }
0x43a6   :  { %6587 = vrot.lane.b32.xlu1 %v15319_v14, %s13960_s30 }
0x43aa   :  { %6583 = vrot.lane.b32.xlu1 %v15313_v11, %s13960_s30 }
0x4414   :  { %v6478_v15 = vpop.xlane.xlu0 %6477 }
0x4415   :  { %v6480_v37 = vsub.f32 %v6472_v32, %v6478_v15 }
0x4416   :  { %v6475_v38 = vpop.xlane.xlu1 %6474 }
0x4417   :  { %v6483_v35 = vmul.f32 1.442695, %v6480_v37  ;;  %v6479_v39 = vsub.f32 %v6471_v45, %v6475_v38  ;;  %v6819_v45 = vld [vmem:[%s16466_s2 + $0x348] sm:$0xff] }
0x4419   :  { %13804 = vpow2.f32 %v6483_v35  ;;  %v6481_v41 = vmul.f32 1.442695, %v6479_v39 }
0x441a   :  { %v6498_v22 = vpop.permute.xlu1 %6497 }
0x441b   :  { %13806 = vpow2.f32 %v6481_v41  ;;  %13149 = vmatprep.subr.msk.mxu1 %vm545_vm10, %v6498_v22 }
0x441c   :  { %13150 = vmatpush3.msk.msra.mxu1 %vm545_vm10, %v6498_v22 }
0x441e   :  { %v6590_v2 = vpop.permute.xlu1 %6589 }
0x4422   :  { %v6588_v55 = vpop.permute.xlu1 %6587 }
0x4426   :  { %v13805_v46 = vpop.eup %13804  ;;  %v6584_v43 = vpop.permute.xlu1 %6583 }
0x4427   :  { %v6488_v44 = vsel %vm514_vm8, %v13805_v46, 0.0 }
0x4428   :  { %v13807_v47 = vpop.eup %13806  ;;  %6489 = vadd.xlane.f32.xlu0 %v6488_v44 }
0x4429   :  { %v6485_v11 = vsel %vm510_vm9, %v13807_v47, 0.0 }
0x442c   :  { %6486 = vadd.xlane.f32.xlu0 %v6485_v11 }
0x4442   :  { %6495 = vrot.lane.b32.xlu0 %v15319_v14, %s13955_s25 }
0x4446   :  { %6585 = vrot.lane.b32.xlu0 %v15329_v18, %s13960_s30 }
0x44b1   :  { %v6490_v51 = vpop.xlane.xlu0 %6489 }
0x44b2   :  { %13808 = vrcp.f32 %v6490_v51 }
0x44b5   :  { %v6487_v3 = vpop.xlane.xlu0 %6486 }
0x44b6   :  { %13810 = vrcp.f32 %v6487_v3 }
0x44b9   :  { %v6496_v40 = vpop.permute.xlu0 %6495 }
0x44ba   :  { %13151 = vmatprep.subr.mxu1 %v6496_v40 }
0x44bb   :  { %13152 = vmatpush3.msra.mxu1 %v6496_v40 }
0x44bc   :  { %13156 = vmatprep.subr.msk.mxu1 %vm422_vm5, %v6590_v2 }
0x44bd   :  { %v6586_v18 = vpop.permute.xlu0 %6585 }
0x44bf   :  { %v13809_v56 = vpop.eup %13808 }
0x44c0   :  { %v6494_v54 = vmul.f32 %v13809_v56, %v13805_v46 }
0x44c3   :  { %v13811_v58 = vpop.eup %13810 }
0x44c4   :  { %v6492_v61 = vmul.f32 %v13811_v58, %v13807_v47 }
0x44c6   :  { %13153 = vmatprep.mubr.msk.f32.mxu1 %vm510_vm9, %v6492_v61 }
0x44c7   :  { %13154 = vmatmul.mubr.msk.f32.vlgmr.msra.gmra.mxu1 %vm510_vm9, %v6494_v54 }
0x44c8   :  { %13157 = vmatpush3.xpose.msk.msra.mxu1 %vm422_vm5, %v6590_v2  ;;  %13160 = vmatprep.mubr.msk.f32.mxu1 %vm422_vm5, %v6584_v43 }
0x44c9   :  { %13158 = vmatprep.subr.msk.mxu1 %vm422_vm5, %v6588_v55 }
0x44cc   :  { %13159 = vmatpush3.xpose.msk.msra.mxu1 %vm422_vm5, %v6588_v55 }
0x44cf   :  { %13161 = vmatmul.mubr.msk.f32.vlgmr.msra.gmra.mxu1 %vm422_vm5, %v6586_v18 }
0x4587   :  { %v13155_v34 = vpop.f32.mrf.mxu1 }
0x4589   :  { %v6574_v33 = vpop.f32.mrf.mxu1 }
0x458f   :  { %v13162_v62 = vpop.f32.mrf.mxu1 }
0x4590   :  { %v6675_v63 = vmul.f32 0.35355338, %v13162_v62 }
0x4591   :  { %v6665_v0 = vpop.f32.mrf.mxu1 }
0x4592   :  { %v6677_v1 = vadd.f32 %v6675_v63, %v14190_v6  ;;  %v6674_v4 = vmul.f32 0.35355338, %v6665_v0 }
0x4594   :  { %v6676_v10 = vadd.f32 %v6674_v4, %v14192_v9  ;;  %v6681_v59 = vsel %vm514_vm8, %v6677_v1, -inf }
0x4595   :  { %6682 = vmax.xlane.f32.xlu0 %v6681_v59  ;;  %v6951_v59 = vld [vmem:[%s16469_s4 + $0x88] sm:$0xff] }
0x4596   :  { %v6678_v5 = vsel %vm510_vm9, %v6676_v10, -inf }
0x4597   :  { %6679 = vmax.xlane.f32.xlu1 %v6678_v5  ;;  %v6950_v5 = vld [vmem:[%s16469_s4 + $0x80] sm:$0xff] }
0x45a8   :  { %6702 = vrot.lane.b32.xlu1 %v15317_v13, %s13959_s29 }
0x45ac   :  { %6790 = vrot.lane.b32.xlu1 %v15395_v21, %s13962_s8 }
0x45b0   :  { %6792 = vrot.lane.b32.xlu1 %v15393_v20, %s13962_s8 }
0x45b4   :  { %6798 = vrot.lane.b32.xlu1 %v6574_v33, %s13963_s0 }
0x461e   :  { %v6683_v12 = vpop.xlane.xlu0 %6682 }
0x461f   :  { %v6685_v17 = vsub.f32 %v6677_v1, %v6683_v12  ;;  %v15493_v12 = vld [vmem:[%s16468_s3 + $0xd8] sm:$0xff] }
0x4620   :  { %v6680_v7 = vpop.xlane.xlu1 %6679 }
0x4621   :  { %v6688_v23 = vmul.f32 1.442695, %v6685_v17  ;;  %v6684_v19 = vsub.f32 %v6676_v10, %v6680_v7  ;;  %v6952_v10 = vld [vmem:[%s16469_s4 + $0x90] sm:$0xff]  ;;  %v7049_v17 = vld [vmem:[%s16466_s2 + $0x398] sm:$0xff] }
0x4622   :  { %v7048_v7 = vld [vmem:[%s16466_s2 + $0x390] sm:$0xff] }
0x4623   :  { %13812 = vpow2.f32 %v6688_v23  ;;  %v6686_v16 = vmul.f32 1.442695, %v6684_v19  ;;  %v7047_v23 = vld [vmem:[%s16466_s2 + $0x388] sm:$0xff]  ;;  %v7046_v19 = vld [vmem:[%s16466_s2 + $0x380] sm:$0xff] }
0x4624   :  { %v6703_v57 = vpop.permute.xlu1 %6702 }
0x4625   :  { %13814 = vpow2.f32 %v6686_v16  ;;  %13163 = vmatprep.subr.msk.mxu0 %vm545_vm10, %v6703_v57 }
0x4626   :  { %13164 = vmatpush3.msk.msra.mxu0 %vm545_vm10, %v6703_v57 }
0x4628   :  { %v6791_v37 = vpop.permute.xlu1 %6790 }
0x4629   :  { %v6812_v41 = vsel %vm422_vm5, %v15363_v53, %v6791_v37  ;;  %v11860_v53 = vld [vmem:[%s16467_s5 + $0x37] ss:$0 sm:$0xff]  ;;  %v7045_v37 = vld [vmem:[%s16466_s2 + $0x378] sm:$0xff] }
0x462c   :  { %v6793_v38 = vpop.permute.xlu1 %6792 }
0x462d   :  { %v6813_v46 = vsel %vm422_vm5, %v15361_v52, %v6793_v38  ;;  %v7044_v38 = vld [vmem:[%s16466_s2 + $0x370] sm:$0xff] }
0x4630   :  { %v13813_v13 = vpop.eup %13812  ;;  %v6799_v39 = vpop.permute.xlu1 %6798 }
0x4631   :  { %v6693_v25 = vsel %vm514_vm8, %v13813_v13, 0.0  ;;  %v6814_v44 = vsel %vm1264_vm11, %v6812_v41, %v6799_v39  ;;  %v7042_v39 = vld [vmem:[%s16466_s2 + $0x360] sm:$0xff]  ;;  %v11865_v41 = vld [vmem:[%s16467_s5 + $0x3a] ss:$0 sm:$0xff] }
0x4632   :  { %v13815_v26 = vpop.eup %13814  ;;  %6694 = vadd.xlane.f32.xlu0 %v6693_v25 }
0x4633   :  { %v6690_v27 = vsel %vm510_vm9, %v13815_v26, 0.0 }
0x4636   :  { %6691 = vadd.xlane.f32.xlu0 %v6690_v27 }
0x464c   :  { %6700 = vrot.lane.b32.xlu0 %v15319_v14, %s13959_s29  ;;  %v6821_v14 = vld [vmem:[%s16466_s2 + $0x358] sm:$0xff] }
0x4650   :  { %6800 = vrot.lane.b32.xlu0 %v13155_v34, %s13963_s0 }
0x46bb   :  { %v6695_v28 = vpop.xlane.xlu0 %6694 }
0x46bc   :  { %13816 = vrcp.f32 %v6695_v28 }
0x46bf   :  { %v6692_v20 = vpop.xlane.xlu0 %6691 }
0x46c0   :  { %13818 = vrcp.f32 %v6692_v20  ;;  %v11863_v20 = vld [vmem:[%s16467_s5 + $0x38] ss:$0 sm:$0xff] }
0x46c3   :  { %v6701_v21 = vpop.permute.xlu0 %6700 }
0x46c4   :  { %13165 = vmatprep.subr.mxu0 %v6701_v21 }
0x46c5   :  { %13166 = vmatpush3.msra.mxu0 %v6701_v21 }
0x46c6   :  { %13170 = vmatprep.subr.mxu0 %v6821_v14 }
0x46c7   :  { %v6801_v35 = vpop.permute.xlu0 %6800 }
0x46c8   :  { %v6815_v11 = vsel %vm1264_vm11, %v6813_v46, %v6801_v35  ;;  %v7043_v35 = vld [vmem:[%s16466_s2 + $0x368] sm:$0xff] }
0x46c9   :  { %v13817_v29 = vpop.eup %13816 }
0x46ca   :  { %v6699_v32 = vmul.f32 %v13817_v29, %v13813_v13  ;;  %v11864_v29 = vld [vmem:[%s16467_s5 + $0x39] ss:$0 sm:$0xff] }
0x46cd   :  { %v13819_v30 = vpop.eup %13818 }
0x46ce   :  { %v6697_v31 = vmul.f32 %v13819_v30, %v13815_v26 }
0x46d0   :  { %13167 = vmatprep.mubr.msk.f32.mxu0 %vm510_vm9, %v6697_v31 }
0x46d1   :  { %13168 = vmatmul.mubr.msk.f32.vlgmr.msra.gmra.mxu0 %vm510_vm9, %v6699_v32 }
0x46d2   :  { %13171 = vmatpush3.msra.mxu0 %v6821_v14 }
0x46d3   :  { %13172 = vmatprep.subr.mxu0 %v6820_v24 }
0x46d4   :  { %13173 = vmatpush3.msra.mxu0 %v6820_v24 }
0x46d5   :  { %13174 = vmatprep.subr.mxu0 %v6819_v45 }
0x46d6   :  { %13175 = vmatpush3.msra.mxu0 %v6819_v45 }
0x46d7   :  { %13176 = vmatprep.subr.mxu0 %v6818_v42 }
0x46d8   :  { %13177 = vmatpush3.msra.mxu0 %v6818_v42  ;;  %v15518_v42 = vld [vmem:[%s16468_s3 + $0xd0] sm:$0xff] }
0x46d9   :  { %13192 = vmatprep.subr.mxu0 %v7049_v17 }
0x4791   :  { %v13169_v36 = vpop.f32.mrf.mxu0 }
0x4792   :  { %6808 = vrot.lane.b32.xlu0 %v13169_v36, %s13964_s17  ;;  %v7179_v36 = vld [vmem:[%s16468_s3 + $0xc8] sm:$0xff] }
0x4793   :  { %v6779_v15 = vpop.f32.mrf.mxu0 }
0x4794   :  { %6806 = vrot.lane.b32.xlu1 %v6779_v15, %s13964_s17  ;;  %v7178_v15 = vld [vmem:[%s16468_s3 + $0xc0] sm:$0xff] }
0x4804   :  { %v6809_v22 = vpop.permute.xlu0 %6808 }
0x4805   :  { %v6817_v3 = vsel %vm1267_vm12, %v6815_v11, %v6809_v22 }
0x4806   :  { %v6807_v47 = vpop.permute.xlu1 %6806 }
0x4807   :  { %v6816_v51 = vsel %vm1267_vm12, %v6814_v44, %v6807_v47 }
0x4808   :  { %13178 = vmatprep.mubr.msk.f32.mxu0 %vm172_vm0, %v6816_v51 }
0x4809   :  { %13179 = vmatmul.mubr.msk.f32.vlgmr.msra.gmra.mxu0 %vm172_vm0, %v6817_v3 }
0x480a   :  { %13193 = vmatpush3.msra.mxu0 %v7049_v17 }
0x480b   :  { %13194 = vmatprep.subr.mxu0 %v7048_v7 }
0x480c   :  { %13195 = vmatpush3.msra.mxu0 %v7048_v7 }
0x480d   :  { %13196 = vmatprep.subr.mxu0 %v7047_v23 }
0x480e   :  { %13197 = vmatpush3.msra.mxu0 %v7047_v23 }
0x480f   :  { %13198 = vmatprep.subr.mxu0 %v7046_v19 }
0x4810   :  { %13199 = vmatpush3.msra.mxu0 %v7046_v19 }
0x4811   :  { %13200 = vmatprep.subr.mxu0 %v7045_v37 }
0x4812   :  { %13201 = vmatpush3.msra.mxu0 %v7045_v37 }
0x4813   :  { %13202 = vmatprep.subr.mxu0 %v7044_v38 }
0x4814   :  { %13203 = vmatpush3.msra.mxu0 %v7044_v38 }
0x4815   :  { %13204 = vmatprep.subr.mxu0 %v7043_v35 }
0x4816   :  { %13205 = vmatpush3.msra.mxu0 %v7043_v35 }
0x4817   :  { %13206 = vmatprep.subr.mxu0 %v7042_v39 }
0x4818   :  { %13207 = vmatpush3.msra.mxu0 %v7042_v39 }
0x48c9   :  { %v13180_v40 = vpop.f32.mrf.mxu0 }
0x48ca   :  { %v6905_v2 = vadd.f32 %v13180_v40, %v11860_v53 }
0x48cb   :  { %v6899_v52 = vpop.f32.mrf.mxu0 }
0x48cc   :  { %v6909_v55 = vadd.f32 %v6905_v2, %v15287_v50  ;;  %v6900_v56 = vadd.f32 %v11860_v53, %v6899_v52  ;;  %v15556_v53 = vld [vmem:[%s16467_s5 + $0x46] ss:$0 sm:$0xff]  ;;  %v11868_v52 = vld [vmem:[%s16467_s5 + $0x3b] ss:$0 sm:$0xff] }
0x48ce   :  { %v6908_v58 = vadd.f32 %v6900_v56, %v15284_v49  ;;  %v6915_v61 = vsel %vm1367_vm13, %v6909_v55, 0.0  ;;  %v6953_v49 = vld [vmem:[%s16469_s4 + $0x98] sm:$0xff] }
0x48cf   :  { %6916 = vadd.xlane.f32.xlu0 %v6915_v61  ;;  %13181 = vmatprep.subr.mxu1 %v6953_v49 }
0x48d0   :  { %v6912_v54 = vsel %vm172_vm0, %v6908_v58, 0.0  ;;  %13182 = vmatpush3.msra.mxu1 %v6953_v49 }
0x48d1   :  { %6913 = vadd.xlane.f32.xlu1 %v6912_v54  ;;  %13183 = vmatprep.subr.mxu1 %v6952_v10 }
0x48d2   :  { %13184 = vmatpush3.msra.mxu1 %v6952_v10 }
0x48d3   :  { %13185 = vmatprep.subr.mxu1 %v6951_v59 }
0x48d4   :  { %13186 = vmatpush3.msra.mxu1 %v6951_v59 }
0x48d5   :  { %13187 = vmatprep.subr.mxu1 %v6950_v5 }
0x48d6   :  { %13188 = vmatpush3.msra.mxu1 %v6950_v5 }
0x48d7   :  { %13211 = vmatprep.subr.mxu1 %v15493_v12 }
0x4958   :  { %v6917_v43 = vpop.xlane.xlu0 %6916 }
0x4959   :  { %v6919_v18 = vmul.f32 0.03125, %v6917_v43 }
0x495a   :  { %v6914_v34 = vpop.xlane.xlu1 %6913 }
0x495b   :  { %v6918_v33 = vmul.f32 0.03125, %v6914_v34  ;;  %v6921_v62 = vsub.f32 %v6909_v55, %v6919_v18 }
0x495d   :  { %v6920_v63 = vsub.f32 %v6908_v58, %v6918_v33  ;;  %v6923_v4 = vmul.f32 %v6921_v62, %v6921_v62 }
0x495f   :  { %v6922_v0 = vmul.f32 %v6920_v63, %v6920_v63  ;;  %v6927_v50 = vsel %vm1367_vm13, %v6923_v4, 0.0 }
0x4961   :  { %v6924_v1 = vsel %vm172_vm0, %v6922_v0, 0.0 }
0x4962   :  { %6925 = vadd.xlane.f32.xlu0 %v6924_v1 }
0x4966   :  { %6928 = vadd.xlane.f32.xlu0 %v6927_v50 }
0x49eb   :  { %v6926_v16 = vpop.xlane.xlu0 %6925 }
0x49ec   :  { %v6930_v57 = vmul.f32 0.03125, %v6926_v16 }
0x49ee   :  { %v6932_v13 = vadd.f32 1e-05, %v6930_v57 }
0x49ef   :  { %v6929_v25 = vpop.xlane.xlu0 %6928 }
0x49f0   :  { %13820 = vrsqrt.f32 %v6932_v13  ;;  %v6931_v26 = vmul.f32 0.03125, %v6929_v25 }
0x49f2   :  { %v6933_v27 = vadd.f32 1e-05, %v6931_v26 }
0x49f4   :  { %13822 = vrsqrt.f32 %v6933_v27  ;;  %v11871_v27 = vld [vmem:[%s16467_s5 + $0x3c] ss:$0 sm:$0xff] }
0x49fd   :  { %v13821_v28 = vpop.eup %13820 }
0x49fe   :  { %v6936_v21 = vmul.f32 %v13821_v28, %v6920_v63 }
0x4a00   :  { %v6942_v30 = vmul.f32 %v11863_v20, %v6936_v21 }
0x4a01   :  { %v13823_v31 = vpop.eup %13822 }
0x4a02   :  { %v6937_v32 = vmul.f32 %v13823_v31, %v6921_v62  ;;  %v6948_v14 = vadd.f32 %v11864_v29, %v6942_v30  ;;  %v11872_v30 = vld [vmem:[%s16467_s5 + $0x3d] ss:$0 sm:$0xff] }
0x4a04   :  { %v6943_v24 = vmul.f32 %v11863_v20, %v6937_v32  ;;  %13189 = vmatprep.mubr.msk.f32.mxu1 %vm172_vm0, %v6948_v14 }
0x4a06   :  { %v6949_v45 = vadd.f32 %v11864_v29, %v6943_v24 }
0x4a08   :  { %13190 = vmatmul.mubr.msk.f32.vlgmr.msra.gmra.mxu1 %vm172_vm0, %v6949_v45 }
0x4a09   :  { %13212 = vmatpush3.msra.mxu1 %v15493_v12  ;;  %13219 = vmatprep.mubr.msk.f32.mxu1 %vm172_vm0, %v15305_v48 }
0x4a0a   :  { %13213 = vmatprep.subr.mxu1 %v15518_v42 }
0x4a0b   :  { %13214 = vmatpush3.msra.mxu1 %v15518_v42 }
0x4a0c   :  { %13215 = vmatprep.subr.mxu1 %v7179_v36 }
0x4a0d   :  { %13216 = vmatpush3.msra.mxu1 %v7179_v36 }
0x4a0e   :  { %13217 = vmatprep.subr.mxu1 %v7178_v15 }
0x4a0f   :  { %13218 = vmatpush3.msra.mxu1 %v7178_v15 }
0x4a10   :  { %13220 = vmatmul.mubr.msk.f32.vlgmr.msra.gmra.mxu1 %vm172_vm0, %v15307_v8 }
0x4ac8   :  { %v13191_v22 = vpop.f32.mrf.mxu1 }
0x4ac9   :  { %v7037_v46 = vadd.f32 %v13191_v22, %v11865_v41 }
0x4aca   :  { %v7031_v44 = vpop.f32.mrf.mxu1 }
0x4acb   :  { %v7032_v47 = vadd.f32 %v11865_v41, %v7031_v44  ;;  %v7041_v51 = vmax.f32 %v7037_v46, 0.0 }
0x4acd   :  { %v7040_v11 = vmax.f32 %v7032_v47, 0.0 }
0x4acf   :  { %13208 = vmatprep.mubr.msk.f32.mxu0 %vm1508_vm14, %v7040_v11 }
0x4ad0   :  { %v15550_v3 = vpop.f32.mrf.mxu1  ;;  %13209 = vmatmul.mubr.msk.f32.vlgmr.msra.gmra.mxu0 %vm1508_vm14, %v7041_v51 }
0x4ad1   :  { %v15606_v37 = vadd.f32 %v15550_v3, %v15556_v53 }
0x4ad2   :  { %v7253_v40 = vpop.f32.mrf.mxu1 }
0x4ad3   :  { %v15559_v2 = vadd.f32 %v15556_v53, %v7253_v40 }
0x4ad5   :  { %13237 = vmatprep.mubr.msk.f32.mxu0 %vm422_vm5, %v15559_v2 }
0x4b90   :  { %v13210_v55 = vpop.f32.mrf.mxu0 }
0x4b91   :  { %v7133_v56 = vadd.f32 %v13210_v55, %v11868_v52 }
0x4b92   :  { %v7127_v58 = vpop.f32.mrf.mxu0 }
0x4b93   :  { %v7137_v61 = vadd.f32 %v7133_v56, %v6949_v45  ;;  %v7128_v54 = vadd.f32 %v11868_v52, %v7127_v58 }
0x4b95   :  { %v7136_v43 = vadd.f32 %v7128_v54, %v6948_v14  ;;  %v7143_v18 = vsel %vm1367_vm13, %v7137_v61, 0.0 }
0x4b96   :  { %7144 = vadd.xlane.f32.xlu0 %v7143_v18 }
0x4b97   :  { %v7140_v34 = vsel %vm172_vm0, %v7136_v43, 0.0 }
0x4b98   :  { %7141 = vadd.xlane.f32.xlu1 %v7140_v34 }
0x4ba9   :  { %7272 = vrot.lane.b32.xlu1 %v15493_v12, %s13950_s21 }
0x4bad   :  { %7268 = vrot.lane.b32.xlu1 %v7179_v36, %s13950_s21 }
0x4c1f   :  { %v7145_v33 = vpop.xlane.xlu0 %7144 }
0x4c20   :  { %v7147_v62 = vmul.f32 0.03125, %v7145_v33 }
0x4c21   :  { %v7142_v63 = vpop.xlane.xlu1 %7141 }
0x4c22   :  { %v7149_v0 = vsub.f32 %v7137_v61, %v7147_v62  ;;  %v7146_v1 = vmul.f32 0.03125, %v7142_v63 }
0x4c24   :  { %v7148_v4 = vsub.f32 %v7136_v43, %v7146_v1  ;;  %v7151_v50 = vmul.f32 %v7149_v0, %v7149_v0 }
0x4c25   :  { %v7273_v49 = vpop.permute.xlu1 %7272 }
0x4c26   :  { %v7155_v10 = vsel %vm1367_vm13, %v7151_v50, 0.0  ;;  %v7150_v59 = vmul.f32 %v7148_v4, %v7148_v4  ;;  %13222 = vmatprep.subr.mxu1 %v7273_v49 }
0x4c27   :  { %7156 = vadd.xlane.f32.xlu0 %v7155_v10  ;;  %13223 = vmatpush3.msra.mxu1 %v7273_v49 }
0x4c28   :  { %v7152_v5 = vsel %vm172_vm0, %v7150_v59, 0.0 }
0x4c29   :  { %7153 = vadd.xlane.f32.xlu1 %v7152_v5  ;;  %v7269_v12 = vpop.permute.xlu1 %7268 }
0x4c3a   :  { %7266 = vrot.lane.b32.xlu1 %v7178_v15, %s13950_s21 }
0x4c3d   :  { %7270 = vrot.lane.b32.xlu0 %v15518_v42, %s13950_s21 }
0x4c3e   :  { %7279 = vrot.lane.b32.xlu1 %v15556_v53, %s13950_s21 }
0x4cb0   :  { %v7157_v17 = vpop.xlane.xlu0 %7156 }
0x4cb1   :  { %v7159_v7 = vmul.f32 0.03125, %v7157_v17 }
0x4cb2   :  { %v7154_v23 = vpop.xlane.xlu1 %7153 }
0x4cb3   :  { %v7161_v19 = vadd.f32 1e-05, %v7159_v7  ;;  %v7158_v16 = vmul.f32 0.03125, %v7154_v23 }
0x4cb4   :  { %v7271_v57 = vpop.permute.xlu0 %7270 }
0x4cb5   :  { %13824 = vrsqrt.f32 %v7161_v19  ;;  %v7160_v13 = vadd.f32 1e-05, %v7158_v16  ;;  %13224 = vmatprep.subr.mxu1 %v7271_v57 }
0x4cb6   :  { %13225 = vmatpush3.msra.mxu1 %v7271_v57  ;;  %v7267_v25 = vpop.permute.xlu1 %7266 }
0x4cb7   :  { %13826 = vrsqrt.f32 %v7160_v13  ;;  %13226 = vmatprep.subr.mxu1 %v7269_v12 }
0x4cb8   :  { %13227 = vmatpush3.msra.mxu1 %v7269_v12 }
0x4cb9   :  { %13228 = vmatprep.subr.mxu1 %v7267_v25 }
0x4cba   :  { %13229 = vmatpush3.msra.mxu1 %v7267_v25  ;;  %v7280_v24 = vpop.permute.xlu1 %7279 }
0x4cc2   :  { %v13825_v26 = vpop.eup %13824 }
0x4cc3   :  { %v7165_v28 = vmul.f32 %v13825_v26, %v7149_v0 }
0x4cc4   :  { %v13827_v20 = vpop.eup %13826 }
0x4cc5   :  { %v7164_v21 = vmul.f32 %v13827_v20, %v7148_v4  ;;  %v7171_v29 = vmul.f32 %v11871_v27, %v7165_v28 }
0x4cc7   :  { %v7170_v31 = vmul.f32 %v11871_v27, %v7164_v21  ;;  %v15586_v14 = vadd.f32 %v11872_v30, %v7171_v29 }
0x4cc9   :  { %v15584_v32 = vadd.f32 %v11872_v30, %v7170_v31 }
0x4ccb   :  { %13230 = vmatprep.mubr.msk.f32.mxu1 %vm172_vm0, %v15584_v32 }
0x4ccc   :  { %13231 = vmatmul.mubr.msk.f32.vlgmr.msra.gmra.mxu1 %vm172_vm0, %v15586_v14 }
0x4d8c   :  { %v13232_v45 = vpop.f32.mrf.mxu1 }
0x4d8d   :  { %v15592_v42 = vadd.f32 %v13232_v45, %v7280_v24 }
0x4d8e   :  { %v7354_v36 = vpop.f32.mrf.mxu1 }
0x4d8f   :  { %v15594_v15 = vadd.f32 %v7354_v36, %v7280_v24  ;;  %13233 = vmatprep.subr.msk.mxu0 %vm422_vm5, %v15592_v42 }
0x4d90   :  { %13234 = vmatpush3.xpose.msk.msra.mxu0 %vm422_vm5, %v15592_v42 }
0x4d91   :  { %13235 = vmatprep.subr.msk.mxu0 %vm422_vm5, %v15594_v15 }
0x4d94   :  { %13236 = vmatpush3.xpose.msk.msra.mxu0 %vm422_vm5, %v15594_v15 }
0x4d97   :  { %13238 = vmatmul.mubr.msk.f32.vlgmr.msra.gmra.mxu0 %vm422_vm5, %v15606_v37 }
0x4e57   :  { %v13239_v38 = vpop.f32.mrf.mxu0 }
0x4e58   :  { %v7451_v35 = vmul.f32 0.35355338, %v13239_v38 }
0x4e59   :  { %v7441_v39 = vpop.f32.mrf.mxu0 }
0x4e5a   :  { %v7453_v41 = vadd.f32 %v7451_v35, %v14190_v6  ;;  %v7450_v22 = vmul.f32 0.35355338, %v7441_v39 }
0x4e5c   :  { %v7452_v46 = vadd.f32 %v7450_v22, %v14192_v9  ;;  %v7457_v44 = vsel %vm514_vm8, %v7453_v41, -inf }
0x4e5d   :  { %7458 = vmax.xlane.f32.xlu1 %v7457_v44 }
0x4e5e   :  { %v7454_v47 = vsel %vm510_vm9, %v7452_v46, -inf }
0x4e5f   :  { %7455 = vmax.xlane.f32.xlu0 %v7454_v47 }
0x4e6e   :  { %7476 = vrot.lane.b32.xlu1 %v15594_v15, %s13950_s21 }
0x4e72   :  { %7570 = vrot.lane.b32.xlu1 %v15592_v42, %s13954_s24 }
0x4e76   :  { %7568 = vrot.lane.b32.xlu1 %v15594_v15, %s13954_s24 }
0x4e7a   :  { %7566 = vrot.lane.b32.xlu1 %v15606_v37, %s13954_s24 }
0x4ee6   :  { %v7459_v11 = vpop.xlane.xlu1 %7458 }
0x4ee7   :  { %v7461_v51 = vsub.f32 %v7453_v41, %v7459_v11 }
0x4ee8   :  { %v7456_v3 = vpop.xlane.xlu0 %7455 }
0x4ee9   :  { %v7464_v53 = vmul.f32 1.442695, %v7461_v51  ;;  %v7460_v40 = vsub.f32 %v7452_v46, %v7456_v3 }
0x4eea   :  { %v7477_v18 = vpop.permute.xlu1 %7476 }
0x4eeb   :  { %13828 = vpow2.f32 %v7464_v53  ;;  %v7462_v52 = vmul.f32 1.442695, %v7460_v40 }
0x4eed   :  { %13830 = vpow2.f32 %v7462_v52 }
0x4eee   :  { %v7571_v33 = vpop.permute.xlu1 %7570 }
0x4ef2   :  { %v7569_v50 = vpop.permute.xlu1 %7568 }
0x4ef6   :  { %v7567_v49 = vpop.permute.xlu1 %7566 }
0x4ef8   :  { %v13829_v55 = vpop.eup %13828 }
0x4ef9   :  { %v7469_v56 = vsel %vm514_vm8, %v13829_v55, 0.0 }
0x4efa   :  { %v13831_v58 = vpop.eup %13830  ;;  %7470 = vadd.xlane.f32.xlu0 %v7469_v56 }
0x4efb   :  { %v7466_v61 = vsel %vm510_vm9, %v13831_v58, 0.0 }
0x4efe   :  { %7467 = vadd.xlane.f32.xlu0 %v7466_v61 }
0x4f14   :  { %7478 = vrot.lane.b32.xlu0 %v15592_v42, %s13950_s21 }
0x4f18   :  { %7564 = vrot.lane.b32.xlu0 %v15559_v2, %s13954_s24 }
0x4f83   :  { %v7471_v54 = vpop.xlane.xlu0 %7470 }
0x4f84   :  { %13832 = vrcp.f32 %v7471_v54 }
0x4f87   :  { %v7468_v43 = vpop.xlane.xlu0 %7467 }
0x4f88   :  { %13834 = vrcp.f32 %v7468_v43 }
0x4f8b   :  { %v7479_v34 = vpop.permute.xlu0 %7478 }
0x4f8c   :  { %13240 = vmatprep.subr.msk.mxu1 %vm545_vm10, %v7479_v34 }
0x4f8d   :  { %13241 = vmatpush3.msk.msra.mxu1 %vm545_vm10, %v7479_v34 }
0x4f8e   :  { %13242 = vmatprep.subr.mxu1 %v7477_v18 }
0x4f8f   :  { %13243 = vmatpush3.msra.mxu1 %v7477_v18  ;;  %v7565_v4 = vpop.permute.xlu0 %7564 }
0x4f90   :  { %13247 = vmatprep.subr.msk.mxu1 %vm422_vm5, %v7571_v33 }
0x4f91   :  { %v13833_v62 = vpop.eup %13832 }
0x4f92   :  { %v7475_v1 = vmul.f32 %v13833_v62, %v13829_v55 }
0x4f95   :  { %v13835_v63 = vpop.eup %13834 }
0x4f96   :  { %v7473_v0 = vmul.f32 %v13835_v63, %v13831_v58 }
0x4f98   :  { %13244 = vmatprep.mubr.msk.f32.mxu1 %vm510_vm9, %v7473_v0 }
0x4f99   :  { %13245 = vmatmul.mubr.msk.f32.vlgmr.msra.gmra.mxu1 %vm510_vm9, %v7475_v1 }
0x4f9a   :  { %13248 = vmatpush3.xpose.msk.msra.mxu1 %vm422_vm5, %v7571_v33  ;;  %13251 = vmatprep.mubr.msk.f32.mxu1 %vm422_vm5, %v7565_v4 }
0x4f9b   :  { %13249 = vmatprep.subr.msk.mxu1 %vm422_vm5, %v7569_v50 }
0x4f9e   :  { %13250 = vmatpush3.xpose.msk.msra.mxu1 %vm422_vm5, %v7569_v50 }
0x4fa1   :  { %13252 = vmatmul.mubr.msk.f32.vlgmr.msra.gmra.mxu1 %vm422_vm5, %v7567_v49 }
0x5059   :  { %v15638_v10 = vpop.f32.mrf.mxu1 }
0x505b   :  { %v15640_v59 = vpop.f32.mrf.mxu1 }
0x5061   :  { %v13253_v5 = vpop.f32.mrf.mxu1 }
0x5062   :  { %v7656_v12 = vmul.f32 0.35355338, %v13253_v5 }
0x5063   :  { %v7646_v17 = vpop.f32.mrf.mxu1 }
0x5064   :  { %v7658_v7 = vadd.f32 %v7656_v12, %v14190_v6  ;;  %v7655_v23 = vmul.f32 0.35355338, %v7646_v17 }
0x5066   :  { %v7657_v19 = vadd.f32 %v7655_v23, %v14192_v9  ;;  %v7662_v16 = vsel %vm514_vm8, %v7658_v7, -inf }
0x5067   :  { %7663 = vmax.xlane.f32.xlu1 %v7662_v16 }
0x5068   :  { %v7659_v57 = vsel %vm510_vm9, %v7657_v19, -inf }
0x5069   :  { %7660 = vmax.xlane.f32.xlu0 %v7659_v57 }
0x5078   :  { %7681 = vrot.lane.b32.xlu1 %v15594_v15, %s13953_s23 }
0x507c   :  { %7775 = vrot.lane.b32.xlu1 %v15592_v42, %s13956_s26 }
0x5080   :  { %7773 = vrot.lane.b32.xlu1 %v15594_v15, %s13956_s26 }
0x5084   :  { %7771 = vrot.lane.b32.xlu1 %v15606_v37, %s13956_s26 }
0x50f0   :  { %v7664_v13 = vpop.xlane.xlu1 %7663 }
0x50f1   :  { %v7666_v25 = vsub.f32 %v7658_v7, %v7664_v13 }
0x50f2   :  { %v7661_v26 = vpop.xlane.xlu0 %7660 }
0x50f3   :  { %v7669_v27 = vmul.f32 1.442695, %v7666_v25  ;;  %v7665_v28 = vsub.f32 %v7657_v19, %v7661_v26 }
0x50f4   :  { %v7682_v36 = vpop.permute.xlu1 %7681 }
0x50f5   :  { %13836 = vpow2.f32 %v7669_v27  ;;  %v7667_v20 = vmul.f32 1.442695, %v7665_v28 }
0x50f7   :  { %13838 = vpow2.f32 %v7667_v20 }
0x50f8   :  { %v7776_v35 = vpop.permute.xlu1 %7775 }
0x50fc   :  { %v7774_v47 = vpop.permute.xlu1 %7773 }
0x5100   :  { %v7772_v11 = vpop.permute.xlu1 %7771 }
0x5102   :  { %v13837_v21 = vpop.eup %13836 }
0x5103   :  { %v7674_v29 = vsel %vm514_vm8, %v13837_v21, 0.0 }
0x5104   :  { %v13839_v30 = vpop.eup %13838  ;;  %7675 = vadd.xlane.f32.xlu0 %v7674_v29 }
0x5105   :  { %v7671_v31 = vsel %vm510_vm9, %v13839_v30, 0.0 }
0x5108   :  { %7672 = vadd.xlane.f32.xlu0 %v7671_v31 }
0x511e   :  { %7683 = vrot.lane.b32.xlu0 %v15592_v42, %s13953_s23 }
0x5122   :  { %7769 = vrot.lane.b32.xlu0 %v15559_v2, %s13956_s26 }
0x518d   :  { %v7676_v24 = vpop.xlane.xlu0 %7675 }
0x518e   :  { %13840 = vrcp.f32 %v7676_v24 }
0x5191   :  { %v7673_v45 = vpop.xlane.xlu0 %7672 }
0x5192   :  { %13842 = vrcp.f32 %v7673_v45 }
0x5195   :  { %v7684_v38 = vpop.permute.xlu0 %7683 }
0x5196   :  { %13254 = vmatprep.subr.msk.mxu0 %vm545_vm10, %v7684_v38 }
0x5197   :  { %13255 = vmatpush3.msk.msra.mxu0 %vm545_vm10, %v7684_v38 }
0x5198   :  { %13256 = vmatprep.subr.mxu0 %v7682_v36 }
0x5199   :  { %13257 = vmatpush3.msra.mxu0 %v7682_v36  ;;  %v7770_v44 = vpop.permute.xlu0 %7769 }
0x519a   :  { %13261 = vmatprep.subr.msk.mxu0 %vm422_vm5, %v7776_v35 }
0x519b   :  { %v13841_v39 = vpop.eup %13840 }
0x519c   :  { %v7680_v46 = vmul.f32 %v13841_v39, %v13837_v21 }
0x519f   :  { %v13843_v41 = vpop.eup %13842 }
0x51a0   :  { %v7678_v22 = vmul.f32 %v13843_v41, %v13839_v30 }
0x51a2   :  { %13258 = vmatprep.mubr.msk.f32.mxu0 %vm510_vm9, %v7678_v22 }
0x51a3   :  { %13259 = vmatmul.mubr.msk.f32.vlgmr.msra.gmra.mxu0 %vm510_vm9, %v7680_v46 }
0x51a4   :  { %13262 = vmatpush3.xpose.msk.msra.mxu0 %vm422_vm5, %v7776_v35  ;;  %13265 = vmatprep.mubr.msk.f32.mxu0 %vm422_vm5, %v7770_v44 }
0x51a5   :  { %13263 = vmatprep.subr.msk.mxu0 %vm422_vm5, %v7774_v47 }
0x51a8   :  { %13264 = vmatpush3.xpose.msk.msra.mxu0 %vm422_vm5, %v7774_v47 }
0x51ab   :  { %13266 = vmatmul.mubr.msk.f32.vlgmr.msra.gmra.mxu0 %vm422_vm5, %v7772_v11 }
0x5263   :  { %v15670_v51 = vpop.f32.mrf.mxu0 }
0x5265   :  { %v15672_v3 = vpop.f32.mrf.mxu0 }
0x526b   :  { %v13267_v53 = vpop.f32.mrf.mxu0 }
0x526c   :  { %v7861_v40 = vmul.f32 0.35355338, %v13267_v53 }
0x526d   :  { %v7851_v52 = vpop.f32.mrf.mxu0 }
0x526e   :  { %v7863_v55 = vadd.f32 %v7861_v40, %v14190_v6  ;;  %v7860_v56 = vmul.f32 0.35355338, %v7851_v52 }
0x5270   :  { %v7862_v58 = vadd.f32 %v7860_v56, %v14192_v9  ;;  %v7867_v61 = vsel %vm514_vm8, %v7863_v55, -inf  ;;  %v8211_v56 = vld [vmem:[%s16466_s2 + $0x410] sm:$0xff] }
0x5271   :  { %7868 = vmax.xlane.f32.xlu1 %v7867_v61  ;;  %v8209_v61 = vld [vmem:[%s16466_s2 + $0x400] sm:$0xff] }
0x5272   :  { %v7864_v54 = vsel %vm510_vm9, %v7862_v58, -inf }
0x5273   :  { %7865 = vmax.xlane.f32.xlu0 %v7864_v54 }
0x5282   :  { %7886 = vrot.lane.b32.xlu1 %v15594_v15, %s13955_s25 }
0x5286   :  { %7980 = vrot.lane.b32.xlu1 %v15592_v42, %s13960_s30 }
0x528a   :  { %7978 = vrot.lane.b32.xlu1 %v15594_v15, %s13960_s30 }
0x528e   :  { %7976 = vrot.lane.b32.xlu1 %v15606_v37, %s13960_s30 }
0x52fa   :  { %v7869_v43 = vpop.xlane.xlu1 %7868 }
0x52fb   :  { %v7871_v18 = vsub.f32 %v7863_v55, %v7869_v43 }
0x52fc   :  { %v7866_v34 = vpop.xlane.xlu0 %7865 }
0x52fd   :  { %v7874_v33 = vmul.f32 1.442695, %v7871_v18  ;;  %v7870_v62 = vsub.f32 %v7862_v58, %v7866_v34  ;;  %v8210_v58 = vld [vmem:[%s16466_s2 + $0x408] sm:$0xff] }
0x52fe   :  { %v7887_v5 = vpop.permute.xlu1 %7886 }
0x52ff   :  { %13844 = vpow2.f32 %v7874_v33  ;;  %v7872_v63 = vmul.f32 1.442695, %v7870_v62 }
0x5301   :  { %13846 = vpow2.f32 %v7872_v63 }
0x5302   :  { %v7981_v17 = vpop.permute.xlu1 %7980 }
0x5306   :  { %v7979_v57 = vpop.permute.xlu1 %7978 }
0x530a   :  { %v7977_v13 = vpop.permute.xlu1 %7976 }
0x530c   :  { %v13845_v0 = vpop.eup %13844 }
0x530d   :  { %v7879_v1 = vsel %vm514_vm8, %v13845_v0, 0.0 }
0x530e   :  { %v13847_v4 = vpop.eup %13846  ;;  %7880 = vadd.xlane.f32.xlu0 %v7879_v1 }
0x530f   :  { %v7876_v50 = vsel %vm510_vm9, %v13847_v4, 0.0 }
0x5312   :  { %7877 = vadd.xlane.f32.xlu0 %v7876_v50 }
0x5328   :  { %7888 = vrot.lane.b32.xlu0 %v15592_v42, %s13955_s25 }
0x532c   :  { %7974 = vrot.lane.b32.xlu0 %v15559_v2, %s13960_s30 }
0x5397   :  { %v7881_v37 = vpop.xlane.xlu0 %7880 }
0x5398   :  { %13848 = vrcp.f32 %v7881_v37 }
0x539b   :  { %v7878_v49 = vpop.xlane.xlu0 %7877 }
0x539c   :  { %13850 = vrcp.f32 %v7878_v49 }
0x539f   :  { %v7889_v12 = vpop.permute.xlu0 %7888 }
0x53a0   :  { %13268 = vmatprep.subr.msk.mxu1 %vm545_vm10, %v7889_v12 }
0x53a1   :  { %13269 = vmatpush3.msk.msra.mxu1 %vm545_vm10, %v7889_v12 }
0x53a2   :  { %13270 = vmatprep.subr.mxu1 %v7887_v5 }
0x53a3   :  { %13271 = vmatpush3.msra.mxu1 %v7887_v5  ;;  %v7975_v2 = vpop.permute.xlu0 %7974 }
0x53a4   :  { %13275 = vmatprep.subr.msk.mxu1 %vm422_vm5, %v7981_v17 }
0x53a5   :  { %v13849_v7 = vpop.eup %13848 }
0x53a6   :  { %v7885_v16 = vmul.f32 %v13849_v7, %v13845_v0 }
0x53a9   :  { %v13851_v23 = vpop.eup %13850 }
0x53aa   :  { %v7883_v19 = vmul.f32 %v13851_v23, %v13847_v4 }
0x53ac   :  { %13272 = vmatprep.mubr.msk.f32.mxu1 %vm510_vm9, %v7883_v19 }
0x53ad   :  { %13273 = vmatmul.mubr.msk.f32.vlgmr.msra.gmra.mxu1 %vm510_vm9, %v7885_v16 }
0x53ae   :  { %13276 = vmatpush3.xpose.msk.msra.mxu1 %vm422_vm5, %v7981_v17  ;;  %13279 = vmatprep.mubr.msk.f32.mxu1 %vm422_vm5, %v7975_v2 }
0x53af   :  { %13277 = vmatprep.subr.msk.mxu1 %vm422_vm5, %v7979_v57 }
0x53b2   :  { %13278 = vmatpush3.xpose.msk.msra.mxu1 %vm422_vm5, %v7979_v57 }
0x53b5   :  { %13280 = vmatmul.mubr.msk.f32.vlgmr.msra.gmra.mxu1 %vm422_vm5, %v7977_v13 }
0x546d   :  { %v13274_v25 = vpop.f32.mrf.mxu1 }
0x546f   :  { %v7965_v26 = vpop.f32.mrf.mxu1 }
0x5475   :  { %v13281_v27 = vpop.f32.mrf.mxu1 }
0x5476   :  { %v8066_v28 = vmul.f32 0.35355338, %v13281_v27 }
0x5477   :  { %v8056_v20 = vpop.f32.mrf.mxu1 }
0x5478   :  { %v8068_v21 = vadd.f32 %v8066_v28, %v14190_v6  ;;  %v8065_v29 = vmul.f32 0.35355338, %v8056_v20 }
0x547a   :  { %v8067_v30 = vadd.f32 %v8065_v29, %v14192_v9  ;;  %v8072_v31 = vsel %vm514_vm8, %v8068_v21, -inf }
0x547b   :  { %8073 = vmax.xlane.f32.xlu1 %v8072_v31  ;;  %v8342_v31 = vld [vmem:[%s16469_s4 + $0xc8] sm:$0xff] }
0x547c   :  { %v8069_v24 = vsel %vm510_vm9, %v8067_v30, -inf }
0x547d   :  { %8070 = vmax.xlane.f32.xlu0 %v8069_v24  ;;  %v8341_v24 = vld [vmem:[%s16469_s4 + $0xc0] sm:$0xff] }
0x548c   :  { %8091 = vrot.lane.b32.xlu1 %v15594_v15, %s13959_s29 }
0x5490   :  { %8181 = vrot.lane.b32.xlu1 %v15672_v3, %s13962_s8 }
0x5494   :  { %8183 = vrot.lane.b32.xlu1 %v15670_v51, %s13962_s8 }
0x5498   :  { %8191 = vrot.lane.b32.xlu1 %v13274_v25, %s13963_s0 }
0x5504   :  { %v8074_v45 = vpop.xlane.xlu1 %8073 }
0x5505   :  { %v8076_v36 = vsub.f32 %v8068_v21, %v8074_v45  ;;  %v15770_v45 = vld [vmem:[%s16468_s3 + $0xb8] sm:$0xff] }
0x5506   :  { %v8071_v38 = vpop.xlane.xlu0 %8070 }
0x5507   :  { %v8079_v35 = vmul.f32 1.442695, %v8076_v36  ;;  %v8075_v39 = vsub.f32 %v8067_v30, %v8071_v38  ;;  %v8343_v30 = vld [vmem:[%s16469_s4 + $0xd0] sm:$0xff]  ;;  %v8440_v36 = vld [vmem:[%s16466_s2 + $0x458] sm:$0xff] }
0x5508   :  { %v8092_v3 = vpop.permute.xlu1 %8091  ;;  %v8439_v38 = vld [vmem:[%s16466_s2 + $0x450] sm:$0xff] }
0x5509   :  { %13852 = vpow2.f32 %v8079_v35  ;;  %v8077_v41 = vmul.f32 1.442695, %v8075_v39  ;;  %v8438_v35 = vld [vmem:[%s16466_s2 + $0x448] sm:$0xff]  ;;  %v8437_v39 = vld [vmem:[%s16466_s2 + $0x440] sm:$0xff] }
0x550b   :  { %13854 = vpow2.f32 %v8077_v41 }
0x550c   :  { %v8182_v18 = vpop.permute.xlu1 %8181 }
0x550d   :  { %v8203_v63 = vsel %vm422_vm5, %v15640_v59, %v8182_v18  ;;  %v11906_v59 = vld [vmem:[%s16467_s5 + $0x47] ss:$0 sm:$0xff]  ;;  %v8436_v18 = vld [vmem:[%s16466_s2 + $0x438] sm:$0xff] }
0x5510   :  { %v8184_v34 = vpop.permute.xlu1 %8183 }
0x5511   :  { %v8204_v1 = vsel %vm422_vm5, %v15638_v10, %v8184_v34  ;;  %v8435_v34 = vld [vmem:[%s16466_s2 + $0x430] sm:$0xff] }
0x5514   :  { %v8192_v33 = vpop.permute.xlu1 %8191 }
0x5515   :  { %v8206_v37 = vsel %vm1264_vm11, %v8204_v1, %v8192_v33  ;;  %v8434_v33 = vld [vmem:[%s16466_s2 + $0x428] sm:$0xff] }
0x5516   :  { %v13853_v22 = vpop.eup %13852 }
0x5517   :  { %v8084_v46 = vsel %vm514_vm8, %v13853_v22, 0.0 }
0x5518   :  { %v13855_v15 = vpop.eup %13854  ;;  %8085 = vadd.xlane.f32.xlu0 %v8084_v46 }
0x5519   :  { %v8081_v44 = vsel %vm510_vm9, %v13855_v15, 0.0 }
0x551c   :  { %8082 = vadd.xlane.f32.xlu0 %v8081_v44 }
0x5532   :  { %8093 = vrot.lane.b32.xlu0 %v15592_v42, %s13959_s29  ;;  %v8212_v42 = vld [vmem:[%s16466_s2 + $0x418] sm:$0xff] }
0x5536   :  { %8189 = vrot.lane.b32.xlu0 %v7965_v26, %s13963_s0 }
0x55a1   :  { %v8086_v47 = vpop.xlane.xlu0 %8085 }
0x55a2   :  { %13856 = vrcp.f32 %v8086_v47 }
0x55a5   :  { %v8083_v11 = vpop.xlane.xlu0 %8082 }
0x55a6   :  { %13858 = vrcp.f32 %v8083_v11 }
0x55a9   :  { %v8094_v51 = vpop.permute.xlu0 %8093 }
0x55aa   :  { %13282 = vmatprep.subr.msk.mxu0 %vm545_vm10, %v8094_v51 }
0x55ab   :  { %13283 = vmatpush3.msk.msra.mxu0 %vm545_vm10, %v8094_v51  ;;  %v11909_v51 = vld [vmem:[%s16467_s5 + $0x48] ss:$0 sm:$0xff] }
0x55ac   :  { %13284 = vmatprep.subr.mxu0 %v8092_v3 }
0x55ad   :  { %13285 = vmatpush3.msra.mxu0 %v8092_v3  ;;  %v8190_v62 = vpop.permute.xlu0 %8189 }
0x55ae   :  { %13289 = vmatprep.subr.mxu0 %v8212_v42  ;;  %v8205_v4 = vsel %vm1264_vm11, %v8203_v63, %v8190_v62  ;;  %v8433_v62 = vld [vmem:[%s16466_s2 + $0x420] sm:$0xff]  ;;  %v11911_v63 = vld [vmem:[%s16467_s5 + $0x4a] ss:$0 sm:$0xff] }
0x55af   :  { %v13857_v53 = vpop.eup %13856 }
0x55b0   :  { %v8090_v55 = vmul.f32 %v13857_v53, %v13853_v22  ;;  %v11910_v53 = vld [vmem:[%s16467_s5 + $0x49] ss:$0 sm:$0xff] }
0x55b3   :  { %v13859_v40 = vpop.eup %13858 }
0x55b4   :  { %v8088_v52 = vmul.f32 %v13859_v40, %v13855_v15 }
0x55b6   :  { %13286 = vmatprep.mubr.msk.f32.mxu0 %vm510_vm9, %v8088_v52 }
0x55b7   :  { %13287 = vmatmul.mubr.msk.f32.vlgmr.msra.gmra.mxu0 %vm510_vm9, %v8090_v55 }
0x55b8   :  { %13290 = vmatpush3.msra.mxu0 %v8212_v42 }
0x55b9   :  { %13291 = vmatprep.subr.mxu0 %v8211_v56 }
0x55ba   :  { %13292 = vmatpush3.msra.mxu0 %v8211_v56 }
0x55bb   :  { %13293 = vmatprep.subr.mxu0 %v8210_v58 }
0x55bc   :  { %13294 = vmatpush3.msra.mxu0 %v8210_v58 }
0x55bd   :  { %13295 = vmatprep.subr.mxu0 %v8209_v61 }
0x55be   :  { %13296 = vmatpush3.msra.mxu0 %v8209_v61  ;;  %v8571_v61 = vld [vmem:[%s16468_s3 + $0xb0] sm:$0xff] }
0x55bf   :  { %13311 = vmatprep.subr.mxu0 %v8440_v36 }
0x5677   :  { %v13288_v54 = vpop.f32.mrf.mxu0 }
0x5678   :  { %8199 = vrot.lane.b32.xlu1 %v13288_v54, %s13964_s17  ;;  %v8570_v54 = vld [vmem:[%s16468_s3 + $0xa8] sm:$0xff] }
0x5679   :  { %v8170_v43 = vpop.f32.mrf.mxu0 }
0x567a   :  { %8197 = vrot.lane.b32.xlu0 %v8170_v43, %s13964_s17  ;;  %v8569_v43 = vld [vmem:[%s16468_s3 + $0xa0] sm:$0xff] }
0x56ea   :  { %v8200_v0 = vpop.permute.xlu1 %8199 }
0x56eb   :  { %v8208_v5 = vsel %vm1267_vm12, %v8206_v37, %v8200_v0 }
0x56ec   :  { %v8198_v50 = vpop.permute.xlu0 %8197 }
0x56ed   :  { %v8207_v49 = vsel %vm1267_vm12, %v8205_v4, %v8198_v50 }
0x56ee   :  { %13297 = vmatprep.mubr.msk.f32.mxu0 %vm172_vm0, %v8207_v49 }
0x56ef   :  { %13298 = vmatmul.mubr.msk.f32.vlgmr.msra.gmra.mxu0 %vm172_vm0, %v8208_v5 }
0x56f0   :  { %13312 = vmatpush3.msra.mxu0 %v8440_v36 }
0x56f1   :  { %13313 = vmatprep.subr.mxu0 %v8439_v38 }
0x56f2   :  { %13314 = vmatpush3.msra.mxu0 %v8439_v38 }
0x56f3   :  { %13315 = vmatprep.subr.mxu0 %v8438_v35 }
0x56f4   :  { %13316 = vmatpush3.msra.mxu0 %v8438_v35 }
0x56f5   :  { %13317 = vmatprep.subr.mxu0 %v8437_v39 }
0x56f6   :  { %13318 = vmatpush3.msra.mxu0 %v8437_v39 }
0x56f7   :  { %13319 = vmatprep.subr.mxu0 %v8436_v18 }
0x56f8   :  { %13320 = vmatpush3.msra.mxu0 %v8436_v18 }
0x56f9   :  { %13321 = vmatprep.subr.mxu0 %v8435_v34 }
0x56fa   :  { %13322 = vmatpush3.msra.mxu0 %v8435_v34 }
0x56fb   :  { %13323 = vmatprep.subr.mxu0 %v8434_v33 }
0x56fc   :  { %13324 = vmatpush3.msra.mxu0 %v8434_v33 }
0x56fd   :  { %13325 = vmatprep.subr.mxu0 %v8433_v62 }
0x56fe   :  { %13326 = vmatpush3.msra.mxu0 %v8433_v62 }
0x57af   :  { %v13299_v12 = vpop.f32.mrf.mxu0 }
0x57b0   :  { %v8296_v17 = vadd.f32 %v13299_v12, %v11906_v59 }
0x57b1   :  { %v8290_v10 = vpop.f32.mrf.mxu0 }
0x57b2   :  { %v8300_v7 = vadd.f32 %v8296_v17, %v15307_v8  ;;  %v8291_v23 = vadd.f32 %v11906_v59, %v8290_v10  ;;  %v15829_v59 = vld [vmem:[%s16467_s5 + $0x3e] ss:$0 sm:$0xff]  ;;  %v11914_v10 = vld [vmem:[%s16467_s5 + $0x4b] ss:$0 sm:$0xff] }
0x57b4   :  { %v8299_v19 = vadd.f32 %v8291_v23, %v15305_v48  ;;  %v8306_v16 = vsel %vm1367_vm13, %v8300_v7, 0.0  ;;  %v8344_v48 = vld [vmem:[%s16469_s4 + $0xd8] sm:$0xff] }
0x57b5   :  { %8307 = vadd.xlane.f32.xlu1 %v8306_v16  ;;  %13300 = vmatprep.subr.mxu1 %v8344_v48 }
0x57b6   :  { %v8303_v2 = vsel %vm172_vm0, %v8299_v19, 0.0  ;;  %13301 = vmatpush3.msra.mxu1 %v8344_v48 }
0x57b7   :  { %8304 = vadd.xlane.f32.xlu0 %v8303_v2  ;;  %13302 = vmatprep.subr.mxu1 %v8343_v30 }
0x57b8   :  { %13303 = vmatpush3.msra.mxu1 %v8343_v30 }
0x57b9   :  { %13304 = vmatprep.subr.mxu1 %v8342_v31 }
0x57ba   :  { %13305 = vmatpush3.msra.mxu1 %v8342_v31 }
0x57bb   :  { %13306 = vmatprep.subr.mxu1 %v8341_v24 }
0x57bc   :  { %13307 = vmatpush3.msra.mxu1 %v8341_v24 }
0x57bd   :  { %13330 = vmatprep.subr.mxu1 %v15770_v45 }
0x583e   :  { %v8308_v57 = vpop.xlane.xlu1 %8307 }
0x583f   :  { %v8310_v13 = vmul.f32 0.03125, %v8308_v57 }
0x5840   :  { %v8305_v25 = vpop.xlane.xlu0 %8304 }
0x5841   :  { %v8309_v26 = vmul.f32 0.03125, %v8305_v25  ;;  %v8312_v27 = vsub.f32 %v8300_v7, %v8310_v13 }
0x5843   :  { %v8311_v28 = vsub.f32 %v8299_v19, %v8309_v26  ;;  %v8314_v29 = vmul.f32 %v8312_v27, %v8312_v27 }
0x5845   :  { %v8313_v20 = vmul.f32 %v8311_v28, %v8311_v28  ;;  %v8318_v8 = vsel %vm1367_vm13, %v8314_v29, 0.0 }
0x5847   :  { %v8315_v21 = vsel %vm172_vm0, %v8313_v20, 0.0 }
0x5848   :  { %8316 = vadd.xlane.f32.xlu0 %v8315_v21 }
0x584c   :  { %8319 = vadd.xlane.f32.xlu0 %v8318_v8 }
0x58d1   :  { %v8317_v41 = vpop.xlane.xlu0 %8316 }
0x58d2   :  { %v8321_v22 = vmul.f32 0.03125, %v8317_v41 }
0x58d4   :  { %v8323_v46 = vadd.f32 1e-05, %v8321_v22 }
0x58d5   :  { %v8320_v15 = vpop.xlane.xlu0 %8319 }
0x58d6   :  { %13860 = vrsqrt.f32 %v8323_v46  ;;  %v8322_v44 = vmul.f32 0.03125, %v8320_v15 }
0x58d8   :  { %v8324_v47 = vadd.f32 1e-05, %v8322_v44 }
0x58da   :  { %13862 = vrsqrt.f32 %v8324_v47  ;;  %v11917_v47 = vld [vmem:[%s16467_s5 + $0x4c] ss:$0 sm:$0xff] }
0x58e3   :  { %v13861_v11 = vpop.eup %13860 }
0x58e4   :  { %v8327_v3 = vmul.f32 %v13861_v11, %v8311_v28 }
0x58e6   :  { %v8333_v40 = vmul.f32 %v11909_v51, %v8327_v3 }
0x58e7   :  { %v13863_v52 = vpop.eup %13862 }
0x58e8   :  { %v8328_v55 = vmul.f32 %v13863_v52, %v8312_v27  ;;  %v8339_v42 = vadd.f32 %v11910_v53, %v8333_v40  ;;  %v11918_v40 = vld [vmem:[%s16467_s5 + $0x4d] ss:$0 sm:$0xff] }
0x58ea   :  { %v8334_v56 = vmul.f32 %v11909_v51, %v8328_v55  ;;  %13308 = vmatprep.mubr.msk.f32.mxu1 %vm172_vm0, %v8339_v42 }
0x58ec   :  { %v8340_v58 = vadd.f32 %v11910_v53, %v8334_v56 }
0x58ee   :  { %13309 = vmatmul.mubr.msk.f32.vlgmr.msra.gmra.mxu1 %vm172_vm0, %v8340_v58 }
0x58ef   :  { %13331 = vmatpush3.msra.mxu1 %v15770_v45  ;;  %13338 = vmatprep.mubr.msk.f32.mxu1 %vm172_vm0, %v15584_v32 }
0x58f0   :  { %13332 = vmatprep.subr.mxu1 %v8571_v61 }
0x58f1   :  { %13333 = vmatpush3.msra.mxu1 %v8571_v61 }
0x58f2   :  { %13334 = vmatprep.subr.mxu1 %v8570_v54 }
0x58f3   :  { %13335 = vmatpush3.msra.mxu1 %v8570_v54 }
0x58f4   :  { %13336 = vmatprep.subr.mxu1 %v8569_v43 }
0x58f5   :  { %13337 = vmatpush3.msra.mxu1 %v8569_v43 }
0x58f6   :  { %13339 = vmatmul.mubr.msk.f32.vlgmr.msra.gmra.mxu1 %vm172_vm0, %v15586_v14 }
0x59ae   :  { %v13310_v0 = vpop.f32.mrf.mxu1 }
0x59af   :  { %v8428_v1 = vadd.f32 %v13310_v0, %v11911_v63 }
0x59b0   :  { %v8422_v4 = vpop.f32.mrf.mxu1 }
0x59b1   :  { %v8423_v50 = vadd.f32 %v11911_v63, %v8422_v4  ;;  %v8432_v49 = vmax.f32 %v8428_v1, 0.0 }
0x59b3   :  { %v8431_v37 = vmax.f32 %v8423_v50, 0.0 }
0x59b5   :  { %13327 = vmatprep.mubr.msk.f32.mxu0 %vm1508_vm14, %v8431_v37 }
0x59b6   :  { %v15823_v5 = vpop.f32.mrf.mxu1  ;;  %13328 = vmatmul.mubr.msk.f32.vlgmr.msra.gmra.mxu0 %vm1508_vm14, %v8432_v49 }
0x59b7   :  { %v15878_v18 = vadd.f32 %v15823_v5, %v15829_v59 }
0x59b8   :  { %v8644_v12 = vpop.f32.mrf.mxu1 }
0x59b9   :  { %v15832_v17 = vadd.f32 %v15829_v59, %v8644_v12 }
0x59bb   :  { %13356 = vmatprep.mubr.msk.f32.mxu0 %vm422_vm5, %v15832_v17 }
0x5a76   :  { %v13329_v7 = vpop.f32.mrf.mxu0 }
0x5a77   :  { %v8524_v23 = vadd.f32 %v13329_v7, %v11914_v10 }
0x5a78   :  { %v8518_v19 = vpop.f32.mrf.mxu0 }
0x5a79   :  { %v8528_v16 = vadd.f32 %v8524_v23, %v8340_v58  ;;  %v8519_v2 = vadd.f32 %v11914_v10, %v8518_v19 }
0x5a7b   :  { %v8527_v57 = vadd.f32 %v8519_v2, %v8339_v42  ;;  %v8534_v13 = vsel %vm1367_vm13, %v8528_v16, 0.0 }
0x5a7c   :  { %8535 = vadd.xlane.f32.xlu1 %v8534_v13 }
0x5a7d   :  { %v8531_v25 = vsel %vm172_vm0, %v8527_v57, 0.0 }
0x5a7e   :  { %8532 = vadd.xlane.f32.xlu0 %v8531_v25 }
0x5b05   :  { %v8536_v26 = vpop.xlane.xlu1 %8535 }
0x5b06   :  { %v8538_v27 = vmul.f32 0.03125, %v8536_v26 }
0x5b07   :  { %v8533_v28 = vpop.xlane.xlu0 %8532 }
0x5b08   :  { %v8540_v20 = vsub.f32 %v8528_v16, %v8538_v27  ;;  %v8537_v21 = vmul.f32 0.03125, %v8533_v28 }
0x5b0a   :  { %v8539_v29 = vsub.f32 %v8527_v57, %v8537_v21  ;;  %v8542_v8 = vmul.f32 %v8540_v20, %v8540_v20 }
0x5b0c   :  { %v8546_v48 = vsel %vm1367_vm13, %v8542_v8, 0.0  ;;  %v8541_v30 = vmul.f32 %v8539_v29, %v8539_v29 }
0x5b0d   :  { %8547 = vadd.xlane.f32.xlu1 %v8546_v48 }
0x5b0e   :  { %v8543_v31 = vsel %vm172_vm0, %v8541_v30, 0.0 }
0x5b0f   :  { %8544 = vadd.xlane.f32.xlu0 %v8543_v31 }
0x5b1e   :  { %8661 = vrot.lane.b32.xlu1 %v8571_v61, %s13950_s21 }
0x5b22   :  { %8659 = vrot.lane.b32.xlu1 %v8570_v54, %s13950_s21 }
0x5b25   :  { %8663 = vrot.lane.b32.xlu0 %v15770_v45, %s13950_s21 }
0x5b26   :  { %8657 = vrot.lane.b32.xlu1 %v8569_v43, %s13950_s21 }
0x5b29   :  { %8670 = vrot.lane.b32.xlu0 %v15829_v59, %s13950_s21 }
0x5b96   :  { %v8548_v24 = vpop.xlane.xlu1 %8547 }
0x5b97   :  { %v8550_v36 = vmul.f32 0.03125, %v8548_v24 }
0x5b98   :  { %v8545_v38 = vpop.xlane.xlu0 %8544 }
0x5b99   :  { %v8552_v35 = vadd.f32 1e-05, %v8550_v36  ;;  %v8549_v39 = vmul.f32 0.03125, %v8545_v38 }
0x5b9a   :  { %v8662_v41 = vpop.permute.xlu1 %8661 }
0x5b9b   :  { %13864 = vrsqrt.f32 %v8552_v35  ;;  %v8551_v22 = vadd.f32 1e-05, %v8549_v39 }
0x5b9c   :  { %v8664_v46 = vpop.permute.xlu0 %8663 }
0x5b9d   :  { %13866 = vrsqrt.f32 %v8551_v22  ;;  %13341 = vmatprep.subr.mxu1 %v8664_v46 }
0x5b9e   :  { %13342 = vmatpush3.msra.mxu1 %v8664_v46  ;;  %v8660_v15 = vpop.permute.xlu1 %8659 }
0x5b9f   :  { %13343 = vmatprep.subr.mxu1 %v8662_v41 }
0x5ba0   :  { %13344 = vmatpush3.msra.mxu1 %v8662_v41  ;;  %v8671_v56 = vpop.permute.xlu0 %8670 }
0x5ba1   :  { %13345 = vmatprep.subr.mxu1 %v8660_v15 }
0x5ba2   :  { %13346 = vmatpush3.msra.mxu1 %v8660_v15  ;;  %v8658_v45 = vpop.permute.xlu1 %8657 }
0x5ba3   :  { %13347 = vmatprep.subr.mxu1 %v8658_v45 }
0x5ba4   :  { %13348 = vmatpush3.msra.mxu1 %v8658_v45 }
0x5ba8   :  { %v13865_v44 = vpop.eup %13864 }
0x5ba9   :  { %v8556_v11 = vmul.f32 %v13865_v44, %v8540_v20 }
0x5baa   :  { %v13867_v51 = vpop.eup %13866 }
0x5bab   :  { %v8555_v3 = vmul.f32 %v13867_v51, %v8539_v29  ;;  %v8562_v53 = vmul.f32 %v11917_v47, %v8556_v11 }
0x5bad   :  { %v8561_v52 = vmul.f32 %v11917_v47, %v8555_v3  ;;  %v15858_v42 = vadd.f32 %v11918_v40, %v8562_v53 }
0x5baf   :  { %v15856_v55 = vadd.f32 %v11918_v40, %v8561_v52 }
0x5bb1   :  { %13349 = vmatprep.mubr.msk.f32.mxu1 %vm172_vm0, %v15856_v55 }
0x5bb2   :  { %13350 = vmatmul.mubr.msk.f32.vlgmr.msra.gmra.mxu1 %vm172_vm0, %v15858_v42 }
0x5c72   :  { %v13351_v58 = vpop.f32.mrf.mxu1 }
0x5c73   :  { %v15864_v61 = vadd.f32 %v13351_v58, %v8671_v56 }
0x5c74   :  { %v8745_v54 = vpop.f32.mrf.mxu1 }
0x5c75   :  { %v15866_v43 = vadd.f32 %v8745_v54, %v8671_v56  ;;  %13352 = vmatprep.subr.msk.mxu0 %vm422_vm5, %v15864_v61 }
0x5c76   :  { %13353 = vmatpush3.xpose.msk.msra.mxu0 %vm422_vm5, %v15864_v61 }
0x5c77   :  { %13354 = vmatprep.subr.msk.mxu0 %vm422_vm5, %v15866_v43 }
0x5c7a   :  { %13355 = vmatpush3.xpose.msk.msra.mxu0 %vm422_vm5, %v15866_v43 }
0x5c7d   :  { %13357 = vmatmul.mubr.msk.f32.vlgmr.msra.gmra.mxu0 %vm422_vm5, %v15878_v18 }
0x5d3d   :  { %v13358_v34 = vpop.f32.mrf.mxu0 }
0x5d3e   :  { %v8842_v33 = vmul.f32 0.35355338, %v13358_v34 }
0x5d3f   :  { %v8832_v62 = vpop.f32.mrf.mxu0 }
0x5d40   :  { %v8844_v63 = vadd.f32 %v8842_v33, %v14190_v6  ;;  %v8841_v0 = vmul.f32 0.35355338, %v8832_v62 }
0x5d42   :  { %v8843_v1 = vadd.f32 %v8841_v0, %v14192_v9  ;;  %v8848_v4 = vsel %vm514_vm8, %v8844_v63, -inf }
0x5d43   :  { %8849 = vmax.xlane.f32.xlu0 %v8848_v4 }
0x5d44   :  { %v8845_v50 = vsel %vm510_vm9, %v8843_v1, -inf }
0x5d45   :  { %8846 = vmax.xlane.f32.xlu1 %v8845_v50 }
0x5d56   :  { %8869 = vrot.lane.b32.xlu1 %v15864_v61, %s13950_s21 }
0x5d5a   :  { %8961 = vrot.lane.b32.xlu1 %v15864_v61, %s13954_s24 }
0x5d5e   :  { %8959 = vrot.lane.b32.xlu1 %v15866_v43, %s13954_s24 }
0x5d62   :  { %8955 = vrot.lane.b32.xlu1 %v15832_v17, %s13954_s24 }
0x5dcc   :  { %v8850_v37 = vpop.xlane.xlu0 %8849 }
0x5dcd   :  { %v8852_v49 = vsub.f32 %v8844_v63, %v8850_v37 }
0x5dce   :  { %v8847_v5 = vpop.xlane.xlu1 %8846 }
0x5dcf   :  { %v8855_v59 = vmul.f32 1.442695, %v8852_v49  ;;  %v8851_v12 = vsub.f32 %v8843_v1, %v8847_v5 }
0x5dd1   :  { %13868 = vpow2.f32 %v8855_v59  ;;  %v8853_v10 = vmul.f32 1.442695, %v8851_v12 }
0x5dd2   :  { %v8870_v7 = vpop.permute.xlu1 %8869 }
0x5dd3   :  { %13870 = vpow2.f32 %v8853_v10  ;;  %13359 = vmatprep.subr.msk.mxu1 %vm545_vm10, %v8870_v7 }
0x5dd4   :  { %13360 = vmatpush3.msk.msra.mxu1 %vm545_vm10, %v8870_v7 }
0x5dd6   :  { %v8962_v26 = vpop.permute.xlu1 %8961 }
0x5dda   :  { %v8960_v27 = vpop.permute.xlu1 %8959 }
0x5dde   :  { %v13869_v23 = vpop.eup %13868  ;;  %v8956_v8 = vpop.permute.xlu1 %8955 }
0x5ddf   :  { %v8860_v19 = vsel %vm514_vm8, %v13869_v23, 0.0 }
0x5de0   :  { %v13871_v16 = vpop.eup %13870  ;;  %8861 = vadd.xlane.f32.xlu0 %v8860_v19 }
0x5de1   :  { %v8857_v2 = vsel %vm510_vm9, %v13871_v16, 0.0 }
0x5de4   :  { %8858 = vadd.xlane.f32.xlu0 %v8857_v2 }
0x5dfa   :  { %8867 = vrot.lane.b32.xlu0 %v15866_v43, %s13950_s21 }
0x5dfe   :  { %8957 = vrot.lane.b32.xlu0 %v15878_v18, %s13954_s24 }
0x5e69   :  { %v8862_v57 = vpop.xlane.xlu0 %8861 }
0x5e6a   :  { %13872 = vrcp.f32 %v8862_v57 }
0x5e6d   :  { %v8859_v13 = vpop.xlane.xlu0 %8858 }
0x5e6e   :  { %13874 = vrcp.f32 %v8859_v13 }
0x5e71   :  { %v8868_v25 = vpop.permute.xlu0 %8867 }
0x5e72   :  { %13361 = vmatprep.subr.mxu1 %v8868_v25 }
0x5e73   :  { %13362 = vmatpush3.msra.mxu1 %v8868_v25 }
0x5e74   :  { %13366 = vmatprep.subr.msk.mxu1 %vm422_vm5, %v8962_v26 }
0x5e75   :  { %v8958_v48 = vpop.permute.xlu0 %8957 }
0x5e77   :  { %v13873_v28 = vpop.eup %13872 }
0x5e78   :  { %v8866_v29 = vmul.f32 %v13873_v28, %v13869_v23 }
0x5e7b   :  { %v13875_v20 = vpop.eup %13874 }
0x5e7c   :  { %v8864_v21 = vmul.f32 %v13875_v20, %v13871_v16 }
0x5e7e   :  { %13363 = vmatprep.mubr.msk.f32.mxu1 %vm510_vm9, %v8864_v21 }
0x5e7f   :  { %13364 = vmatmul.mubr.msk.f32.vlgmr.msra.gmra.mxu1 %vm510_vm9, %v8866_v29 }
0x5e80   :  { %13367 = vmatpush3.xpose.msk.msra.mxu1 %vm422_vm5, %v8962_v26  ;;  %13370 = vmatprep.mubr.msk.f32.mxu1 %vm422_vm5, %v8956_v8 }
0x5e81   :  { %13368 = vmatprep.subr.msk.mxu1 %vm422_vm5, %v8960_v27 }
0x5e84   :  { %13369 = vmatpush3.xpose.msk.msra.mxu1 %vm422_vm5, %v8960_v27 }
0x5e87   :  { %13371 = vmatmul.mubr.msk.f32.vlgmr.msra.gmra.mxu1 %vm422_vm5, %v8958_v48 }
0x5f3f   :  { %v15910_v30 = vpop.f32.mrf.mxu1 }
0x5f41   :  { %v15912_v31 = vpop.f32.mrf.mxu1 }
0x5f47   :  { %v13372_v24 = vpop.f32.mrf.mxu1 }
0x5f48   :  { %v9047_v36 = vmul.f32 0.35355338, %v13372_v24 }
0x5f49   :  { %v9037_v38 = vpop.f32.mrf.mxu1 }
0x5f4a   :  { %v9049_v35 = vadd.f32 %v9047_v36, %v14190_v6  ;;  %v9046_v39 = vmul.f32 0.35355338, %v9037_v38 }
0x5f4c   :  { %v9048_v41 = vadd.f32 %v9046_v39, %v14192_v9  ;;  %v9053_v22 = vsel %vm514_vm8, %v9049_v35, -inf }
0x5f4d   :  { %9054 = vmax.xlane.f32.xlu0 %v9053_v22 }
0x5f4e   :  { %v9050_v46 = vsel %vm510_vm9, %v9048_v41, -inf }
0x5f4f   :  { %9051 = vmax.xlane.f32.xlu1 %v9050_v46 }
0x5f60   :  { %9074 = vrot.lane.b32.xlu1 %v15864_v61, %s13953_s23 }
0x5f64   :  { %9166 = vrot.lane.b32.xlu1 %v15864_v61, %s13956_s26 }
0x5f68   :  { %9164 = vrot.lane.b32.xlu1 %v15866_v43, %s13956_s26 }
0x5f6c   :  { %9160 = vrot.lane.b32.xlu1 %v15832_v17, %s13956_s26 }
0x5fd6   :  { %v9055_v15 = vpop.xlane.xlu0 %9054 }
0x5fd7   :  { %v9057_v45 = vsub.f32 %v9049_v35, %v9055_v15 }
0x5fd8   :  { %v9052_v44 = vpop.xlane.xlu1 %9051 }
0x5fd9   :  { %v9060_v47 = vmul.f32 1.442695, %v9057_v45  ;;  %v9056_v11 = vsub.f32 %v9048_v41, %v9052_v44 }
0x5fdb   :  { %13876 = vpow2.f32 %v9060_v47  ;;  %v9058_v51 = vmul.f32 1.442695, %v9056_v11 }
0x5fdc   :  { %v9075_v3 = vpop.permute.xlu1 %9074 }
0x5fdd   :  { %13878 = vpow2.f32 %v9058_v51  ;;  %13373 = vmatprep.subr.msk.mxu0 %vm545_vm10, %v9075_v3 }
0x5fde   :  { %13374 = vmatpush3.msk.msra.mxu0 %vm545_vm10, %v9075_v3 }
0x5fe0   :  { %v9167_v33 = vpop.permute.xlu1 %9166 }
0x5fe4   :  { %v9165_v62 = vpop.permute.xlu1 %9164 }
0x5fe8   :  { %v13877_v53 = vpop.eup %13876  ;;  %v9161_v50 = vpop.permute.xlu1 %9160 }
0x5fe9   :  { %v9065_v40 = vsel %vm514_vm8, %v13877_v53, 0.0 }
0x5fea   :  { %v13879_v52 = vpop.eup %13878  ;;  %9066 = vadd.xlane.f32.xlu0 %v9065_v40 }
0x5feb   :  { %v9062_v56 = vsel %vm510_vm9, %v13879_v52, 0.0 }
0x5fee   :  { %9063 = vadd.xlane.f32.xlu0 %v9062_v56 }
0x6004   :  { %9072 = vrot.lane.b32.xlu0 %v15866_v43, %s13953_s23 }
0x6008   :  { %9162 = vrot.lane.b32.xlu0 %v15878_v18, %s13956_s26 }
0x6073   :  { %v9067_v58 = vpop.xlane.xlu0 %9066 }
0x6074   :  { %13880 = vrcp.f32 %v9067_v58 }
0x6077   :  { %v9064_v54 = vpop.xlane.xlu0 %9063 }
0x6078   :  { %13882 = vrcp.f32 %v9064_v54 }
0x607b   :  { %v9073_v34 = vpop.permute.xlu0 %9072 }
0x607c   :  { %13375 = vmatprep.subr.mxu0 %v9073_v34 }
0x607d   :  { %13376 = vmatpush3.msra.mxu0 %v9073_v34 }
0x607e   :  { %13380 = vmatprep.subr.msk.mxu0 %vm422_vm5, %v9167_v33 }
0x607f   :  { %v9163_v37 = vpop.permute.xlu0 %9162 }
0x6081   :  { %v13881_v63 = vpop.eup %13880 }
0x6082   :  { %v9071_v4 = vmul.f32 %v13881_v63, %v13877_v53 }
0x6085   :  { %v13883_v0 = vpop.eup %13882 }
0x6086   :  { %v9069_v1 = vmul.f32 %v13883_v0, %v13879_v52 }
0x6088   :  { %13377 = vmatprep.mubr.msk.f32.mxu0 %vm510_vm9, %v9069_v1 }
0x6089   :  { %13378 = vmatmul.mubr.msk.f32.vlgmr.msra.gmra.mxu0 %vm510_vm9, %v9071_v4 }
0x608a   :  { %13381 = vmatpush3.xpose.msk.msra.mxu0 %vm422_vm5, %v9167_v33  ;;  %13384 = vmatprep.mubr.msk.f32.mxu0 %vm422_vm5, %v9161_v50 }
0x608b   :  { %13382 = vmatprep.subr.msk.mxu0 %vm422_vm5, %v9165_v62 }
0x608e   :  { %13383 = vmatpush3.xpose.msk.msra.mxu0 %vm422_vm5, %v9165_v62 }
0x6091   :  { %13385 = vmatmul.mubr.msk.f32.vlgmr.msra.gmra.mxu0 %vm422_vm5, %v9163_v37 }
0x6149   :  { %v15942_v49 = vpop.f32.mrf.mxu0 }
0x614b   :  { %v15944_v5 = vpop.f32.mrf.mxu0 }
0x6151   :  { %v13386_v59 = vpop.f32.mrf.mxu0 }
0x6152   :  { %v9252_v12 = vmul.f32 0.35355338, %v13386_v59 }
0x6153   :  { %v9242_v10 = vpop.f32.mrf.mxu0 }
0x6154   :  { %v9254_v7 = vadd.f32 %v9252_v12, %v14190_v6  ;;  %v9251_v23 = vmul.f32 0.35355338, %v9242_v10 }
0x6156   :  { %v9253_v19 = vadd.f32 %v9251_v23, %v14192_v9  ;;  %v9258_v16 = vsel %vm514_vm8, %v9254_v7, -inf  ;;  %v9602_v23 = vld [vmem:[%s16466_s2 + $0x3b0] sm:$0xff] }
0x6157   :  { %9259 = vmax.xlane.f32.xlu0 %v9258_v16  ;;  %v9600_v16 = vld [vmem:[%s16466_s2 + $0x3a0] sm:$0xff] }
0x6158   :  { %v9255_v2 = vsel %vm510_vm9, %v9253_v19, -inf }
0x6159   :  { %9256 = vmax.xlane.f32.xlu1 %v9255_v2 }
0x616a   :  { %9279 = vrot.lane.b32.xlu1 %v15864_v61, %s13955_s25 }
0x616e   :  { %9371 = vrot.lane.b32.xlu1 %v15864_v61, %s13960_s30 }
0x6172   :  { %9369 = vrot.lane.b32.xlu1 %v15866_v43, %s13960_s30 }
0x6176   :  { %9365 = vrot.lane.b32.xlu1 %v15832_v17, %s13960_s30 }
0x61e0   :  { %v9260_v57 = vpop.xlane.xlu0 %9259 }
0x61e1   :  { %v9262_v13 = vsub.f32 %v9254_v7, %v9260_v57 }
0x61e2   :  { %v9257_v25 = vpop.xlane.xlu1 %9256 }
0x61e3   :  { %v9265_v26 = vmul.f32 1.442695, %v9262_v13  ;;  %v9261_v27 = vsub.f32 %v9253_v19, %v9257_v25  ;;  %v9601_v19 = vld [vmem:[%s16466_s2 + $0x3a8] sm:$0xff] }
0x61e5   :  { %13884 = vpow2.f32 %v9265_v26  ;;  %v9263_v28 = vmul.f32 1.442695, %v9261_v27 }
0x61e6   :  { %v9280_v20 = vpop.permute.xlu1 %9279 }
0x61e7   :  { %13886 = vpow2.f32 %v9263_v28  ;;  %13387 = vmatprep.subr.msk.mxu1 %vm545_vm10, %v9280_v20 }
0x61e8   :  { %13388 = vmatpush3.msk.msra.mxu1 %vm545_vm10, %v9280_v20 }
0x61ea   :  { %v9372_v38 = vpop.permute.xlu1 %9371 }
0x61ee   :  { %v9370_v35 = vpop.permute.xlu1 %9369 }
0x61f2   :  { %v13885_v21 = vpop.eup %13884  ;;  %v9366_v15 = vpop.permute.xlu1 %9365 }
0x61f3   :  { %v9270_v29 = vsel %vm514_vm8, %v13885_v21, 0.0 }
0x61f4   :  { %v13887_v8 = vpop.eup %13886  ;;  %9271 = vadd.xlane.f32.xlu0 %v9270_v29 }
0x61f5   :  { %v9267_v17 = vsel %vm510_vm9, %v13887_v8, 0.0 }
0x61f8   :  { %9268 = vadd.xlane.f32.xlu0 %v9267_v17 }
0x620e   :  { %9277 = vrot.lane.b32.xlu0 %v15866_v43, %s13955_s25 }
0x6212   :  { %9367 = vrot.lane.b32.xlu0 %v15878_v18, %s13960_s30 }
0x627d   :  { %v9272_v48 = vpop.xlane.xlu0 %9271 }
0x627e   :  { %13888 = vrcp.f32 %v9272_v48 }
0x6281   :  { %v9269_v24 = vpop.xlane.xlu0 %9268 }
0x6282   :  { %13890 = vrcp.f32 %v9269_v24 }
0x6285   :  { %v9278_v36 = vpop.permute.xlu0 %9277 }
0x6286   :  { %13389 = vmatprep.subr.mxu1 %v9278_v36 }
0x6287   :  { %13390 = vmatpush3.msra.mxu1 %v9278_v36 }
0x6288   :  { %13394 = vmatprep.subr.msk.mxu1 %vm422_vm5, %v9372_v38 }
0x6289   :  { %v9368_v18 = vpop.permute.xlu0 %9367 }
0x628b   :  { %v13889_v39 = vpop.eup %13888 }
0x628c   :  { %v9276_v46 = vmul.f32 %v13889_v39, %v13885_v21 }
0x628f   :  { %v13891_v41 = vpop.eup %13890 }
0x6290   :  { %v9274_v22 = vmul.f32 %v13891_v41, %v13887_v8 }
0x6292   :  { %13391 = vmatprep.mubr.msk.f32.mxu1 %vm510_vm9, %v9274_v22 }
0x6293   :  { %13392 = vmatmul.mubr.msk.f32.vlgmr.msra.gmra.mxu1 %vm510_vm9, %v9276_v46 }
0x6294   :  { %13395 = vmatpush3.xpose.msk.msra.mxu1 %vm422_vm5, %v9372_v38  ;;  %13398 = vmatprep.mubr.msk.f32.mxu1 %vm422_vm5, %v9366_v15 }
0x6295   :  { %13396 = vmatprep.subr.msk.mxu1 %vm422_vm5, %v9370_v35 }
0x6298   :  { %13397 = vmatpush3.xpose.msk.msra.mxu1 %vm422_vm5, %v9370_v35 }
0x629b   :  { %13399 = vmatmul.mubr.msk.f32.vlgmr.msra.gmra.mxu1 %vm422_vm5, %v9368_v18 }
0x6353   :  { %v13393_v45 = vpop.f32.mrf.mxu1 }
0x6355   :  { %v9356_v44 = vpop.f32.mrf.mxu1 }
0x635b   :  { %v13400_v47 = vpop.f32.mrf.mxu1 }
0x635c   :  { %v9457_v11 = vmul.f32 0.35355338, %v13400_v47 }
0x635d   :  { %v9447_v51 = vpop.f32.mrf.mxu1 }
0x635e   :  { %v9459_v3 = vadd.f32 %v9457_v11, %v14190_v6  ;;  %v9456_v53 = vmul.f32 0.35355338, %v9447_v51 }
0x6360   :  { %v9458_v40 = vadd.f32 %v9456_v53, %v14192_v9  ;;  %v9463_v52 = vsel %vm514_vm8, %v9459_v3, -inf }
0x6361   :  { %9464 = vmax.xlane.f32.xlu0 %v9463_v52  ;;  %v9733_v52 = vld [vmem:[%s16469_s4 + $0xa8] sm:$0xff] }
0x6362   :  { %v9460_v56 = vsel %vm510_vm9, %v9458_v40, -inf }
0x6363   :  { %9461 = vmax.xlane.f32.xlu1 %v9460_v56  ;;  %v9732_v56 = vld [vmem:[%s16469_s4 + $0xa0] sm:$0xff] }
0x6374   :  { %9484 = vrot.lane.b32.xlu1 %v15864_v61, %s13959_s29 }
0x6378   :  { %9572 = vrot.lane.b32.xlu1 %v15944_v5, %s13962_s8 }
0x637c   :  { %9574 = vrot.lane.b32.xlu1 %v15942_v49, %s13962_s8 }
0x6380   :  { %9580 = vrot.lane.b32.xlu1 %v9356_v44, %s13963_s0 }
0x63ea   :  { %v9465_v58 = vpop.xlane.xlu0 %9464 }
0x63eb   :  { %v9467_v54 = vsub.f32 %v9459_v3, %v9465_v58  ;;  %v16042_v58 = vld [vmem:[%s16468_s3 + $0xf8] sm:$0xff] }
0x63ec   :  { %v9462_v34 = vpop.xlane.xlu1 %9461 }
0x63ed   :  { %v9470_v33 = vmul.f32 1.442695, %v9467_v54  ;;  %v9466_v62 = vsub.f32 %v9458_v40, %v9462_v34  ;;  %v9734_v40 = vld [vmem:[%s16469_s4 + $0xb0] sm:$0xff]  ;;  %v9831_v54 = vld [vmem:[%s16466_s2 + $0x3f8] sm:$0xff] }
0x63ee   :  { %v9830_v34 = vld [vmem:[%s16466_s2 + $0x3f0] sm:$0xff] }
0x63ef   :  { %13892 = vpow2.f32 %v9470_v33  ;;  %v9468_v63 = vmul.f32 1.442695, %v9466_v62  ;;  %v9829_v33 = vld [vmem:[%s16466_s2 + $0x3e8] sm:$0xff]  ;;  %v9828_v62 = vld [vmem:[%s16466_s2 + $0x3e0] sm:$0xff] }
0x63f0   :  { %v9485_v0 = vpop.permute.xlu1 %9484 }
0x63f1   :  { %13894 = vpow2.f32 %v9468_v63  ;;  %13401 = vmatprep.subr.msk.mxu0 %vm545_vm10, %v9485_v0 }
0x63f2   :  { %13402 = vmatpush3.msk.msra.mxu0 %vm545_vm10, %v9485_v0 }
0x63f4   :  { %v9573_v13 = vpop.permute.xlu1 %9572 }
0x63f5   :  { %v9594_v28 = vsel %vm422_vm5, %v15912_v31, %v9573_v13  ;;  %v11952_v31 = vld [vmem:[%s16467_s5 + $0x3f] ss:$0 sm:$0xff] }
0x63f6   :  { %v9827_v13 = vld [vmem:[%s16466_s2 + $0x3d8] sm:$0xff] }
0x63f8   :  { %v9575_v25 = vpop.permute.xlu1 %9574 }
0x63f9   :  { %v9595_v21 = vsel %vm422_vm5, %v15910_v30, %v9575_v25  ;;  %v9826_v25 = vld [vmem:[%s16466_s2 + $0x3d0] sm:$0xff] }
0x63fc   :  { %v13893_v61 = vpop.eup %13892  ;;  %v9581_v27 = vpop.permute.xlu1 %9580 }
0x63fd   :  { %v9475_v1 = vsel %vm514_vm8, %v13893_v61, 0.0  ;;  %v9596_v29 = vsel %vm1264_vm11, %v9594_v28, %v9581_v27  ;;  %v9824_v27 = vld [vmem:[%s16466_s2 + $0x3c0] sm:$0xff] }
0x63fe   :  { %v13895_v4 = vpop.eup %13894  ;;  %9476 = vadd.xlane.f32.xlu0 %v9475_v1  ;;  %v11957_v28 = vld [vmem:[%s16467_s5 + $0x42] ss:$0 sm:$0xff] }
0x63ff   :  { %v9472_v50 = vsel %vm510_vm9, %v13895_v4, 0.0 }
0x6402   :  { %9473 = vadd.xlane.f32.xlu0 %v9472_v50 }
0x6418   :  { %9482 = vrot.lane.b32.xlu0 %v15866_v43, %s13959_s29  ;;  %v9603_v43 = vld [vmem:[%s16466_s2 + $0x3b8] sm:$0xff] }
0x641c   :  { %9582 = vrot.lane.b32.xlu0 %v13393_v45, %s13963_s0 }
0x6487   :  { %v9477_v37 = vpop.xlane.xlu0 %9476 }
0x6488   :  { %13896 = vrcp.f32 %v9477_v37 }
0x648b   :  { %v9474_v49 = vpop.xlane.xlu0 %9473 }
0x648c   :  { %13898 = vrcp.f32 %v9474_v49  ;;  %v11955_v49 = vld [vmem:[%s16467_s5 + $0x40] ss:$0 sm:$0xff] }
0x648f   :  { %v9483_v5 = vpop.permute.xlu0 %9482 }
0x6490   :  { %13403 = vmatprep.subr.mxu0 %v9483_v5 }
0x6491   :  { %13404 = vmatpush3.msra.mxu0 %v9483_v5 }
0x6492   :  { %13408 = vmatprep.subr.mxu0 %v9603_v43 }
0x6493   :  { %v9583_v26 = vpop.permute.xlu0 %9582 }
0x6494   :  { %v9597_v17 = vsel %vm1264_vm11, %v9595_v21, %v9583_v26  ;;  %v9825_v26 = vld [vmem:[%s16466_s2 + $0x3c8] sm:$0xff] }
0x6495   :  { %v13897_v59 = vpop.eup %13896 }
0x6496   :  { %v9481_v7 = vmul.f32 %v13897_v59, %v13893_v61  ;;  %v11956_v59 = vld [vmem:[%s16467_s5 + $0x41] ss:$0 sm:$0xff] }
0x6499   :  { %v13899_v12 = vpop.eup %13898 }
0x649a   :  { %v9479_v10 = vmul.f32 %v13899_v12, %v13895_v4 }
0x649c   :  { %13405 = vmatprep.mubr.msk.f32.mxu0 %vm510_vm9, %v9479_v10 }
0x649d   :  { %13406 = vmatmul.mubr.msk.f32.vlgmr.msra.gmra.mxu0 %vm510_vm9, %v9481_v7 }
0x649e   :  { %13409 = vmatpush3.msra.mxu0 %v9603_v43 }
0x649f   :  { %13410 = vmatprep.subr.mxu0 %v9602_v23 }
0x64a0   :  { %13411 = vmatpush3.msra.mxu0 %v9602_v23 }
0x64a1   :  { %13412 = vmatprep.subr.mxu0 %v9601_v19 }
0x64a2   :  { %13413 = vmatpush3.msra.mxu0 %v9601_v19 }
0x64a3   :  { %13414 = vmatprep.subr.mxu0 %v9600_v16 }
0x64a4   :  { %13415 = vmatpush3.msra.mxu0 %v9600_v16  ;;  %v16067_v16 = vld [vmem:[%s16468_s3 + $0xf0] sm:$0xff] }
0x64a5   :  { %13430 = vmatprep.subr.mxu0 %v9831_v54 }
0x655d   :  { %v13407_v2 = vpop.f32.mrf.mxu0 }
0x655e   :  { %9590 = vrot.lane.b32.xlu0 %v13407_v2, %s13964_s17  ;;  %v9961_v2 = vld [vmem:[%s16468_s3 + $0xe8] sm:$0xff] }
0x655f   :  { %v9561_v57 = vpop.f32.mrf.mxu0 }
0x6560   :  { %9588 = vrot.lane.b32.xlu1 %v9561_v57, %s13964_s17  ;;  %v9960_v57 = vld [vmem:[%s16468_s3 + $0xe0] sm:$0xff] }
0x65d0   :  { %v9591_v20 = vpop.permute.xlu0 %9590 }
0x65d1   :  { %v9599_v24 = vsel %vm1267_vm12, %v9597_v17, %v9591_v20 }
0x65d2   :  { %v9589_v8 = vpop.permute.xlu1 %9588 }
0x65d3   :  { %v9598_v48 = vsel %vm1267_vm12, %v9596_v29, %v9589_v8 }
0x65d4   :  { %13416 = vmatprep.mubr.msk.f32.mxu0 %vm172_vm0, %v9598_v48 }
0x65d5   :  { %13417 = vmatmul.mubr.msk.f32.vlgmr.msra.gmra.mxu0 %vm172_vm0, %v9599_v24 }
0x65d6   :  { %13431 = vmatpush3.msra.mxu0 %v9831_v54 }
0x65d7   :  { %13432 = vmatprep.subr.mxu0 %v9830_v34 }
0x65d8   :  { %13433 = vmatpush3.msra.mxu0 %v9830_v34 }
0x65d9   :  { %13434 = vmatprep.subr.mxu0 %v9829_v33 }
0x65da   :  { %13435 = vmatpush3.msra.mxu0 %v9829_v33 }
0x65db   :  { %13436 = vmatprep.subr.mxu0 %v9828_v62 }
0x65dc   :  { %13437 = vmatpush3.msra.mxu0 %v9828_v62 }
0x65dd   :  { %13438 = vmatprep.subr.mxu0 %v9827_v13 }
0x65de   :  { %13439 = vmatpush3.msra.mxu0 %v9827_v13 }
0x65df   :  { %13440 = vmatprep.subr.mxu0 %v9826_v25 }
0x65e0   :  { %13441 = vmatpush3.msra.mxu0 %v9826_v25 }
0x65e1   :  { %13442 = vmatprep.subr.mxu0 %v9825_v26 }
0x65e2   :  { %13443 = vmatpush3.msra.mxu0 %v9825_v26 }
0x65e3   :  { %13444 = vmatprep.subr.mxu0 %v9824_v27 }
0x65e4   :  { %13445 = vmatpush3.msra.mxu0 %v9824_v27 }
0x6695   :  { %v13418_v36 = vpop.f32.mrf.mxu0 }
0x6696   :  { %v9687_v38 = vadd.f32 %v13418_v36, %v11952_v31 }
0x6697   :  { %v9681_v30 = vpop.f32.mrf.mxu0 }
0x6698   :  { %v9691_v35 = vadd.f32 %v9687_v38, %v15586_v14  ;;  %v9682_v39 = vadd.f32 %v11952_v31, %v9681_v30  ;;  %v16105_v31 = vld [vmem:[%s16467_s5 + $0x4e] ss:$0 sm:$0xff]  ;;  %v11960_v30 = vld [vmem:[%s16467_s5 + $0x43] ss:$0 sm:$0xff] }
0x669a   :  { %v9690_v41 = vadd.f32 %v9682_v39, %v15584_v32  ;;  %v9697_v22 = vsel %vm1367_vm13, %v9691_v35, 0.0  ;;  %v9735_v32 = vld [vmem:[%s16469_s4 + $0xb8] sm:$0xff] }
0x669b   :  { %9698 = vadd.xlane.f32.xlu0 %v9697_v22  ;;  %13419 = vmatprep.subr.mxu1 %v9735_v32 }
0x669c   :  { %v9694_v46 = vsel %vm172_vm0, %v9690_v41, 0.0  ;;  %13420 = vmatpush3.msra.mxu1 %v9735_v32 }
0x669d   :  { %9695 = vadd.xlane.f32.xlu1 %v9694_v46  ;;  %13421 = vmatprep.subr.mxu1 %v9734_v40 }
0x669e   :  { %13422 = vmatpush3.msra.mxu1 %v9734_v40 }
0x669f   :  { %13423 = vmatprep.subr.mxu1 %v9733_v52 }
0x66a0   :  { %13424 = vmatpush3.msra.mxu1 %v9733_v52 }
0x66a1   :  { %13425 = vmatprep.subr.mxu1 %v9732_v56 }
0x66a2   :  { %13426 = vmatpush3.msra.mxu1 %v9732_v56 }
0x66a3   :  { %13449 = vmatprep.subr.mxu1 %v16042_v58 }
0x6724   :  { %v9699_v15 = vpop.xlane.xlu0 %9698 }
0x6725   :  { %v9701_v18 = vmul.f32 0.03125, %v9699_v15 }
0x6726   :  { %v9696_v45 = vpop.xlane.xlu1 %9695 }
0x6727   :  { %v9700_v44 = vmul.f32 0.03125, %v9696_v45  ;;  %v9703_v47 = vsub.f32 %v9691_v35, %v9701_v18 }
0x6729   :  { %v9702_v11 = vsub.f32 %v9690_v41, %v9700_v44  ;;  %v9705_v53 = vmul.f32 %v9703_v47, %v9703_v47 }
0x672b   :  { %v9704_v51 = vmul.f32 %v9702_v11, %v9702_v11  ;;  %v9709_v14 = vsel %vm1367_vm13, %v9705_v53, 0.0 }
0x672d   :  { %v9706_v3 = vsel %vm172_vm0, %v9704_v51, 0.0 }
0x672e   :  { %9707 = vadd.xlane.f32.xlu0 %v9706_v3 }
0x6732   :  { %9710 = vadd.xlane.f32.xlu0 %v9709_v14 }
0x67b7   :  { %v9708_v63 = vpop.xlane.xlu0 %9707 }
0x67b8   :  { %v9712_v0 = vmul.f32 0.03125, %v9708_v63 }
0x67ba   :  { %v9714_v61 = vadd.f32 1e-05, %v9712_v0 }
0x67bb   :  { %v9711_v1 = vpop.xlane.xlu0 %9710 }
0x67bc   :  { %13900 = vrsqrt.f32 %v9714_v61  ;;  %v9713_v4 = vmul.f32 0.03125, %v9711_v1 }
0x67be   :  { %v9715_v50 = vadd.f32 1e-05, %v9713_v4 }
0x67c0   :  { %13902 = vrsqrt.f32 %v9715_v50  ;;  %v11963_v50 = vld [vmem:[%s16467_s5 + $0x44] ss:$0 sm:$0xff] }
0x67c9   :  { %v13901_v37 = vpop.eup %13900 }
0x67ca   :  { %v9718_v5 = vmul.f32 %v13901_v37, %v9702_v11 }
0x67cc   :  { %v9724_v12 = vmul.f32 %v11955_v49, %v9718_v5  ;;  %v11964_v5 = vld [vmem:[%s16467_s5 + $0x45] ss:$0 sm:$0xff] }
0x67cd   :  { %v13903_v10 = vpop.eup %13902 }
0x67ce   :  { %v9719_v7 = vmul.f32 %v13903_v10, %v9703_v47  ;;  %v9730_v43 = vadd.f32 %v11956_v59, %v9724_v12 }
0x67d0   :  { %v9725_v23 = vmul.f32 %v11955_v49, %v9719_v7  ;;  %13427 = vmatprep.mubr.msk.f32.mxu1 %vm172_vm0, %v9730_v43 }
0x67d2   :  { %v9731_v19 = vadd.f32 %v11956_v59, %v9725_v23 }
0x67d4   :  { %13428 = vmatmul.mubr.msk.f32.vlgmr.msra.gmra.mxu1 %vm172_vm0, %v9731_v19 }
0x67d5   :  { %13450 = vmatpush3.msra.mxu1 %v16042_v58  ;;  %13457 = vmatprep.mubr.msk.f32.mxu1 %vm172_vm0, %v15856_v55 }
0x67d6   :  { %13451 = vmatprep.subr.mxu1 %v16067_v16 }
0x67d7   :  { %13452 = vmatpush3.msra.mxu1 %v16067_v16 }
0x67d8   :  { %13453 = vmatprep.subr.mxu1 %v9961_v2 }
0x67d9   :  { %13454 = vmatpush3.msra.mxu1 %v9961_v2 }
0x67da   :  { %13455 = vmatprep.subr.mxu1 %v9960_v57 }
0x67db   :  { %13456 = vmatpush3.msra.mxu1 %v9960_v57 }
0x67dc   :  { %13458 = vmatmul.mubr.msk.f32.vlgmr.msra.gmra.mxu1 %vm172_vm0, %v15858_v42 }
0x6894   :  { %v13429_v20 = vpop.f32.mrf.mxu1 }
0x6895   :  { %v9819_v21 = vadd.f32 %v13429_v20, %v11957_v28 }
0x6896   :  { %v9813_v29 = vpop.f32.mrf.mxu1 }
0x6897   :  { %v9814_v8 = vadd.f32 %v11957_v28, %v9813_v29  ;;  %v9823_v48 = vmax.f32 %v9819_v21, 0.0 }
0x6899   :  { %v9822_v17 = vmax.f32 %v9814_v8, 0.0 }
0x689b   :  { %13446 = vmatprep.mubr.msk.f32.mxu0 %vm1508_vm14, %v9822_v17 }
0x689c   :  { %v16099_v24 = vpop.f32.mrf.mxu1  ;;  %13447 = vmatmul.mubr.msk.f32.vlgmr.msra.gmra.mxu0 %vm1508_vm14, %v9823_v48 }
0x689d   :  { %v16156_v27 = vadd.f32 %v16099_v24, %v16105_v31 }
0x689e   :  { %v10035_v36 = vpop.f32.mrf.mxu1 }
0x689f   :  { %v16108_v38 = vadd.f32 %v16105_v31, %v10035_v36 }
0x68a1   :  { %13475 = vmatprep.mubr.msk.f32.mxu0 %vm422_vm5, %v16108_v38 }
0x695c   :  { %v13448_v35 = vpop.f32.mrf.mxu0 }
0x695d   :  { %v9915_v39 = vadd.f32 %v13448_v35, %v11960_v30 }
0x695e   :  { %v9909_v41 = vpop.f32.mrf.mxu0 }
0x695f   :  { %v9919_v22 = vadd.f32 %v9915_v39, %v9731_v19  ;;  %v9910_v46 = vadd.f32 %v11960_v30, %v9909_v41 }
0x6961   :  { %v9918_v15 = vadd.f32 %v9910_v46, %v9730_v43  ;;  %v9925_v18 = vsel %vm1367_vm13, %v9919_v22, 0.0 }
0x6962   :  { %9926 = vadd.xlane.f32.xlu0 %v9925_v18 }
0x6963   :  { %v9922_v45 = vsel %vm172_vm0, %v9918_v15, 0.0 }
0x6964   :  { %9923 = vadd.xlane.f32.xlu1 %v9922_v45 }
0x6975   :  { %10054 = vrot.lane.b32.xlu1 %v16042_v58, %s13950_s21 }
0x6979   :  { %10050 = vrot.lane.b32.xlu1 %v9961_v2, %s13950_s21 }
0x69eb   :  { %v9927_v44 = vpop.xlane.xlu0 %9926 }
0x69ec   :  { %v9929_v47 = vmul.f32 0.03125, %v9927_v44 }
0x69ed   :  { %v9924_v11 = vpop.xlane.xlu1 %9923 }
0x69ee   :  { %v9931_v51 = vsub.f32 %v9919_v22, %v9929_v47  ;;  %v9928_v3 = vmul.f32 0.03125, %v9924_v11 }
0x69f0   :  { %v9930_v53 = vsub.f32 %v9918_v15, %v9928_v3  ;;  %v9933_v14 = vmul.f32 %v9931_v51, %v9931_v51 }
0x69f1   :  { %v10055_v32 = vpop.permute.xlu1 %10054 }
0x69f2   :  { %v9937_v40 = vsel %vm1367_vm13, %v9933_v14, 0.0  ;;  %v9932_v52 = vmul.f32 %v9930_v53, %v9930_v53  ;;  %13460 = vmatprep.subr.mxu1 %v10055_v32 }
0x69f3   :  { %9938 = vadd.xlane.f32.xlu0 %v9937_v40  ;;  %13461 = vmatpush3.msra.mxu1 %v10055_v32 }
0x69f4   :  { %v9934_v56 = vsel %vm172_vm0, %v9932_v52, 0.0 }
0x69f5   :  { %9935 = vadd.xlane.f32.xlu1 %v9934_v56  ;;  %v10051_v58 = vpop.permute.xlu1 %10050 }
0x6a06   :  { %10048 = vrot.lane.b32.xlu1 %v9960_v57, %s13950_s21 }
0x6a09   :  { %10052 = vrot.lane.b32.xlu0 %v16067_v16, %s13950_s21 }
0x6a0a   :  { %10061 = vrot.lane.b32.xlu1 %v16105_v31, %s13950_s21 }
0x6a7c   :  { %v9939_v54 = vpop.xlane.xlu0 %9938 }
0x6a7d   :  { %v9941_v34 = vmul.f32 0.03125, %v9939_v54 }
0x6a7e   :  { %v9936_v33 = vpop.xlane.xlu1 %9935 }
0x6a7f   :  { %v9943_v62 = vadd.f32 1e-05, %v9941_v34  ;;  %v9940_v63 = vmul.f32 0.03125, %v9936_v33 }
0x6a80   :  { %v10053_v0 = vpop.permute.xlu0 %10052 }
0x6a81   :  { %13904 = vrsqrt.f32 %v9943_v62  ;;  %v9942_v61 = vadd.f32 1e-05, %v9940_v63  ;;  %13462 = vmatprep.subr.mxu1 %v10053_v0 }
0x6a82   :  { %13463 = vmatpush3.msra.mxu1 %v10053_v0  ;;  %v10049_v1 = vpop.permute.xlu1 %10048 }
0x6a83   :  { %13906 = vrsqrt.f32 %v9942_v61  ;;  %13464 = vmatprep.subr.mxu1 %v10051_v58 }
0x6a84   :  { %13465 = vmatpush3.msra.mxu1 %v10051_v58 }
0x6a85   :  { %13466 = vmatprep.subr.mxu1 %v10049_v1 }
0x6a86   :  { %13467 = vmatpush3.msra.mxu1 %v10049_v1  ;;  %v10062_v2 = vpop.permute.xlu1 %10061 }
0x6a8e   :  { %v13905_v4 = vpop.eup %13904 }
0x6a8f   :  { %v9947_v37 = vmul.f32 %v13905_v4, %v9931_v51 }
0x6a90   :  { %v13907_v49 = vpop.eup %13906 }
0x6a91   :  { %v9946_v59 = vmul.f32 %v13907_v49, %v9930_v53  ;;  %v9953_v12 = vmul.f32 %v11963_v50, %v9947_v37 }
0x6a93   :  { %v9952_v10 = vmul.f32 %v11963_v50, %v9946_v59  ;;  %v9959_v7 = vadd.f32 %v11964_v5, %v9953_v12 }
0x6a95   :  { %v16133_v43 = vadd.f32 %v11964_v5, %v9952_v10  ;;  %v11376_v19 = vrot.slane %v9959_v7, 5 }
0x6a97   :  { %13468 = vmatprep.mubr.msk.f32.mxu1 %vm172_vm0, %v16133_v43  ;;  %v11375_v23 = vrot.slane %v16133_v43, 5 }
0x6a98   :  { %13469 = vmatmul.mubr.msk.f32.vlgmr.msra.gmra.mxu1 %vm172_vm0, %v9959_v7 }
0x6a99   :  { %v16140_v16 = vsel %vm11374_vm15, %v11375_v23, %v11376_v19 }
0x6b58   :  { %v13470_v57 = vpop.f32.mrf.mxu1 }
0x6b59   :  { %v16142_v13 = vadd.f32 %v13470_v57, %v10062_v2 }
0x6b5a   :  { %v10136_v25 = vpop.f32.mrf.mxu1 }
0x6b5b   :  { %v16144_v26 = vadd.f32 %v10136_v25, %v10062_v2  ;;  %13471 = vmatprep.subr.msk.mxu0 %vm422_vm5, %v16142_v13 }
0x6b5c   :  { %13472 = vmatpush3.xpose.msk.msra.mxu0 %vm422_vm5, %v16142_v13 }
0x6b5d   :  { %13473 = vmatprep.subr.msk.mxu0 %vm422_vm5, %v16144_v26 }
0x6b60   :  { %13474 = vmatpush3.xpose.msk.msra.mxu0 %vm422_vm5, %v16144_v26 }
0x6b63   :  { %13476 = vmatmul.mubr.msk.f32.vlgmr.msra.gmra.mxu0 %vm422_vm5, %v16156_v27 }
0x6c23   :  { %v13477_v28 = vpop.f32.mrf.mxu0 }
0x6c24   :  { %v10233_v20 = vmul.f32 0.35355338, %v13477_v28 }
0x6c25   :  { %v10223_v21 = vpop.f32.mrf.mxu0 }
0x6c26   :  { %v10235_v29 = vadd.f32 %v10233_v20, %v14190_v6  ;;  %v10232_v8 = vmul.f32 0.35355338, %v10223_v21 }
0x6c28   :  { %v10234_v17 = vadd.f32 %v10232_v8, %v14192_v9  ;;  %v10239_v48 = vsel %vm514_vm8, %v10235_v29, -inf }
0x6c29   :  { %10240 = vmax.xlane.f32.xlu1 %v10239_v48 }
0x6c2a   :  { %v10236_v36 = vsel %vm510_vm9, %v10234_v17, -inf }
0x6c2b   :  { %10237 = vmax.xlane.f32.xlu0 %v10236_v36 }
0x6c3a   :  { %10258 = vrot.lane.b32.xlu1 %v16144_v26, %s13950_s21 }
0x6c3e   :  { %10352 = vrot.lane.b32.xlu1 %v16142_v13, %s13954_s24 }
0x6c42   :  { %10350 = vrot.lane.b32.xlu1 %v16144_v26, %s13954_s24 }
0x6c46   :  { %10348 = vrot.lane.b32.xlu1 %v16156_v27, %s13954_s24 }
0x6cb2   :  { %v10241_v24 = vpop.xlane.xlu1 %10240 }
0x6cb3   :  { %v10243_v31 = vsub.f32 %v10235_v29, %v10241_v24 }
0x6cb4   :  { %v10238_v30 = vpop.xlane.xlu0 %10237 }
0x6cb5   :  { %v10246_v35 = vmul.f32 1.442695, %v10243_v31  ;;  %v10242_v39 = vsub.f32 %v10234_v17, %v10238_v30 }
0x6cb6   :  { %v10259_v47 = vpop.permute.xlu1 %10258 }
0x6cb7   :  { %13908 = vpow2.f32 %v10246_v35  ;;  %v10244_v41 = vmul.f32 1.442695, %v10242_v39 }
0x6cb9   :  { %13910 = vpow2.f32 %v10244_v41 }
0x6cba   :  { %v10353_v51 = vpop.permute.xlu1 %10352 }
0x6cbe   :  { %v10351_v52 = vpop.permute.xlu1 %10350 }
0x6cc2   :  { %v10349_v56 = vpop.permute.xlu1 %10348 }
0x6cc4   :  { %v13909_v22 = vpop.eup %13908 }
0x6cc5   :  { %v10251_v46 = vsel %vm514_vm8, %v13909_v22, 0.0 }
0x6cc6   :  { %v13911_v15 = vpop.eup %13910  ;;  %10252 = vadd.xlane.f32.xlu0 %v10251_v46 }
0x6cc7   :  { %v10248_v18 = vsel %vm510_vm9, %v13911_v15, 0.0 }
0x6cca   :  { %10249 = vadd.xlane.f32.xlu0 %v10248_v18 }
0x6ce0   :  { %10260 = vrot.lane.b32.xlu0 %v16142_v13, %s13950_s21 }
0x6ce4   :  { %10346 = vrot.lane.b32.xlu0 %v16108_v38, %s13954_s24 }
0x6d4f   :  { %v10253_v45 = vpop.xlane.xlu0 %10252 }
0x6d50   :  { %13912 = vrcp.f32 %v10253_v45 }
0x6d53   :  { %v10250_v44 = vpop.xlane.xlu0 %10249 }
0x6d54   :  { %13914 = vrcp.f32 %v10250_v44 }
0x6d57   :  { %v10261_v11 = vpop.permute.xlu0 %10260 }
0x6d58   :  { %13478 = vmatprep.subr.msk.mxu1 %vm545_vm10, %v10261_v11 }
0x6d59   :  { %13479 = vmatpush3.msk.msra.mxu1 %vm545_vm10, %v10261_v11 }
0x6d5a   :  { %13480 = vmatprep.subr.mxu1 %v10259_v47 }
0x6d5b   :  { %13481 = vmatpush3.msra.mxu1 %v10259_v47  ;;  %v10347_v40 = vpop.permute.xlu0 %10346 }
0x6d5c   :  { %13485 = vmatprep.subr.msk.mxu1 %vm422_vm5, %v10353_v51 }
0x6d5d   :  { %v13913_v3 = vpop.eup %13912 }
0x6d5e   :  { %v10257_v32 = vmul.f32 %v13913_v3, %v13909_v22 }
0x6d61   :  { %v13915_v53 = vpop.eup %13914 }
0x6d62   :  { %v10255_v14 = vmul.f32 %v13915_v53, %v13911_v15 }
0x6d64   :  { %13482 = vmatprep.mubr.msk.f32.mxu1 %vm510_vm9, %v10255_v14 }
0x6d65   :  { %13483 = vmatmul.mubr.msk.f32.vlgmr.msra.gmra.mxu1 %vm510_vm9, %v10257_v32 }
0x6d66   :  { %13486 = vmatpush3.xpose.msk.msra.mxu1 %vm422_vm5, %v10353_v51  ;;  %13489 = vmatprep.mubr.msk.f32.mxu1 %vm422_vm5, %v10347_v40 }
0x6d67   :  { %13487 = vmatprep.subr.msk.mxu1 %vm422_vm5, %v10351_v52 }
0x6d6a   :  { %13488 = vmatpush3.xpose.msk.msra.mxu1 %vm422_vm5, %v10351_v52 }
0x6d6d   :  { %13490 = vmatmul.mubr.msk.f32.vlgmr.msra.gmra.mxu1 %vm422_vm5, %v10349_v56 }
0x6e25   :  { %v16188_v58 = vpop.f32.mrf.mxu1 }
0x6e27   :  { %v16190_v54 = vpop.f32.mrf.mxu1 }
0x6e2d   :  { %v13491_v34 = vpop.f32.mrf.mxu1 }
0x6e2e   :  { %v10438_v33 = vmul.f32 0.35355338, %v13491_v34 }
0x6e2f   :  { %v10428_v62 = vpop.f32.mrf.mxu1 }
0x6e30   :  { %v10440_v63 = vadd.f32 %v10438_v33, %v14190_v6  ;;  %v10437_v0 = vmul.f32 0.35355338, %v10428_v62 }
0x6e32   :  { %v10439_v61 = vadd.f32 %v10437_v0, %v14192_v9  ;;  %v10444_v1 = vsel %vm514_vm8, %v10440_v63, -inf }
0x6e33   :  { %10445 = vmax.xlane.f32.xlu1 %v10444_v1 }
0x6e34   :  { %v10441_v4 = vsel %vm510_vm9, %v10439_v61, -inf }
0x6e35   :  { %10442 = vmax.xlane.f32.xlu0 %v10441_v4 }
0x6e44   :  { %10463 = vrot.lane.b32.xlu1 %v16144_v26, %s13953_s23 }
0x6e48   :  { %10557 = vrot.lane.b32.xlu1 %v16142_v13, %s13956_s26 }
0x6e4c   :  { %10555 = vrot.lane.b32.xlu1 %v16144_v26, %s13956_s26 }
0x6e50   :  { %10553 = vrot.lane.b32.xlu1 %v16156_v27, %s13956_s26 }
0x6ebc   :  { %v10446_v50 = vpop.xlane.xlu1 %10445 }
0x6ebd   :  { %v10448_v37 = vsub.f32 %v10440_v63, %v10446_v50 }
0x6ebe   :  { %v10443_v49 = vpop.xlane.xlu0 %10442 }
0x6ebf   :  { %v10451_v5 = vmul.f32 1.442695, %v10448_v37  ;;  %v10447_v59 = vsub.f32 %v10439_v61, %v10443_v49 }
0x6ec0   :  { %v10464_v25 = vpop.permute.xlu1 %10463 }
0x6ec1   :  { %13916 = vpow2.f32 %v10451_v5  ;;  %v10449_v12 = vmul.f32 1.442695, %v10447_v59 }
0x6ec3   :  { %13918 = vpow2.f32 %v10449_v12 }
0x6ec4   :  { %v10558_v20 = vpop.permute.xlu1 %10557 }
0x6ec8   :  { %v10556_v36 = vpop.permute.xlu1 %10555 }
0x6ecc   :  { %v10554_v24 = vpop.permute.xlu1 %10553 }
0x6ece   :  { %v13917_v10 = vpop.eup %13916 }
0x6ecf   :  { %v10456_v7 = vsel %vm514_vm8, %v13917_v10, 0.0 }
0x6ed0   :  { %v13919_v23 = vpop.eup %13918  ;;  %10457 = vadd.xlane.f32.xlu0 %v10456_v7 }
0x6ed1   :  { %v10453_v19 = vsel %vm510_vm9, %v13919_v23, 0.0 }
0x6ed4   :  { %10454 = vadd.xlane.f32.xlu0 %v10453_v19 }
0x6eea   :  { %10465 = vrot.lane.b32.xlu0 %v16142_v13, %s13953_s23 }
0x6eee   :  { %10551 = vrot.lane.b32.xlu0 %v16108_v38, %s13956_s26 }
0x6f59   :  { %v10458_v2 = vpop.xlane.xlu0 %10457 }
0x6f5a   :  { %13920 = vrcp.f32 %v10458_v2 }
0x6f5d   :  { %v10455_v57 = vpop.xlane.xlu0 %10454 }
0x6f5e   :  { %13922 = vrcp.f32 %v10455_v57 }
0x6f61   :  { %v10466_v28 = vpop.permute.xlu0 %10465 }
0x6f62   :  { %13492 = vmatprep.subr.msk.mxu0 %vm545_vm10, %v10466_v28 }
0x6f63   :  { %13493 = vmatpush3.msk.msra.mxu0 %vm545_vm10, %v10466_v28 }
0x6f64   :  { %13494 = vmatprep.subr.mxu0 %v10464_v25 }
0x6f65   :  { %13495 = vmatpush3.msra.mxu0 %v10464_v25  ;;  %v10552_v48 = vpop.permute.xlu0 %10551 }
0x6f66   :  { %13499 = vmatprep.subr.msk.mxu0 %vm422_vm5, %v10558_v20 }
0x6f67   :  { %v13921_v21 = vpop.eup %13920 }
0x6f68   :  { %v10462_v17 = vmul.f32 %v13921_v21, %v13917_v10 }
0x6f6b   :  { %v13923_v29 = vpop.eup %13922 }
0x6f6c   :  { %v10460_v8 = vmul.f32 %v13923_v29, %v13919_v23 }
0x6f6e   :  { %13496 = vmatprep.mubr.msk.f32.mxu0 %vm510_vm9, %v10460_v8 }
0x6f6f   :  { %13497 = vmatmul.mubr.msk.f32.vlgmr.msra.gmra.mxu0 %vm510_vm9, %v10462_v17 }
0x6f70   :  { %13500 = vmatpush3.xpose.msk.msra.mxu0 %vm422_vm5, %v10558_v20  ;;  %13503 = vmatprep.mubr.msk.f32.mxu0 %vm422_vm5, %v10552_v48 }
0x6f71   :  { %13501 = vmatprep.subr.msk.mxu0 %vm422_vm5, %v10556_v36 }
0x6f74   :  { %13502 = vmatpush3.xpose.msk.msra.mxu0 %vm422_vm5, %v10556_v36 }
0x6f77   :  { %13504 = vmatmul.mubr.msk.f32.vlgmr.msra.gmra.mxu0 %vm422_vm5, %v10554_v24 }
0x702f   :  { %v16220_v31 = vpop.f32.mrf.mxu0 }
0x7031   :  { %v16222_v30 = vpop.f32.mrf.mxu0 }
0x7037   :  { %v13505_v35 = vpop.f32.mrf.mxu0 }
0x7038   :  { %v10643_v39 = vmul.f32 0.35355338, %v13505_v35 }
0x7039   :  { %v10633_v41 = vpop.f32.mrf.mxu0 }
0x703a   :  { %v10645_v22 = vadd.f32 %v10643_v39, %v14190_v6  ;;  %v10642_v46 = vmul.f32 0.35355338, %v10633_v41  ;;  %v10993_v41 = vld [vmem:[%s16466_s2 + $0x470] sm:$0xff] }
0x703c   :  { %v10644_v15 = vadd.f32 %v10642_v46, %v14192_v9  ;;  %v10649_v18 = vsel %vm514_vm8, %v10645_v22, -inf  ;;  %v10991_v46 = vld [vmem:[%s16466_s2 + $0x460] sm:$0xff] }
0x703d   :  { %10650 = vmax.xlane.f32.xlu1 %v10649_v18 }
0x703e   :  { %v10646_v45 = vsel %vm510_vm9, %v10644_v15, -inf }
0x703f   :  { %10647 = vmax.xlane.f32.xlu0 %v10646_v45 }
0x704e   :  { %10668 = vrot.lane.b32.xlu1 %v16144_v26, %s13955_s25 }
0x7052   :  { %10762 = vrot.lane.b32.xlu1 %v16142_v13, %s13960_s30 }
0x7056   :  { %10760 = vrot.lane.b32.xlu1 %v16144_v26, %s13960_s30 }
0x705a   :  { %10758 = vrot.lane.b32.xlu1 %v16156_v27, %s13960_s30 }
0x70c6   :  { %v10651_v44 = vpop.xlane.xlu1 %10650 }
0x70c7   :  { %v10653_v47 = vsub.f32 %v10645_v22, %v10651_v44  ;;  %v10992_v22 = vld [vmem:[%s16466_s2 + $0x468] sm:$0xff] }
0x70c8   :  { %v10648_v11 = vpop.xlane.xlu0 %10647 }
0x70c9   :  { %v10656_v51 = vmul.f32 1.442695, %v10653_v47  ;;  %v10652_v3 = vsub.f32 %v10644_v15, %v10648_v11 }
0x70ca   :  { %v10669_v34 = vpop.permute.xlu1 %10668 }
0x70cb   :  { %13924 = vpow2.f32 %v10656_v51  ;;  %v10654_v53 = vmul.f32 1.442695, %v10652_v3 }
0x70cd   :  { %13926 = vpow2.f32 %v10654_v53 }
0x70ce   :  { %v10763_v62 = vpop.permute.xlu1 %10762 }
0x70d2   :  { %v10761_v4 = vpop.permute.xlu1 %10760 }
0x70d6   :  { %v10759_v50 = vpop.permute.xlu1 %10758 }
0x70d8   :  { %v13925_v14 = vpop.eup %13924 }
0x70d9   :  { %v10661_v32 = vsel %vm514_vm8, %v13925_v14, 0.0 }
0x70da   :  { %v13927_v40 = vpop.eup %13926  ;;  %10662 = vadd.xlane.f32.xlu0 %v10661_v32 }
0x70db   :  { %v10658_v52 = vsel %vm510_vm9, %v13927_v40, 0.0 }
0x70de   :  { %10659 = vadd.xlane.f32.xlu0 %v10658_v52 }
0x70f4   :  { %10670 = vrot.lane.b32.xlu0 %v16142_v13, %s13955_s25 }
0x70f8   :  { %10756 = vrot.lane.b32.xlu0 %v16108_v38, %s13960_s30  ;;  %s13965_s30 = smov 32  }
0x7163   :  { %v10663_v27 = vpop.xlane.xlu0 %10662 }
0x7164   :  { %13928 = vrcp.f32 %v10663_v27 }
0x7167   :  { %v10660_v56 = vpop.xlane.xlu0 %10659 }
0x7168   :  { %13930 = vrcp.f32 %v10660_v56 }
0x716b   :  { %v10671_v33 = vpop.permute.xlu0 %10670 }
0x716c   :  { %13506 = vmatprep.subr.msk.mxu1 %vm545_vm10, %v10671_v33 }
0x716d   :  { %13507 = vmatpush3.msk.msra.mxu1 %vm545_vm10, %v10671_v33 }
0x716e   :  { %13508 = vmatprep.subr.mxu1 %v10669_v34 }
0x716f   :  { %13509 = vmatpush3.msra.mxu1 %v10669_v34  ;;  %v10757_v38 = vpop.permute.xlu0 %10756 }
0x7170   :  { %13513 = vmatprep.subr.msk.mxu1 %vm422_vm5, %v10763_v62 }
0x7171   :  { %v13929_v63 = vpop.eup %13928 }
0x7172   :  { %v10667_v1 = vmul.f32 %v13929_v63, %v13925_v14 }
0x7175   :  { %v13931_v0 = vpop.eup %13930 }
0x7176   :  { %v10665_v61 = vmul.f32 %v13931_v0, %v13927_v40 }
0x7178   :  { %13510 = vmatprep.mubr.msk.f32.mxu1 %vm510_vm9, %v10665_v61 }
0x7179   :  { %13511 = vmatmul.mubr.msk.f32.vlgmr.msra.gmra.mxu1 %vm510_vm9, %v10667_v1 }
0x717a   :  { %13514 = vmatpush3.xpose.msk.msra.mxu1 %vm422_vm5, %v10763_v62  ;;  %13517 = vmatprep.mubr.msk.f32.mxu1 %vm422_vm5, %v10757_v38 }
0x717b   :  { %13515 = vmatprep.subr.msk.mxu1 %vm422_vm5, %v10761_v4 }
0x717e   :  { %13516 = vmatpush3.xpose.msk.msra.mxu1 %vm422_vm5, %v10761_v4 }
0x7181   :  { %13518 = vmatmul.mubr.msk.f32.vlgmr.msra.gmra.mxu1 %vm422_vm5, %v10759_v50 }
0x7239   :  { %v13512_v37 = vpop.f32.mrf.mxu1 }
0x723b   :  { %v10747_v49 = vpop.f32.mrf.mxu1 }
0x7241   :  { %v13519_v5 = vpop.f32.mrf.mxu1 }
0x7242   :  { %v10848_v59 = vmul.f32 0.35355338, %v13519_v5 }
0x7243   :  { %v10838_v12 = vpop.f32.mrf.mxu1 }
0x7244   :  { %v10850_v10 = vadd.f32 %v10848_v59, %v14190_v6  ;;  %v10847_v7 = vmul.f32 0.35355338, %v10838_v12 }
0x7246   :  { %v10849_v23 = vadd.f32 %v10847_v7, %v14192_v9  ;;  %v10854_v19 = vsel %vm514_vm8, %v10850_v10, -inf  ;;  %v11124_v7 = vld [vmem:[%s16469_s4 + $0xe8] sm:$0xff] }
0x7247   :  { %10855 = vmax.xlane.f32.xlu1 %v10854_v19  ;;  %v11222_v19 = vld [vmem:[%s16466_s2 + $0x4b8] sm:$0xff] }
0x7248   :  { %v10851_v2 = vsel %vm510_vm9, %v10849_v23, -inf }
0x7249   :  { %10852 = vmax.xlane.f32.xlu0 %v10851_v2  ;;  %v11221_v2 = vld [vmem:[%s16466_s2 + $0x4b0] sm:$0xff] }
0x7258   :  { %10873 = vrot.lane.b32.xlu1 %v16144_v26, %s13959_s29 }
0x725c   :  { %10963 = vrot.lane.b32.xlu1 %v16222_v30, %s13962_s8 }
0x7260   :  { %10965 = vrot.lane.b32.xlu1 %v16220_v31, %s13962_s8 }
0x7264   :  { %10973 = vrot.lane.b32.xlu1 %v13512_v37, %s13963_s0 }
0x72d0   :  { %v10856_v6 = vpop.xlane.xlu1 %10855 }
0x72d1   :  { %v10858_v57 = vsub.f32 %v10850_v10, %v10856_v6  ;;  %v11125_v10 = vld [vmem:[%s16469_s4 + $0xf0] sm:$0xff]  ;;  %v11220_v6 = vld [vmem:[%s16466_s2 + $0x4a8] sm:$0xff] }
0x72d2   :  { %v10853_v9 = vpop.xlane.xlu0 %10852 }
0x72d3   :  { %v10861_v25 = vmul.f32 1.442695, %v10858_v57  ;;  %v10857_v28 = vsub.f32 %v10849_v23, %v10853_v9  ;;  %v11123_v23 = vld [vmem:[%s16469_s4 + $0xe0] sm:$0xff] }
0x72d4   :  { %v10874_v24 = vpop.permute.xlu1 %10873  ;;  %v11219_v57 = vld [vmem:[%s16466_s2 + $0x4a0] sm:$0xff] }
0x72d5   :  { %13932 = vpow2.f32 %v10861_v25  ;;  %v10859_v20 = vmul.f32 1.442695, %v10857_v28 }
0x72d7   :  { %13934 = vpow2.f32 %v10859_v20 }
0x72d8   :  { %v10964_v45 = vpop.permute.xlu1 %10963 }
0x72d9   :  { %v10985_v51 = vsel %vm422_vm5, %v16190_v54, %v10964_v45  ;;  %v11998_v54 = vld [vmem:[%s16467_s5 + $0x4f] ss:$0 sm:$0xff] }
0x72dc   :  { %v10966_v44 = vpop.permute.xlu1 %10965 }
0x72dd   :  { %v10986_v53 = vsel %vm422_vm5, %v16188_v58, %v10966_v44 }
0x72e0   :  { %v10974_v47 = vpop.permute.xlu1 %10973 }
0x72e1   :  { %v10988_v40 = vsel %vm1264_vm11, %v10986_v53, %v10974_v47 }
0x72e2   :  { %v13933_v21 = vpop.eup %13932 }
0x72e3   :  { %v10866_v29 = vsel %vm514_vm8, %v13933_v21, 0.0 }
0x72e4   :  { %v13935_v26 = vpop.eup %13934  ;;  %10867 = vadd.xlane.f32.xlu0 %v10866_v29 }
0x72e5   :  { %v10863_v8 = vsel %vm510_vm9, %v13935_v26, 0.0 }
0x72e8   :  { %10864 = vadd.xlane.f32.xlu0 %v10863_v8  ;;  %v12001_v8 = vld [vmem:[%s16467_s5 + $0x50] ss:$0 sm:$0xff] }
0x72fe   :  { %10875 = vrot.lane.b32.xlu0 %v16142_v13, %s13959_s29  ;;  %v10994_v13 = vld [vmem:[%s16466_s2 + $0x478] sm:$0xff] }
0x7302   :  { %10971 = vrot.lane.b32.xlu0 %v10747_v49, %s13963_s0 }
0x736d   :  { %v10868_v17 = vpop.xlane.xlu0 %10867 }
0x736e   :  { %13936 = vrcp.f32 %v10868_v17 }
0x7371   :  { %v10865_v48 = vpop.xlane.xlu0 %10864 }
0x7372   :  { %13938 = vrcp.f32 %v10865_v48  ;;  %v12002_v48 = vld [vmem:[%s16467_s5 + $0x51] ss:$0 sm:$0xff] }
0x7375   :  { %v10876_v36 = vpop.permute.xlu0 %10875 }
0x7376   :  { %13520 = vmatprep.subr.msk.mxu0 %vm545_vm10, %v10876_v36 }
0x7377   :  { %13521 = vmatpush3.msk.msra.mxu0 %vm545_vm10, %v10876_v36 }
0x7378   :  { %13522 = vmatprep.subr.mxu0 %v10874_v24 }
0x7379   :  { %13523 = vmatpush3.msra.mxu0 %v10874_v24  ;;  %v10972_v11 = vpop.permute.xlu0 %10971 }
0x737a   :  { %13527 = vmatprep.subr.mxu0 %v10994_v13  ;;  %v10987_v14 = vsel %vm1264_vm11, %v10985_v51, %v10972_v11 }
0x737b   :  { %v13937_v31 = vpop.eup %13936 }
0x737c   :  { %v10872_v39 = vmul.f32 %v13937_v31, %v13933_v21 }
0x737f   :  { %v13939_v30 = vpop.eup %13938 }
0x7380   :  { %v10870_v35 = vmul.f32 %v13939_v30, %v13935_v26 }
0x7382   :  { %13524 = vmatprep.mubr.msk.f32.mxu0 %vm510_vm9, %v10870_v35 }
0x7383   :  { %13525 = vmatmul.mubr.msk.f32.vlgmr.msra.gmra.mxu0 %vm510_vm9, %v10872_v39 }
0x7384   :  { %13528 = vmatpush3.msra.mxu0 %v10994_v13  ;;  %v11218_v13 = vld [vmem:[%s16466_s2 + $0x498] sm:$0xff] }
0x7385   :  { %13529 = vmatprep.subr.mxu0 %v10993_v41 }
0x7386   :  { %13530 = vmatpush3.msra.mxu0 %v10993_v41  ;;  %v11217_v41 = vld [vmem:[%s16466_s2 + $0x490] sm:$0xff] }
0x7387   :  { %13531 = vmatprep.subr.mxu0 %v10992_v22 }
0x7388   :  { %13532 = vmatpush3.msra.mxu0 %v10992_v22  ;;  %v11216_v22 = vld [vmem:[%s16466_s2 + $0x488] sm:$0xff] }
0x7389   :  { %13533 = vmatprep.subr.mxu0 %v10991_v46 }
0x738a   :  { %13534 = vmatpush3.msra.mxu0 %v10991_v46  ;;  %v11215_v46 = vld [vmem:[%s16466_s2 + $0x480] sm:$0xff] }
0x738b   :  { %13549 = vmatprep.subr.mxu0 %v11222_v19 }
0x7443   :  { %v13526_v15 = vpop.f32.mrf.mxu0 }
0x7444   :  { %10981 = vrot.lane.b32.xlu1 %v13526_v15, %s13964_s17  ;;  %v12003_v15 = vld [vmem:[%s16467_s5 + $0x52] ss:$0 sm:$0xff] }
0x7445   :  { %v10952_v18 = vpop.f32.mrf.mxu0 }
0x7446   :  { %10979 = vrot.lane.b32.xlu0 %v10952_v18, %s13964_s17 }
0x74b6   :  { %v10982_v3 = vpop.permute.xlu1 %10981 }
0x74b7   :  { %v10990_v27 = vsel %vm1267_vm12, %v10988_v40, %v10982_v3  ;;  %v12006_v3 = vld [vmem:[%s16467_s5 + $0x53] ss:$0 sm:$0xff] }
0x74b8   :  { %v10980_v32 = vpop.permute.xlu0 %10979 }
0x74b9   :  { %v10989_v52 = vsel %vm1267_vm12, %v10987_v14, %v10980_v32 }
0x74ba   :  { %13535 = vmatprep.mubr.msk.f32.mxu0 %vm172_vm0, %v10989_v52 }
0x74bb   :  { %13536 = vmatmul.mubr.msk.f32.vlgmr.msra.gmra.mxu0 %vm172_vm0, %v10990_v27 }
0x74bc   :  { %13550 = vmatpush3.msra.mxu0 %v11222_v19 }
0x74bd   :  { %13551 = vmatprep.subr.mxu0 %v11221_v2 }
0x74be   :  { %13552 = vmatpush3.msra.mxu0 %v11221_v2  ;;  %v12010_v2 = vld [vmem:[%s16467_s5 + $0x55] ss:$0 sm:$0xff] }
0x74bf   :  { %13553 = vmatprep.subr.mxu0 %v11220_v6 }
0x74c0   :  { %13554 = vmatpush3.msra.mxu0 %v11220_v6 }
0x74c1   :  { %13555 = vmatprep.subr.mxu0 %v11219_v57 }
0x74c2   :  { %13556 = vmatpush3.msra.mxu0 %v11219_v57 }
0x74c3   :  { %13557 = vmatprep.subr.mxu0 %v11218_v13 }
0x74c4   :  { %13558 = vmatpush3.msra.mxu0 %v11218_v13 }
0x74c5   :  { %13559 = vmatprep.subr.mxu0 %v11217_v41 }
0x74c6   :  { %13560 = vmatpush3.msra.mxu0 %v11217_v41  ;;  %v11424_v41 = vld [vmem:[%s16466_s2 + $0x4d0] sm:$0xff] }
0x74c7   :  { %13561 = vmatprep.subr.mxu0 %v11216_v22 }
0x74c8   :  { %13562 = vmatpush3.msra.mxu0 %v11216_v22 }
0x74c9   :  { %13563 = vmatprep.subr.mxu0 %v11215_v46 }
0x74ca   :  { %13564 = vmatpush3.msra.mxu0 %v11215_v46 }
0x74cb   :  { %13587 = vmatprep.subr.mxu0 %v13948_v60 }
0x757b   :  { %v13537_v56 = vpop.f32.mrf.mxu0 }
0x757c   :  { %v11078_v34 = vadd.f32 %v13537_v56, %v11998_v54 }
0x757d   :  { %v11072_v58 = vpop.f32.mrf.mxu0 }
0x757e   :  { %v11082_v33 = vadd.f32 %v11078_v34, %v15858_v42  ;;  %v11073_v62 = vadd.f32 %v11998_v54, %v11072_v58 }
0x7580   :  { %v11081_v63 = vadd.f32 %v11073_v62, %v15856_v55  ;;  %v11088_v0 = vsel %vm1367_vm13, %v11082_v33, 0.0  ;;  %v11126_v55 = vld [vmem:[%s16469_s4 + $0xf8] sm:$0xff] }
0x7581   :  { %11089 = vadd.xlane.f32.xlu1 %v11088_v0  ;;  %13538 = vmatprep.subr.mxu1 %v11126_v55 }
0x7582   :  { %v11085_v61 = vsel %vm172_vm0, %v11081_v63, 0.0  ;;  %13539 = vmatpush3.msra.mxu1 %v11126_v55 }
0x7583   :  { %11086 = vadd.xlane.f32.xlu0 %v11085_v61  ;;  %13540 = vmatprep.subr.mxu1 %v11125_v10 }
0x7584   :  { %13541 = vmatpush3.msra.mxu1 %v11125_v10 }
0x7585   :  { %13542 = vmatprep.subr.mxu1 %v11124_v7 }
0x7586   :  { %13543 = vmatpush3.msra.mxu1 %v11124_v7  ;;  %v12009_v7 = vld [vmem:[%s16467_s5 + $0x54] ss:$0 sm:$0xff] }
0x7587   :  { %13544 = vmatprep.subr.mxu1 %v11123_v23 }
0x7588   :  { %13545 = vmatpush3.msra.mxu1 %v11123_v23 }
0x7589   :  { %13568 = vmatprep.subr.mxu1 %v13948_v60 }
0x760a   :  { %v11090_v1 = vpop.xlane.xlu1 %11089 }
0x760b   :  { %v11092_v38 = vmul.f32 0.03125, %v11090_v1 }
0x760c   :  { %v11087_v4 = vpop.xlane.xlu0 %11086 }
0x760d   :  { %v11091_v50 = vmul.f32 0.03125, %v11087_v4  ;;  %v11094_v37 = vsub.f32 %v11082_v33, %v11092_v38 }
0x760f   :  { %v11093_v49 = vsub.f32 %v11081_v63, %v11091_v50  ;;  %v11096_v12 = vmul.f32 %v11094_v37, %v11094_v37  ;;  %v11429_v50 = vld [vmem:[%s16466_s2 + $0x4f8] sm:$0xff] }
0x7611   :  { %v11095_v5 = vmul.f32 %v11093_v49, %v11093_v49  ;;  %v11100_v42 = vsel %vm1367_vm13, %v11096_v12, 0.0 }
0x7613   :  { %v11097_v59 = vsel %vm172_vm0, %v11095_v5, 0.0 }
0x7614   :  { %11098 = vadd.xlane.f32.xlu0 %v11097_v59 }
0x7618   :  { %11101 = vadd.xlane.f32.xlu0 %v11100_v42 }
0x769d   :  { %v11099_v9 = vpop.xlane.xlu0 %11098 }
0x769e   :  { %v11103_v25 = vmul.f32 0.03125, %v11099_v9 }
0x76a0   :  { %v11105_v28 = vadd.f32 1e-05, %v11103_v25 }
0x76a1   :  { %v11102_v20 = vpop.xlane.xlu0 %11101 }
0x76a2   :  { %13940 = vrsqrt.f32 %v11105_v28  ;;  %v11104_v21 = vmul.f32 0.03125, %v11102_v20 }
0x76a4   :  { %v11106_v29 = vadd.f32 1e-05, %v11104_v21 }
0x76a6   :  { %13942 = vrsqrt.f32 %v11106_v29 }
0x76af   :  { %v13941_v26 = vpop.eup %13940 }
0x76b0   :  { %v11109_v17 = vmul.f32 %v13941_v26, %v11093_v49 }
0x76b2   :  { %v11115_v36 = vmul.f32 %v12001_v8, %v11109_v17 }
0x76b3   :  { %v13943_v24 = vpop.eup %13942 }
0x76b4   :  { %v11110_v31 = vmul.f32 %v13943_v24, %v11094_v37  ;;  %v11121_v30 = vadd.f32 %v12002_v48, %v11115_v36  ;;  %v11428_v37 = vld [vmem:[%s16466_s2 + $0x4f0] sm:$0xff] }
0x76b6   :  { %v11116_v35 = vmul.f32 %v12001_v8, %v11110_v31  ;;  %13546 = vmatprep.mubr.msk.f32.mxu1 %vm172_vm0, %v11121_v30  ;;  %v11427_v8 = vld [vmem:[%s16466_s2 + $0x4e8] sm:$0xff] }
0x76b8   :  { %v11122_v39 = vadd.f32 %v12002_v48, %v11116_v35  ;;  %v11426_v48 = vld [vmem:[%s16466_s2 + $0x4e0] sm:$0xff]  ;;  %v11425_v35 = vld [vmem:[%s16466_s2 + $0x4d8] sm:$0xff] }
0x76ba   :  { %13547 = vmatmul.mubr.msk.f32.vlgmr.msra.gmra.mxu1 %vm172_vm0, %v11122_v39 }
0x76bb   :  { %13584 = vmatprep.mubr.msk.f32.mxu1 %vm13949_vm1, %v13948_v60  ;;  %13569 = vmatpush3.msra.mxu1 %v11429_v50 }
0x76bc   :  { %13570 = vmatprep.subr.mxu1 %v13948_v60 }
0x76bd   :  { %13571 = vmatpush3.msra.mxu1 %v11428_v37 }
0x76be   :  { %13572 = vmatprep.subr.mxu1 %v13948_v60 }
0x76bf   :  { %13573 = vmatpush3.msra.mxu1 %v11427_v8  ;;  %v12020_v8 = vld [vmem:[%s16467_s5 + $0x5d] ss:$0 sm:$0xff] }
0x76c0   :  { %13574 = vmatprep.subr.mxu1 %v13948_v60 }
0x76c1   :  { %13575 = vmatpush3.msra.mxu1 %v11426_v48 }
0x76c2   :  { %13576 = vmatprep.subr.mxu1 %v13948_v60 }
0x76c3   :  { %13577 = vmatpush3.msra.mxu1 %v11425_v35 }
0x76c4   :  { %13578 = vmatprep.subr.mxu1 %v13948_v60 }
0x76c5   :  { %13579 = vmatpush3.msra.mxu1 %v11424_v41 }
0x76c6   :  { %13580 = vmatprep.subr.mxu1 %v13948_v60 }
0x777a   :  { %v13548_v18 = vpop.f32.mrf.mxu1 }
0x777b   :  { %v11210_v45 = vadd.f32 %v13548_v18, %v12003_v15 }
0x777c   :  { %v11204_v44 = vpop.f32.mrf.mxu1 }
0x777d   :  { %v11205_v47 = vadd.f32 %v12003_v15, %v11204_v44  ;;  %v11214_v51 = vmax.f32 %v11210_v45, 0.0  ;;  %v11423_v15 = vld [vmem:[%s16466_s2 + $0x4c8] sm:$0xff]  ;;  %v11422_v44 = vld [vmem:[%s16466_s2 + $0x4c0] sm:$0xff] }
0x777e   :  { %13581 = vmatpush3.msra.mxu1 %v11423_v15 }
0x777f   :  { %v11213_v11 = vmax.f32 %v11205_v47, 0.0  ;;  %13582 = vmatprep.subr.mxu1 %v13948_v60 }
0x7780   :  { %13583 = vmatpush3.msra.mxu1 %v11422_v44 }
0x7781   :  { %13565 = vmatprep.mubr.msk.f32.mxu0 %vm1508_vm14, %v11213_v11 }
0x7782   :  { %13566 = vmatmul.mubr.msk.f32.vlgmr.msra.gmra.mxu0 %vm1508_vm14, %v11214_v51 }
0x7783   :  { %13595 = vmatprep.mubr.msk.f32.mxu0 %vm13949_vm1, %v13948_v60  ;;  %vm11351_vm1 = vcmask 258048  }
0x7842   :  { %v13567_v53 = vpop.f32.mrf.mxu0 }
0x7843   :  { %v11306_v14 = vadd.f32 %v13567_v53, %v12006_v3  ;;  %v11379_v53 = vsel %vm11351_vm1, %v16140_v16, 0.0 }
0x7844   :  { %v11300_v32 = vpop.f32.mrf.mxu0 }
0x7845   :  { %v11310_v40 = vadd.f32 %v11306_v14, %v11122_v39  ;;  %v11301_v52 = vadd.f32 %v12006_v3, %v11300_v32  ;;  %v11352_v14 = vsel %vm11351_vm1, %v16133_v43, 0.0  ;;  %v11380_v32 = vrot.slane %v11379_v53, 4  ;;  %v12011_v43 = vld [vmem:[%s16467_s5 + $0x56] ss:$0 sm:$0xff] }
0x7847   :  { %v11309_v27 = vadd.f32 %v11301_v52, %v11121_v30  ;;  %v11316_v54 = vsel %vm1367_vm13, %v11310_v40, 0.0  ;;  %v11381_v52 = vadd.f32 %v11380_v32, %v11379_v53 }
0x7848   :  { %11317 = vadd.xlane.f32.xlu1 %v11316_v54 }
0x7849   :  { %v11313_v56 = vsel %vm172_vm0, %v11309_v27, 0.0  ;;  %v11382_v54 = vrot.slane %v11381_v52, 2 }
0x784a   :  { %11314 = vadd.xlane.f32.xlu0 %v11313_v56 }
0x78d1   :  { %v11318_v34 = vpop.xlane.xlu1 %11317 }
0x78d2   :  { %v11320_v58 = vmul.f32 0.03125, %v11318_v34  ;;  %v11383_v34 = vadd.f32 %v11382_v54, %v11381_v52 }
0x78d3   :  { %v11315_v33 = vpop.xlane.xlu0 %11314 }
0x78d4   :  { %v11322_v62 = vsub.f32 %v11310_v40, %v11320_v58  ;;  %v11319_v63 = vmul.f32 0.03125, %v11315_v33  ;;  %v11353_v40 = vrot.slane %v11352_v14, 4  ;;  %v11384_v33 = vrot.slane %v11383_v34, 1 }
0x78d6   :  { %v11321_v0 = vsub.f32 %v11309_v27, %v11319_v63  ;;  %v11324_v61 = vmul.f32 %v11322_v62, %v11322_v62  ;;  %v11354_v27 = vadd.f32 %v11353_v40, %v11352_v14  ;;  %v11385_v63 = vadd.f32 %v11384_v33, %v11383_v34 }
0x78d8   :  { %v11328_v1 = vsel %vm1367_vm13, %v11324_v61, 0.0  ;;  %v11323_v38 = vmul.f32 %v11321_v0, %v11321_v0  ;;  %v11355_v56 = vrot.slane %v11354_v27, 2  ;;  %v11386_v61 = vmul.f32 0.2, %v11385_v63 }
0x78d9   :  { %11329 = vadd.xlane.f32.xlu1 %v11328_v1 }
0x78da   :  { %v11325_v4 = vsel %vm172_vm0, %v11323_v38, 0.0  ;;  %v11356_v58 = vadd.f32 %v11355_v56, %v11354_v27 }
0x78db   :  { %11326 = vadd.xlane.f32.xlu0 %v11325_v4 }
0x7962   :  { %v11330_v49 = vpop.xlane.xlu1 %11329 }
0x7963   :  { %v11332_v5 = vmul.f32 0.03125, %v11330_v49  ;;  %v12012_v49 = vld [vmem:[%s16467_s5 + $0x57] ss:$0 sm:$0xff] }
0x7964   :  { %v11327_v59 = vpop.xlane.xlu0 %11326 }
0x7965   :  { %v11334_v12 = vadd.f32 1e-05, %v11332_v5  ;;  %v11331_v42 = vmul.f32 0.03125, %v11327_v59 }
0x7967   :  { %13944 = vrsqrt.f32 %v11334_v12  ;;  %v11333_v55 = vadd.f32 1e-05, %v11331_v42  ;;  %v11524_v42 = vld [vmem:[%s16466_s2 + $0x518] sm:$0xff] }
0x7968   :  { %13588 = vmatpush3.msra.mxu0 %v11524_v42 }
0x7969   :  { %13946 = vrsqrt.f32 %v11333_v55  ;;  %13589 = vmatprep.subr.mxu0 %v13948_v60  ;;  %v11523_v55 = vld [vmem:[%s16466_s2 + $0x510] sm:$0xff] }
0x796a   :  { %13590 = vmatpush3.msra.mxu0 %v11523_v55 }
0x796b   :  { %13591 = vmatprep.subr.mxu0 %v13948_v60 }
0x7974   :  { %v13945_v10 = vpop.eup %13944 }
0x7975   :  { %v11338_v23 = vmul.f32 %v13945_v10, %v11322_v62  ;;  %v11357_v62 = vrot.slane %v11356_v58, 1  ;;  %v11522_v10 = vld [vmem:[%s16466_s2 + $0x508] sm:$0xff] }
0x7976   :  { %v13947_v19 = vpop.eup %13946  ;;  %13592 = vmatpush3.msra.mxu0 %v11522_v10 }
0x7977   :  { %v11344_v6 = vmul.f32 %v12009_v7, %v11338_v23  ;;  %v11337_v57 = vmul.f32 %v13947_v19, %v11321_v0  ;;  %v11358_v0 = vadd.f32 %v11357_v62, %v11356_v58  ;;  %13593 = vmatprep.subr.mxu0 %v13948_v60  ;;  %v12013_v23 = vld [vmem:[%s16467_s5 + $0x58] ss:$0 sm:$0xff] }
0x7979   :  { %v11343_v9 = vmul.f32 %v12009_v7, %v11337_v57  ;;  %v11350_v25 = vadd.f32 %v12010_v2, %v11344_v6  ;;  %v11360_v4 = vmul.f32 0.2, %v11358_v0  ;;  %v11521_v7 = vld [vmem:[%s16466_s2 + $0x500] sm:$0xff]  ;;  %v12016_v57 = vld [vmem:[%s16467_s5 + $0x5a] ss:$0 sm:$0xff] }
0x797a   :  { %13594 = vmatpush3.msra.mxu0 %v11521_v7 }
0x797b   :  { %v11349_v28 = vadd.f32 %v12010_v2, %v11343_v9  ;;  %v11390_v29 = vrot.slane %v11350_v25, 5  ;;  %v12015_v2 = vld [vmem:[%s16467_s5 + $0x59] ss:$0 sm:$0xff] }
0x797d   :  { %v11361_v20 = vsel %vm11351_vm1, %v11349_v28, 0.0  ;;  %v11389_v21 = vrot.slane %v11349_v28, 5 }
0x797e   :  { %v11362_v26 = vrot.slane %v11361_v20, 4 }
0x797f   :  { %v11391_v17 = vsel %vm11374_vm15, %v11389_v21, %v11390_v29  ;;  %v12019_v29 = vld [vmem:[%s16467_s5 + $0x5c] ss:$0 sm:$0xff] }
0x7980   :  { %v11363_v36 = vadd.f32 %v11362_v26, %v11361_v20  ;;  %v11393_v24 = vsel %vm11351_vm1, %v11391_v17, 0.0  ;;  %v12017_v20 = vld [vmem:[%s16467_s5 + $0x5b] ss:$0 sm:$0xff] }
0x7981   :  { %v11394_v31 = vrot.slane %v11393_v24, 4 }
0x7982   :  { %v11364_v30 = vrot.slane %v11363_v36, 2 }
0x7983   :  { %v11395_v39 = vadd.f32 %v11394_v31, %v11393_v24  ;;  %v12021_v24 = vld [vmem:[%s16467_s5 + $0x5e] ss:$0 sm:$0xff] }
0x7984   :  { %v11365_v13 = vadd.f32 %v11364_v30, %v11363_v36 }
0x7985   :  { %v11396_v22 = vrot.slane %v11395_v39, 2 }
0x7986   :  { %v11366_v46 = vrot.slane %v11365_v13, 1 }
0x7987   :  { %v11397_v18 = vadd.f32 %v11396_v22, %v11395_v39  ;;  %v12022_v39 = vld [vmem:[%s16467_s5 + $0x5f] ss:$0 sm:$0xff] }
0x7988   :  { %v11367_v45 = vadd.f32 %v11366_v46, %v11365_v13 }
0x7989   :  { %v11398_v47 = vrot.slane %v11397_v18, 1 }
0x798a   :  { %v11368_v11 = vmul.f32 0.2, %v11367_v45 }
0x798b   :  { %v11399_v51 = vadd.f32 %v11398_v47, %v11397_v18 }
0x798c   :  { %11370 = vrot.lane.b32.xlu1 %v11368_v11, %s13965_s30 }
0x798d   :  { %v11400_v3 = vmul.f32 0.2, %v11399_v51 }
0x798f   :  { %11402 = vrot.lane.b32.xlu0 %v11400_v3, %s13965_s30 }
0x79fe   :  { %v11371_v1 = vpop.permute.xlu1 %11370 }
0x79ff   :  { %v11373_v37 = vsel %vm172_vm0, %v11360_v4, %v11371_v1 }
0x7a01   :  { %v11403_v38 = vpop.permute.xlu0 %11402 }
0x7a02   :  { %v11405_v16 = vsel %vm172_vm0, %v11386_v61, %v11403_v38 }
0x7a03   :  { %v11407_v50 = vrot.slane %v11405_v16, 7 }
0x7a05   :  { %v11409_v5 = vsel %vm321_vm2, %v11373_v37, %v11407_v50 }
0x7a06   :  { %v11415_v59 = vmul.f32 %v12011_v43, %v11409_v5 }
0x7a08   :  { %v11421_v12 = vadd.f32 %v12012_v49, %v11415_v59 }
0x7a0a   :  { %13585 = vmatmul.mubr.msk.f32.vlgmr.msra.gmra.mxu1 %vm1508_vm14, %v11421_v12 }
0x7aca   :  { %v11504_v19 = vpop.f32.mrf.mxu1 }
0x7acb   :  { %v11505_v6 = vadd.f32 %v12013_v23, %v11504_v19 }
0x7acc   :  { %v13586_v60 = vpop.f32.mrf.mxu1 }
0x7acd   :  { %v11513_v9 = vmul.f32 %v12015_v2, %v11505_v6 }
0x7acf   :  { %v11519_v25 = vadd.f32 %v12016_v57, %v11513_v9 }
0x7ad1   :  { %v11520_v28 = vmax.f32 %v11519_v25, 0.0 }
0x7ad3   :  { %13596 = vmatmul.mubr.msk.f32.vlgmr.msra.gmra.mxu0 %vm172_vm0, %v11520_v28  ;;  %vm11631_vm0 = vcmask 1024  }
0x7b93   :  { %v11599_v21 = vpop.f32.mrf.mxu0 }
0x7b94   :  { %v11600_v26 = vadd.f32 %v12017_v20, %v11599_v21 }
0x7b95   :  { %v13597_v17 = vpop.f32.mrf.mxu0 }
0x7b96   :  { %v11608_v48 = vmul.f32 %v12019_v29, %v11600_v26 }
0x7b98   :  { %v11614_v36 = vadd.f32 %v12020_v8, %v11608_v48 }
0x7b9a   :  { %v11615_v31 = vmax.f32 %v11614_v36, 0.0 }
0x7b9c   :  { %v11622_v30 = vmul.f32 %v12021_v24, %v11615_v31 }
0x7b9e   :  { %v11623_v35 = vsel %vm1367_vm13, %v11622_v30, 0.0 }
0x7b9f   :  { %11624 = vadd.xlane.f32.xlu1 %v11623_v35 }
0x7c28   :  { %v11625_v13 = vpop.xlane.xlu1 %11624 }
0x7c29   :  { %v11630_v41 = vadd.f32 %v12022_v39, %v11625_v13 }
0x7c2b   :  { %11632 = vst.msk [vmem:[%s16471_s6] sm:$0x3] %vm11631_vm0, %v11630_v41 }

</bundles_post_ra>
